<compile_context>
chip_gen: v6e
topology: v6e:2x2x1
jax: 0.10.0
libtpu: 0.0.40
codegen_flags: <defaults>
</compile_context>

<pallas_src>
import functools

import jax
import jax.numpy as jnp
from jax.experimental import pallas as pl
from jax.experimental.pallas import tpu as pltpu

EPS = 1e-5


def _round_up(x, m):
    return (x + m - 1) // m * m


# ----------------------------------------------------------------------------
# Pallas kernels
# ----------------------------------------------------------------------------
def _gemm_stats_kernel(a_ref, b_ref, o_ref, sum_ref, sq_ref):
    """Single-step GEMM tile (bf16 in, f32 MXU acc) + per-tile column stats."""
    acc = jnp.dot(a_ref[...], b_ref[...], preferred_element_type=jnp.float32)
    o_ref[...] = acc.astype(o_ref.dtype)
    sum_ref[...] = jnp.sum(acc, axis=0, keepdims=True)[None]        # (1,1,tn)
    sq_ref[...] = jnp.sum(acc * acc, axis=0, keepdims=True)[None]   # (1,1,tn)


def _gemm_bias_act_kernel(a_ref, b_ref, bias_ref, o_ref, *, act):
    """Single-step GEMM tile with fused bias + activation (used for conv4)."""
    y = jnp.dot(a_ref[...], b_ref[...], preferred_element_type=jnp.float32)
    y = y + bias_ref[...]
    if act == "relu":
        y = jnp.maximum(y, 0.0)
    elif act == "tanh":
        y = jnp.tanh(y)
    o_ref[...] = y.astype(o_ref.dtype)


def _affine_act_kernel(*refs, act, has_res):
    """y = act(x * scale + shift) [+ residual]; math in f32, I/O in bf16."""
    if has_res:
        x_ref, scale_ref, shift_ref, res_ref, o_ref = refs
    else:
        x_ref, scale_ref, shift_ref, o_ref = refs
    y = x_ref[...].astype(jnp.float32) * scale_ref[...] + shift_ref[...]
    if act == "relu":
        y = jnp.maximum(y, 0.0)
    elif act == "tanh":
        y = jnp.tanh(y)
    if has_res:
        y = y + res_ref[...].astype(jnp.float32)
    o_ref[...] = y.astype(o_ref.dtype)


# ----------------------------------------------------------------------------
# Tiling helpers
# ----------------------------------------------------------------------------
def _gemm_tiles(M, N):
    """Tile sizes / padded dims for an (M,K)x(K,N) GEMM with collapsed K."""
    Np = _round_up(N, 128)
    tn = 128
    Mp = _round_up(M, 16)
    if Mp >= 256:
        tm = 256
        Mp = _round_up(Mp, 256)
    else:
        tm = Mp
    # v7x has 2 TensorCores: keep >= 2 parallel grid steps when possible.
    if (Mp // tm) * (Np // tn) < 2 and Mp >= 32 and (Mp // 2) % 16 == 0:
        tm = Mp // 2
    return tm, tn, Mp, Np


def _pick_row_tile(Mp):
    """Row tile for the elementwise affine pass (>=2 tiles when possible)."""
    for t in (256, 128, 64, 32, 16):
        if Mp % t == 0 and Mp // t >= 2:
            return t
    return Mp


# ----------------------------------------------------------------------------
# GEMM wrappers (inputs already padded; weights pre-packed bf16)
# ----------------------------------------------------------------------------
def pallas_gemm_stats(a_p, b_p, tm, tn):
    """(Mp,Kp)@(Kp,Np) -> bf16 (Mp,Np) + f32 per-column sum / sum-of-squares."""
    Mp, Kp = a_p.shape
    Kp2, Np = b_p.shape
    assert Kp == Kp2
    n_mt = Mp // tm

    out, s_stats, q_stats = pl.pallas_call(
        _gemm_stats_kernel,
        out_shape=(jax.ShapeDtypeStruct((Mp, Np), jnp.bfloat16),
                   jax.ShapeDtypeStruct((n_mt, 1, Np), jnp.float32),
                   jax.ShapeDtypeStruct((n_mt, 1, Np), jnp.float32)),
        grid=(n_mt, Np // tn),
        in_specs=[pl.BlockSpec((tm, Kp), lambda i, j: (i, 0)),
                  pl.BlockSpec((Kp, tn), lambda i, j: (0, j))],
        out_specs=(pl.BlockSpec((tm, tn), lambda i, j: (i, j)),
                   pl.BlockSpec((1, 1, tn), lambda i, j: (i, 0, j)),
                   pl.BlockSpec((1, 1, tn), lambda i, j: (i, 0, j))),
        compiler_params=pltpu.CompilerParams(
            dimension_semantics=("parallel", "parallel")),
    )(a_p, b_p)

    col_sum = jnp.sum(s_stats[:, 0, :], axis=0)      # (Np,)
    col_sumsq = jnp.sum(q_stats[:, 0, :], axis=0)    # (Np,)
    return out, col_sum, col_sumsq


def pallas_gemm_bias_act(a_p, b_p, bias_p, act, tm, tn):
    """(Mp,Kp)@(Kp,Np) + bias with fused activation; returns f32 (Mp,Np)."""
    Mp, Kp = a_p.shape
    _, Np = b_p.shape
    return pl.pallas_call(
        functools.partial(_gemm_bias_act_kernel, act=act),
        out_shape=jax.ShapeDtypeStruct((Mp, Np), jnp.float32),
        grid=(Mp // tm, Np // tn),
        in_specs=[pl.BlockSpec((tm, Kp), lambda i, j: (i, 0)),
                  pl.BlockSpec((Kp, tn), lambda i, j: (0, j)),
                  pl.BlockSpec((1, tn), lambda i, j: (0, j))],
        out_specs=pl.BlockSpec((tm, tn), lambda i, j: (i, j)),
        compiler_params=pltpu.CompilerParams(
            dimension_semantics=("parallel", "parallel")),
    )(a_p, b_p, bias_p)


def pallas_affine_act(x_p, scale_p, shift_p, act, res_p=None):
    """x_p: padded bf16 (Mp,Cp); scale/shift f32 (1,Cp); optional bf16 residual."""
    Mp, Cp = x_p.shape
    tm = _pick_row_tile(Mp)
    has_res = res_p is not None
    in_specs = [pl.BlockSpec((tm, Cp), lambda i: (i, 0)),
                pl.BlockSpec((1, Cp), lambda i: (0, 0)),
                pl.BlockSpec((1, Cp), lambda i: (0, 0))]
    args = [x_p, scale_p, shift_p]
    if has_res:
        in_specs.append(pl.BlockSpec((tm, Cp), lambda i: (i, 0)))
        args.append(res_p)

    return pl.pallas_call(
        functools.partial(_affine_act_kernel, act=act, has_res=has_res),
        out_shape=jax.ShapeDtypeStruct((Mp, Cp), jnp.bfloat16),
        grid=(Mp // tm,),
        in_specs=in_specs,
        out_specs=pl.BlockSpec((tm, Cp), lambda i: (i, 0)),
        compiler_params=pltpu.CompilerParams(
            dimension_semantics=("parallel",)),
    )(*args)


# ----------------------------------------------------------------------------
# Layer helpers (im2col glue stays in XLA, compute in Pallas)
# ----------------------------------------------------------------------------
def _im2col(x, kh, kw, stride, pad):
    """x: (N,H,W,C) bf16 -> patches (N*Ho*Wo, kh*kw*C) bf16, Ho, Wo."""
    # TODO(synk): fuse patch extraction into the GEMM (Element-offset specs).
    N, H, W, C = x.shape
    xp = jnp.pad(x, ((0, 0), (pad, pad), (pad, pad), (0, 0)))
    Hp, Wp = H + 2 * pad, W + 2 * pad
    Ho = (Hp - kh) // stride + 1
    Wo = (Wp - kw) // stride + 1
    cols = []
    for i in range(kh):
        for j in range(kw):
            cols.append(
                xp[:, i:i + stride * Ho:stride, j:j + stride * Wo:stride, :])
    patches = jnp.concatenate(cols, axis=-1)             # (N,Ho,Wo,kh*kw*C)
    return patches.reshape(N * Ho * Wo, kh * kw * C), Ho, Wo


def conv_bn_act(x, layer, *, cout, k, stride, pad, act, residual_p=None):
    """Conv2d (bias cancelled by BN) + training-mode BatchNorm + act [+ res].

    Returns (nhwc_bf16, padded_gemm_layout_bf16)."""
    N = x.shape[0]
    patches, Ho, Wo = _im2col(x, k, k, stride, pad)
    M, K = patches.shape
    w_p = layer["w"]                                     # pre-packed (Kp,Np) bf16
    Kp, Np = w_p.shape
    tm, tn, Mp, Np2 = _gemm_tiles(M, cout)
    assert Np2 == Np
    a_p = jnp.pad(patches, ((0, Mp - M), (0, Kp - K)))

    y_p, col_sum, col_sumsq = pallas_gemm_stats(a_p, w_p, tm, tn)

    # Padded A rows are exactly zero -> they do not bias the batch statistics.
    mean = col_sum[:cout] / M
    var = jnp.maximum(col_sumsq[:cout] / M - mean * mean, 0.0)   # biased var
    scale = layer["gamma"] / jnp.sqrt(var + EPS)
    shift = layer["beta"] - mean * scale
    scale_p = jnp.pad(scale, (0, Np - cout)).reshape(1, Np)
    shift_p = jnp.pad(shift, (0, Np - cout)).reshape(1, Np)

    if residual_p is not None:
        assert residual_p.shape == y_p.shape, (residual_p.shape, y_p.shape)

    out_p = pallas_affine_act(y_p, scale_p, shift_p, act, residual_p)
    nhwc = out_p[:M, :cout].reshape(N, Ho, Wo, cout)
    return nhwc, out_p


def convtrans_bn_relu(x, layer, *, cout):
    """ConvTranspose2d(k=3,s=2,p=1,op=1) + BN + ReLU via sub-pixel GEMM."""
    N, H, W, Cin = x.shape
    xp = jnp.pad(x, ((0, 0), (0, 1), (0, 1), (0, 0)))
    cols = [xp[:, di:di + H, dj:dj + W, :] for di in range(2) for dj in range(2)]
    patches = jnp.concatenate(cols, axis=-1).reshape(N * H * W, 4 * Cin)
    M, K = patches.shape
    w_p = layer["w"]                                     # (Kp, Np) bf16
    Kp, Np = w_p.shape
    tm, tn, Mp, Np2 = _gemm_tiles(M, 4 * cout)
    assert Np2 == Np
    a_p = jnp.pad(patches, ((0, Mp - M), (0, Kp - K)))

    y_p, col_sum, col_sumsq = pallas_gemm_stats(a_p, w_p, tm, tn)

    count = 4.0 * M                                      # output elems / channel
    mean = jnp.sum(col_sum[:4 * cout].reshape(4, cout), axis=0) / count
    ex2 = jnp.sum(col_sumsq[:4 * cout].reshape(4, cout), axis=0) / count
    var = jnp.maximum(ex2 - mean * mean, 0.0)
    scale = layer["gamma"] / jnp.sqrt(var + EPS)
    shift = layer["beta"] - mean * scale
    scale_p = jnp.pad(jnp.tile(scale, 4), (0, Np - 4 * cout)).reshape(1, Np)
    shift_p = jnp.pad(jnp.tile(shift, 4), (0, Np - 4 * cout)).reshape(1, Np)

    out_p = pallas_affine_act(y_p, scale_p, shift_p, "relu")
    out = out_p[:M, :4 * cout].reshape(N, H, W, 2, 2, cout)
    # TODO(synk): sub-pixel phase interleave stays in XLA.
    out = jnp.transpose(out, (0, 1, 3, 2, 4, 5)).reshape(N, 2 * H, 2 * W, cout)
    return out


def conv_bias_act(x, layer, *, cout, k, stride, pad, act):
    """Conv2d + bias + activation, fully fused into the GEMM (conv4)."""
    N = x.shape[0]
    patches, Ho, Wo = _im2col(x, k, k, stride, pad)
    M, K = patches.shape
    w_p = layer["w"]
    Kp, Np = w_p.shape
    tm, tn, Mp, Np2 = _gemm_tiles(M, cout)
    assert Np2 == Np
    a_p = jnp.pad(patches, ((0, Mp - M), (0, Kp - K)))
    out_p = pallas_gemm_bias_act(a_p, w_p, layer["b"], act, tm, tn)
    return out_p[:M, :cout].reshape(N, Ho, Wo, cout)


# ----------------------------------------------------------------------------
# Parameter init (PyTorch-layout) + one-time packing to GEMM layout
# ----------------------------------------------------------------------------
def _init_conv(key, cout, cin, k):
    k1, k2 = jax.random.split(key)
    return {"w": 0.05 * jax.random.normal(k1, (cout, cin, k, k), jnp.float32),
            "b": 0.05 * jax.random.normal(k2, (cout,), jnp.float32)}


def _init_convtrans(key, cin, cout, k):
    k1, k2 = jax.random.split(key)
    return {"w": 0.05 * jax.random.normal(k1, (cin, cout, k, k), jnp.float32),
            "b": 0.05 * jax.random.normal(k2, (cout,), jnp.float32)}


def _init_bn(key, c):
    k1, k2 = jax.random.split(key)
    return {"gamma": 1.0 + 0.1 * jax.random.normal(k1, (c,), jnp.float32),
            "beta": 0.1 * jax.random.normal(k2, (c,), jnp.float32)}


def init_generator_params(key):
    keys = jax.random.split(key, 32)
    p = {}
    p["conv1"] = {**_init_conv(keys[0], 32, 3, 7), **_init_bn(keys[1], 32)}
    p["conv2"] = {**_init_conv(keys[2], 64, 32, 3), **_init_bn(keys[3], 64)}
    p["conv3"] = {**_init_conv(keys[4], 128, 64, 3), **_init_bn(keys[5], 128)}
    p["res1"] = {"a": {**_init_conv(keys[6], 128, 128, 3), **_init_bn(keys[7], 128)},
                 "b": {**_init_conv(keys[8], 128, 128, 3), **_init_bn(keys[9], 128)}}
    p["res2"] = {"a": {**_init_conv(keys[10], 128, 128, 3), **_init_bn(keys[11], 128)},
                 "b": {**_init_conv(keys[12], 128, 128, 3), **_init_bn(keys[13], 128)}}
    p["trans1"] = {**_init_convtrans(keys[14], 128, 64, 3), **_init_bn(keys[15], 64)}
    p["trans2"] = {**_init_convtrans(keys[16], 64, 32, 3), **_init_bn(keys[17], 32)}
    p["conv4"] = _init_conv(keys[18], 3, 32, 7)          # no BN, tanh
    return p


def _pack_conv_weight(w_oihw):
    cout, cin, kh, kw = w_oihw.shape
    K = kh * kw * cin
    Kp, Np = _round_up(K, 128), _round_up(cout, 128)
    w_mat = jnp.transpose(w_oihw, (2, 3, 1, 0)).reshape(K, cout)
    return jnp.pad(w_mat.astype(jnp.bfloat16), ((0, Kp - K), (0, Np - cout)))


def _convtrans_weight_matrix(w_iohw):
    """Sub-pixel weight matrix (4*Cin, 4*Cout) for k=3, s=2, p=1, op=1."""
    cin, cout, kh, kw = w_iohw.shape
    w = jnp.transpose(w_iohw, (0, 2, 3, 1))              # (Cin, kh, kw, Cout)
    rows = []
    for di in range(2):
        for dj in range(2):
            cols = []
            for ph in range(2):
                for pw in range(2):
                    ki = ph + 1 - 2 * di
                    kj = pw + 1 - 2 * dj
                    if 0 <= ki < kh and 0 <= kj < kw:
                        cols.append(w[:, ki, kj, :])
                    else:
                        cols.append(jnp.zeros((cin, cout), w.dtype))
            rows.append(jnp.concatenate(cols, axis=1))    # (Cin, 4*Cout)
    return jnp.concatenate(rows, axis=0)                  # (4*Cin, 4*Cout)


def _pack_convtrans_weight(w_iohw):
    cin, cout = w_iohw.shape[0], w_iohw.shape[1]
    K, Ncols = 4 * cin, 4 * cout
    Kp, Np = _round_up(K, 128), _round_up(Ncols, 128)
    w_mat = _convtrans_weight_matrix(w_iohw).astype(jnp.bfloat16)
    return jnp.pad(w_mat, ((0, Kp - K), (0, Np - Ncols)))


def pack_generator_params(p):
    """One-time packing: transpose/reshape/pad/bf16-cast every GEMM weight."""
    def bn(layer):
        return {"gamma": layer["gamma"].astype(jnp.float32),
                "beta": layer["beta"].astype(jnp.float32)}

    packed = {}
    for name in ("conv1", "conv2", "conv3"):
        packed[name] = {"w": _pack_conv_weight(p[name]["w"]), **bn(p[name])}
    for name in ("res1", "res2"):
        packed[name] = {sub: {"w": _pack_conv_weight(p[name][sub]["w"]),
                              **bn(p[name][sub])} for sub in ("a", "b")}
    for name in ("trans1", "trans2"):
        packed[name] = {"w": _pack_convtrans_weight(p[name]["w"]), **bn(p[name])}
    cout4 = p["conv4"]["w"].shape[0]
    Np4 = _round_up(cout4, 128)
    packed["conv4"] = {"w": _pack_conv_weight(p["conv4"]["w"]),
                       "b": jnp.pad(p["conv4"]["b"].astype(jnp.float32),
                                    (0, Np4 - cout4)).reshape(1, Np4)}
    return packed


# ----------------------------------------------------------------------------
# Generator forward (NHWC/bf16 internally, NCHW/f32 at the boundary)
# ----------------------------------------------------------------------------
def generator_forward(packed, x_nchw):
    x = jnp.transpose(x_nchw, (0, 2, 3, 1)).astype(jnp.bfloat16)   # -> NHWC bf16
    p = packed

    # downsample_blocks
    y, _ = conv_bn_act(x, p["conv1"], cout=32, k=7, stride=1, pad=3, act="relu")
    y, _ = conv_bn_act(y, p["conv2"], cout=64, k=3, stride=2, pad=1, act="relu")
    y, y_pad = conv_bn_act(y, p["conv3"], cout=128, k=3, stride=2, pad=1,
                           act="relu")

    # res_blocks (residual add fused into the second conv's BN-affine epilogue;
    # the residual is threaded through in padded GEMM layout — no re-pad)
    for name in ("res1", "res2"):
        r, _ = conv_bn_act(y, p[name]["a"], cout=128, k=3, stride=1, pad=1,
                           act="relu")
        y, y_pad = conv_bn_act(r, p[name]["b"], cout=128, k=3, stride=1, pad=1,
                               act=None, residual_p=y_pad)

    # upsample_blocks
    y = convtrans_bn_relu(y, p["trans1"], cout=64)
    y = convtrans_bn_relu(y, p["trans2"], cout=32)
    y = conv_bias_act(y, p["conv4"], cout=3, k=7, stride=1, pad=3, act="tanh")

    return jnp.transpose(y, (0, 3, 1, 2)).astype(jnp.float32)      # -> NCHW f32


if __name__ == "__main__":
    key = jax.random.PRNGKey(0)
    pkey, xkey = jax.random.split(key)

    params = init_generator_params(pkey)
    packed = pack_generator_params(params)             # one-time weight packing
    x = jax.random.normal(xkey, (2, 3, 16, 16), jnp.float32)       # NCHW

    fwd = jax.jit(generator_forward)
    out = fwd(packed, x)
    out = jax.block_until_ready(out)

    assert out.shape == (2, 3, 16, 16), out.shape
    assert out.dtype == jnp.float32
    assert bool(jnp.all(jnp.isfinite(out)))
    # tanh output must be in [-1, 1]
    assert bool(jnp.all(jnp.abs(out) <= 1.0 + 1e-6))

    print("KERNEL_OK")
</pallas_src>

<mosaic_0001>
module attributes {stable_mosaic.version = 11 : i64} {
  func.func @_gemm_stats_kernel(%arg0: i32, %arg1: i32, %arg2: memref<256x256xbf16, #tpu.memory_space<vmem>>, %arg3: memref<256x128xbf16, #tpu.memory_space<vmem>>, %arg4: memref<256x128xbf16, #tpu.memory_space<vmem>>, %arg5: memref<1x1x128xf32, #tpu.memory_space<vmem>>, %arg6: memref<1x1x128xf32, #tpu.memory_space<vmem>>) attributes {dimension_semantics = [#tpu.dimension_semantics<parallel>, #tpu.dimension_semantics<parallel>], iteration_bounds = array<i64: 2, 1>, scalar_prefetch = 0 : i64, scratch_operands = 0 : i64, tpu.core_type = #tpu.core_type<tc>, window_params = [{transform_indices = @transform_0, window_bounds = array<i64: 256, 256>}, {transform_indices = @transform_1, window_bounds = array<i64: 256, 128>}, {transform_indices = @transform_2, window_bounds = array<i64: 256, 128>}, {transform_indices = @transform_3, window_bounds = array<i64: 1, 1, 128>}, {transform_indices = @transform_4, window_bounds = array<i64: 1, 1, 128>}]} {
    %c0 = arith.constant 0 : index
    %c0_0 = arith.constant 0 : index
    %0 = vector.load %arg2[%c0, %c0_0] : memref<256x256xbf16, #tpu.memory_space<vmem>>, vector<256x256xbf16>
    %c0_1 = arith.constant 0 : index
    %c0_2 = arith.constant 0 : index
    %1 = vector.load %arg3[%c0_1, %c0_2] : memref<256x128xbf16, #tpu.memory_space<vmem>>, vector<256x128xbf16>
    %cst = arith.constant dense<0.000000e+00> : vector<256x128xf32>
    %2 = tpu.matmul %0, %1, %cst {dimension_numbers = #tpu.dot_dimension_numbers<[1], [0], [0], [1], [0, 0, 1, 1], [], []>} : vector<256x256xbf16>, vector<256x128xbf16>, vector<256x128xf32> -> vector<256x128xf32>
    %3 = arith.truncf %2 : vector<256x128xf32> to vector<256x128xbf16>
    %c0_3 = arith.constant 0 : index
    %c0_4 = arith.constant 0 : index
    %4 = vector.load %arg4[%c0_3, %c0_4] : memref<256x128xbf16, #tpu.memory_space<vmem>>, vector<256x128xbf16>
    tpu.vector_store %arg4[%c0_3, %c0_4], %3 {strides = array<i32>} : memref<256x128xbf16, #tpu.memory_space<vmem>>, vector<256x128xbf16>,
    %cst_5 = arith.constant dense<0.000000e+00> : vector<128xf32>
    %5 = vector.multi_reduction <add>, %2, %cst_5 [0] : vector<256x128xf32> to vector<128xf32>
    %6 = vector.shape_cast %5 : vector<128xf32> to vector<1x128xf32>
    %7 = vector.shape_cast %6 : vector<1x128xf32> to vector<1x1x128xf32>
    %c0_6 = arith.constant 0 : index
    %c0_7 = arith.constant 0 : index
    %c0_8 = arith.constant 0 : index
    %8 = vector.load %arg5[%c0_6, %c0_7, %c0_8] : memref<1x1x128xf32, #tpu.memory_space<vmem>>, vector<1x1x128xf32>
    tpu.vector_store %arg5[%c0_6, %c0_7, %c0_8], %7 {strides = array<i32>} : memref<1x1x128xf32, #tpu.memory_space<vmem>>, vector<1x1x128xf32>,
    %9 = arith.mulf %2, %2 : vector<256x128xf32>
    %cst_9 = arith.constant dense<0.000000e+00> : vector<128xf32>
    %10 = vector.multi_reduction <add>, %9, %cst_9 [0] : vector<256x128xf32> to vector<128xf32>
    %11 = vector.shape_cast %10 : vector<128xf32> to vector<1x128xf32>
    %12 = vector.shape_cast %11 : vector<1x128xf32> to vector<1x1x128xf32>
    %c0_10 = arith.constant 0 : index
    %c0_11 = arith.constant 0 : index
    %c0_12 = arith.constant 0 : index
    %13 = vector.load %arg6[%c0_10, %c0_11, %c0_12] : memref<1x1x128xf32, #tpu.memory_space<vmem>>, vector<1x1x128xf32>
    tpu.vector_store %arg6[%c0_10, %c0_11, %c0_12], %12 {strides = array<i32>} : memref<1x1x128xf32, #tpu.memory_space<vmem>>, vector<1x1x128xf32>,
    return
  }
  func.func @transform_0(%arg0: i32, %arg1: i32) -> (i32, i32) {
    %c0_i32 = arith.constant 0 : i32
    %c0_i32_0 = arith.constant 0 : i32
    return %arg0, %c0_i32 : i32, i32
  }
  func.func @transform_1(%arg0: i32, %arg1: i32) -> (i32, i32) {
    %c0_i32 = arith.constant 0 : i32
    %c0_i32_0 = arith.constant 0 : i32
    return %c0_i32, %arg1 : i32, i32
  }
  func.func @transform_2(%arg0: i32, %arg1: i32) -> (i32, i32) {
    %c0_i32 = arith.constant 0 : i32
    return %arg0, %arg1 : i32, i32
  }
  func.func @transform_3(%arg0: i32, %arg1: i32) -> (i32, i32, i32) {
    %c0_i32 = arith.constant 0 : i32
    %c0_i32_0 = arith.constant 0 : i32
    return %arg0, %c0_i32, %arg1 : i32, i32, i32
  }
  func.func @transform_4(%arg0: i32, %arg1: i32) -> (i32, i32, i32) {
    %c0_i32 = arith.constant 0 : i32
    %c0_i32_0 = arith.constant 0 : i32
    return %arg0, %c0_i32, %arg1 : i32, i32, i32
  }
}

module attributes {stable_mosaic.version = 11 : i64} {
  func.func @_affine_act_kernel(%arg0: i32, %arg1: memref<256x128xbf16, #tpu.memory_space<vmem>>, %arg2: memref<1x128xf32, #tpu.memory_space<vmem>>, %arg3: memref<1x128xf32, #tpu.memory_space<vmem>>, %arg4: memref<256x128xbf16, #tpu.memory_space<vmem>>) attributes {dimension_semantics = [#tpu.dimension_semantics<parallel>], iteration_bounds = array<i64: 2>, scalar_prefetch = 0 : i64, scratch_operands = 0 : i64, tpu.core_type = #tpu.core_type<tc>, window_params = [{transform_indices = @transform_0, window_bounds = array<i64: 256, 128>}, {pipeline_mode = #tpu.pipeline_mode<synchronous>, transform_indices = @transform_1, window_bounds = array<i64: 1, 128>}, {pipeline_mode = #tpu.pipeline_mode<synchronous>, transform_indices = @transform_2, window_bounds = array<i64: 1, 128>}, {transform_indices = @transform_3, window_bounds = array<i64: 256, 128>}]} {
    %c0 = arith.constant 0 : index
    %c0_0 = arith.constant 0 : index
    %0 = vector.load %arg1[%c0, %c0_0] : memref<256x128xbf16, #tpu.memory_space<vmem>>, vector<256x128xbf16>
    %1 = arith.extf %0 : vector<256x128xbf16> to vector<256x128xf32>
    %c0_1 = arith.constant 0 : index
    %c0_2 = arith.constant 0 : index
    %2 = vector.load %arg2[%c0_1, %c0_2] : memref<1x128xf32, #tpu.memory_space<vmem>>, vector<1x128xf32>
    %3 = vector.broadcast %2 : vector<1x128xf32> to vector<256x128xf32>
    %4 = arith.mulf %1, %3 : vector<256x128xf32>
    %c0_3 = arith.constant 0 : index
    %c0_4 = arith.constant 0 : index
    %5 = vector.load %arg3[%c0_3, %c0_4] : memref<1x128xf32, #tpu.memory_space<vmem>>, vector<1x128xf32>
    %6 = vector.broadcast %5 : vector<1x128xf32> to vector<256x128xf32>
    %7 = arith.addf %4, %6 : vector<256x128xf32>
    %cst = arith.constant 0.000000e+00 : f32
    %8 = vector.broadcast %cst : f32 to vector<256x128xf32>
    %9 = arith.maximumf %7, %8 : vector<256x128xf32>
    %10 = arith.truncf %9 : vector<256x128xf32> to vector<256x128xbf16>
    %c0_5 = arith.constant 0 : index
    %c0_6 = arith.constant 0 : index
    %11 = vector.load %arg4[%c0_5, %c0_6] : memref<256x128xbf16, #tpu.memory_space<vmem>>, vector<256x128xbf16>
    tpu.vector_store %arg4[%c0_5, %c0_6], %10 {strides = array<i32>} : memref<256x128xbf16, #tpu.memory_space<vmem>>, vector<256x128xbf16>,
    return
  }
  func.func @transform_0(%arg0: i32) -> (i32, i32) {
    %c0_i32 = arith.constant 0 : i32
    %c0_i32_0 = arith.constant 0 : i32
    return %arg0, %c0_i32 : i32, i32
  }
  func.func @transform_1(%arg0: i32) -> (i32, i32) {
    %c0_i32 = arith.constant 0 : i32
    %c0_i32_0 = arith.constant 0 : i32
    %c0_i32_1 = arith.constant 0 : i32
    return %c0_i32, %c0_i32_0 : i32, i32
  }
  func.func @transform_2(%arg0: i32) -> (i32, i32) {
    %c0_i32 = arith.constant 0 : i32
    %c0_i32_0 = arith.constant 0 : i32
    %c0_i32_1 = arith.constant 0 : i32
    return %c0_i32, %c0_i32_0 : i32, i32
  }
  func.func @transform_3(%arg0: i32) -> (i32, i32) {
    %c0_i32 = arith.constant 0 : i32
    %c0_i32_0 = arith.constant 0 : i32
    return %arg0, %c0_i32 : i32, i32
  }
}

module attributes {stable_mosaic.version = 11 : i64} {
  func.func @_gemm_stats_kernel(%arg0: i32, %arg1: i32, %arg2: memref<64x384xbf16, #tpu.memory_space<vmem>>, %arg3: memref<384x128xbf16, #tpu.memory_space<vmem>>, %arg4: memref<64x128xbf16, #tpu.memory_space<vmem>>, %arg5: memref<1x1x128xf32, #tpu.memory_space<vmem>>, %arg6: memref<1x1x128xf32, #tpu.memory_space<vmem>>) attributes {dimension_semantics = [#tpu.dimension_semantics<parallel>, #tpu.dimension_semantics<parallel>], iteration_bounds = array<i64: 2, 1>, scalar_prefetch = 0 : i64, scratch_operands = 0 : i64, tpu.core_type = #tpu.core_type<tc>, window_params = [{transform_indices = @transform_0, window_bounds = array<i64: 64, 384>}, {transform_indices = @transform_1, window_bounds = array<i64: 384, 128>}, {transform_indices = @transform_2, window_bounds = array<i64: 64, 128>}, {transform_indices = @transform_3, window_bounds = array<i64: 1, 1, 128>}, {transform_indices = @transform_4, window_bounds = array<i64: 1, 1, 128>}]} {
    %c0 = arith.constant 0 : index
    %c0_0 = arith.constant 0 : index
    %0 = vector.load %arg2[%c0, %c0_0] : memref<64x384xbf16, #tpu.memory_space<vmem>>, vector<64x384xbf16>
    %c0_1 = arith.constant 0 : index
    %c0_2 = arith.constant 0 : index
    %1 = vector.load %arg3[%c0_1, %c0_2] : memref<384x128xbf16, #tpu.memory_space<vmem>>, vector<384x128xbf16>
    %cst = arith.constant dense<0.000000e+00> : vector<64x128xf32>
    %2 = tpu.matmul %0, %1, %cst {dimension_numbers = #tpu.dot_dimension_numbers<[1], [0], [0], [1], [0, 0, 1, 1], [], []>} : vector<64x384xbf16>, vector<384x128xbf16>, vector<64x128xf32> -> vector<64x128xf32>
    %3 = arith.truncf %2 : vector<64x128xf32> to vector<64x128xbf16>
    %c0_3 = arith.constant 0 : index
    %c0_4 = arith.constant 0 : index
    %4 = vector.load %arg4[%c0_3, %c0_4] : memref<64x128xbf16, #tpu.memory_space<vmem>>, vector<64x128xbf16>
    tpu.vector_store %arg4[%c0_3, %c0_4], %3 {strides = array<i32>} : memref<64x128xbf16, #tpu.memory_space<vmem>>, vector<64x128xbf16>,
    %cst_5 = arith.constant dense<0.000000e+00> : vector<128xf32>
    %5 = vector.multi_reduction <add>, %2, %cst_5 [0] : vector<64x128xf32> to vector<128xf32>
    %6 = vector.shape_cast %5 : vector<128xf32> to vector<1x128xf32>
    %7 = vector.shape_cast %6 : vector<1x128xf32> to vector<1x1x128xf32>
    %c0_6 = arith.constant 0 : index
    %c0_7 = arith.constant 0 : index
    %c0_8 = arith.constant 0 : index
    %8 = vector.load %arg5[%c0_6, %c0_7, %c0_8] : memref<1x1x128xf32, #tpu.memory_space<vmem>>, vector<1x1x128xf32>
    tpu.vector_store %arg5[%c0_6, %c0_7, %c0_8], %7 {strides = array<i32>} : memref<1x1x128xf32, #tpu.memory_space<vmem>>, vector<1x1x128xf32>,
    %9 = arith.mulf %2, %2 : vector<64x128xf32>
    %cst_9 = arith.constant dense<0.000000e+00> : vector<128xf32>
    %10 = vector.multi_reduction <add>, %9, %cst_9 [0] : vector<64x128xf32> to vector<128xf32>
    %11 = vector.shape_cast %10 : vector<128xf32> to vector<1x128xf32>
    %12 = vector.shape_cast %11 : vector<1x128xf32> to vector<1x1x128xf32>
    %c0_10 = arith.constant 0 : index
    %c0_11 = arith.constant 0 : index
    %c0_12 = arith.constant 0 : index
    %13 = vector.load %arg6[%c0_10, %c0_11, %c0_12] : memref<1x1x128xf32, #tpu.memory_space<vmem>>, vector<1x1x128xf32>
    tpu.vector_store %arg6[%c0_10, %c0_11, %c0_12], %12 {strides = array<i32>} : memref<1x1x128xf32, #tpu.memory_space<vmem>>, vector<1x1x128xf32>,
    return
  }
  func.func @transform_0(%arg0: i32, %arg1: i32) -> (i32, i32) {
    %c0_i32 = arith.constant 0 : i32
    %c0_i32_0 = arith.constant 0 : i32
    return %arg0, %c0_i32 : i32, i32
  }
  func.func @transform_1(%arg0: i32, %arg1: i32) -> (i32, i32) {
    %c0_i32 = arith.constant 0 : i32
    %c0_i32_0 = arith.constant 0 : i32
    return %c0_i32, %arg1 : i32, i32
  }
  func.func @transform_2(%arg0: i32, %arg1: i32) -> (i32, i32) {
    %c0_i32 = arith.constant 0 : i32
    return %arg0, %arg1 : i32, i32
  }
  func.func @transform_3(%arg0: i32, %arg1: i32) -> (i32, i32, i32) {
    %c0_i32 = arith.constant 0 : i32
    %c0_i32_0 = arith.constant 0 : i32
    return %arg0, %c0_i32, %arg1 : i32, i32, i32
  }
  func.func @transform_4(%arg0: i32, %arg1: i32) -> (i32, i32, i32) {
    %c0_i32 = arith.constant 0 : i32
    %c0_i32_0 = arith.constant 0 : i32
    return %arg0, %c0_i32, %arg1 : i32, i32, i32
  }
}

module attributes {stable_mosaic.version = 11 : i64} {
  func.func @_affine_act_kernel(%arg0: i32, %arg1: memref<64x128xbf16, #tpu.memory_space<vmem>>, %arg2: memref<1x128xf32, #tpu.memory_space<vmem>>, %arg3: memref<1x128xf32, #tpu.memory_space<vmem>>, %arg4: memref<64x128xbf16, #tpu.memory_space<vmem>>) attributes {dimension_semantics = [#tpu.dimension_semantics<parallel>], iteration_bounds = array<i64: 2>, scalar_prefetch = 0 : i64, scratch_operands = 0 : i64, tpu.core_type = #tpu.core_type<tc>, window_params = [{transform_indices = @transform_0, window_bounds = array<i64: 64, 128>}, {pipeline_mode = #tpu.pipeline_mode<synchronous>, transform_indices = @transform_1, window_bounds = array<i64: 1, 128>}, {pipeline_mode = #tpu.pipeline_mode<synchronous>, transform_indices = @transform_2, window_bounds = array<i64: 1, 128>}, {transform_indices = @transform_3, window_bounds = array<i64: 64, 128>}]} {
    %c0 = arith.constant 0 : index
    %c0_0 = arith.constant 0 : index
    %0 = vector.load %arg1[%c0, %c0_0] : memref<64x128xbf16, #tpu.memory_space<vmem>>, vector<64x128xbf16>
    %1 = arith.extf %0 : vector<64x128xbf16> to vector<64x128xf32>
    %c0_1 = arith.constant 0 : index
    %c0_2 = arith.constant 0 : index
    %2 = vector.load %arg2[%c0_1, %c0_2] : memref<1x128xf32, #tpu.memory_space<vmem>>, vector<1x128xf32>
    %3 = vector.broadcast %2 : vector<1x128xf32> to vector<64x128xf32>
    %4 = arith.mulf %1, %3 : vector<64x128xf32>
    %c0_3 = arith.constant 0 : index
    %c0_4 = arith.constant 0 : index
    %5 = vector.load %arg3[%c0_3, %c0_4] : memref<1x128xf32, #tpu.memory_space<vmem>>, vector<1x128xf32>
    %6 = vector.broadcast %5 : vector<1x128xf32> to vector<64x128xf32>
    %7 = arith.addf %4, %6 : vector<64x128xf32>
    %cst = arith.constant 0.000000e+00 : f32
    %8 = vector.broadcast %cst : f32 to vector<64x128xf32>
    %9 = arith.maximumf %7, %8 : vector<64x128xf32>
    %10 = arith.truncf %9 : vector<64x128xf32> to vector<64x128xbf16>
    %c0_5 = arith.constant 0 : index
    %c0_6 = arith.constant 0 : index
    %11 = vector.load %arg4[%c0_5, %c0_6] : memref<64x128xbf16, #tpu.memory_space<vmem>>, vector<64x128xbf16>
    tpu.vector_store %arg4[%c0_5, %c0_6], %10 {strides = array<i32>} : memref<64x128xbf16, #tpu.memory_space<vmem>>, vector<64x128xbf16>,
    return
  }
  func.func @transform_0(%arg0: i32) -> (i32, i32) {
    %c0_i32 = arith.constant 0 : i32
    %c0_i32_0 = arith.constant 0 : i32
    return %arg0, %c0_i32 : i32, i32
  }
  func.func @transform_1(%arg0: i32) -> (i32, i32) {
    %c0_i32 = arith.constant 0 : i32
    %c0_i32_0 = arith.constant 0 : i32
    %c0_i32_1 = arith.constant 0 : i32
    return %c0_i32, %c0_i32_0 : i32, i32
  }
  func.func @transform_2(%arg0: i32) -> (i32, i32) {
    %c0_i32 = arith.constant 0 : i32
    %c0_i32_0 = arith.constant 0 : i32
    %c0_i32_1 = arith.constant 0 : i32
    return %c0_i32, %c0_i32_0 : i32, i32
  }
  func.func @transform_3(%arg0: i32) -> (i32, i32) {
    %c0_i32 = arith.constant 0 : i32
    %c0_i32_0 = arith.constant 0 : i32
    return %arg0, %c0_i32 : i32, i32
  }
}

module attributes {stable_mosaic.version = 11 : i64} {
  func.func @_gemm_stats_kernel(%arg0: i32, %arg1: i32, %arg2: memref<16x640xbf16, #tpu.memory_space<vmem>>, %arg3: memref<640x128xbf16, #tpu.memory_space<vmem>>, %arg4: memref<16x128xbf16, #tpu.memory_space<vmem>>, %arg5: memref<1x1x128xf32, #tpu.memory_space<vmem>>, %arg6: memref<1x1x128xf32, #tpu.memory_space<vmem>>) attributes {dimension_semantics = [#tpu.dimension_semantics<parallel>, #tpu.dimension_semantics<parallel>], iteration_bounds = array<i64: 2, 1>, scalar_prefetch = 0 : i64, scratch_operands = 0 : i64, tpu.core_type = #tpu.core_type<tc>, window_params = [{transform_indices = @transform_0, window_bounds = array<i64: 16, 640>}, {transform_indices = @transform_1, window_bounds = array<i64: 640, 128>}, {transform_indices = @transform_2, window_bounds = array<i64: 16, 128>}, {transform_indices = @transform_3, window_bounds = array<i64: 1, 1, 128>}, {transform_indices = @transform_4, window_bounds = array<i64: 1, 1, 128>}]} {
    %c0 = arith.constant 0 : index
    %c0_0 = arith.constant 0 : index
    %0 = vector.load %arg2[%c0, %c0_0] : memref<16x640xbf16, #tpu.memory_space<vmem>>, vector<16x640xbf16>
    %c0_1 = arith.constant 0 : index
    %c0_2 = arith.constant 0 : index
    %1 = vector.load %arg3[%c0_1, %c0_2] : memref<640x128xbf16, #tpu.memory_space<vmem>>, vector<640x128xbf16>
    %cst = arith.constant dense<0.000000e+00> : vector<16x128xf32>
    %2 = tpu.matmul %0, %1, %cst {dimension_numbers = #tpu.dot_dimension_numbers<[1], [0], [0], [1], [0, 0, 1, 1], [], []>} : vector<16x640xbf16>, vector<640x128xbf16>, vector<16x128xf32> -> vector<16x128xf32>
    %3 = arith.truncf %2 : vector<16x128xf32> to vector<16x128xbf16>
    %c0_3 = arith.constant 0 : index
    %c0_4 = arith.constant 0 : index
    %4 = vector.load %arg4[%c0_3, %c0_4] : memref<16x128xbf16, #tpu.memory_space<vmem>>, vector<16x128xbf16>
    tpu.vector_store %arg4[%c0_3, %c0_4], %3 {strides = array<i32>} : memref<16x128xbf16, #tpu.memory_space<vmem>>, vector<16x128xbf16>,
    %cst_5 = arith.constant dense<0.000000e+00> : vector<128xf32>
    %5 = vector.multi_reduction <add>, %2, %cst_5 [0] : vector<16x128xf32> to vector<128xf32>
    %6 = vector.shape_cast %5 : vector<128xf32> to vector<1x128xf32>
    %7 = vector.shape_cast %6 : vector<1x128xf32> to vector<1x1x128xf32>
    %c0_6 = arith.constant 0 : index
    %c0_7 = arith.constant 0 : index
    %c0_8 = arith.constant 0 : index
    %8 = vector.load %arg5[%c0_6, %c0_7, %c0_8] : memref<1x1x128xf32, #tpu.memory_space<vmem>>, vector<1x1x128xf32>
    tpu.vector_store %arg5[%c0_6, %c0_7, %c0_8], %7 {strides = array<i32>} : memref<1x1x128xf32, #tpu.memory_space<vmem>>, vector<1x1x128xf32>,
    %9 = arith.mulf %2, %2 : vector<16x128xf32>
    %cst_9 = arith.constant dense<0.000000e+00> : vector<128xf32>
    %10 = vector.multi_reduction <add>, %9, %cst_9 [0] : vector<16x128xf32> to vector<128xf32>
    %11 = vector.shape_cast %10 : vector<128xf32> to vector<1x128xf32>
    %12 = vector.shape_cast %11 : vector<1x128xf32> to vector<1x1x128xf32>
    %c0_10 = arith.constant 0 : index
    %c0_11 = arith.constant 0 : index
    %c0_12 = arith.constant 0 : index
    %13 = vector.load %arg6[%c0_10, %c0_11, %c0_12] : memref<1x1x128xf32, #tpu.memory_space<vmem>>, vector<1x1x128xf32>
    tpu.vector_store %arg6[%c0_10, %c0_11, %c0_12], %12 {strides = array<i32>} : memref<1x1x128xf32, #tpu.memory_space<vmem>>, vector<1x1x128xf32>,
    return
  }
  func.func @transform_0(%arg0: i32, %arg1: i32) -> (i32, i32) {
    %c0_i32 = arith.constant 0 : i32
    %c0_i32_0 = arith.constant 0 : i32
    return %arg0, %c0_i32 : i32, i32
  }
  func.func @transform_1(%arg0: i32, %arg1: i32) -> (i32, i32) {
    %c0_i32 = arith.constant 0 : i32
    %c0_i32_0 = arith.constant 0 : i32
    return %c0_i32, %arg1 : i32, i32
  }
  func.func @transform_2(%arg0: i32, %arg1: i32) -> (i32, i32) {
    %c0_i32 = arith.constant 0 : i32
    return %arg0, %arg1 : i32, i32
  }
  func.func @transform_3(%arg0: i32, %arg1: i32) -> (i32, i32, i32) {
    %c0_i32 = arith.constant 0 : i32
    %c0_i32_0 = arith.constant 0 : i32
    return %arg0, %c0_i32, %arg1 : i32, i32, i32
  }
  func.func @transform_4(%arg0: i32, %arg1: i32) -> (i32, i32, i32) {
    %c0_i32 = arith.constant 0 : i32
    %c0_i32_0 = arith.constant 0 : i32
    return %arg0, %c0_i32, %arg1 : i32, i32, i32
  }
}

module attributes {stable_mosaic.version = 11 : i64} {
  func.func @_affine_act_kernel(%arg0: i32, %arg1: memref<16x128xbf16, #tpu.memory_space<vmem>>, %arg2: memref<1x128xf32, #tpu.memory_space<vmem>>, %arg3: memref<1x128xf32, #tpu.memory_space<vmem>>, %arg4: memref<16x128xbf16, #tpu.memory_space<vmem>>) attributes {dimension_semantics = [#tpu.dimension_semantics<parallel>], iteration_bounds = array<i64: 2>, scalar_prefetch = 0 : i64, scratch_operands = 0 : i64, tpu.core_type = #tpu.core_type<tc>, window_params = [{transform_indices = @transform_0, window_bounds = array<i64: 16, 128>}, {pipeline_mode = #tpu.pipeline_mode<synchronous>, transform_indices = @transform_1, window_bounds = array<i64: 1, 128>}, {pipeline_mode = #tpu.pipeline_mode<synchronous>, transform_indices = @transform_2, window_bounds = array<i64: 1, 128>}, {transform_indices = @transform_3, window_bounds = array<i64: 16, 128>}]} {
    %c0 = arith.constant 0 : index
    %c0_0 = arith.constant 0 : index
    %0 = vector.load %arg1[%c0, %c0_0] : memref<16x128xbf16, #tpu.memory_space<vmem>>, vector<16x128xbf16>
    %1 = arith.extf %0 : vector<16x128xbf16> to vector<16x128xf32>
    %c0_1 = arith.constant 0 : index
    %c0_2 = arith.constant 0 : index
    %2 = vector.load %arg2[%c0_1, %c0_2] : memref<1x128xf32, #tpu.memory_space<vmem>>, vector<1x128xf32>
    %3 = vector.broadcast %2 : vector<1x128xf32> to vector<16x128xf32>
    %4 = arith.mulf %1, %3 : vector<16x128xf32>
    %c0_3 = arith.constant 0 : index
    %c0_4 = arith.constant 0 : index
    %5 = vector.load %arg3[%c0_3, %c0_4] : memref<1x128xf32, #tpu.memory_space<vmem>>, vector<1x128xf32>
    %6 = vector.broadcast %5 : vector<1x128xf32> to vector<16x128xf32>
    %7 = arith.addf %4, %6 : vector<16x128xf32>
    %cst = arith.constant 0.000000e+00 : f32
    %8 = vector.broadcast %cst : f32 to vector<16x128xf32>
    %9 = arith.maximumf %7, %8 : vector<16x128xf32>
    %10 = arith.truncf %9 : vector<16x128xf32> to vector<16x128xbf16>
    %c0_5 = arith.constant 0 : index
    %c0_6 = arith.constant 0 : index
    %11 = vector.load %arg4[%c0_5, %c0_6] : memref<16x128xbf16, #tpu.memory_space<vmem>>, vector<16x128xbf16>
    tpu.vector_store %arg4[%c0_5, %c0_6], %10 {strides = array<i32>} : memref<16x128xbf16, #tpu.memory_space<vmem>>, vector<16x128xbf16>,
    return
  }
  func.func @transform_0(%arg0: i32) -> (i32, i32) {
    %c0_i32 = arith.constant 0 : i32
    %c0_i32_0 = arith.constant 0 : i32
    return %arg0, %c0_i32 : i32, i32
  }
  func.func @transform_1(%arg0: i32) -> (i32, i32) {
    %c0_i32 = arith.constant 0 : i32
    %c0_i32_0 = arith.constant 0 : i32
    %c0_i32_1 = arith.constant 0 : i32
    return %c0_i32, %c0_i32_0 : i32, i32
  }
  func.func @transform_2(%arg0: i32) -> (i32, i32) {
    %c0_i32 = arith.constant 0 : i32
    %c0_i32_0 = arith.constant 0 : i32
    %c0_i32_1 = arith.constant 0 : i32
    return %c0_i32, %c0_i32_0 : i32, i32
  }
  func.func @transform_3(%arg0: i32) -> (i32, i32) {
    %c0_i32 = arith.constant 0 : i32
    %c0_i32_0 = arith.constant 0 : i32
    return %arg0, %c0_i32 : i32, i32
  }
}

module attributes {stable_mosaic.version = 11 : i64} {
  func.func @_affine_act_kernel(%arg0: i32, %arg1: memref<16x128xbf16, #tpu.memory_space<vmem>>, %arg2: memref<1x128xf32, #tpu.memory_space<vmem>>, %arg3: memref<1x128xf32, #tpu.memory_space<vmem>>, %arg4: memref<16x128xbf16, #tpu.memory_space<vmem>>, %arg5: memref<16x128xbf16, #tpu.memory_space<vmem>>) attributes {dimension_semantics = [#tpu.dimension_semantics<parallel>], iteration_bounds = array<i64: 2>, scalar_prefetch = 0 : i64, scratch_operands = 0 : i64, tpu.core_type = #tpu.core_type<tc>, window_params = [{transform_indices = @transform_0, window_bounds = array<i64: 16, 128>}, {pipeline_mode = #tpu.pipeline_mode<synchronous>, transform_indices = @transform_1, window_bounds = array<i64: 1, 128>}, {pipeline_mode = #tpu.pipeline_mode<synchronous>, transform_indices = @transform_2, window_bounds = array<i64: 1, 128>}, {transform_indices = @transform_3, window_bounds = array<i64: 16, 128>}, {transform_indices = @transform_4, window_bounds = array<i64: 16, 128>}]} {
    %c0 = arith.constant 0 : index
    %c0_0 = arith.constant 0 : index
    %0 = vector.load %arg1[%c0, %c0_0] : memref<16x128xbf16, #tpu.memory_space<vmem>>, vector<16x128xbf16>
    %1 = arith.extf %0 : vector<16x128xbf16> to vector<16x128xf32>
    %c0_1 = arith.constant 0 : index
    %c0_2 = arith.constant 0 : index
    %2 = vector.load %arg2[%c0_1, %c0_2] : memref<1x128xf32, #tpu.memory_space<vmem>>, vector<1x128xf32>
    %3 = vector.broadcast %2 : vector<1x128xf32> to vector<16x128xf32>
    %4 = arith.mulf %1, %3 : vector<16x128xf32>
    %c0_3 = arith.constant 0 : index
    %c0_4 = arith.constant 0 : index
    %5 = vector.load %arg3[%c0_3, %c0_4] : memref<1x128xf32, #tpu.memory_space<vmem>>, vector<1x128xf32>
    %6 = vector.broadcast %5 : vector<1x128xf32> to vector<16x128xf32>
    %7 = arith.addf %4, %6 : vector<16x128xf32>
    %c0_5 = arith.constant 0 : index
    %c0_6 = arith.constant 0 : index
    %8 = vector.load %arg4[%c0_5, %c0_6] : memref<16x128xbf16, #tpu.memory_space<vmem>>, vector<16x128xbf16>
    %9 = arith.extf %8 : vector<16x128xbf16> to vector<16x128xf32>
    %10 = arith.addf %7, %9 : vector<16x128xf32>
    %11 = arith.truncf %10 : vector<16x128xf32> to vector<16x128xbf16>
    %c0_7 = arith.constant 0 : index
    %c0_8 = arith.constant 0 : index
    %12 = vector.load %arg5[%c0_7, %c0_8] : memref<16x128xbf16, #tpu.memory_space<vmem>>, vector<16x128xbf16>
    tpu.vector_store %arg5[%c0_7, %c0_8], %11 {strides = array<i32>} : memref<16x128xbf16, #tpu.memory_space<vmem>>, vector<16x128xbf16>,
    return
  }
  func.func @transform_0(%arg0: i32) -> (i32, i32) {
    %c0_i32 = arith.constant 0 : i32
    %c0_i32_0 = arith.constant 0 : i32
    return %arg0, %c0_i32 : i32, i32
  }
  func.func @transform_1(%arg0: i32) -> (i32, i32) {
    %c0_i32 = arith.constant 0 : i32
    %c0_i32_0 = arith.constant 0 : i32
    %c0_i32_1 = arith.constant 0 : i32
    return %c0_i32, %c0_i32_0 : i32, i32
  }
  func.func @transform_2(%arg0: i32) -> (i32, i32) {
    %c0_i32 = arith.constant 0 : i32
    %c0_i32_0 = arith.constant 0 : i32
    %c0_i32_1 = arith.constant 0 : i32
    return %c0_i32, %c0_i32_0 : i32, i32
  }
  func.func @transform_3(%arg0: i32) -> (i32, i32) {
    %c0_i32 = arith.constant 0 : i32
    %c0_i32_0 = arith.constant 0 : i32
    return %arg0, %c0_i32 : i32, i32
  }
  func.func @transform_4(%arg0: i32) -> (i32, i32) {
    %c0_i32 = arith.constant 0 : i32
    %c0_i32_0 = arith.constant 0 : i32
    return %arg0, %c0_i32 : i32, i32
  }
}

module attributes {stable_mosaic.version = 11 : i64} {
  func.func @_gemm_stats_kernel(%arg0: i32, %arg1: i32, %arg2: memref<16x1152xbf16, #tpu.memory_space<vmem>>, %arg3: memref<1152x128xbf16, #tpu.memory_space<vmem>>, %arg4: memref<16x128xbf16, #tpu.memory_space<vmem>>, %arg5: memref<1x1x128xf32, #tpu.memory_space<vmem>>, %arg6: memref<1x1x128xf32, #tpu.memory_space<vmem>>) attributes {dimension_semantics = [#tpu.dimension_semantics<parallel>, #tpu.dimension_semantics<parallel>], iteration_bounds = array<i64: 2, 1>, scalar_prefetch = 0 : i64, scratch_operands = 0 : i64, tpu.core_type = #tpu.core_type<tc>, window_params = [{transform_indices = @transform_0, window_bounds = array<i64: 16, 1152>}, {transform_indices = @transform_1, window_bounds = array<i64: 1152, 128>}, {transform_indices = @transform_2, window_bounds = array<i64: 16, 128>}, {transform_indices = @transform_3, window_bounds = array<i64: 1, 1, 128>}, {transform_indices = @transform_4, window_bounds = array<i64: 1, 1, 128>}]} {
    %c0 = arith.constant 0 : index
    %c0_0 = arith.constant 0 : index
    %0 = vector.load %arg2[%c0, %c0_0] : memref<16x1152xbf16, #tpu.memory_space<vmem>>, vector<16x1152xbf16>
    %c0_1 = arith.constant 0 : index
    %c0_2 = arith.constant 0 : index
    %1 = vector.load %arg3[%c0_1, %c0_2] : memref<1152x128xbf16, #tpu.memory_space<vmem>>, vector<1152x128xbf16>
    %cst = arith.constant dense<0.000000e+00> : vector<16x128xf32>
    %2 = tpu.matmul %0, %1, %cst {dimension_numbers = #tpu.dot_dimension_numbers<[1], [0], [0], [1], [0, 0, 1, 1], [], []>} : vector<16x1152xbf16>, vector<1152x128xbf16>, vector<16x128xf32> -> vector<16x128xf32>
    %3 = arith.truncf %2 : vector<16x128xf32> to vector<16x128xbf16>
    %c0_3 = arith.constant 0 : index
    %c0_4 = arith.constant 0 : index
    %4 = vector.load %arg4[%c0_3, %c0_4] : memref<16x128xbf16, #tpu.memory_space<vmem>>, vector<16x128xbf16>
    tpu.vector_store %arg4[%c0_3, %c0_4], %3 {strides = array<i32>} : memref<16x128xbf16, #tpu.memory_space<vmem>>, vector<16x128xbf16>,
    %cst_5 = arith.constant dense<0.000000e+00> : vector<128xf32>
    %5 = vector.multi_reduction <add>, %2, %cst_5 [0] : vector<16x128xf32> to vector<128xf32>
    %6 = vector.shape_cast %5 : vector<128xf32> to vector<1x128xf32>
    %7 = vector.shape_cast %6 : vector<1x128xf32> to vector<1x1x128xf32>
    %c0_6 = arith.constant 0 : index
    %c0_7 = arith.constant 0 : index
    %c0_8 = arith.constant 0 : index
    %8 = vector.load %arg5[%c0_6, %c0_7, %c0_8] : memref<1x1x128xf32, #tpu.memory_space<vmem>>, vector<1x1x128xf32>
    tpu.vector_store %arg5[%c0_6, %c0_7, %c0_8], %7 {strides = array<i32>} : memref<1x1x128xf32, #tpu.memory_space<vmem>>, vector<1x1x128xf32>,
    %9 = arith.mulf %2, %2 : vector<16x128xf32>
    %cst_9 = arith.constant dense<0.000000e+00> : vector<128xf32>
    %10 = vector.multi_reduction <add>, %9, %cst_9 [0] : vector<16x128xf32> to vector<128xf32>
    %11 = vector.shape_cast %10 : vector<128xf32> to vector<1x128xf32>
    %12 = vector.shape_cast %11 : vector<1x128xf32> to vector<1x1x128xf32>
    %c0_10 = arith.constant 0 : index
    %c0_11 = arith.constant 0 : index
    %c0_12 = arith.constant 0 : index
    %13 = vector.load %arg6[%c0_10, %c0_11, %c0_12] : memref<1x1x128xf32, #tpu.memory_space<vmem>>, vector<1x1x128xf32>
    tpu.vector_store %arg6[%c0_10, %c0_11, %c0_12], %12 {strides = array<i32>} : memref<1x1x128xf32, #tpu.memory_space<vmem>>, vector<1x1x128xf32>,
    return
  }
  func.func @transform_0(%arg0: i32, %arg1: i32) -> (i32, i32) {
    %c0_i32 = arith.constant 0 : i32
    %c0_i32_0 = arith.constant 0 : i32
    return %arg0, %c0_i32 : i32, i32
  }
  func.func @transform_1(%arg0: i32, %arg1: i32) -> (i32, i32) {
    %c0_i32 = arith.constant 0 : i32
    %c0_i32_0 = arith.constant 0 : i32
    return %c0_i32, %arg1 : i32, i32
  }
  func.func @transform_2(%arg0: i32, %arg1: i32) -> (i32, i32) {
    %c0_i32 = arith.constant 0 : i32
    return %arg0, %arg1 : i32, i32
  }
  func.func @transform_3(%arg0: i32, %arg1: i32) -> (i32, i32, i32) {
    %c0_i32 = arith.constant 0 : i32
    %c0_i32_0 = arith.constant 0 : i32
    return %arg0, %c0_i32, %arg1 : i32, i32, i32
  }
  func.func @transform_4(%arg0: i32, %arg1: i32) -> (i32, i32, i32) {
    %c0_i32 = arith.constant 0 : i32
    %c0_i32_0 = arith.constant 0 : i32
    return %arg0, %c0_i32, %arg1 : i32, i32, i32
  }
}

module attributes {stable_mosaic.version = 11 : i64} {
  func.func @_gemm_stats_kernel(%arg0: i32, %arg1: i32, %arg2: memref<32x512xbf16, #tpu.memory_space<vmem>>, %arg3: memref<512x128xbf16, #tpu.memory_space<vmem>>, %arg4: memref<32x128xbf16, #tpu.memory_space<vmem>>, %arg5: memref<1x1x128xf32, #tpu.memory_space<vmem>>, %arg6: memref<1x1x128xf32, #tpu.memory_space<vmem>>) attributes {dimension_semantics = [#tpu.dimension_semantics<parallel>, #tpu.dimension_semantics<parallel>], iteration_bounds = array<i64: 1, 2>, scalar_prefetch = 0 : i64, scratch_operands = 0 : i64, tpu.core_type = #tpu.core_type<tc>, window_params = [{transform_indices = @transform_0, window_bounds = array<i64: 32, 512>}, {transform_indices = @transform_1, window_bounds = array<i64: 512, 128>}, {transform_indices = @transform_2, window_bounds = array<i64: 32, 128>}, {transform_indices = @transform_3, window_bounds = array<i64: 1, 1, 128>}, {transform_indices = @transform_4, window_bounds = array<i64: 1, 1, 128>}]} {
    %c0 = arith.constant 0 : index
    %c0_0 = arith.constant 0 : index
    %0 = vector.load %arg2[%c0, %c0_0] : memref<32x512xbf16, #tpu.memory_space<vmem>>, vector<32x512xbf16>
    %c0_1 = arith.constant 0 : index
    %c0_2 = arith.constant 0 : index
    %1 = vector.load %arg3[%c0_1, %c0_2] : memref<512x128xbf16, #tpu.memory_space<vmem>>, vector<512x128xbf16>
    %cst = arith.constant dense<0.000000e+00> : vector<32x128xf32>
    %2 = tpu.matmul %0, %1, %cst {dimension_numbers = #tpu.dot_dimension_numbers<[1], [0], [0], [1], [0, 0, 1, 1], [], []>} : vector<32x512xbf16>, vector<512x128xbf16>, vector<32x128xf32> -> vector<32x128xf32>
    %3 = arith.truncf %2 : vector<32x128xf32> to vector<32x128xbf16>
    %c0_3 = arith.constant 0 : index
    %c0_4 = arith.constant 0 : index
    %4 = vector.load %arg4[%c0_3, %c0_4] : memref<32x128xbf16, #tpu.memory_space<vmem>>, vector<32x128xbf16>
    tpu.vector_store %arg4[%c0_3, %c0_4], %3 {strides = array<i32>} : memref<32x128xbf16, #tpu.memory_space<vmem>>, vector<32x128xbf16>,
    %cst_5 = arith.constant dense<0.000000e+00> : vector<128xf32>
    %5 = vector.multi_reduction <add>, %2, %cst_5 [0] : vector<32x128xf32> to vector<128xf32>
    %6 = vector.shape_cast %5 : vector<128xf32> to vector<1x128xf32>
    %7 = vector.shape_cast %6 : vector<1x128xf32> to vector<1x1x128xf32>
    %c0_6 = arith.constant 0 : index
    %c0_7 = arith.constant 0 : index
    %c0_8 = arith.constant 0 : index
    %8 = vector.load %arg5[%c0_6, %c0_7, %c0_8] : memref<1x1x128xf32, #tpu.memory_space<vmem>>, vector<1x1x128xf32>
    tpu.vector_store %arg5[%c0_6, %c0_7, %c0_8], %7 {strides = array<i32>} : memref<1x1x128xf32, #tpu.memory_space<vmem>>, vector<1x1x128xf32>,
    %9 = arith.mulf %2, %2 : vector<32x128xf32>
    %cst_9 = arith.constant dense<0.000000e+00> : vector<128xf32>
    %10 = vector.multi_reduction <add>, %9, %cst_9 [0] : vector<32x128xf32> to vector<128xf32>
    %11 = vector.shape_cast %10 : vector<128xf32> to vector<1x128xf32>
    %12 = vector.shape_cast %11 : vector<1x128xf32> to vector<1x1x128xf32>
    %c0_10 = arith.constant 0 : index
    %c0_11 = arith.constant 0 : index
    %c0_12 = arith.constant 0 : index
    %13 = vector.load %arg6[%c0_10, %c0_11, %c0_12] : memref<1x1x128xf32, #tpu.memory_space<vmem>>, vector<1x1x128xf32>
    tpu.vector_store %arg6[%c0_10, %c0_11, %c0_12], %12 {strides = array<i32>} : memref<1x1x128xf32, #tpu.memory_space<vmem>>, vector<1x1x128xf32>,
    return
  }
  func.func @transform_0(%arg0: i32, %arg1: i32) -> (i32, i32) {
    %c0_i32 = arith.constant 0 : i32
    %c0_i32_0 = arith.constant 0 : i32
    return %arg0, %c0_i32 : i32, i32
  }
  func.func @transform_1(%arg0: i32, %arg1: i32) -> (i32, i32) {
    %c0_i32 = arith.constant 0 : i32
    %c0_i32_0 = arith.constant 0 : i32
    return %c0_i32, %arg1 : i32, i32
  }
  func.func @transform_2(%arg0: i32, %arg1: i32) -> (i32, i32) {
    %c0_i32 = arith.constant 0 : i32
    return %arg0, %arg1 : i32, i32
  }
  func.func @transform_3(%arg0: i32, %arg1: i32) -> (i32, i32, i32) {
    %c0_i32 = arith.constant 0 : i32
    %c0_i32_0 = arith.constant 0 : i32
    return %arg0, %c0_i32, %arg1 : i32, i32, i32
  }
  func.func @transform_4(%arg0: i32, %arg1: i32) -> (i32, i32, i32) {
    %c0_i32 = arith.constant 0 : i32
    %c0_i32_0 = arith.constant 0 : i32
    return %arg0, %c0_i32, %arg1 : i32, i32, i32
  }
}

module attributes {stable_mosaic.version = 11 : i64} {
  func.func @_affine_act_kernel(%arg0: i32, %arg1: memref<16x256xbf16, #tpu.memory_space<vmem>>, %arg2: memref<1x256xf32, #tpu.memory_space<vmem>>, %arg3: memref<1x256xf32, #tpu.memory_space<vmem>>, %arg4: memref<16x256xbf16, #tpu.memory_space<vmem>>) attributes {dimension_semantics = [#tpu.dimension_semantics<parallel>], iteration_bounds = array<i64: 2>, scalar_prefetch = 0 : i64, scratch_operands = 0 : i64, tpu.core_type = #tpu.core_type<tc>, window_params = [{transform_indices = @transform_0, window_bounds = array<i64: 16, 256>}, {pipeline_mode = #tpu.pipeline_mode<synchronous>, transform_indices = @transform_1, window_bounds = array<i64: 1, 256>}, {pipeline_mode = #tpu.pipeline_mode<synchronous>, transform_indices = @transform_2, window_bounds = array<i64: 1, 256>}, {transform_indices = @transform_3, window_bounds = array<i64: 16, 256>}]} {
    %c0 = arith.constant 0 : index
    %c0_0 = arith.constant 0 : index
    %0 = vector.load %arg1[%c0, %c0_0] : memref<16x256xbf16, #tpu.memory_space<vmem>>, vector<16x256xbf16>
    %1 = arith.extf %0 : vector<16x256xbf16> to vector<16x256xf32>
    %c0_1 = arith.constant 0 : index
    %c0_2 = arith.constant 0 : index
    %2 = vector.load %arg2[%c0_1, %c0_2] : memref<1x256xf32, #tpu.memory_space<vmem>>, vector<1x256xf32>
    %3 = vector.broadcast %2 : vector<1x256xf32> to vector<16x256xf32>
    %4 = arith.mulf %1, %3 : vector<16x256xf32>
    %c0_3 = arith.constant 0 : index
    %c0_4 = arith.constant 0 : index
    %5 = vector.load %arg3[%c0_3, %c0_4] : memref<1x256xf32, #tpu.memory_space<vmem>>, vector<1x256xf32>
    %6 = vector.broadcast %5 : vector<1x256xf32> to vector<16x256xf32>
    %7 = arith.addf %4, %6 : vector<16x256xf32>
    %cst = arith.constant 0.000000e+00 : f32
    %8 = vector.broadcast %cst : f32 to vector<16x256xf32>
    %9 = arith.maximumf %7, %8 : vector<16x256xf32>
    %10 = arith.truncf %9 : vector<16x256xf32> to vector<16x256xbf16>
    %c0_5 = arith.constant 0 : index
    %c0_6 = arith.constant 0 : index
    %11 = vector.load %arg4[%c0_5, %c0_6] : memref<16x256xbf16, #tpu.memory_space<vmem>>, vector<16x256xbf16>
    tpu.vector_store %arg4[%c0_5, %c0_6], %10 {strides = array<i32>} : memref<16x256xbf16, #tpu.memory_space<vmem>>, vector<16x256xbf16>,
    return
  }
  func.func @transform_0(%arg0: i32) -> (i32, i32) {
    %c0_i32 = arith.constant 0 : i32
    %c0_i32_0 = arith.constant 0 : i32
    return %arg0, %c0_i32 : i32, i32
  }
  func.func @transform_1(%arg0: i32) -> (i32, i32) {
    %c0_i32 = arith.constant 0 : i32
    %c0_i32_0 = arith.constant 0 : i32
    %c0_i32_1 = arith.constant 0 : i32
    return %c0_i32, %c0_i32_0 : i32, i32
  }
  func.func @transform_2(%arg0: i32) -> (i32, i32) {
    %c0_i32 = arith.constant 0 : i32
    %c0_i32_0 = arith.constant 0 : i32
    %c0_i32_1 = arith.constant 0 : i32
    return %c0_i32, %c0_i32_0 : i32, i32
  }
  func.func @transform_3(%arg0: i32) -> (i32, i32) {
    %c0_i32 = arith.constant 0 : i32
    %c0_i32_0 = arith.constant 0 : i32
    return %arg0, %c0_i32 : i32, i32
  }
}

module attributes {stable_mosaic.version = 11 : i64} {
  func.func @_gemm_stats_kernel(%arg0: i32, %arg1: i32, %arg2: memref<64x256xbf16, #tpu.memory_space<vmem>>, %arg3: memref<256x128xbf16, #tpu.memory_space<vmem>>, %arg4: memref<64x128xbf16, #tpu.memory_space<vmem>>, %arg5: memref<1x1x128xf32, #tpu.memory_space<vmem>>, %arg6: memref<1x1x128xf32, #tpu.memory_space<vmem>>) attributes {dimension_semantics = [#tpu.dimension_semantics<parallel>, #tpu.dimension_semantics<parallel>], iteration_bounds = array<i64: 2, 1>, scalar_prefetch = 0 : i64, scratch_operands = 0 : i64, tpu.core_type = #tpu.core_type<tc>, window_params = [{transform_indices = @transform_0, window_bounds = array<i64: 64, 256>}, {transform_indices = @transform_1, window_bounds = array<i64: 256, 128>}, {transform_indices = @transform_2, window_bounds = array<i64: 64, 128>}, {transform_indices = @transform_3, window_bounds = array<i64: 1, 1, 128>}, {transform_indices = @transform_4, window_bounds = array<i64: 1, 1, 128>}]} {
    %c0 = arith.constant 0 : index
    %c0_0 = arith.constant 0 : index
    %0 = vector.load %arg2[%c0, %c0_0] : memref<64x256xbf16, #tpu.memory_space<vmem>>, vector<64x256xbf16>
    %c0_1 = arith.constant 0 : index
    %c0_2 = arith.constant 0 : index
    %1 = vector.load %arg3[%c0_1, %c0_2] : memref<256x128xbf16, #tpu.memory_space<vmem>>, vector<256x128xbf16>
    %cst = arith.constant dense<0.000000e+00> : vector<64x128xf32>
    %2 = tpu.matmul %0, %1, %cst {dimension_numbers = #tpu.dot_dimension_numbers<[1], [0], [0], [1], [0, 0, 1, 1], [], []>} : vector<64x256xbf16>, vector<256x128xbf16>, vector<64x128xf32> -> vector<64x128xf32>
    %3 = arith.truncf %2 : vector<64x128xf32> to vector<64x128xbf16>
    %c0_3 = arith.constant 0 : index
    %c0_4 = arith.constant 0 : index
    %4 = vector.load %arg4[%c0_3, %c0_4] : memref<64x128xbf16, #tpu.memory_space<vmem>>, vector<64x128xbf16>
    tpu.vector_store %arg4[%c0_3, %c0_4], %3 {strides = array<i32>} : memref<64x128xbf16, #tpu.memory_space<vmem>>, vector<64x128xbf16>,
    %cst_5 = arith.constant dense<0.000000e+00> : vector<128xf32>
    %5 = vector.multi_reduction <add>, %2, %cst_5 [0] : vector<64x128xf32> to vector<128xf32>
    %6 = vector.shape_cast %5 : vector<128xf32> to vector<1x128xf32>
    %7 = vector.shape_cast %6 : vector<1x128xf32> to vector<1x1x128xf32>
    %c0_6 = arith.constant 0 : index
    %c0_7 = arith.constant 0 : index
    %c0_8 = arith.constant 0 : index
    %8 = vector.load %arg5[%c0_6, %c0_7, %c0_8] : memref<1x1x128xf32, #tpu.memory_space<vmem>>, vector<1x1x128xf32>
    tpu.vector_store %arg5[%c0_6, %c0_7, %c0_8], %7 {strides = array<i32>} : memref<1x1x128xf32, #tpu.memory_space<vmem>>, vector<1x1x128xf32>,
    %9 = arith.mulf %2, %2 : vector<64x128xf32>
    %cst_9 = arith.constant dense<0.000000e+00> : vector<128xf32>
    %10 = vector.multi_reduction <add>, %9, %cst_9 [0] : vector<64x128xf32> to vector<128xf32>
    %11 = vector.shape_cast %10 : vector<128xf32> to vector<1x128xf32>
    %12 = vector.shape_cast %11 : vector<1x128xf32> to vector<1x1x128xf32>
    %c0_10 = arith.constant 0 : index
    %c0_11 = arith.constant 0 : index
    %c0_12 = arith.constant 0 : index
    %13 = vector.load %arg6[%c0_10, %c0_11, %c0_12] : memref<1x1x128xf32, #tpu.memory_space<vmem>>, vector<1x1x128xf32>
    tpu.vector_store %arg6[%c0_10, %c0_11, %c0_12], %12 {strides = array<i32>} : memref<1x1x128xf32, #tpu.memory_space<vmem>>, vector<1x1x128xf32>,
    return
  }
  func.func @transform_0(%arg0: i32, %arg1: i32) -> (i32, i32) {
    %c0_i32 = arith.constant 0 : i32
    %c0_i32_0 = arith.constant 0 : i32
    return %arg0, %c0_i32 : i32, i32
  }
  func.func @transform_1(%arg0: i32, %arg1: i32) -> (i32, i32) {
    %c0_i32 = arith.constant 0 : i32
    %c0_i32_0 = arith.constant 0 : i32
    return %c0_i32, %arg1 : i32, i32
  }
  func.func @transform_2(%arg0: i32, %arg1: i32) -> (i32, i32) {
    %c0_i32 = arith.constant 0 : i32
    return %arg0, %arg1 : i32, i32
  }
  func.func @transform_3(%arg0: i32, %arg1: i32) -> (i32, i32, i32) {
    %c0_i32 = arith.constant 0 : i32
    %c0_i32_0 = arith.constant 0 : i32
    return %arg0, %c0_i32, %arg1 : i32, i32, i32
  }
  func.func @transform_4(%arg0: i32, %arg1: i32) -> (i32, i32, i32) {
    %c0_i32 = arith.constant 0 : i32
    %c0_i32_0 = arith.constant 0 : i32
    return %arg0, %c0_i32, %arg1 : i32, i32, i32
  }
}

module attributes {stable_mosaic.version = 11 : i64} {
  func.func @_gemm_bias_act_kernel(%arg0: i32, %arg1: i32, %arg2: memref<256x1664xbf16, #tpu.memory_space<vmem>>, %arg3: memref<1664x128xbf16, #tpu.memory_space<vmem>>, %arg4: memref<1x128xf32, #tpu.memory_space<vmem>>, %arg5: memref<256x128xf32, #tpu.memory_space<vmem>>) attributes {dimension_semantics = [#tpu.dimension_semantics<parallel>, #tpu.dimension_semantics<parallel>], iteration_bounds = array<i64: 2, 1>, scalar_prefetch = 0 : i64, scratch_operands = 0 : i64, tpu.core_type = #tpu.core_type<tc>, window_params = [{transform_indices = @transform_0, window_bounds = array<i64: 256, 1664>}, {transform_indices = @transform_1, window_bounds = array<i64: 1664, 128>}, {transform_indices = @transform_2, window_bounds = array<i64: 1, 128>}, {transform_indices = @transform_3, window_bounds = array<i64: 256, 128>}]} {
    %c0 = arith.constant 0 : index
    %c0_0 = arith.constant 0 : index
    %0 = vector.load %arg2[%c0, %c0_0] : memref<256x1664xbf16, #tpu.memory_space<vmem>>, vector<256x1664xbf16>
    %c0_1 = arith.constant 0 : index
    %c0_2 = arith.constant 0 : index
    %1 = vector.load %arg3[%c0_1, %c0_2] : memref<1664x128xbf16, #tpu.memory_space<vmem>>, vector<1664x128xbf16>
    %cst = arith.constant dense<0.000000e+00> : vector<256x128xf32>
    %2 = tpu.matmul %0, %1, %cst {dimension_numbers = #tpu.dot_dimension_numbers<[1], [0], [0], [1], [0, 0, 1, 1], [], []>} : vector<256x1664xbf16>, vector<1664x128xbf16>, vector<256x128xf32> -> vector<256x128xf32>
    %c0_3 = arith.constant 0 : index
    %c0_4 = arith.constant 0 : index
    %3 = vector.load %arg4[%c0_3, %c0_4] : memref<1x128xf32, #tpu.memory_space<vmem>>, vector<1x128xf32>
    %4 = vector.broadcast %3 : vector<1x128xf32> to vector<256x128xf32>
    %5 = arith.addf %2, %4 : vector<256x128xf32>
    %6 = math.tanh %5 : vector<256x128xf32>
    %c0_5 = arith.constant 0 : index
    %c0_6 = arith.constant 0 : index
    %7 = vector.load %arg5[%c0_5, %c0_6] : memref<256x128xf32, #tpu.memory_space<vmem>>, vector<256x128xf32>
    tpu.vector_store %arg5[%c0_5, %c0_6], %6 {strides = array<i32>} : memref<256x128xf32, #tpu.memory_space<vmem>>, vector<256x128xf32>,
    return
  }
  func.func @transform_0(%arg0: i32, %arg1: i32) -> (i32, i32) {
    %c0_i32 = arith.constant 0 : i32
    %c0_i32_0 = arith.constant 0 : i32
    return %arg0, %c0_i32 : i32, i32
  }
  func.func @transform_1(%arg0: i32, %arg1: i32) -> (i32, i32) {
    %c0_i32 = arith.constant 0 : i32
    %c0_i32_0 = arith.constant 0 : i32
    return %c0_i32, %arg1 : i32, i32
  }
  func.func @transform_2(%arg0: i32, %arg1: i32) -> (i32, i32) {
    %c0_i32 = arith.constant 0 : i32
    %c0_i32_0 = arith.constant 0 : i32
    return %c0_i32, %arg1 : i32, i32
  }
  func.func @transform_3(%arg0: i32, %arg1: i32) -> (i32, i32) {
    %c0_i32 = arith.constant 0 : i32
    return %arg0, %arg1 : i32, i32
  }
}

</mosaic_0001>

<bundles_post_ra>
// kernel: generator_forward.20
= control target key start
LH: loop header
LB: loop body
LE: loop exit
PB: predicated region body
PF: predicated region fallthrough
CT: control target
= control target key end

     0   :  { %s851_s12 = smov 0   ;;  %s985_s0 = inlined_call_operand.vmem [shape: bf16[512,128], index: 0, kind: input, shape index: {}]   ;;  %s986_s1 = inlined_call_operand.vmem [shape: f32[1,128], index: 1, kind: input, shape index: {}]   ;;  %s987_s2 = inlined_call_operand.vmem [shape: f32[1,128], index: 2, kind: input, shape index: {}]   ;;  %s988_s3 = inlined_call_operand.vmem [shape: bf16[512,128], index: 3, kind: output, shape index: {}]  }
   0x1 LB: > { %s564_s13 = sadd.s32 4294967295, %s829_s12   ;;  %p568_p0 = scmp.ge.s32.totalorder %s829_s12, 1  ;;  %s829_s12 = sphi %s851_s12, %s13_s12  }
   0x2   : > { %p138_p1 = scmp.lt.s32.totalorder %s829_s12, 3 }
   0x4   : > { %p139_p2 = pnand %p568_p0, %p138_p1 }
   0x5   : > { %s569_s14 = sshll.u32 (!%p139_p2), %s564_s13, 5 }
   0x6   : > { %142 = sbr.rel (%p139_p2) target bundleno = 57 (0x39), region = 32  ;;  %p163_p3 = scmp.lt.s32.totalorder (!%p139_p2), %s569_s14, 63 }
   0xb   : > { %s990_s14 = smov (!%p163_p3, %s569_s14), 63  ;;  %v872_v0 = vld [vmem:[%s986_s1] ss:$0 sm:$0xff] }
   0xc   : > { %s570_s15 = sshll.u32 %s990_s14, 2  ;;  %v881_v9 = vld [vmem:[%s987_s2] ss:$0 sm:$0xff] }
   0xd   : > { %s867_s18 = scalar_lea.vmem %s985_s0, %s570_s15  ;;  %s906_s25 = scalar_lea.vmem %s988_s3, %s570_s15 }
   0xe   : > { %v642_v1 = vld [vmem:[%s867_s18] sm:$0xff]   ;;  %v785_v2 = vld [vmem:[%s867_s18 + $0x8] sm:$0xff]   ;;  %v786_v3 = vld [vmem:[%s867_s18 + $0x10] sm:$0xff]  }
   0xf   : > { %v643_v4 = vunpack.c.l.bf16 %v642_v1  ;;  %v644_v5 = vunpack.c.h.bf16 %v642_v1  ;;  %v647_v6 = vunpack.c.l.bf16 %v785_v2  ;;  %v648_v7 = vunpack.c.h.bf16 %v785_v2  ;;  %v787_v8 = vld [vmem:[%s867_s18 + $0x18] sm:$0xff]   ;;  %v788_v30 = vld [vmem:[%s867_s18 + $0x20] sm:$0xff]   ;;  %v789_v35 = vld [vmem:[%s867_s18 + $0x28] sm:$0xff]  }
  0x10   : > { %v651_v10 = vunpack.c.l.bf16 %v786_v3  ;;  %v652_v11 = vunpack.c.h.bf16 %v786_v3  ;;  %v655_v12 = vunpack.c.l.bf16 %v787_v8  ;;  %v656_v13 = vunpack.c.h.bf16 %v787_v8  ;;  %v790_v40 = vld [vmem:[%s867_s18 + $0x30] sm:$0xff]   ;;  %v791_v45 = vld [vmem:[%s867_s18 + $0x38] sm:$0xff]   ;;  %v792_v3 = vld [vmem:[%s867_s18 + $0x40] sm:$0xff]  }
  0x11   : > { %v245_v14 = vmul.f32 %v643_v4, %v872_v0  ;;  %v246_v15 = vmul.f32 %v644_v5, %v872_v0  ;;  %v247_v16 = vmul.f32 %v647_v6, %v872_v0  ;;  %v248_v17 = vmul.f32 %v648_v7, %v872_v0 }
  0x12   : > { %v249_v18 = vmul.f32 %v651_v10, %v872_v0  ;;  %v250_v19 = vmul.f32 %v652_v11, %v872_v0  ;;  %v251_v20 = vmul.f32 %v655_v12, %v872_v0  ;;  %v252_v21 = vmul.f32 %v656_v13, %v872_v0  ;;  %v793_v13 = vld [vmem:[%s867_s18 + $0x48] sm:$0xff]  }
  0x13   : > { %v284_v22 = vadd.f32 %v881_v9, %v245_v14  ;;  %v285_v23 = vadd.f32 %v881_v9, %v246_v15  ;;  %v286_v24 = vadd.f32 %v881_v9, %v247_v16  ;;  %v287_v25 = vadd.f32 %v881_v9, %v248_v17 }
  0x14   : > { %v288_v26 = vadd.f32 %v881_v9, %v249_v18  ;;  %v289_v27 = vadd.f32 %v881_v9, %v250_v19  ;;  %v290_v28 = vadd.f32 %v881_v9, %v251_v20  ;;  %v291_v29 = vadd.f32 %v881_v9, %v252_v21  ;;  %v794_v18 = vld [vmem:[%s867_s18 + $0x50] sm:$0xff]  }
  0x15   : > { %v316_v31 = vmax.f32 %v284_v22, 0.0  ;;  %v317_v32 = vmax.f32 %v285_v23, 0.0  ;;  %v318_v33 = vmax.f32 %v286_v24, 0.0  ;;  %v319_v34 = vmax.f32 %v287_v25, 0.0  ;;  %v795_v23 = vld [vmem:[%s867_s18 + $0x58] sm:$0xff]  }
  0x16   : > { %v320_v36 = vmax.f32 %v288_v26, 0.0  ;;  %v321_v37 = vmax.f32 %v289_v27, 0.0  ;;  %v322_v38 = vmax.f32 %v290_v28, 0.0  ;;  %v323_v39 = vmax.f32 %v291_v29, 0.0 }
  0x17   : > { %v708_v41 = vpack.c.bf16 %v317_v32, %v316_v31  ;;  %v713_v42 = vpack.c.bf16 %v319_v34, %v318_v33  ;;  %v659_v43 = vunpack.c.l.bf16 %v788_v30  ;;  %v660_v44 = vunpack.c.h.bf16 %v788_v30 }
  0x18   : > { %v718_v46 = vpack.c.bf16 %v321_v37, %v320_v36  ;;  %v723_v47 = vpack.c.bf16 %v323_v39, %v322_v38  ;;  %v663_v48 = vunpack.c.l.bf16 %v789_v35  ;;  %v664_v49 = vunpack.c.h.bf16 %v789_v35 }
  0x19   : > { %709 = vst [vmem:[%s906_s25] sm:$0xff] %v708_v41   ;;  %800 = vst [vmem:[%s906_s25 + $0x8] sm:$0xff] %v713_v42   ;;  %v253_v50 = vmul.f32 %v659_v43, %v872_v0  ;;  %v254_v51 = vmul.f32 %v660_v44, %v872_v0  ;;  %v667_v52 = vunpack.c.l.bf16 %v790_v40  ;;  %v668_v53 = vunpack.c.h.bf16 %v790_v40  ;;  %v796_v40 = vld [vmem:[%s867_s18 + $0x60] sm:$0xff]  }
  0x1a   : > { %801 = vst [vmem:[%s906_s25 + $0x10] sm:$0xff] %v718_v46   ;;  %802 = vst [vmem:[%s906_s25 + $0x18] sm:$0xff] %v723_v47   ;;  %v255_v54 = vmul.f32 %v663_v48, %v872_v0  ;;  %v256_v55 = vmul.f32 %v664_v49, %v872_v0  ;;  %v671_v56 = vunpack.c.l.bf16 %v791_v45  ;;  %v672_v57 = vunpack.c.h.bf16 %v791_v45 }
  0x1b   : > { %v292_v58 = vadd.f32 %v881_v9, %v253_v50  ;;  %v293_v59 = vadd.f32 %v881_v9, %v254_v51  ;;  %v257_v60 = vmul.f32 %v667_v52, %v872_v0  ;;  %v258_v61 = vmul.f32 %v668_v53, %v872_v0  ;;  %v797_v53 = vld [vmem:[%s867_s18 + $0x68] sm:$0xff]  }
  0x1c   : > { %v294_v62 = vadd.f32 %v881_v9, %v255_v54  ;;  %v295_v63 = vadd.f32 %v881_v9, %v256_v55  ;;  %v259_v1 = vmul.f32 %v671_v56, %v872_v0  ;;  %v260_v2 = vmul.f32 %v672_v57, %v872_v0 }
  0x1d   : > { %v324_v4 = vmax.f32 %v292_v58, 0.0  ;;  %v325_v5 = vmax.f32 %v293_v59, 0.0  ;;  %v296_v6 = vadd.f32 %v881_v9, %v257_v60  ;;  %v297_v7 = vadd.f32 %v881_v9, %v258_v61  ;;  %v798_v58 = vld [vmem:[%s867_s18 + $0x70] sm:$0xff]  }
  0x1e   : > { %v326_v8 = vmax.f32 %v294_v62, 0.0  ;;  %v327_v10 = vmax.f32 %v295_v63, 0.0  ;;  %v298_v11 = vadd.f32 %v881_v9, %v259_v1  ;;  %v299_v12 = vadd.f32 %v881_v9, %v260_v2  ;;  %v799_v63 = vld [vmem:[%s867_s18 + $0x78] sm:$0xff]  }
  0x1f   : > { %v728_v14 = vpack.c.bf16 %v325_v5, %v324_v4  ;;  %v328_v15 = vmax.f32 %v296_v6, 0.0  ;;  %v329_v16 = vmax.f32 %v297_v7, 0.0  ;;  %v675_v17 = vunpack.c.l.bf16 %v792_v3 }
  0x20   : > { %v733_v19 = vpack.c.bf16 %v327_v10, %v326_v8  ;;  %v330_v20 = vmax.f32 %v298_v11, 0.0  ;;  %v331_v21 = vmax.f32 %v299_v12, 0.0  ;;  %v676_v22 = vunpack.c.h.bf16 %v792_v3 }
  0x21   : > { %803 = vst [vmem:[%s906_s25 + $0x20] sm:$0xff] %v728_v14   ;;  %v738_v24 = vpack.c.bf16 %v329_v16, %v328_v15  ;;  %v261_v25 = vmul.f32 %v675_v17, %v872_v0  ;;  %v679_v26 = vunpack.c.l.bf16 %v793_v13  ;;  %v680_v27 = vunpack.c.h.bf16 %v793_v13 }
  0x22   : > { %804 = vst [vmem:[%s906_s25 + $0x28] sm:$0xff] %v733_v19   ;;  %v743_v28 = vpack.c.bf16 %v331_v21, %v330_v20  ;;  %v262_v29 = vmul.f32 %v676_v22, %v872_v0  ;;  %v683_v30 = vunpack.c.l.bf16 %v794_v18  ;;  %v684_v31 = vunpack.c.h.bf16 %v794_v18 }
  0x23   : > { %805 = vst [vmem:[%s906_s25 + $0x30] sm:$0xff] %v738_v24   ;;  %v300_v32 = vadd.f32 %v881_v9, %v261_v25  ;;  %v263_v33 = vmul.f32 %v679_v26, %v872_v0  ;;  %v264_v34 = vmul.f32 %v680_v27, %v872_v0  ;;  %v687_v35 = vunpack.c.l.bf16 %v795_v23 }
  0x24   : > { %806 = vst [vmem:[%s906_s25 + $0x38] sm:$0xff] %v743_v28   ;;  %v301_v36 = vadd.f32 %v881_v9, %v262_v29  ;;  %v265_v37 = vmul.f32 %v683_v30, %v872_v0  ;;  %v266_v38 = vmul.f32 %v684_v31, %v872_v0  ;;  %v688_v39 = vunpack.c.h.bf16 %v795_v23 }
  0x25   : > { %v332_v41 = vmax.f32 %v300_v32, 0.0  ;;  %v302_v42 = vadd.f32 %v881_v9, %v263_v33  ;;  %v303_v43 = vadd.f32 %v881_v9, %v264_v34  ;;  %v267_v44 = vmul.f32 %v687_v35, %v872_v0 }
  0x26   : > { %v333_v45 = vmax.f32 %v301_v36, 0.0  ;;  %v304_v46 = vadd.f32 %v881_v9, %v265_v37  ;;  %v305_v47 = vadd.f32 %v881_v9, %v266_v38  ;;  %v268_v48 = vmul.f32 %v688_v39, %v872_v0 }
  0x27   : > { %v334_v49 = vmax.f32 %v302_v42, 0.0  ;;  %v335_v50 = vmax.f32 %v303_v43, 0.0  ;;  %v306_v51 = vadd.f32 %v881_v9, %v267_v44  ;;  %v691_v52 = vunpack.c.l.bf16 %v796_v40 }
  0x28   : > { %v748_v54 = vpack.c.bf16 %v333_v45, %v332_v41  ;;  %v336_v55 = vmax.f32 %v304_v46, 0.0  ;;  %v337_v56 = vmax.f32 %v305_v47, 0.0  ;;  %v307_v57 = vadd.f32 %v881_v9, %v268_v48 }
  0x29   : > { %v753_v59 = vpack.c.bf16 %v335_v50, %v334_v49  ;;  %v338_v60 = vmax.f32 %v306_v51, 0.0  ;;  %v692_v61 = vunpack.c.h.bf16 %v796_v40  ;;  %v269_v62 = vmul.f32 %v691_v52, %v872_v0 }
  0x2a   : > { %807 = vst [vmem:[%s906_s25 + $0x40] sm:$0xff] %v748_v54   ;;  %v758_v1 = vpack.c.bf16 %v337_v56, %v336_v55  ;;  %v339_v2 = vmax.f32 %v307_v57, 0.0  ;;  %v695_v3 = vunpack.c.l.bf16 %v797_v53  ;;  %v696_v4 = vunpack.c.h.bf16 %v797_v53 }
  0x2b   : > { %808 = vst [vmem:[%s906_s25 + $0x48] sm:$0xff] %v753_v59   ;;  %v270_v5 = vmul.f32 %v692_v61, %v872_v0  ;;  %v308_v6 = vadd.f32 %v881_v9, %v269_v62  ;;  %v699_v7 = vunpack.c.l.bf16 %v798_v58  ;;  %v700_v8 = vunpack.c.h.bf16 %v798_v58 }
  0x2c   : > { %809 = vst [vmem:[%s906_s25 + $0x50] sm:$0xff] %v758_v1   ;;  %v763_v10 = vpack.c.bf16 %v339_v2, %v338_v60  ;;  %v271_v11 = vmul.f32 %v695_v3, %v872_v0  ;;  %v272_v12 = vmul.f32 %v696_v4, %v872_v0  ;;  %v703_v13 = vunpack.c.l.bf16 %v799_v63 }
  0x2d   : > { %v309_v14 = vadd.f32 %v881_v9, %v270_v5  ;;  %v340_v15 = vmax.f32 %v308_v6, 0.0  ;;  %v273_v16 = vmul.f32 %v699_v7, %v872_v0  ;;  %v274_v17 = vmul.f32 %v700_v8, %v872_v0 }
  0x2e   : > { %810 = vst [vmem:[%s906_s25 + $0x58] sm:$0xff] %v763_v10   ;;  %v310_v18 = vadd.f32 %v881_v9, %v271_v11  ;;  %v311_v19 = vadd.f32 %v881_v9, %v272_v12  ;;  %v704_v20 = vunpack.c.h.bf16 %v799_v63  ;;  %v275_v21 = vmul.f32 %v703_v13, %v872_v0 }
  0x2f   : > { %v341_v22 = vmax.f32 %v309_v14, 0.0  ;;  %v312_v23 = vadd.f32 %v881_v9, %v273_v16  ;;  %v313_v24 = vadd.f32 %v881_v9, %v274_v17 }
  0x30   : > { %v342_v25 = vmax.f32 %v310_v18, 0.0  ;;  %v343_v26 = vmax.f32 %v311_v19, 0.0  ;;  %v276_v27 = vmul.f32 %v704_v20, %v872_v0  ;;  %v314_v28 = vadd.f32 %v881_v9, %v275_v21 }
  0x31   : > { %v768_v29 = vpack.c.bf16 %v341_v22, %v340_v15  ;;  %v344_v30 = vmax.f32 %v312_v23, 0.0  ;;  %v345_v31 = vmax.f32 %v313_v24, 0.0 }
  0x32   : > { %v773_v32 = vpack.c.bf16 %v343_v26, %v342_v25  ;;  %v315_v33 = vadd.f32 %v881_v9, %v276_v27  ;;  %v346_v34 = vmax.f32 %v314_v28, 0.0 }
  0x33   : > { %811 = vst [vmem:[%s906_s25 + $0x60] sm:$0xff] %v768_v29   ;;  %v778_v35 = vpack.c.bf16 %v345_v31, %v344_v30 }
  0x34   : > { %812 = vst [vmem:[%s906_s25 + $0x68] sm:$0xff] %v773_v32   ;;  %v347_v36 = vmax.f32 %v315_v33, 0.0 }
  0x35   : > { %813 = vst [vmem:[%s906_s25 + $0x70] sm:$0xff] %v778_v35  }
  0x36   : > { %v783_v37 = vpack.c.bf16 %v347_v36, %v346_v34 }
  0x38   : > { %814 = vst [vmem:[%s906_s25 + $0x78] sm:$0xff] %v783_v37  }
  0x39 PF: > { %s13_s12 = sadd.s32 1, %s829_s12  }
  0x3a   : > { %p10_p4 = scmp.ge.s32.totalorder %s13_s12, 4  }
  0x3c   :  { %12 = sbr.rel (!%p10_p4) target bundleno = 1 (0x1), region = 62 }

// kernel: generator_forward.19
= control target key start
LH: loop header
LB: loop body
LE: loop exit
PB: predicated region body
PF: predicated region fallthrough
CT: control target
= control target key end

     0   :  { %s1670_s15 = smov 0   ;;  %s1672_s16 = smov 0   ;;  %s1914_s0 = inlined_call_operand.vmem [shape: bf16[512,256], index: 0, kind: input, shape index: {}]   ;;  %s1915_s1 = inlined_call_operand.vmem [shape: bf16[256,128], index: 1, kind: input, shape index: {}]   ;;  %s1916_s2 = inlined_call_operand.vmem [shape: bf16[512,128], index: 2, kind: output, shape index: {0}]   ;;  %s1917_s3 = inlined_call_operand.vmem [shape: f32[2,1,128], index: 3, kind: output, shape index: {1}]   ;;  %s1918_s4 = inlined_call_operand.vmem [shape: f32[2,1,128], index: 4, kind: output, shape index: {2}]  }
   0x1   :  { %s1674_s17 = smov 0  }
   0x2 LB: > { %s27_s18 = sadd.s32 1, %s1639_s16  ;;  %p1189_p0 = scmp.ge.s32.totalorder %s1643_s17, 1  ;;  %s1643_s17 = sphi %s1674_s17, %s15_s17   ;;  %s1639_s16 = sphi %s1672_s16, %s1920_s16   ;;  %s1635_s15 = sphi %s1670_s15, %s1919_s15  }
   0x3   : > { %p29_p1 = scmp.ge.s32.totalorder %s27_s18, 2  ;;  %p196_p2 = scmp.lt.s32.totalorder %s1643_s17, 3 }
   0x5   : > { %s1922_s18 = smov (%p29_p1, %s27_s18), 0  ;;  %p197_p3 = pnand %p1189_p0, %p196_p2 }
   0x6   : > { %s1190_s21 = sshll.u32 (!%p197_p3), %s1635_s15, 5  ;;  %p262_p5 = scmp.lt.s32.totalorder (!%p197_p3), %s1635_s15, 1 }
   0x7   : > { %200 = sbr.rel (%p197_p3) target bundleno = 351 (0x15f), region = 28  ;;  %p243_p4 = scmp.lt.s32.totalorder (!%p197_p3), %s1190_s21, 63 }
   0xc   : > { %v1557_v0 = vld [vmem:[%s1915_s1 + $0x78] sm:$0xff]   ;;  %v1559_v2 = vld [vmem:[%s1915_s1 + $0x70] sm:$0xff]   ;;  %v1561_v4 = vld [vmem:[%s1915_s1 + $0x68] sm:$0xff]   ;;  %s1924_s21 = smov (!%p243_p4, %s1190_s21), 63  ;;  %s1926_s15 = smov (!%p262_p5, %s1635_s15), 1 }
   0xd   : > { %v1558_v1 = vld [vmem:[%s1915_s1 + $0x38] sm:$0xff]   ;;  %1405 = vmatprep.subr.bf16.mxu0 %v1557_v0  ;;  %1517 = vmatprep.subr.bf16.mxu1 %v1557_v0  ;;  %v1560_v3 = vld [vmem:[%s1915_s1 + $0x30] sm:$0xff]   ;;  %v1562_v5 = vld [vmem:[%s1915_s1 + $0x28] sm:$0xff]   ;;  %s1277_s10 = sshll.u32 %s1924_s21, 3  ;;  %s1194_s9 = sshll.u32 %s1924_s21, 2 }
   0xe   : > { %1406 = vmatpush3.bf16.msra.mxu0 %v1558_v1  ;;  %1525 = vmatpush3.bf16.msra.mxu1 %v1558_v1  ;;  %v1563_v6 = vld [vmem:[%s1915_s1 + $0x60] sm:$0xff]   ;;  %v1565_v8 = vld [vmem:[%s1915_s1 + $0x58] sm:$0xff]   ;;  %s1724_s19 = scalar_lea.vmem %s1914_s0, %s1277_s10  ;;  %v1567_v10 = vld [vmem:[%s1915_s1 + $0x50] sm:$0xff]   ;;  %s1789_s12 = scalar_lea.vmem %s1916_s2, %s1194_s9 }
   0xf   : > { %1407 = vmatprep.subr.bf16.mxu0 %v1559_v2  ;;  %1518 = vmatprep.subr.bf16.mxu1 %v1559_v2  ;;  %v1564_v7 = vld [vmem:[%s1915_s1 + $0x20] sm:$0xff]   ;;  %v1566_v9 = vld [vmem:[%s1915_s1 + $0x18] sm:$0xff]   ;;  %v1568_v12 = vld [vmem:[%s1915_s1 + $0x10] sm:$0xff]   ;;  %s267_s14 = scalar_lea.vmem %s1917_s3, %s1926_s15  ;;  %s273_s22 = scalar_lea.vmem %s1918_s4, %s1926_s15 }
  0x10   : > { %v1575_v11 = vld [vmem:[%s1724_s19 + $0x4] ss:$8 sps:$4 sm:$0xff]   ;;  %v1573_v18 = vld [vmem:[%s1724_s19] ss:$8 sps:$4 sm:$0xff]   ;;  %v1576_v19 = vld [vmem:[%s1724_s19 + $0x14] ss:$8 sps:$4 sm:$0xff]  }
  0x11   : > { %627 = vmatprep.mubr.bf16.mxu0 %v1575_v11  ;;  %v1569_v13 = vld [vmem:[%s1915_s1 + $0x48] sm:$0xff]   ;;  %v1571_v16 = vld [vmem:[%s1915_s1 + $0x40] sm:$0xff]   ;;  %v1591_v21 = vld [vmem:[%s1724_s19 + $0x94] ss:$8 sps:$4 sm:$0xff]  }
  0x12   : > { %1408 = vmatpush3.bf16.msra.mxu0 %v1560_v3  ;;  %1526 = vmatpush3.bf16.msra.mxu1 %v1560_v3  ;;  %v1587_v14 = vld [vmem:[%s1724_s19 + $0x84] ss:$8 sps:$4 sm:$0xff]   ;;  %v1585_v20 = vld [vmem:[%s1724_s19 + $0x80] ss:$8 sps:$4 sm:$0xff]   ;;  %v1578_v22 = vld [vmem:[%s1724_s19 + $0x10] ss:$8 sps:$4 sm:$0xff]  }
  0x13   : > { %1409 = vmatprep.subr.bf16.mxu0 %v1561_v4  ;;  %1519 = vmatprep.subr.bf16.mxu1 %v1561_v4  ;;  %v1570_v15 = vld [vmem:[%s1915_s1 + $0x8] sm:$0xff]   ;;  %v1572_v17 = vld [vmem:[%s1915_s1] sm:$0xff]   ;;  %v1593_v24 = vld [vmem:[%s1724_s19 + $0x90] ss:$8 sps:$4 sm:$0xff]  }
  0x14   : > { %691 = vmatprep.mubr.bf16.mxu1 %v1587_v14  ;;  %v1579_v23 = vld [vmem:[%s1724_s19 + $0x24] ss:$8 sps:$4 sm:$0xff]   ;;  %v1581_v26 = vld [vmem:[%s1724_s19 + $0x20] ss:$8 sps:$4 sm:$0xff]   ;;  %v1582_v27 = vld [vmem:[%s1724_s19 + $0x34] ss:$8 sps:$4 sm:$0xff]  }
  0x15   : > { %v1597_v25 = vld [vmem:[%s1724_s19 + $0xa4] ss:$8 sps:$4 sm:$0xff]   ;;  %v1599_v28 = vld [vmem:[%s1724_s19 + $0xa0] ss:$8 sps:$4 sm:$0xff]   ;;  %v1603_v29 = vld [vmem:[%s1724_s19 + $0xb4] ss:$8 sps:$4 sm:$0xff]  }
  0x16   : > { %1410 = vmatpush3.bf16.msra.mxu0 %v1562_v5  ;;  %1527 = vmatpush3.bf16.msra.mxu1 %v1562_v5  ;;  %v1584_v30 = vld [vmem:[%s1724_s19 + $0x30] ss:$8 sps:$4 sm:$0xff]   ;;  %v1588_v31 = vld [vmem:[%s1724_s19 + $0x44] ss:$8 sps:$4 sm:$0xff]   ;;  %v1590_v34 = vld [vmem:[%s1724_s19 + $0x40] ss:$8 sps:$4 sm:$0xff]  }
  0x17   : > { %1411 = vmatprep.subr.bf16.mxu0 %v1563_v6  ;;  %1520 = vmatprep.subr.bf16.mxu1 %v1563_v6  ;;  %v1605_v32 = vld [vmem:[%s1724_s19 + $0xb0] ss:$8 sps:$4 sm:$0xff]   ;;  %v1609_v33 = vld [vmem:[%s1724_s19 + $0xc4] ss:$8 sps:$4 sm:$0xff]   ;;  %v1594_v35 = vld [vmem:[%s1724_s19 + $0x54] ss:$8 sps:$4 sm:$0xff]  }
  0x18   : > { %v1611_v36 = vld [vmem:[%s1724_s19 + $0xc0] ss:$8 sps:$4 sm:$0xff]   ;;  %v1612_v37 = vld [vmem:[%s1724_s19 + $0xd4] ss:$8 sps:$4 sm:$0xff]   ;;  %v1596_v38 = vld [vmem:[%s1724_s19 + $0x50] ss:$8 sps:$4 sm:$0xff]  }
  0x19   : > { %v1600_v39 = vld [vmem:[%s1724_s19 + $0x64] ss:$8 sps:$4 sm:$0xff]   ;;  %v1614_v40 = vld [vmem:[%s1724_s19 + $0xd0] ss:$8 sps:$4 sm:$0xff]   ;;  %v1602_v42 = vld [vmem:[%s1724_s19 + $0x60] ss:$8 sps:$4 sm:$0xff]  }
  0x1a   : > { %1412 = vmatpush3.bf16.msra.mxu0 %v1564_v7  ;;  %1528 = vmatpush3.bf16.msra.mxu1 %v1564_v7  ;;  %v1615_v41 = vld [vmem:[%s1724_s19 + $0xe4] ss:$8 sps:$4 sm:$0xff]   ;;  %v1606_v43 = vld [vmem:[%s1724_s19 + $0x74] ss:$8 sps:$4 sm:$0xff]   ;;  %v1617_v44 = vld [vmem:[%s1724_s19 + $0xe0] ss:$8 sps:$4 sm:$0xff]  }
  0x1b   : > { %1413 = vmatprep.subr.bf16.mxu0 %v1565_v8  ;;  %1521 = vmatprep.subr.bf16.mxu1 %v1565_v8  ;;  %v1618_v45 = vld [vmem:[%s1724_s19 + $0xf4] ss:$8 sps:$4 sm:$0xff]   ;;  %v1608_v46 = vld [vmem:[%s1724_s19 + $0x70] ss:$8 sps:$4 sm:$0xff]  }
  0x1c   : > { %v1620_v47 = vld [vmem:[%s1724_s19 + $0xf0] ss:$8 sps:$4 sm:$0xff]  }
  0x1e   : > { %1414 = vmatpush3.bf16.msra.mxu0 %v1566_v9  ;;  %1529 = vmatpush3.bf16.msra.mxu1 %v1566_v9 }
  0x1f   : > { %1415 = vmatprep.subr.bf16.mxu0 %v1567_v10  ;;  %1522 = vmatprep.subr.bf16.mxu1 %v1567_v10 }
  0x22   : > { %1416 = vmatpush3.bf16.msra.mxu0 %v1568_v12  ;;  %1530 = vmatpush3.bf16.msra.mxu1 %v1568_v12 }
  0x23   : > { %1417 = vmatprep.subr.bf16.mxu0 %v1569_v13  ;;  %1523 = vmatprep.subr.bf16.mxu1 %v1569_v13 }
  0x26   : > { %1418 = vmatpush3.bf16.msra.mxu0 %v1570_v15  ;;  %1531 = vmatpush3.bf16.msra.mxu1 %v1570_v15 }
  0x27   : > { %1419 = vmatprep.subr.bf16.mxu0 %v1571_v16  ;;  %1524 = vmatprep.subr.bf16.mxu1 %v1571_v16 }
  0x2a   : > { %1420 = vmatpush3.bf16.msra.mxu0 %v1572_v17  ;;  %1532 = vmatpush3.bf16.msra.mxu1 %v1572_v17 }
  0x2d   : > { %628 = vmatmul.mubr.bf16.vlgmr.msra.gmra.mxu0 %v1573_v18  ;;  %692 = vmatmul.mubr.bf16.vlgmr.msra.gmra.mxu1 %v1585_v20 }
  0x2e   : > { %635 = vmatprep.mubr.bf16.mxu0 %v1576_v19  ;;  %699 = vmatprep.mubr.bf16.mxu1 %v1591_v21 }
  0x35   : > { %636 = vmatmul.mubr.bf16.gmra.mxu0 %v1578_v22  ;;  %700 = vmatmul.mubr.bf16.gmra.mxu1 %v1593_v24 }
  0x36   : > { %643 = vmatprep.mubr.bf16.mxu0 %v1579_v23  ;;  %707 = vmatprep.mubr.bf16.mxu1 %v1597_v25 }
  0x3d   : > { %644 = vmatmul.mubr.bf16.gmra.mxu0 %v1581_v26  ;;  %708 = vmatmul.mubr.bf16.gmra.mxu1 %v1599_v28 }
  0x3e   : > { %651 = vmatprep.mubr.bf16.mxu0 %v1582_v27  ;;  %715 = vmatprep.mubr.bf16.mxu1 %v1603_v29 }
  0x45   : > { %652 = vmatmul.mubr.bf16.gmra.mxu0 %v1584_v30  ;;  %716 = vmatmul.mubr.bf16.gmra.mxu1 %v1605_v32 }
  0x46   : > { %659 = vmatprep.mubr.bf16.mxu0 %v1588_v31  ;;  %723 = vmatprep.mubr.bf16.mxu1 %v1609_v33 }
  0x4d   : > { %660 = vmatmul.mubr.bf16.gmra.mxu0 %v1590_v34  ;;  %724 = vmatmul.mubr.bf16.gmra.mxu1 %v1611_v36 }
  0x4e   : > { %667 = vmatprep.mubr.bf16.mxu0 %v1594_v35  ;;  %731 = vmatprep.mubr.bf16.mxu1 %v1612_v37 }
  0x55   : > { %668 = vmatmul.mubr.bf16.gmra.mxu0 %v1596_v38  ;;  %732 = vmatmul.mubr.bf16.gmra.mxu1 %v1614_v40 }
  0x56   : > { %675 = vmatprep.mubr.bf16.mxu0 %v1600_v39  ;;  %739 = vmatprep.mubr.bf16.mxu1 %v1615_v41 }
  0x5d   : > { %676 = vmatmul.mubr.bf16.gmra.mxu0 %v1602_v42  ;;  %740 = vmatmul.mubr.bf16.gmra.mxu1 %v1617_v44 }
  0x5e   : > { %683 = vmatprep.mubr.bf16.mxu0 %v1606_v43  ;;  %747 = vmatprep.mubr.bf16.mxu1 %v1618_v45 }
  0x65   : > { %684 = vmatmul.mubr.bf16.gmra.mxu0 %v1608_v46  ;;  %748 = vmatmul.mubr.bf16.gmra.mxu1 %v1620_v47 }
  0xed   : > { %v1421_v48 = vpop.f32.mrf.mxu0  ;;  %v1469_v49 = vpop.f32.mrf.mxu1 }
  0xef   : > { %v1422_v50 = vpop.f32.mrf.mxu0  ;;  %v1470_v51 = vpop.f32.mrf.mxu1 }
  0xf0   : > { %v1780_v55 = vadd.f32 %v1470_v51, %v1469_v49  ;;  %v1782_v56 = vadd.f32 %v1422_v50, %v1421_v48 }
  0xf1   : > { %v1424_v52 = vpop.f32.mrf.mxu0  ;;  %v1472_v53 = vpop.f32.mrf.mxu1 }
  0xf2   : > { %v954_v45 = vmul.f32 %v1782_v56, %v1782_v56 }
  0xf3   : > { %v1425_v54 = vpop.f32.mrf.mxu0  ;;  %v1473_v58 = vpop.f32.mrf.mxu1 }
  0xf4   : > { %v1784_v57 = vadd.f32 %v1425_v54, %v1424_v52  ;;  %v1791_v60 = vadd.f32 %v1473_v58, %v1472_v53 }
  0xf5   : > { %v1427_v59 = vpop.f32.mrf.mxu0  ;;  %v1475_v62 = vpop.f32.mrf.mxu1 }
  0xf6   : > { %v1313_v61 = vpack.c.bf16 %v1784_v57, %v1782_v56  ;;  %v1353_v0 = vpack.c.bf16 %v1791_v60, %v1780_v55  ;;  %v955_v41 = vmul.f32 %v1784_v57, %v1784_v57  ;;  %v916_v48 = vadd.f32 %v1784_v57, %v1782_v56 }
  0xf7   : > { %v1428_v63 = vpop.f32.mrf.mxu0  ;;  %v1476_v1 = vpop.f32.mrf.mxu1 }
  0xf8   : > { %1314 = vst [vmem:[%s1789_s12] sm:$0xff] %v1313_v61   ;;  %1397 = vst [vmem:[%s1789_s12 + $0x40] sm:$0xff] %v1353_v0   ;;  %v1799_v5 = vadd.f32 %v1476_v1, %v1475_v62  ;;  %v1429_v6 = vadd.f32 %v1428_v63, %v1427_v59  ;;  %v986_v50 = vadd.f32 %v955_v41, %v954_v45 }
  0xf9   : > { %v1430_v2 = vpop.f32.mrf.mxu0  ;;  %v1478_v3 = vpop.f32.mrf.mxu1 }
  0xfa   : > { %v956_v46 = vmul.f32 %v1429_v6, %v1429_v6  ;;  %v917_v54 = vadd.f32 %v1429_v6, %v916_v48 }
  0xfb   : > { %v1431_v4 = vpop.f32.mrf.mxu0  ;;  %v1479_v8 = vpop.f32.mrf.mxu1 }
  0xfc   : > { %v1432_v7 = vadd.f32 %v1431_v4, %v1430_v2  ;;  %v1801_v10 = vadd.f32 %v1479_v8, %v1478_v3  ;;  %v987_v62 = vadd.f32 %v986_v50, %v956_v46 }
  0xfd   : > { %v1433_v9 = vpop.f32.mrf.mxu0  ;;  %v1481_v12 = vpop.f32.mrf.mxu1 }
  0xfe   : > { %v1318_v11 = vpack.c.bf16 %v1432_v7, %v1429_v6  ;;  %v1358_v14 = vpack.c.bf16 %v1801_v10, %v1799_v5  ;;  %v957_v51 = vmul.f32 %v1432_v7, %v1432_v7  ;;  %v918_v2 = vadd.f32 %v1432_v7, %v917_v54 }
  0xff   : > { %v1434_v13 = vpop.f32.mrf.mxu0  ;;  %v1482_v15 = vpop.f32.mrf.mxu1 }
 0x100   : > { %1390 = vst [vmem:[%s1789_s12 + $0x8] sm:$0xff] %v1318_v11   ;;  %1398 = vst [vmem:[%s1789_s12 + $0x48] sm:$0xff] %v1358_v14   ;;  %v1807_v19 = vadd.f32 %v1482_v15, %v1481_v12  ;;  %v1435_v20 = vadd.f32 %v1434_v13, %v1433_v9  ;;  %v988_v57 = vadd.f32 %v987_v62, %v957_v51 }
 0x101   : > { %v1436_v16 = vpop.f32.mrf.mxu0  ;;  %v1484_v17 = vpop.f32.mrf.mxu1 }
 0x102   : > { %v958_v63 = vmul.f32 %v1435_v20, %v1435_v20  ;;  %v919_v6 = vadd.f32 %v1435_v20, %v918_v2 }
 0x103   : > { %v1437_v18 = vpop.f32.mrf.mxu0  ;;  %v1485_v22 = vpop.f32.mrf.mxu1 }
 0x104   : > { %v1438_v21 = vadd.f32 %v1437_v18, %v1436_v16  ;;  %v1809_v24 = vadd.f32 %v1485_v22, %v1484_v17  ;;  %v989_v12 = vadd.f32 %v988_v57, %v958_v63 }
 0x105   : > { %v1439_v23 = vpop.f32.mrf.mxu0  ;;  %v1487_v26 = vpop.f32.mrf.mxu1 }
 0x106   : > { %v1323_v25 = vpack.c.bf16 %v1438_v21, %v1435_v20  ;;  %v1363_v28 = vpack.c.bf16 %v1809_v24, %v1807_v19  ;;  %v959_v4 = vmul.f32 %v1438_v21, %v1438_v21  ;;  %v920_v14 = vadd.f32 %v1438_v21, %v919_v6 }
 0x107   : > { %v1440_v27 = vpop.f32.mrf.mxu0  ;;  %v1488_v29 = vpop.f32.mrf.mxu1 }
 0x108   : > { %1391 = vst [vmem:[%s1789_s12 + $0x10] sm:$0xff] %v1323_v25   ;;  %1399 = vst [vmem:[%s1789_s12 + $0x50] sm:$0xff] %v1363_v28   ;;  %v1815_v33 = vadd.f32 %v1488_v29, %v1487_v26  ;;  %v1441_v34 = vadd.f32 %v1440_v27, %v1439_v23  ;;  %v990_v17 = vadd.f32 %v989_v12, %v959_v4 }
 0x109   : > { %v1442_v30 = vpop.f32.mrf.mxu0  ;;  %v1490_v31 = vpop.f32.mrf.mxu1 }
 0x10a   : > { %v960_v15 = vmul.f32 %v1441_v34, %v1441_v34  ;;  %v921_v22 = vadd.f32 %v1441_v34, %v920_v14 }
 0x10b   : > { %v1443_v32 = vpop.f32.mrf.mxu0  ;;  %v1491_v36 = vpop.f32.mrf.mxu1 }
 0x10c   : > { %v1444_v35 = vadd.f32 %v1443_v32, %v1442_v30  ;;  %v1817_v38 = vadd.f32 %v1491_v36, %v1490_v31  ;;  %v991_v29 = vadd.f32 %v990_v17, %v960_v15 }
 0x10d   : > { %v1445_v37 = vpop.f32.mrf.mxu0  ;;  %v1493_v40 = vpop.f32.mrf.mxu1 }
 0x10e   : > { %v1328_v39 = vpack.c.bf16 %v1444_v35, %v1441_v34  ;;  %v1368_v43 = vpack.c.bf16 %v1817_v38, %v1815_v33  ;;  %v961_v23 = vmul.f32 %v1444_v35, %v1444_v35  ;;  %v922_v30 = vadd.f32 %v1444_v35, %v921_v22 }
 0x10f   : > { %v1446_v42 = vpop.f32.mrf.mxu0  ;;  %v1494_v44 = vpop.f32.mrf.mxu1 }
 0x110   : > { %1392 = vst [vmem:[%s1789_s12 + $0x18] sm:$0xff] %v1328_v39   ;;  %1400 = vst [vmem:[%s1789_s12 + $0x58] sm:$0xff] %v1368_v43   ;;  %v1829_v53 = vadd.f32 %v1494_v44, %v1493_v40  ;;  %v1447_v58 = vadd.f32 %v1446_v42, %v1445_v37  ;;  %v992_v39 = vadd.f32 %v991_v29, %v961_v23 }
 0x111   : > { %v1448_v47 = vpop.f32.mrf.mxu0  ;;  %v1496_v49 = vpop.f32.mrf.mxu1 }
 0x112   : > { %v962_v31 = vmul.f32 %v1447_v58, %v1447_v58  ;;  %v923_v34 = vadd.f32 %v1447_v58, %v922_v30 }
 0x113   : > { %v1449_v52 = vpop.f32.mrf.mxu0  ;;  %v1497_v61 = vpop.f32.mrf.mxu1 }
 0x114   : > { %v1450_v59 = vadd.f32 %v1449_v52, %v1448_v47  ;;  %v1831_v1 = vadd.f32 %v1497_v61, %v1496_v49  ;;  %v993_v43 = vadd.f32 %v992_v39, %v962_v31 }
 0x115   : > { %v1451_v0 = vpop.f32.mrf.mxu0  ;;  %v1499_v56 = vpop.f32.mrf.mxu1 }
 0x116   : > { %v1333_v3 = vpack.c.bf16 %v1450_v59, %v1447_v58  ;;  %v1373_v9 = vpack.c.bf16 %v1831_v1, %v1829_v53  ;;  %v963_v40 = vmul.f32 %v1450_v59, %v1450_v59  ;;  %v924_v44 = vadd.f32 %v1450_v59, %v923_v34 }
 0x117   : > { %v1452_v8 = vpop.f32.mrf.mxu0  ;;  %v1500_v11 = vpop.f32.mrf.mxu1 }
 0x118   : > { %1393 = vst [vmem:[%s1789_s12 + $0x20] sm:$0xff] %v1333_v3   ;;  %1401 = vst [vmem:[%s1789_s12 + $0x60] sm:$0xff] %v1373_v9   ;;  %v1837_v7 = vadd.f32 %v1500_v11, %v1499_v56  ;;  %v1453_v25 = vadd.f32 %v1452_v8, %v1451_v0  ;;  %v994_v49 = vadd.f32 %v993_v43, %v963_v40 }
 0x119   : > { %v1454_v13 = vpop.f32.mrf.mxu0  ;;  %v1502_v16 = vpop.f32.mrf.mxu1  ;;  %v972_v40 = vmul.f32 %v1799_v5, %v1799_v5  ;;  %v973_v43 = vmul.f32 %v1801_v10, %v1801_v10 }
 0x11a   : > { %v964_v45 = vmul.f32 %v1453_v25, %v1453_v25  ;;  %v925_v50 = vadd.f32 %v1453_v25, %v924_v44 }
 0x11b   : > { %v1455_v18 = vpop.f32.mrf.mxu0  ;;  %v1503_v27 = vpop.f32.mrf.mxu1 }
 0x11c   : > { %v1456_v26 = vadd.f32 %v1455_v18, %v1454_v13  ;;  %v1839_v28 = vadd.f32 %v1503_v27, %v1502_v16  ;;  %v995_v62 = vadd.f32 %v994_v49, %v964_v45  ;;  %v974_v45 = vmul.f32 %v1807_v19, %v1807_v19 }
 0x11d   : > { %v1457_v20 = vpop.f32.mrf.mxu0  ;;  %v1505_v32 = vpop.f32.mrf.mxu1 }
 0x11e   : > { %v1338_v21 = vpack.c.bf16 %v1456_v26, %v1453_v25  ;;  %v1378_v37 = vpack.c.bf16 %v1839_v28, %v1837_v7  ;;  %v965_v51 = vmul.f32 %v1456_v26, %v1456_v26  ;;  %v926_v63 = vadd.f32 %v1456_v26, %v925_v50 }
 0x11f   : > { %v1458_v36 = vpop.f32.mrf.mxu0  ;;  %v1506_v41 = vpop.f32.mrf.mxu1 }
 0x120   : > { %1394 = vst [vmem:[%s1789_s12 + $0x28] sm:$0xff] %v1338_v21   ;;  %1402 = vst [vmem:[%s1789_s12 + $0x68] sm:$0xff] %v1378_v37   ;;  %v1459_v46 = vadd.f32 %v1458_v36, %v1457_v20  ;;  %v1845_v48 = vadd.f32 %v1506_v41, %v1505_v32  ;;  %v996_v57 = vadd.f32 %v995_v62, %v965_v51 }
 0x121   : > { %v1460_v42 = vpop.f32.mrf.mxu0  ;;  %v1508_v47 = vpop.f32.mrf.mxu1  ;;  %v970_v21 = vmul.f32 %v1780_v55, %v1780_v55  ;;  %v971_v37 = vmul.f32 %v1791_v60, %v1791_v60 }
 0x122   : > { %v966_v0 = vmul.f32 %v1459_v46, %v1459_v46  ;;  %v927_v4 = vadd.f32 %v1459_v46, %v926_v63  ;;  %v979_v63 = vmul.f32 %v1831_v1, %v1831_v1 }
 0x123   : > { %v1461_v35 = vpop.f32.mrf.mxu0  ;;  %v1509_v54 = vpop.f32.mrf.mxu1 }
 0x124   : > { %v1462_v52 = vadd.f32 %v1461_v35, %v1460_v42  ;;  %v1847_v61 = vadd.f32 %v1509_v54, %v1508_v47  ;;  %v997_v12 = vadd.f32 %v996_v57, %v966_v0 }
 0x125   : > { %v1463_v58 = vpop.f32.mrf.mxu0  ;;  %v1511_v2 = vpop.f32.mrf.mxu1 }
 0x126   : > { %v1343_v59 = vpack.c.bf16 %v1462_v52, %v1459_v46  ;;  %v1383_v56 = vpack.c.bf16 %v1847_v61, %v1845_v48  ;;  %v967_v8 = vmul.f32 %v1462_v52, %v1462_v52  ;;  %v928_v13 = vadd.f32 %v1462_v52, %v927_v4 }
 0x127   : > { %v1464_v3 = vpop.f32.mrf.mxu0  ;;  %v1512_v6 = vpop.f32.mrf.mxu1 }
 0x128   : > { %1395 = vst [vmem:[%s1789_s12 + $0x30] sm:$0xff] %v1343_v59   ;;  %v1465_v9 = vadd.f32 %v1464_v3, %v1463_v58  ;;  %1403 = vst [vmem:[%s1789_s12 + $0x70] sm:$0xff] %v1383_v56   ;;  %v1513_v17 = vadd.f32 %v1512_v6, %v1511_v2  ;;  %v998_v18 = vadd.f32 %v997_v12, %v967_v8 }
 0x129   : > { %v1466_v11 = vpop.f32.mrf.mxu0  ;;  %v1514_v15 = vpop.f32.mrf.mxu1  ;;  %v980_v2 = vmul.f32 %v1837_v7, %v1837_v7 }
 0x12a   : > { %v968_v14 = vmul.f32 %v1465_v9, %v1465_v9  ;;  %v929_v22 = vadd.f32 %v1465_v9, %v928_v13 }
 0x12b   : > { %v1467_v16 = vpop.f32.mrf.mxu0  ;;  %v1515_v25 = vpop.f32.mrf.mxu1 }
 0x12c   : > { %v1468_v23 = vadd.f32 %v1467_v16, %v1466_v11  ;;  %v1516_v26 = vadd.f32 %v1515_v25, %v1514_v15  ;;  %v999_v27 = vadd.f32 %v998_v18, %v968_v14  ;;  %v984_v11 = vmul.f32 %v1513_v17, %v1513_v17 }
 0x12e   : > { %v1348_v20 = vpack.c.bf16 %v1468_v23, %v1465_v9  ;;  %v930_v29 = vadd.f32 %v1468_v23, %v929_v22  ;;  %v969_v30 = vmul.f32 %v1468_v23, %v1468_v23  ;;  %v1388_v31 = vpack.c.bf16 %v1516_v26, %v1513_v17 }
 0x12f   : > { %v985_v14 = vmul.f32 %v1516_v26, %v1516_v26 }
 0x130   : > { %1396 = vst [vmem:[%s1789_s12 + $0x38] sm:$0xff] %v1348_v20   ;;  %v931_v32 = vadd.f32 %v1780_v55, %v930_v29  ;;  %v1000_v36 = vadd.f32 %v999_v27, %v969_v30  ;;  %1404 = vst [vmem:[%s1789_s12 + $0x78] sm:$0xff] %v1388_v31  }
 0x132   : > { %v932_v39 = vadd.f32 %v1791_v60, %v931_v32  ;;  %v1001_v34 = vadd.f32 %v1000_v36, %v970_v21  ;;  %v975_v60 = vmul.f32 %v1809_v24, %v1809_v24 }
 0x134   : > { %v933_v41 = vadd.f32 %v1799_v5, %v932_v39  ;;  %v1002_v42 = vadd.f32 %v1001_v34, %v971_v37  ;;  %v976_v5 = vmul.f32 %v1815_v33, %v1815_v33 }
 0x136   : > { %v934_v44 = vadd.f32 %v1801_v10, %v933_v41  ;;  %v1003_v55 = vadd.f32 %v1002_v42, %v972_v40  ;;  %v977_v10 = vmul.f32 %v1817_v38, %v1817_v38 }
 0x138   : > { %v1004_v46 = vadd.f32 %v1003_v55, %v973_v43  ;;  %v935_v47 = vadd.f32 %v1807_v19, %v934_v44  ;;  %v978_v19 = vmul.f32 %v1829_v53, %v1829_v53 }
 0x13a   : > { %v936_v35 = vadd.f32 %v1809_v24, %v935_v47  ;;  %v1005_v49 = vadd.f32 %v1004_v46, %v974_v45 }
 0x13c   : > { %v937_v50 = vadd.f32 %v1815_v33, %v936_v35  ;;  %v1006_v51 = vadd.f32 %v1005_v49, %v975_v60 }
 0x13e   : > { %v938_v52 = vadd.f32 %v1817_v38, %v937_v50  ;;  %v1007_v54 = vadd.f32 %v1006_v51, %v976_v5 }
 0x140   : > { %v939_v58 = vadd.f32 %v1829_v53, %v938_v52  ;;  %v1008_v62 = vadd.f32 %v1007_v54, %v977_v10  ;;  %v981_v53 = vmul.f32 %v1839_v28, %v1839_v28 }
 0x142   : > { %v940_v24 = vadd.f32 %v1831_v1, %v939_v58  ;;  %v1009_v0 = vadd.f32 %v1008_v62, %v978_v19  ;;  %v982_v1 = vmul.f32 %v1845_v48, %v1845_v48 }
 0x144   : > { %v1010_v33 = vadd.f32 %v1009_v0, %v979_v63  ;;  %v941_v59 = vadd.f32 %v1837_v7, %v940_v24  ;;  %v983_v7 = vmul.f32 %v1847_v61, %v1847_v61 }
 0x146   : > { %v1011_v38 = vadd.f32 %v1010_v33, %v980_v2  ;;  %v942_v3 = vadd.f32 %v1839_v28, %v941_v59 }
 0x148   : > { %v1012_v56 = vadd.f32 %v1011_v38, %v981_v53  ;;  %v943_v57 = vadd.f32 %v1845_v48, %v942_v3 }
 0x14a   : > { %v1013_v4 = vadd.f32 %v1012_v56, %v982_v1  ;;  %v944_v8 = vadd.f32 %v1847_v61, %v943_v57 }
 0x14c   : > { %v1014_v9 = vadd.f32 %v1013_v4, %v983_v7  ;;  %v945_v6 = vadd.f32 %v1513_v17, %v944_v8 }
 0x14e   : > { %v1015_v12 = vadd.f32 %v1014_v9, %v984_v11  ;;  %v946_v13 = vadd.f32 %v1516_v26, %v945_v6 }
 0x150   : > { %v947_v28 = vrot.slane %v946_v13, 4  ;;  %v1016_v15 = vadd.f32 %v1015_v12, %v985_v14 }
 0x152   : > { %v948_v16 = vadd.f32 %v947_v28, %v946_v13  ;;  %v1017_v18 = vrot.slane %v1016_v15, 4 }
 0x154   : > { %v949_v22 = vrot.slane %v948_v16, 2  ;;  %v1018_v48 = vadd.f32 %v1017_v18, %v1016_v15 }
 0x156   : > { %v950_v23 = vadd.f32 %v949_v22, %v948_v16  ;;  %v1019_v25 = vrot.slane %v1018_v48, 2 }
 0x158   : > { %v951_v27 = vrot.slane %v950_v23, 1  ;;  %v1020_v20 = vadd.f32 %v1019_v25, %v1018_v48 }
 0x15a   : > { %v952_v61 = vadd.f32 %v951_v27, %v950_v23  ;;  %v1021_v17 = vrot.slane %v1020_v20, 1 }
 0x15c   : > { %953 = vst [vmem:[%s267_s14] sm:$0x1] %v952_v61  ;;  %v1022_v26 = vadd.f32 %v1021_v17, %v1020_v20 }
 0x15e   : > { %1023 = vst [vmem:[%s273_s22] sm:$0x1] %v1022_v26 }
 0x15f PF: > { %s15_s17 = sadd.s32 1, %s1643_s17   ;;  %s1919_s15 = smov %s1639_s16 }
 0x160   : > { %p12_p6 = scmp.ge.s32.totalorder %s15_s17, 4   ;;  %s1920_s16 = smov %s1922_s18 }
 0x162   :  { %14 = sbr.rel (!%p12_p6) target bundleno = 2 (0x2), region = 85 }

// kernel: generator_forward.22
= control target key start
LH: loop header
LB: loop body
LE: loop exit
PB: predicated region body
PF: predicated region fallthrough
CT: control target
= control target key end

     0   :  { %s431_s12 = smov 0   ;;  %s461_s0 = inlined_call_operand.vmem [shape: bf16[128,128], index: 0, kind: input, shape index: {}]   ;;  %s462_s1 = inlined_call_operand.vmem [shape: f32[1,128], index: 1, kind: input, shape index: {}]   ;;  %s463_s2 = inlined_call_operand.vmem [shape: f32[1,128], index: 2, kind: input, shape index: {}]   ;;  %s464_s3 = inlined_call_operand.vmem [shape: bf16[128,128], index: 3, kind: output, shape index: {}]  }
   0x1 LB: > { %s324_s13 = sadd.s32 4294967295, %s409_s12   ;;  %p328_p0 = scmp.ge.s32.totalorder %s409_s12, 1  ;;  %s409_s12 = sphi %s431_s12, %s13_s12  }
   0x2   : > { %p138_p1 = scmp.lt.s32.totalorder %s409_s12, 3 }
   0x4   : > { %p139_p2 = pnand %p328_p0, %p138_p1 }
   0x5   : > { %s329_s14 = sshll.u32 (!%p139_p2), %s324_s13, 3 }
   0x6   : > { %142 = sbr.rel (%p139_p2) target bundleno = 27 (0x1b), region = 32  ;;  %p163_p3 = scmp.lt.s32.totalorder (!%p139_p2), %s329_s14, 15 }
   0xb   : > { %s466_s14 = smov (!%p163_p3, %s329_s14), 15  ;;  %v333_v0 = vld [vmem:[%s462_s1] ss:$0 sm:$0xff] }
   0xc   : > { %s330_s15 = sshll.u32 %s466_s14, 2  ;;  %v334_v9 = vld [vmem:[%s463_s2] ss:$0 sm:$0xff] }
   0xd   : > { %s166_s18 = scalar_lea.vmem %s461_s0, %s330_s15  ;;  %s172_s25 = scalar_lea.vmem %s464_s3, %s330_s15 }
   0xe   : > { %v354_v1 = vld [vmem:[%s166_s18] sm:$0xff]   ;;  %v389_v2 = vld [vmem:[%s166_s18 + $0x8] sm:$0xff]   ;;  %v390_v3 = vld [vmem:[%s166_s18 + $0x10] sm:$0xff]  }
   0xf   : > { %v355_v4 = vunpack.c.l.bf16 %v354_v1  ;;  %v356_v5 = vunpack.c.h.bf16 %v354_v1  ;;  %v359_v6 = vunpack.c.l.bf16 %v389_v2  ;;  %v360_v7 = vunpack.c.h.bf16 %v389_v2  ;;  %v391_v8 = vld [vmem:[%s166_s18 + $0x18] sm:$0xff]  }
  0x10   : > { %v363_v10 = vunpack.c.l.bf16 %v390_v3  ;;  %v364_v11 = vunpack.c.h.bf16 %v390_v3  ;;  %v367_v12 = vunpack.c.l.bf16 %v391_v8  ;;  %v368_v13 = vunpack.c.h.bf16 %v391_v8 }
  0x11   : > { %v197_v14 = vmul.f32 %v355_v4, %v333_v0  ;;  %v198_v15 = vmul.f32 %v356_v5, %v333_v0  ;;  %v199_v16 = vmul.f32 %v359_v6, %v333_v0  ;;  %v200_v17 = vmul.f32 %v360_v7, %v333_v0 }
  0x12   : > { %v201_v18 = vmul.f32 %v363_v10, %v333_v0  ;;  %v202_v19 = vmul.f32 %v364_v11, %v333_v0  ;;  %v203_v20 = vmul.f32 %v367_v12, %v333_v0  ;;  %v204_v21 = vmul.f32 %v368_v13, %v333_v0 }
  0x13   : > { %v212_v22 = vadd.f32 %v334_v9, %v197_v14  ;;  %v213_v23 = vadd.f32 %v334_v9, %v198_v15  ;;  %v214_v24 = vadd.f32 %v334_v9, %v199_v16  ;;  %v215_v25 = vadd.f32 %v334_v9, %v200_v17 }
  0x14   : > { %v216_v26 = vadd.f32 %v334_v9, %v201_v18  ;;  %v217_v27 = vadd.f32 %v334_v9, %v202_v19  ;;  %v218_v28 = vadd.f32 %v334_v9, %v203_v20  ;;  %v219_v29 = vadd.f32 %v334_v9, %v204_v21 }
  0x15   : > { %v220_v30 = vmax.f32 %v212_v22, 0.0  ;;  %v221_v31 = vmax.f32 %v213_v23, 0.0  ;;  %v222_v32 = vmax.f32 %v214_v24, 0.0  ;;  %v223_v33 = vmax.f32 %v215_v25, 0.0 }
  0x16   : > { %v224_v34 = vmax.f32 %v216_v26, 0.0  ;;  %v225_v35 = vmax.f32 %v217_v27, 0.0  ;;  %v226_v36 = vmax.f32 %v218_v28, 0.0  ;;  %v227_v37 = vmax.f32 %v219_v29, 0.0 }
  0x17   : > { %v372_v38 = vpack.c.bf16 %v221_v31, %v220_v30  ;;  %v377_v39 = vpack.c.bf16 %v223_v33, %v222_v32 }
  0x18   : > { %v382_v40 = vpack.c.bf16 %v225_v35, %v224_v34  ;;  %v387_v41 = vpack.c.bf16 %v227_v37, %v226_v36 }
  0x19   : > { %373 = vst [vmem:[%s172_s25] sm:$0xff] %v372_v38   ;;  %392 = vst [vmem:[%s172_s25 + $0x8] sm:$0xff] %v377_v39  }
  0x1a   : > { %393 = vst [vmem:[%s172_s25 + $0x10] sm:$0xff] %v382_v40   ;;  %394 = vst [vmem:[%s172_s25 + $0x18] sm:$0xff] %v387_v41  }
  0x1b PF: > { %s13_s12 = sadd.s32 1, %s409_s12  }
  0x1c   : > { %p10_p4 = scmp.ge.s32.totalorder %s13_s12, 4  }
  0x1e   :  { %12 = sbr.rel (!%p10_p4) target bundleno = 1 (0x1), region = 62 }

// kernel: generator_forward.21
= control target key start
LH: loop header
LB: loop body
LE: loop exit
PB: predicated region body
PF: predicated region fallthrough
CT: control target
= control target key end

     0   :  { %s1190_s15 = smov 0   ;;  %s1192_s16 = smov 0   ;;  %s1330_s0 = inlined_call_operand.vmem [shape: bf16[128,384], index: 0, kind: input, shape index: {}]   ;;  %s1331_s1 = inlined_call_operand.vmem [shape: bf16[384,128], index: 1, kind: input, shape index: {}]   ;;  %s1332_s2 = inlined_call_operand.vmem [shape: bf16[128,128], index: 2, kind: output, shape index: {0}]   ;;  %s1333_s3 = inlined_call_operand.vmem [shape: f32[2,1,128], index: 3, kind: output, shape index: {1}]   ;;  %s1334_s4 = inlined_call_operand.vmem [shape: f32[2,1,128], index: 4, kind: output, shape index: {2}]  }
   0x1   :  { %s1194_s17 = smov 0  }
   0x2 LB: > { %s27_s18 = sadd.s32 1, %s1159_s16  ;;  %p918_p0 = scmp.ge.s32.totalorder %s1163_s17, 1  ;;  %s1163_s17 = sphi %s1194_s17, %s15_s17   ;;  %s1159_s16 = sphi %s1192_s16, %s1336_s16   ;;  %s1155_s15 = sphi %s1190_s15, %s1335_s15  }
   0x3   : > { %p29_p1 = scmp.ge.s32.totalorder %s27_s18, 2  ;;  %p196_p2 = scmp.lt.s32.totalorder %s1163_s17, 3 }
   0x5   : > { %s1338_s18 = smov (%p29_p1, %s27_s18), 0  ;;  %p197_p3 = pnand %p918_p0, %p196_p2 }
   0x6   : > { %s919_s9 = sshll.u32 (!%p197_p3), %s1155_s15, 3  ;;  %p262_p5 = scmp.lt.s32.totalorder (!%p197_p3), %s1155_s15, 1 }
   0x7   : > { %200 = sbr.rel (%p197_p3) target bundleno = 289 (0x121), region = 28  ;;  %p243_p4 = scmp.lt.s32.totalorder (!%p197_p3), %s919_s9, 15 }
   0xc   : > { %v1101_v0 = vld [vmem:[%s1331_s1 + $0x78] sm:$0xff]   ;;  %v1104_v3 = vld [vmem:[%s1331_s1 + $0x70] sm:$0xff]   ;;  %v1107_v6 = vld [vmem:[%s1331_s1 + $0x68] sm:$0xff]   ;;  %s1340_s9 = smov (!%p243_p4, %s919_s9), 15  ;;  %s1342_s15 = smov (!%p262_p5, %s1155_s15), 1 }
   0xd   : > { %v1102_v1 = vld [vmem:[%s1331_s1 + $0x38] sm:$0xff]   ;;  %1000 = vmatprep.subr.bf16.mxu0 %v1101_v0  ;;  %v1105_v4 = vld [vmem:[%s1331_s1 + $0x30] sm:$0xff]   ;;  %v1108_v7 = vld [vmem:[%s1331_s1 + $0x28] sm:$0xff]   ;;  %s1076_s6 = smul.u32 12, %s1340_s9  ;;  %s922_s29 = sshll.u32 %s1340_s9, 2 }
   0xe   : > { %v1103_v2 = vld [vmem:[%s1331_s1 + $0xb8] sm:$0xff]   ;;  %1001 = vmatpush3.bf16.msra.mxu0 %v1102_v1  ;;  %v1106_v5 = vld [vmem:[%s1331_s1 + $0xb0] sm:$0xff]   ;;  %v1109_v8 = vld [vmem:[%s1331_s1 + $0xa8] sm:$0xff]   ;;  %s267_s8 = scalar_lea.vmem %s1333_s3, %s1342_s15  ;;  %s273_s12 = scalar_lea.vmem %s1334_s4, %s1342_s15 }
   0xf   : > { %1052 = vmatprep.subr.bf16.mxu1 %v1103_v2  ;;  %1002 = vmatprep.subr.bf16.mxu0 %v1104_v3  ;;  %v1110_v9 = vld [vmem:[%s1331_s1 + $0x60] sm:$0xff]   ;;  %v1113_v12 = vld [vmem:[%s1331_s1 + $0x58] sm:$0xff]   ;;  %v1116_v15 = vld [vmem:[%s1331_s1 + $0x50] sm:$0xff]   ;;  %s1280_s22 = scalar_lea.vmem %s1330_s0, %s1076_s6  ;;  %s1307_s6 = scalar_lea.vmem %s1332_s2, %s922_s29 }
  0x10   : > { %1053 = vmatpush3.bf16.msra.mxu1 %v1103_v2  ;;  %v1111_v10 = vld [vmem:[%s1331_s1 + $0x20] sm:$0xff]   ;;  %v1115_v13 = vld [vmem:[%s1331_s1 + $0x98] sm:$0xff]   ;;  %v1118_v16 = vld [vmem:[%s1331_s1 + $0x90] sm:$0xff]  }
  0x11   : > { %1054 = vmatprep.subr.bf16.mxu1 %v1106_v5  ;;  %v1112_v11 = vld [vmem:[%s1331_s1 + $0xa0] sm:$0xff]   ;;  %v1114_v14 = vld [vmem:[%s1331_s1 + $0x18] sm:$0xff]   ;;  %v1117_v17 = vld [vmem:[%s1331_s1 + $0x10] sm:$0xff]  }
  0x12   : > { %1003 = vmatpush3.bf16.msra.mxu0 %v1105_v4  ;;  %v1119_v18 = vld [vmem:[%s1331_s1 + $0x48] sm:$0xff]   ;;  %v1122_v21 = vld [vmem:[%s1331_s1 + $0x40] sm:$0xff]   ;;  %v1137_v32 = vld [vmem:[%s1280_s22 + $0x50] ss:$12 sps:$4 sm:$0xff]  }
  0x13   : > { %1004 = vmatprep.subr.bf16.mxu0 %v1107_v6  ;;  %v1120_v19 = vld [vmem:[%s1331_s1 + $0x8] sm:$0xff]   ;;  %v1124_v22 = vld [vmem:[%s1331_s1 + $0x80] sm:$0xff]   ;;  %v1136_v33 = vld [vmem:[%s1280_s22 + $0x30] ss:$12 sps:$4 sm:$0xff]  }
  0x14   : > { %1055 = vmatpush3.bf16.msra.mxu1 %v1106_v5  ;;  %v1121_v20 = vld [vmem:[%s1331_s1 + $0x88] sm:$0xff]   ;;  %v1127_v23 = vld [vmem:[%s1280_s22 + $0x4] ss:$12 sps:$4 sm:$0xff]   ;;  %v1133_v31 = vld [vmem:[%s1280_s22 + $0x34] ss:$12 sps:$4 sm:$0xff]  }
  0x15   : > { %1056 = vmatprep.subr.bf16.mxu1 %v1109_v8  ;;  %v1128_v24 = vld [vmem:[%s1280_s22 + $0x8] ss:$12 sps:$4 sm:$0xff]   ;;  %v1123_v25 = vld [vmem:[%s1331_s1] sm:$0xff]   ;;  %579 = vmatprep.mubr.bf16.mxu0 %v1127_v23  ;;  %v1138_v34 = vld [vmem:[%s1280_s22 + $0x4c] ss:$12 sps:$4 sm:$0xff]  }
  0x16   : > { %1005 = vmatpush3.bf16.msra.mxu0 %v1108_v7  ;;  %1068 = vmatprep.mubr.bf16.mxu1 %v1128_v24  ;;  %v1125_v26 = vld [vmem:[%s1280_s22] ss:$12 sps:$4 sm:$0xff]   ;;  %v1130_v27 = vld [vmem:[%s1280_s22 + $0x1c] ss:$12 sps:$4 sm:$0xff]   ;;  %v1135_v29 = vld [vmem:[%s1280_s22 + $0x38] ss:$12 sps:$4 sm:$0xff]  }
  0x17   : > { %1006 = vmatprep.subr.bf16.mxu0 %v1110_v9  ;;  %v1129_v28 = vld [vmem:[%s1280_s22 + $0x20] ss:$12 sps:$4 sm:$0xff]   ;;  %v1132_v30 = vld [vmem:[%s1280_s22 + $0x18] ss:$12 sps:$4 sm:$0xff]   ;;  %v1140_v35 = vld [vmem:[%s1280_s22 + $0x48] ss:$12 sps:$4 sm:$0xff]  }
  0x18   : > { %1057 = vmatpush3.bf16.msra.mxu1 %v1109_v8 }
  0x19   : > { %1058 = vmatprep.subr.bf16.mxu1 %v1112_v11 }
  0x1a   : > { %1007 = vmatpush3.bf16.msra.mxu0 %v1111_v10 }
  0x1b   : > { %1008 = vmatprep.subr.bf16.mxu0 %v1113_v12 }
  0x1c   : > { %1059 = vmatpush3.bf16.msra.mxu1 %v1112_v11 }
  0x1d   : > { %1060 = vmatprep.subr.bf16.mxu1 %v1115_v13 }
  0x1e   : > { %1009 = vmatpush3.bf16.msra.mxu0 %v1114_v14 }
  0x1f   : > { %1010 = vmatprep.subr.bf16.mxu0 %v1116_v15 }
  0x20   : > { %1061 = vmatpush3.bf16.msra.mxu1 %v1115_v13 }
  0x21   : > { %1062 = vmatprep.subr.bf16.mxu1 %v1118_v16 }
  0x22   : > { %1011 = vmatpush3.bf16.msra.mxu0 %v1117_v17 }
  0x23   : > { %1012 = vmatprep.subr.bf16.mxu0 %v1119_v18 }
  0x24   : > { %1063 = vmatpush3.bf16.msra.mxu1 %v1118_v16 }
  0x25   : > { %1064 = vmatprep.subr.bf16.mxu1 %v1121_v20 }
  0x26   : > { %1013 = vmatpush3.bf16.msra.mxu0 %v1120_v19 }
  0x27   : > { %1014 = vmatprep.subr.bf16.mxu0 %v1122_v21 }
  0x28   : > { %1065 = vmatpush3.bf16.msra.mxu1 %v1121_v20 }
  0x29   : > { %1066 = vmatprep.subr.bf16.mxu1 %v1124_v22 }
  0x2a   : > { %1015 = vmatpush3.bf16.msra.mxu0 %v1123_v25 }
  0x2c   : > { %1067 = vmatpush3.bf16.msra.mxu1 %v1124_v22 }
  0x2d   : > { %580 = vmatmul.mubr.bf16.vlgmr.msra.gmra.mxu0 %v1125_v26 }
  0x2e   : > { %587 = vmatprep.mubr.bf16.mxu0 %v1130_v27 }
  0x2f   : > { %1069 = vmatmul.mubr.bf16.vlgmr.msra.gmra.mxu1 %v1129_v28 }
  0x30   : > { %1072 = vmatprep.mubr.bf16.mxu1 %v1135_v29 }
  0x35   : > { %588 = vmatmul.mubr.bf16.gmra.mxu0 %v1132_v30 }
  0x36   : > { %595 = vmatprep.mubr.bf16.mxu0 %v1133_v31 }
  0x37   : > { %1073 = vmatmul.mubr.bf16.gmra.mxu1 %v1137_v32 }
  0x3d   : > { %596 = vmatmul.mubr.bf16.gmra.mxu0 %v1136_v33 }
  0x3e   : > { %603 = vmatprep.mubr.bf16.mxu0 %v1138_v34 }
  0x45   : > { %604 = vmatmul.mubr.bf16.gmra.mxu0 %v1140_v35 }
  0xed   : > { %v1016_v36 = vpop.f32.mrf.mxu0 }
  0xef   : > { %v1017_v37 = vpop.f32.mrf.mxu0  ;;  %v1070_v38 = vpop.f32.mrf.mxu1 }
  0xf0   : > { %v1018_v41 = vadd.f32 %v1017_v37, %v1016_v36 }
  0xf1   : > { %v1019_v39 = vpop.f32.mrf.mxu0  ;;  %v646_v40 = vpop.f32.mrf.mxu1 }
  0xf2   : > { %v647_v47 = vadd.f32 %v1018_v41, %v646_v40 }
  0xf3   : > { %v1020_v42 = vpop.f32.mrf.mxu0  ;;  %v1071_v43 = vpop.f32.mrf.mxu1 }
  0xf4   : > { %v1021_v44 = vadd.f32 %v1020_v42, %v1019_v39  ;;  %v731_v2 = vmul.f32 %v647_v47, %v647_v47 }
  0xf5   : > { %v1022_v45 = vpop.f32.mrf.mxu0  ;;  %v649_v46 = vpop.f32.mrf.mxu1 }
  0xf6   : > { %v650_v48 = vadd.f32 %v1021_v44, %v649_v46 }
  0xf7   : > { %v1023_v49 = vpop.f32.mrf.mxu0  ;;  %v1074_v52 = vpop.f32.mrf.mxu1 }
  0xf8   : > { %v980_v50 = vpack.c.bf16 %v650_v48, %v647_v47  ;;  %v1024_v53 = vadd.f32 %v1023_v49, %v1022_v45  ;;  %v732_v63 = vmul.f32 %v650_v48, %v650_v48  ;;  %v717_v5 = vadd.f32 %v650_v48, %v647_v47 }
  0xf9   : > { %v1025_v51 = vpop.f32.mrf.mxu0  ;;  %v662_v57 = vpop.f32.mrf.mxu1 }
  0xfa   : > { %981 = vst [vmem:[%s1307_s6] sm:$0xff] %v980_v50   ;;  %v655_v58 = vadd.f32 %v1070_v38, %v1024_v53  ;;  %v739_v8 = vadd.f32 %v732_v63, %v731_v2 }
  0xfb   : > { %v1026_v54 = vpop.f32.mrf.mxu0  ;;  %v1075_v1 = vpop.f32.mrf.mxu1 }
  0xfc   : > { %v1027_v55 = vadd.f32 %v1026_v54, %v1025_v51  ;;  %v733_v3 = vmul.f32 %v655_v58, %v655_v58  ;;  %v718_v11 = vadd.f32 %v717_v5, %v655_v58 }
  0xfd   : > { %v1028_v56 = vpop.f32.mrf.mxu0  ;;  %v665_v9 = vpop.f32.mrf.mxu1 }
  0xfe   : > { %v658_v59 = vadd.f32 %v1071_v43, %v1027_v55  ;;  %v740_v14 = vadd.f32 %v739_v8, %v733_v3 }
  0xff   : > { %v1029_v60 = vpop.f32.mrf.mxu0 }
 0x100   : > { %v985_v61 = vpack.c.bf16 %v658_v59, %v655_v58  ;;  %v1030_v62 = vadd.f32 %v1029_v60, %v1028_v56  ;;  %v734_v12 = vmul.f32 %v658_v59, %v658_v59  ;;  %v719_v16 = vadd.f32 %v718_v11, %v658_v59 }
 0x101   : > { %v1031_v0 = vpop.f32.mrf.mxu0 }
 0x102   : > { %997 = vst [vmem:[%s1307_s6 + $0x8] sm:$0xff] %v985_v61   ;;  %v663_v6 = vadd.f32 %v1030_v62, %v662_v57  ;;  %v741_v22 = vadd.f32 %v740_v14, %v734_v12 }
 0x103   : > { %v1032_v4 = vpop.f32.mrf.mxu0 }
 0x104   : > { %v1033_v7 = vadd.f32 %v1032_v4, %v1031_v0  ;;  %v735_v17 = vmul.f32 %v663_v6, %v663_v6  ;;  %v720_v21 = vadd.f32 %v719_v16, %v663_v6 }
 0x105   : > { %v1034_v10 = vpop.f32.mrf.mxu0 }
 0x106   : > { %v666_v13 = vadd.f32 %v1033_v7, %v665_v9  ;;  %v742_v26 = vadd.f32 %v741_v22, %v735_v17 }
 0x107   : > { %v1035_v15 = vpop.f32.mrf.mxu0 }
 0x108   : > { %v990_v18 = vpack.c.bf16 %v666_v13, %v663_v6  ;;  %v1036_v19 = vadd.f32 %v1035_v15, %v1034_v10  ;;  %v736_v23 = vmul.f32 %v666_v13, %v666_v13  ;;  %v721_v27 = vadd.f32 %v720_v21, %v666_v13 }
 0x109   : > { %v1037_v20 = vpop.f32.mrf.mxu0 }
 0x10a   : > { %998 = vst [vmem:[%s1307_s6 + $0x10] sm:$0xff] %v990_v18   ;;  %v671_v24 = vadd.f32 %v1074_v52, %v1036_v19  ;;  %v743_v30 = vadd.f32 %v742_v26, %v736_v23 }
 0x10b   : > { %v1038_v25 = vpop.f32.mrf.mxu0 }
 0x10c   : > { %v737_v28 = vmul.f32 %v671_v24, %v671_v24  ;;  %v1039_v29 = vadd.f32 %v1038_v25, %v1037_v20  ;;  %v722_v31 = vadd.f32 %v721_v27, %v671_v24 }
 0x10e   : > { %v674_v32 = vadd.f32 %v1075_v1, %v1039_v29  ;;  %v744_v33 = vadd.f32 %v743_v30, %v737_v28 }
 0x110   : > { %v995_v34 = vpack.c.bf16 %v674_v32, %v671_v24  ;;  %v723_v35 = vadd.f32 %v722_v31, %v674_v32  ;;  %v738_v36 = vmul.f32 %v674_v32, %v674_v32 }
 0x112   : > { %999 = vst [vmem:[%s1307_s6 + $0x18] sm:$0xff] %v995_v34   ;;  %v724_v37 = vrot.slane %v723_v35, 4  ;;  %v745_v38 = vadd.f32 %v744_v33, %v738_v36 }
 0x114   : > { %v725_v39 = vadd.f32 %v724_v37, %v723_v35  ;;  %v746_v40 = vrot.slane %v745_v38, 4 }
 0x116   : > { %v726_v41 = vrot.slane %v725_v39, 2  ;;  %v747_v42 = vadd.f32 %v746_v40, %v745_v38 }
 0x118   : > { %v727_v43 = vadd.f32 %v726_v41, %v725_v39  ;;  %v748_v44 = vrot.slane %v747_v42, 2 }
 0x11a   : > { %v728_v45 = vrot.slane %v727_v43, 1  ;;  %v749_v46 = vadd.f32 %v748_v44, %v747_v42 }
 0x11c   : > { %v729_v47 = vadd.f32 %v728_v45, %v727_v43  ;;  %v750_v48 = vrot.slane %v749_v46, 1 }
 0x11e   : > { %730 = vst [vmem:[%s267_s8] sm:$0x1] %v729_v47  ;;  %v751_v49 = vadd.f32 %v750_v48, %v749_v46 }
 0x120   : > { %752 = vst [vmem:[%s273_s12] sm:$0x1] %v751_v49 }
 0x121 PF: > { %s15_s17 = sadd.s32 1, %s1163_s17   ;;  %s1335_s15 = smov %s1159_s16 }
 0x122   : > { %p12_p6 = scmp.ge.s32.totalorder %s15_s17, 4   ;;  %s1336_s16 = smov %s1338_s18 }
 0x124   :  { %14 = sbr.rel (!%p12_p6) target bundleno = 2 (0x2), region = 85 }

// kernel: generator_forward.24
= control target key start
LH: loop header
LB: loop body
LE: loop exit
PB: predicated region body
PF: predicated region fallthrough
CT: control target
= control target key end

     0   :  { %s326_s12 = smov 0   ;;  %s343_s0 = inlined_call_operand.vmem [shape: bf16[32,128], index: 0, kind: input, shape index: {}]   ;;  %s344_s1 = inlined_call_operand.vmem [shape: f32[1,128], index: 1, kind: input, shape index: {}]   ;;  %s345_s2 = inlined_call_operand.vmem [shape: f32[1,128], index: 2, kind: input, shape index: {}]   ;;  %s346_s3 = inlined_call_operand.vmem [shape: bf16[32,128], index: 3, kind: output, shape index: {}]  }
   0x1 LB: > { %s264_s13 = sadd.s32 4294967295, %s304_s12   ;;  %p268_p0 = scmp.ge.s32.totalorder %s304_s12, 1  ;;  %s304_s12 = sphi %s326_s12, %s13_s12  }
   0x2   : > { %p138_p1 = scmp.lt.s32.totalorder %s304_s12, 3 }
   0x4   : > { %p139_p2 = pnand %p268_p0, %p138_p1 }
   0x5   : > { %s269_s14 = sshll.u32 (!%p139_p2), %s264_s13, 1 }
   0x6   : > { %142 = sbr.rel (%p139_p2) target bundleno = 26 (0x1a), region = 32  ;;  %p163_p3 = scmp.lt.s32.totalorder (!%p139_p2), %s269_s14, 3 }
   0xb   : > { %s348_s14 = smov (!%p163_p3, %s269_s14), 3  ;;  %v273_v1 = vld [vmem:[%s344_s1] ss:$0 sm:$0xff] }
   0xc   : > { %s270_s15 = sshll.u32 %s348_s14, 2  ;;  %v274_v4 = vld [vmem:[%s345_s2] ss:$0 sm:$0xff] }
   0xd   : > { %s166_s18 = scalar_lea.vmem %s343_s0, %s270_s15  ;;  %s172_s25 = scalar_lea.vmem %s346_s3, %s270_s15 }
   0xe   : > { %v282_v0 = vld [vmem:[%s166_s18] sm:$0xff]  }
   0xf   : > { %v283_v2 = vunpack.c.l.bf16 %v282_v0  ;;  %v284_v3 = vunpack.c.h.bf16 %v282_v0 }
  0x11   : > { %v185_v5 = vmul.f32 %v283_v2, %v273_v1  ;;  %v186_v6 = vmul.f32 %v284_v3, %v273_v1 }
  0x13   : > { %v194_v7 = vadd.f32 %v274_v4, %v185_v5  ;;  %v195_v8 = vadd.f32 %v274_v4, %v186_v6 }
  0x15   : > { %v196_v9 = vmax.f32 %v194_v7, 0.0  ;;  %v197_v10 = vmax.f32 %v195_v8, 0.0 }
  0x17   : > { %v288_v11 = vpack.c.bf16 %v197_v10, %v196_v9 }
  0x19   : > { %289 = vst [vmem:[%s172_s25] sm:$0xff] %v288_v11  }
  0x1a PF: > { %s13_s12 = sadd.s32 1, %s304_s12  }
  0x1b   : > { %p10_p4 = scmp.ge.s32.totalorder %s13_s12, 4  }
  0x1d   :  { %12 = sbr.rel (!%p10_p4) target bundleno = 1 (0x1), region = 62 }

// kernel: generator_forward.23
= control target key start
LH: loop header
LB: loop body
LE: loop exit
PB: predicated region body
PF: predicated region fallthrough
CT: control target
= control target key end

     0   :  { %s1202_s15 = smov 0   ;;  %s1204_s16 = smov 0   ;;  %s1377_s0 = inlined_call_operand.vmem [shape: bf16[32,640], index: 0, kind: input, shape index: {}]   ;;  %s1378_s1 = inlined_call_operand.vmem [shape: bf16[640,128], index: 1, kind: input, shape index: {}]   ;;  %s1379_s2 = inlined_call_operand.vmem [shape: bf16[32,128], index: 2, kind: output, shape index: {0}]   ;;  %s1380_s3 = inlined_call_operand.vmem [shape: f32[2,1,128], index: 3, kind: output, shape index: {1}]   ;;  %s1381_s4 = inlined_call_operand.vmem [shape: f32[2,1,128], index: 4, kind: output, shape index: {2}]  }
   0x1   :  { %s1206_s17 = smov 0  }
   0x2 LB: > { %s27_s18 = sadd.s32 1, %s1169_s16  ;;  %p943_p0 = scmp.ge.s32.totalorder %s1173_s17, 1  ;;  %s1173_s17 = sphi %s1206_s17, %s15_s17   ;;  %s1169_s16 = sphi %s1204_s16, %s1383_s16   ;;  %s1165_s15 = sphi %s1202_s15, %s1382_s15  }
   0x3   : > { %p29_p1 = scmp.ge.s32.totalorder %s27_s18, 2  ;;  %p196_p2 = scmp.lt.s32.totalorder %s1173_s17, 3 }
   0x5   : > { %s1385_s18 = smov (%p29_p1, %s27_s18), 0  ;;  %p197_p3 = pnand %p943_p0, %p196_p2 }
   0x6   : > { %s944_s27 = sshll.u32 (!%p197_p3), %s1165_s15, 1  ;;  %p262_p5 = scmp.lt.s32.totalorder (!%p197_p3), %s1165_s15, 1 }
   0x7   : > { %200 = sbr.rel (%p197_p3) target bundleno = 294 (0x126), region = 28  ;;  %p243_p4 = scmp.lt.s32.totalorder (!%p197_p3), %s944_s27, 3 }
   0xc   : > { %v1104_v0 = vld [vmem:[%s1378_s1 + $0x78] sm:$0xff]   ;;  %v1108_v4 = vld [vmem:[%s1378_s1 + $0x70] sm:$0xff]   ;;  %v1112_v8 = vld [vmem:[%s1378_s1 + $0x68] sm:$0xff]   ;;  %s1387_s27 = smov (!%p243_p4, %s944_s27), 3  ;;  %v1175_v34 = vmov 0.0   ;;  %vm1176_vm0 = vmmov 0  }
   0xd   : > { %v1105_v1 = vld [vmem:[%s1378_s1 + $0xf8] sm:$0xff]   ;;  %1004 = vmatprep.subr.bf16.mxu0 %v1104_v0  ;;  %v1109_v5 = vld [vmem:[%s1378_s1 + $0xf0] sm:$0xff]   ;;  %v1113_v9 = vld [vmem:[%s1378_s1 + $0xe8] sm:$0xff]   ;;  %s1077_s29 = smul.u32 20, %s1387_s27  ;;  %s1389_s15 = smov (!%p262_p5, %s1165_s15), 1 }
   0xe   : > { %v1106_v2 = vld [vmem:[%s1378_s1 + $0x38] sm:$0xff]   ;;  %1026 = vmatprep.subr.bf16.mxu1 %v1105_v1  ;;  %v1110_v6 = vld [vmem:[%s1378_s1 + $0x30] sm:$0xff]   ;;  %v1114_v10 = vld [vmem:[%s1378_s1 + $0x28] sm:$0xff]   ;;  %s267_s23 = scalar_lea.vmem %s1380_s3, %s1389_s15  ;;  %s273_s26 = scalar_lea.vmem %s1381_s4, %s1389_s15 }
   0xf   : > { %v1107_v3 = vld [vmem:[%s1378_s1 + $0xb8] sm:$0xff]   ;;  %1005 = vmatpush3.bf16.msra.mxu0 %v1106_v2  ;;  %v1111_v7 = vld [vmem:[%s1378_s1 + $0xb0] sm:$0xff]   ;;  %v1115_v11 = vld [vmem:[%s1378_s1 + $0xa8] sm:$0xff]   ;;  %s1319_s14 = scalar_lea.vmem %s1377_s0, %s1077_s29 }
  0x10   : > { %1027 = vmatpush3.bf16.msra.mxu1 %v1107_v3  ;;  %1006 = vmatprep.subr.bf16.mxu0 %v1108_v4  ;;  %v1116_v12 = vld [vmem:[%s1378_s1 + $0x60] sm:$0xff]   ;;  %v1120_v16 = vld [vmem:[%s1378_s1 + $0x58] sm:$0xff]   ;;  %v1124_v20 = vld [vmem:[%s1378_s1 + $0x50] sm:$0xff]  }
  0x11   : > { %1028 = vmatprep.subr.bf16.mxu1 %v1109_v5  ;;  %v1117_v13 = vld [vmem:[%s1378_s1 + $0xe0] sm:$0xff]   ;;  %v1121_v17 = vld [vmem:[%s1378_s1 + $0xd8] sm:$0xff]   ;;  %v1125_v21 = vld [vmem:[%s1378_s1 + $0xd0] sm:$0xff]  }
  0x12   : > { %v1118_v14 = vld [vmem:[%s1378_s1 + $0x20] sm:$0xff]   ;;  %v1122_v18 = vld [vmem:[%s1378_s1 + $0x18] sm:$0xff]   ;;  %v1126_v22 = vld [vmem:[%s1378_s1 + $0x10] sm:$0xff]  }
  0x13   : > { %1007 = vmatpush3.bf16.msra.mxu0 %v1110_v6  ;;  %v1119_v15 = vld [vmem:[%s1378_s1 + $0xa0] sm:$0xff]   ;;  %v1123_v19 = vld [vmem:[%s1378_s1 + $0x98] sm:$0xff]   ;;  %v1127_v23 = vld [vmem:[%s1378_s1 + $0x90] sm:$0xff]  }
  0x14   : > { %1029 = vmatpush3.bf16.msra.mxu1 %v1111_v7  ;;  %1008 = vmatprep.subr.bf16.mxu0 %v1112_v8  ;;  %v1128_v24 = vld [vmem:[%s1378_s1 + $0x48] sm:$0xff]   ;;  %v1132_v28 = vld [vmem:[%s1378_s1 + $0x40] sm:$0xff]   ;;  %v1142_v37 = vld [vmem:[%s1378_s1 + $0x138] sm:$0xff]  }
  0x15   : > { %1030 = vmatprep.subr.bf16.mxu1 %v1113_v9  ;;  %v1129_v25 = vld [vmem:[%s1378_s1 + $0xc8] sm:$0xff]   ;;  %v1133_v29 = vld [vmem:[%s1378_s1 + $0xc0] sm:$0xff]   ;;  %v1143_v38 = vld [vmem:[%s1378_s1 + $0x130] sm:$0xff]  }
  0x16   : > { %v1130_v26 = vld [vmem:[%s1378_s1 + $0x8] sm:$0xff]   ;;  %v1134_v30 = vld [vmem:[%s1378_s1] sm:$0xff]   ;;  %v1146_v41 = vld [vmem:[%s1378_s1 + $0x118] sm:$0xff]  }
  0x17   : > { %1009 = vmatpush3.bf16.msra.mxu0 %v1114_v10  ;;  %v1131_v27 = vld [vmem:[%s1378_s1 + $0x88] sm:$0xff]   ;;  %v1135_v31 = vld [vmem:[%s1378_s1 + $0x80] sm:$0xff]   ;;  %v1147_v42 = vld [vmem:[%s1378_s1 + $0x110] sm:$0xff]  }
  0x18   : > { %1031 = vmatpush3.bf16.msra.mxu1 %v1115_v11  ;;  %1010 = vmatprep.subr.bf16.mxu0 %v1116_v12  ;;  %v1136_v32 = vld [vmem:[%s1319_s14] ss:$20 sps:$4 sm:$0xff]   ;;  %v1138_v33 = vld [vmem:[%s1319_s14 + $0x4] ss:$20 sps:$4 sm:$0xff]   ;;  %v1139_v35 = vld [vmem:[%s1319_s14 + $0x8] ss:$20 sps:$4 sm:$0xff]  }
  0x19   : > { %1032 = vmatprep.subr.bf16.mxu1 %v1117_v13  ;;  %v1141_v36 = vld [vmem:[%s1319_s14 + $0xc] ss:$20 sps:$4 sm:$0xff]   ;;  %659 = vmatprep.mubr.bf16.mxu0 %v1138_v33  ;;  %v1150_v45 = vld [vmem:[%s1319_s14 + $0x10] ss:$20 sps:$4 sm:$0xff]   ;;  %s947_s14 = sshll.u32 %s1387_s27, 2 }
  0x1a   : > { %700 = vmatprep.mubr.bf16.mxu1 %v1141_v36  ;;  %v1144_v39 = vld [vmem:[%s1378_s1 + $0x128] sm:$0xff]   ;;  %v1145_v40 = vld [vmem:[%s1378_s1 + $0x120] sm:$0xff]   ;;  %s260_s21 = scalar_lea.vmem %s1379_s2, %s947_s14 }
  0x1b   : > { %1011 = vmatpush3.bf16.msra.mxu0 %v1118_v14  ;;  %v1148_v43 = vld [vmem:[%s1378_s1 + $0x108] sm:$0xff]   ;;  %v1149_v44 = vld [vmem:[%s1378_s1 + $0x100] sm:$0xff]  }
  0x1c   : > { %1033 = vmatpush3.bf16.msra.mxu1 %v1119_v15  ;;  %1012 = vmatprep.subr.bf16.mxu0 %v1120_v16 }
  0x1d   : > { %1034 = vmatprep.subr.bf16.mxu1 %v1121_v17 }
  0x1f   : > { %1013 = vmatpush3.bf16.msra.mxu0 %v1122_v18 }
  0x20   : > { %1035 = vmatpush3.bf16.msra.mxu1 %v1123_v19  ;;  %1014 = vmatprep.subr.bf16.mxu0 %v1124_v20 }
  0x21   : > { %1036 = vmatprep.subr.bf16.mxu1 %v1125_v21 }
  0x23   : > { %1015 = vmatpush3.bf16.msra.mxu0 %v1126_v22 }
  0x24   : > { %1037 = vmatpush3.bf16.msra.mxu1 %v1127_v23  ;;  %1016 = vmatprep.subr.bf16.mxu0 %v1128_v24 }
  0x25   : > { %1038 = vmatprep.subr.bf16.mxu1 %v1129_v25 }
  0x27   : > { %1017 = vmatpush3.bf16.msra.mxu0 %v1130_v26 }
  0x28   : > { %1039 = vmatpush3.bf16.msra.mxu1 %v1131_v27  ;;  %1018 = vmatprep.subr.bf16.mxu0 %v1132_v28 }
  0x29   : > { %1040 = vmatprep.subr.bf16.mxu1 %v1133_v29 }
  0x2b   : > { %1019 = vmatpush3.bf16.msra.mxu0 %v1134_v30 }
  0x2c   : > { %1041 = vmatpush3.bf16.msra.mxu1 %v1135_v31  ;;  %1057 = vmatprep.subr.bf16.mxu0 %v1175_v34 }
  0x2e   : > { %660 = vmatmul.mubr.bf16.vlgmr.msra.gmra.mxu0 %v1136_v32 }
  0x2f   : > { %701 = vmatmul.mubr.bf16.vlgmr.msra.gmra.mxu1 %v1139_v35  ;;  %1058 = vmatpush3.bf16.msra.mxu0 %v1142_v37 }
  0x30   : > { %1059 = vmatprep.subr.bf16.mxu0 %v1175_v34  ;;  %1073 = vmatprep.mubr.msk.bf16.mxu0 %vm1176_vm0, %v1175_v34 }
  0x33   : > { %1060 = vmatpush3.bf16.msra.mxu0 %v1143_v38 }
  0x34   : > { %1061 = vmatprep.subr.bf16.mxu0 %v1175_v34 }
  0x37   : > { %1062 = vmatpush3.bf16.msra.mxu0 %v1144_v39 }
  0x38   : > { %1063 = vmatprep.subr.bf16.mxu0 %v1175_v34 }
  0x3b   : > { %1064 = vmatpush3.bf16.msra.mxu0 %v1145_v40 }
  0x3c   : > { %1065 = vmatprep.subr.bf16.mxu0 %v1175_v34 }
  0x3f   : > { %1066 = vmatpush3.bf16.msra.mxu0 %v1146_v41 }
  0x40   : > { %1067 = vmatprep.subr.bf16.mxu0 %v1175_v34 }
  0x43   : > { %1068 = vmatpush3.bf16.msra.mxu0 %v1147_v42 }
  0x44   : > { %1069 = vmatprep.subr.bf16.mxu0 %v1175_v34 }
  0x47   : > { %1070 = vmatpush3.bf16.msra.mxu0 %v1148_v43 }
  0x48   : > { %1071 = vmatprep.subr.bf16.mxu0 %v1175_v34 }
  0x4b   : > { %1072 = vmatpush3.bf16.msra.mxu0 %v1149_v44 }
  0x4e   : > { %1074 = vmatmul.mubr.bf16.vlgmr.msra.gmra.mxu0 %v1150_v45 }
  0xee   : > { %v1020_v46 = vpop.f32.mrf.mxu0 }
  0xef   : > { %v1042_v47 = vpop.f32.mrf.mxu1 }
  0xf0   : > { %v1021_v48 = vpop.f32.mrf.mxu0 }
  0xf1   : > { %v1043_v49 = vpop.f32.mrf.mxu1  ;;  %v1022_v54 = vadd.f32 %v1021_v48, %v1020_v46 }
  0xf2   : > { %v1023_v50 = vpop.f32.mrf.mxu0  ;;  %v1044_v55 = vadd.f32 %v1043_v49, %v1042_v47 }
  0xf3   : > { %v1045_v51 = vpop.f32.mrf.mxu1 }
  0xf4   : > { %v1024_v52 = vpop.f32.mrf.mxu0  ;;  %v703_v59 = vadd.f32 %v1044_v55, %v1022_v54 }
  0xf5   : > { %v1046_v53 = vpop.f32.mrf.mxu1  ;;  %v1025_v56 = vadd.f32 %v1024_v52, %v1023_v50 }
  0xf6   : > { %v1047_v57 = vadd.f32 %v1046_v53, %v1045_v51 }
  0xf8   : > { %v706_v62 = vadd.f32 %v1047_v57, %v1025_v56 }
 0x10e   : > { %v743_v58 = vpop.f32.mrf.mxu0 }
 0x10f   : > { %v744_v61 = vadd.f32 %v743_v58, %v703_v59 }
 0x110   : > { %v1075_v60 = vpop.f32.mrf.mxu0 }
 0x111   : > { %v768_v2 = vmul.f32 %v744_v61, %v744_v61 }
 0x112   : > { %v746_v63 = vpop.f32.mrf.mxu0 }
 0x113   : > { %v747_v0 = vadd.f32 %v746_v63, %v706_v62 }
 0x114   : > { %v1076_v1 = vpop.f32.mrf.mxu0 }
 0x115   : > { %v1002_v3 = vpack.c.bf16 %v747_v0, %v744_v61  ;;  %v760_v4 = vadd.f32 %v747_v0, %v744_v61  ;;  %v769_v5 = vmul.f32 %v747_v0, %v747_v0 }
 0x117   : > { %1003 = vst [vmem:[%s260_s21] sm:$0xff] %v1002_v3   ;;  %v761_v6 = vrot.slane %v760_v4, 4  ;;  %v770_v7 = vadd.f32 %v769_v5, %v768_v2 }
 0x119   : > { %v762_v8 = vadd.f32 %v761_v6, %v760_v4  ;;  %v771_v9 = vrot.slane %v770_v7, 4 }
 0x11b   : > { %v763_v10 = vrot.slane %v762_v8, 2  ;;  %v772_v11 = vadd.f32 %v771_v9, %v770_v7 }
 0x11d   : > { %v764_v12 = vadd.f32 %v763_v10, %v762_v8  ;;  %v773_v13 = vrot.slane %v772_v11, 2 }
 0x11f   : > { %v765_v14 = vrot.slane %v764_v12, 1  ;;  %v774_v15 = vadd.f32 %v773_v13, %v772_v11 }
 0x121   : > { %v766_v16 = vadd.f32 %v765_v14, %v764_v12  ;;  %v775_v17 = vrot.slane %v774_v15, 1 }
 0x123   : > { %767 = vst [vmem:[%s267_s23] sm:$0x1] %v766_v16  ;;  %v776_v18 = vadd.f32 %v775_v17, %v774_v15 }
 0x125   : > { %777 = vst [vmem:[%s273_s26] sm:$0x1] %v776_v18 }
 0x126 PF: > { %s15_s17 = sadd.s32 1, %s1173_s17   ;;  %s1382_s15 = smov %s1169_s16 }
 0x127   : > { %p12_p6 = scmp.ge.s32.totalorder %s15_s17, 4   ;;  %s1383_s16 = smov %s1385_s18 }
 0x129   :  { %14 = sbr.rel (!%p12_p6) target bundleno = 2 (0x2), region = 85 }

// kernel: generator_forward.28
= control target key start
LH: loop header
LB: loop body
LE: loop exit
PB: predicated region body
PF: predicated region fallthrough
CT: control target
= control target key end

     0   :  { %s402_s15 = smov 0   ;;  %s428_s0 = inlined_call_operand.vmem [shape: bf16[32,128], index: 0, kind: input, shape index: {}]   ;;  %s429_s1 = inlined_call_operand.vmem [shape: f32[1,128], index: 1, kind: input, shape index: {}]   ;;  %s430_s2 = inlined_call_operand.vmem [shape: f32[1,128], index: 2, kind: input, shape index: {}]   ;;  %s431_s3 = inlined_call_operand.vmem [shape: bf16[32,128], index: 3, kind: input, shape index: {}]   ;;  %s432_s4 = inlined_call_operand.vmem [shape: bf16[32,128], index: 4, kind: output, shape index: {}]  }
   0x1 LB: > { %s329_s16 = sadd.s32 4294967295, %s375_s15   ;;  %p333_p0 = scmp.ge.s32.totalorder %s375_s15, 1  ;;  %s375_s15 = sphi %s402_s15, %s14_s15  }
   0x2   : > { %p174_p1 = scmp.lt.s32.totalorder %s375_s15, 3 }
   0x4   : > { %p175_p2 = pnand %p333_p0, %p174_p1 }
   0x5   : > { %s334_s17 = sshll.u32 (!%p175_p2), %s329_s16, 1 }
   0x6   : > { %178 = sbr.rel (%p175_p2) target bundleno = 26 (0x1a), region = 36  ;;  %p206_p3 = scmp.lt.s32.totalorder (!%p175_p2), %s334_s17, 3 }
   0xb   : > { %s434_s17 = smov (!%p206_p3, %s334_s17), 3  ;;  %v340_v1 = vld [vmem:[%s429_s1] ss:$0 sm:$0xff] }
   0xc   : > { %s335_s18 = sshll.u32 %s434_s17, 2  ;;  %v341_v5 = vld [vmem:[%s430_s2] ss:$0 sm:$0xff] }
   0xd   : > { %s209_s21 = scalar_lea.vmem %s428_s0, %s335_s18  ;;  %s215_s24 = scalar_lea.vmem %s431_s3, %s335_s18 }
   0xe   : > { %v349_v0 = vld [vmem:[%s209_s21] sm:$0xff]   ;;  %s221_s5 = scalar_lea.vmem %s432_s4, %s335_s18 }
   0xf   : > { %v353_v2 = vld [vmem:[%s215_s24] sm:$0xff]   ;;  %v350_v3 = vunpack.c.l.bf16 %v349_v0  ;;  %v351_v4 = vunpack.c.h.bf16 %v349_v0 }
  0x10   : > { %v354_v8 = vunpack.c.l.bf16 %v353_v2  ;;  %v355_v9 = vunpack.c.h.bf16 %v353_v2 }
  0x11   : > { %v234_v6 = vmul.f32 %v350_v3, %v340_v1  ;;  %v235_v7 = vmul.f32 %v351_v4, %v340_v1 }
  0x13   : > { %v243_v10 = vadd.f32 %v341_v5, %v234_v6  ;;  %v244_v11 = vadd.f32 %v341_v5, %v235_v7 }
  0x15   : > { %v249_v12 = vadd.f32 %v354_v8, %v243_v10  ;;  %v250_v13 = vadd.f32 %v355_v9, %v244_v11 }
  0x17   : > { %v359_v14 = vpack.c.bf16 %v250_v13, %v249_v12 }
  0x19   : > { %360 = vst [vmem:[%s221_s5] sm:$0xff] %v359_v14  }
  0x1a PF: > { %s14_s15 = sadd.s32 1, %s375_s15  }
  0x1b   : > { %p11_p4 = scmp.ge.s32.totalorder %s14_s15, 4  }
  0x1d   :  { %13 = sbr.rel (!%p11_p4) target bundleno = 1 (0x1), region = 69 }

// kernel: tile.28
= control target key start
LH: loop header
LB: loop body
LE: loop exit
PB: predicated region body
PF: predicated region fallthrough
CT: control target
= control target key end

     0   :  { %s22_s0 = inlined_call_operand.vmem [shape: f32[64], index: 0, kind: input, shape index: {}]   ;;  %s23_s1 = inlined_call_operand.vmem [shape: f32[4,64], index: 1, kind: output, shape index: {}]  }
   0x1   :  { %v4_v0 = vld [vmem:[%s22_s0] ss:$0 sm:$0xff] }
   0x2   :  { %5 = vst [vmem:[%s23_s1] sm:$0xf] %v4_v0 }

// kernel: generator_forward.33
= control target key start
LH: loop header
LB: loop body
LE: loop exit
PB: predicated region body
PF: predicated region fallthrough
CT: control target
= control target key end

     0   :  { %s1518_s15 = smov 0   ;;  %s1520_s16 = smov 0   ;;  %s1800_s0 = inlined_call_operand.vmem [shape: bf16[32,512], index: 0, kind: input, shape index: {}]   ;;  %s1801_s1 = inlined_call_operand.vmem [shape: bf16[512,256], index: 1, kind: input, shape index: {}]   ;;  %s1802_s2 = inlined_call_operand.vmem [shape: bf16[32,256], index: 2, kind: output, shape index: {0}]   ;;  %s1803_s3 = inlined_call_operand.vmem [shape: f32[1,1,256], index: 3, kind: output, shape index: {1}]   ;;  %s1804_s4 = inlined_call_operand.vmem [shape: f32[1,1,256], index: 4, kind: output, shape index: {2}]  }
   0x1   :  { %s1522_s17 = smov 0   ;;  %s1524_s18 = smov 0  }
   0x2   :  { %s1526_s19 = smov 0  }
   0x3 LB: > { %s24_s20 = sadd.s32 1, %s1487_s18  ;;  %s1240_s21 = sadd.s32 4294967295, %s1491_s19   ;;  %s1491_s19 = sphi %s1526_s19, %s15_s19   ;;  %s1487_s18 = sphi %s1524_s18, %s1809_s18   ;;  %s1483_s17 = sphi %s1522_s17, %s1808_s17   ;;  %s1479_s16 = sphi %s1520_s16, %s1807_s16   ;;  %s1475_s15 = sphi %s1518_s15, %s1806_s15  }
   0x4   : > { %p25_p0 = scmp.ge.s32.totalorder %s24_s20, 2  ;;  %p67_p1 = scmp.ne.s32.totalorder %s1479_s16, %s1475_s15 }
   0x5   : > { %p68_p2 = scmp.eq.s32.totalorder %s1491_s19, 0  ;;  %p99_p4 = scmp.eq.s32.totalorder %s1240_s21, 1 }
   0x6   : > { %s1811_s20 = smov (%p25_p0, %s24_s20), 0  ;;  %s60_s23 = sadd.s32 1, %s1479_s16 }
   0x7   : > { %p69_p3 = por %p68_p2, %p67_p1  ;;  %s57_s22 = ssub.s32 %s1487_s18, %s1811_s20 }
   0x8   : > { %p58_p5 = scmp.eq.s32.totalorder %s57_s22, 0  ;;  %p1553_p6 = por %p99_p4, %p67_p1 }
   0x9   : > { %p1244_p7 = scmp.ge.s32.totalorder %s1491_s19, 2 }
   0xa   : > { %s1558_s25 = scalar_select %p58_p5, %s1479_s16, %s60_s23  }
   0xb   : > { %187 = sbr.rel (%p1244_p7) target bundleno = 62 (0x3e), region = 20 }
  0x10   : > { %190 = sbr.rel (!%p69_p3) target bundleno = 62 (0x3e), region = 24  ;;  %s192_s26 = sand.u32 (%p69_p3), 1, %s1479_s16  }
  0x11   : > { %s1246_s27 = sshll.u32 (%p69_p3), %s1487_s18, 2  ;;  %s1245_s28 = sshll.u32 (%p69_p3), %s192_s26, 8 }
  0x12   : > { %s1566_s5 = scalar_lea.vmem (%p69_p3), %s1801_s1, %s1246_s27  ;;  %s1570_s6 = scalar_lea.vmem (%p69_p3), [#allocation2], %s1245_s28 }
  0x13   : > { %v213_v0 = vld [vmem:[%s1566_s5] sm:$0xf] (%p69_p3)  ;;  %v215_v1 = vld [vmem:[%s1566_s5 + $0x8] sm:$0xf] (%p69_p3)  ;;  %v217_v2 = vld [vmem:[%s1566_s5 + $0x10] sm:$0xf] (%p69_p3) }
  0x14   : > { %214 = vst [vmem:[%s1570_s6] sm:$0xf] (%p69_p3), %v213_v0  ;;  %216 = vst [vmem:[%s1570_s6 + $0x4] sm:$0xf] (%p69_p3), %v215_v1  ;;  %v219_v3 = vld [vmem:[%s1566_s5 + $0x18] sm:$0xf] (%p69_p3) }
  0x15   : > { %v221_v4 = vld [vmem:[%s1566_s5 + $0x20] sm:$0xf]  ;;  %218 = vst [vmem:[%s1570_s6 + $0x8] sm:$0xf] %v217_v2  ;;  %220 = vst [vmem:[%s1570_s6 + $0xc] sm:$0xf] %v219_v3 }
  0x16   : > { %222 = vst [vmem:[%s1570_s6 + $0x10] sm:$0xf] %v221_v4  ;;  %v223_v5 = vld [vmem:[%s1566_s5 + $0x28] sm:$0xf]  ;;  %v225_v6 = vld [vmem:[%s1566_s5 + $0x30] sm:$0xf] }
  0x17   : > { %v227_v7 = vld [vmem:[%s1566_s5 + $0x38] sm:$0xf]  ;;  %224 = vst [vmem:[%s1570_s6 + $0x14] sm:$0xf] %v223_v5  ;;  %226 = vst [vmem:[%s1570_s6 + $0x18] sm:$0xf] %v225_v6 }
  0x18   : > { %228 = vst [vmem:[%s1570_s6 + $0x1c] sm:$0xf] %v227_v7  ;;  %v229_v8 = vld [vmem:[%s1566_s5 + $0x40] sm:$0xf]  ;;  %v231_v9 = vld [vmem:[%s1566_s5 + $0x48] sm:$0xf] }
  0x19   : > { %v233_v10 = vld [vmem:[%s1566_s5 + $0x50] sm:$0xf]  ;;  %230 = vst [vmem:[%s1570_s6 + $0x20] sm:$0xf] %v229_v8  ;;  %232 = vst [vmem:[%s1570_s6 + $0x24] sm:$0xf] %v231_v9 }
  0x1a   : > { %234 = vst [vmem:[%s1570_s6 + $0x28] sm:$0xf] %v233_v10  ;;  %v235_v11 = vld [vmem:[%s1566_s5 + $0x58] sm:$0xf]  ;;  %v237_v12 = vld [vmem:[%s1566_s5 + $0x60] sm:$0xf] }
  0x1b   : > { %v239_v13 = vld [vmem:[%s1566_s5 + $0x68] sm:$0xf]  ;;  %236 = vst [vmem:[%s1570_s6 + $0x2c] sm:$0xf] %v235_v11  ;;  %238 = vst [vmem:[%s1570_s6 + $0x30] sm:$0xf] %v237_v12 }
  0x1c   : > { %240 = vst [vmem:[%s1570_s6 + $0x34] sm:$0xf] %v239_v13  ;;  %v241_v14 = vld [vmem:[%s1566_s5 + $0x70] sm:$0xf]  ;;  %v243_v15 = vld [vmem:[%s1566_s5 + $0x78] sm:$0xf] }
  0x1d   : > { %v245_v16 = vld [vmem:[%s1566_s5 + $0x80] sm:$0xf]  ;;  %242 = vst [vmem:[%s1570_s6 + $0x38] sm:$0xf] %v241_v14  ;;  %244 = vst [vmem:[%s1570_s6 + $0x3c] sm:$0xf] %v243_v15 }
  0x1e   : > { %246 = vst [vmem:[%s1570_s6 + $0x40] sm:$0xf] %v245_v16  ;;  %v247_v17 = vld [vmem:[%s1566_s5 + $0x88] sm:$0xf]  ;;  %v249_v18 = vld [vmem:[%s1566_s5 + $0x90] sm:$0xf] }
  0x1f   : > { %v251_v19 = vld [vmem:[%s1566_s5 + $0x98] sm:$0xf]  ;;  %248 = vst [vmem:[%s1570_s6 + $0x44] sm:$0xf] %v247_v17  ;;  %250 = vst [vmem:[%s1570_s6 + $0x48] sm:$0xf] %v249_v18 }
  0x20   : > { %252 = vst [vmem:[%s1570_s6 + $0x4c] sm:$0xf] %v251_v19  ;;  %v253_v20 = vld [vmem:[%s1566_s5 + $0xa0] sm:$0xf]  ;;  %v255_v21 = vld [vmem:[%s1566_s5 + $0xa8] sm:$0xf] }
  0x21   : > { %v257_v22 = vld [vmem:[%s1566_s5 + $0xb0] sm:$0xf]  ;;  %254 = vst [vmem:[%s1570_s6 + $0x50] sm:$0xf] %v253_v20  ;;  %256 = vst [vmem:[%s1570_s6 + $0x54] sm:$0xf] %v255_v21 }
  0x22   : > { %258 = vst [vmem:[%s1570_s6 + $0x58] sm:$0xf] %v257_v22  ;;  %v259_v23 = vld [vmem:[%s1566_s5 + $0xb8] sm:$0xf]  ;;  %v261_v24 = vld [vmem:[%s1566_s5 + $0xc0] sm:$0xf] }
  0x23   : > { %v263_v25 = vld [vmem:[%s1566_s5 + $0xc8] sm:$0xf]  ;;  %260 = vst [vmem:[%s1570_s6 + $0x5c] sm:$0xf] %v259_v23  ;;  %262 = vst [vmem:[%s1570_s6 + $0x60] sm:$0xf] %v261_v24 }
  0x24   : > { %264 = vst [vmem:[%s1570_s6 + $0x64] sm:$0xf] %v263_v25  ;;  %v265_v26 = vld [vmem:[%s1566_s5 + $0xd0] sm:$0xf]  ;;  %v267_v27 = vld [vmem:[%s1566_s5 + $0xd8] sm:$0xf] }
  0x25   : > { %v269_v28 = vld [vmem:[%s1566_s5 + $0xe0] sm:$0xf]  ;;  %266 = vst [vmem:[%s1570_s6 + $0x68] sm:$0xf] %v265_v26  ;;  %268 = vst [vmem:[%s1570_s6 + $0x6c] sm:$0xf] %v267_v27 }
  0x26   : > { %270 = vst [vmem:[%s1570_s6 + $0x70] sm:$0xf] %v269_v28  ;;  %v271_v29 = vld [vmem:[%s1566_s5 + $0xe8] sm:$0xf]  ;;  %v273_v30 = vld [vmem:[%s1566_s5 + $0xf0] sm:$0xf] }
  0x27   : > { %v275_v31 = vld [vmem:[%s1566_s5 + $0xf8] sm:$0xf]  ;;  %272 = vst [vmem:[%s1570_s6 + $0x74] sm:$0xf] %v271_v29  ;;  %274 = vst [vmem:[%s1570_s6 + $0x78] sm:$0xf] %v273_v30 }
  0x28   : > { %276 = vst [vmem:[%s1570_s6 + $0x7c] sm:$0xf] %v275_v31  ;;  %v277_v32 = vld [vmem:[%s1566_s5 + $0x100] sm:$0xf]  ;;  %v279_v33 = vld [vmem:[%s1566_s5 + $0x108] sm:$0xf] }
  0x29   : > { %v281_v34 = vld [vmem:[%s1566_s5 + $0x110] sm:$0xf]  ;;  %278 = vst [vmem:[%s1570_s6 + $0x80] sm:$0xf] %v277_v32  ;;  %280 = vst [vmem:[%s1570_s6 + $0x84] sm:$0xf] %v279_v33 }
  0x2a   : > { %282 = vst [vmem:[%s1570_s6 + $0x88] sm:$0xf] %v281_v34  ;;  %v283_v35 = vld [vmem:[%s1566_s5 + $0x118] sm:$0xf]  ;;  %v285_v36 = vld [vmem:[%s1566_s5 + $0x120] sm:$0xf] }
  0x2b   : > { %v287_v37 = vld [vmem:[%s1566_s5 + $0x128] sm:$0xf]  ;;  %284 = vst [vmem:[%s1570_s6 + $0x8c] sm:$0xf] %v283_v35  ;;  %286 = vst [vmem:[%s1570_s6 + $0x90] sm:$0xf] %v285_v36 }
  0x2c   : > { %288 = vst [vmem:[%s1570_s6 + $0x94] sm:$0xf] %v287_v37  ;;  %v289_v38 = vld [vmem:[%s1566_s5 + $0x130] sm:$0xf]  ;;  %v291_v39 = vld [vmem:[%s1566_s5 + $0x138] sm:$0xf] }
  0x2d   : > { %v293_v40 = vld [vmem:[%s1566_s5 + $0x140] sm:$0xf]  ;;  %290 = vst [vmem:[%s1570_s6 + $0x98] sm:$0xf] %v289_v38  ;;  %292 = vst [vmem:[%s1570_s6 + $0x9c] sm:$0xf] %v291_v39 }
  0x2e   : > { %294 = vst [vmem:[%s1570_s6 + $0xa0] sm:$0xf] %v293_v40  ;;  %v295_v41 = vld [vmem:[%s1566_s5 + $0x148] sm:$0xf]  ;;  %v297_v42 = vld [vmem:[%s1566_s5 + $0x150] sm:$0xf] }
  0x2f   : > { %v299_v43 = vld [vmem:[%s1566_s5 + $0x158] sm:$0xf]  ;;  %296 = vst [vmem:[%s1570_s6 + $0xa4] sm:$0xf] %v295_v41  ;;  %298 = vst [vmem:[%s1570_s6 + $0xa8] sm:$0xf] %v297_v42 }
  0x30   : > { %300 = vst [vmem:[%s1570_s6 + $0xac] sm:$0xf] %v299_v43  ;;  %v301_v44 = vld [vmem:[%s1566_s5 + $0x160] sm:$0xf]  ;;  %v303_v45 = vld [vmem:[%s1566_s5 + $0x168] sm:$0xf] }
  0x31   : > { %v305_v46 = vld [vmem:[%s1566_s5 + $0x170] sm:$0xf]  ;;  %302 = vst [vmem:[%s1570_s6 + $0xb0] sm:$0xf] %v301_v44  ;;  %304 = vst [vmem:[%s1570_s6 + $0xb4] sm:$0xf] %v303_v45 }
  0x32   : > { %306 = vst [vmem:[%s1570_s6 + $0xb8] sm:$0xf] %v305_v46  ;;  %v307_v47 = vld [vmem:[%s1566_s5 + $0x178] sm:$0xf]  ;;  %v309_v48 = vld [vmem:[%s1566_s5 + $0x180] sm:$0xf] }
  0x33   : > { %v311_v49 = vld [vmem:[%s1566_s5 + $0x188] sm:$0xf]  ;;  %308 = vst [vmem:[%s1570_s6 + $0xbc] sm:$0xf] %v307_v47  ;;  %310 = vst [vmem:[%s1570_s6 + $0xc0] sm:$0xf] %v309_v48 }
  0x34   : > { %312 = vst [vmem:[%s1570_s6 + $0xc4] sm:$0xf] %v311_v49  ;;  %v313_v50 = vld [vmem:[%s1566_s5 + $0x190] sm:$0xf]  ;;  %v315_v51 = vld [vmem:[%s1566_s5 + $0x198] sm:$0xf] }
  0x35   : > { %v317_v52 = vld [vmem:[%s1566_s5 + $0x1a0] sm:$0xf]  ;;  %314 = vst [vmem:[%s1570_s6 + $0xc8] sm:$0xf] %v313_v50  ;;  %316 = vst [vmem:[%s1570_s6 + $0xcc] sm:$0xf] %v315_v51 }
  0x36   : > { %318 = vst [vmem:[%s1570_s6 + $0xd0] sm:$0xf] %v317_v52  ;;  %v319_v53 = vld [vmem:[%s1566_s5 + $0x1a8] sm:$0xf]  ;;  %v321_v54 = vld [vmem:[%s1566_s5 + $0x1b0] sm:$0xf] }
  0x37   : > { %v323_v55 = vld [vmem:[%s1566_s5 + $0x1b8] sm:$0xf]  ;;  %320 = vst [vmem:[%s1570_s6 + $0xd4] sm:$0xf] %v319_v53  ;;  %322 = vst [vmem:[%s1570_s6 + $0xd8] sm:$0xf] %v321_v54 }
  0x38   : > { %324 = vst [vmem:[%s1570_s6 + $0xdc] sm:$0xf] %v323_v55  ;;  %v325_v56 = vld [vmem:[%s1566_s5 + $0x1c0] sm:$0xf]  ;;  %v327_v57 = vld [vmem:[%s1566_s5 + $0x1c8] sm:$0xf] }
  0x39   : > { %v329_v58 = vld [vmem:[%s1566_s5 + $0x1d0] sm:$0xf]  ;;  %326 = vst [vmem:[%s1570_s6 + $0xe0] sm:$0xf] %v325_v56  ;;  %328 = vst [vmem:[%s1570_s6 + $0xe4] sm:$0xf] %v327_v57 }
  0x3a   : > { %330 = vst [vmem:[%s1570_s6 + $0xe8] sm:$0xf] %v329_v58  ;;  %v331_v59 = vld [vmem:[%s1566_s5 + $0x1d8] sm:$0xf]  ;;  %v333_v60 = vld [vmem:[%s1566_s5 + $0x1e0] sm:$0xf] }
  0x3b   : > { %v335_v61 = vld [vmem:[%s1566_s5 + $0x1e8] sm:$0xf]  ;;  %332 = vst [vmem:[%s1570_s6 + $0xec] sm:$0xf] %v331_v59  ;;  %334 = vst [vmem:[%s1570_s6 + $0xf0] sm:$0xf] %v333_v60 }
  0x3c   : > { %336 = vst [vmem:[%s1570_s6 + $0xf4] sm:$0xf] %v335_v61  ;;  %v337_v62 = vld [vmem:[%s1566_s5 + $0x1f0] sm:$0xf]  ;;  %v339_v63 = vld [vmem:[%s1566_s5 + $0x1f8] sm:$0xf] }
  0x3d   : > { %338 = vst [vmem:[%s1570_s6 + $0xf8] sm:$0xf] %v337_v62  ;;  %340 = vst [vmem:[%s1570_s6 + $0xfc] sm:$0xf] %v339_v63 }
  0x3e PF: > { %p1247_p8 = scmp.ge.s32.totalorder %s1491_s19, 1  ;;  %p491_p9 = scmp.lt.s32.totalorder %s1491_s19, 3 }
  0x40   : > { %p492_p10 = pnand %p1247_p8, %p491_p9 }
  0x41   : > { %s498_s7 = sand.u32 (!%p492_p10), 1, %s1475_s15   ;;  %p552_p11 = scmp.lt.s32.totalorder (!%p492_p10), %s1483_s17, 1 }
  0x42   : > { %495 = sbr.rel (%p492_p10) target bundleno = 335 (0x14f), region = 65  ;;  %s1248_s8 = sshll.u32 (!%p492_p10), %s498_s7, 8 }
  0x43   : > { %s1709_s13 = scalar_lea.vmem (!%p492_p10), [#allocation2], %s1248_s8  ;;  %s1249_s9 = sshll.u32 (!%p492_p10), %s498_s7, 4 }
  0x44   : > { %s1763_s10 = scalar_lea.vmem (!%p492_p10), [#allocation3], %s1249_s9 }
  0x47   : > { %v1443_v0 = vld [vmem:[%s1800_s0 + $0x4] ss:$16 sps:$4 sm:$0xff]   ;;  %v1446_v1 = vld [vmem:[%s1800_s0 + $0xc] ss:$16 sps:$4 sm:$0xff]   ;;  %v1441_v32 = vld [vmem:[%s1800_s0] ss:$16 sps:$4 sm:$0xff]  }
  0x48   : > { %v1409_v2 = vld [vmem:[%s1709_s13 + $0x78] sm:$0xff]   ;;  %901 = vmatprep.mubr.bf16.mxu0 %v1443_v0  ;;  %950 = vmatprep.mubr.bf16.mxu1 %v1446_v1  ;;  %v1413_v6 = vld [vmem:[%s1709_s13 + $0x70] sm:$0xff]   ;;  %v1417_v10 = vld [vmem:[%s1709_s13 + $0x68] sm:$0xff]   ;;  %s553_s15 = scalar_select %p552_p11, %s1483_s17, 1 }
  0x49   : > { %v1410_v3 = vld [vmem:[%s1709_s13 + $0xf8] sm:$0xff]   ;;  %1313 = vmatprep.subr.bf16.mxu0 %v1409_v2  ;;  %v1414_v7 = vld [vmem:[%s1709_s13 + $0xf0] sm:$0xff]   ;;  %v1418_v11 = vld [vmem:[%s1709_s13 + $0xe8] sm:$0xff]   ;;  %s1295_s22 = sshll.u32 (%p1553_p6), %s1483_s17, 2 }
  0x4a   : > { %v1411_v4 = vld [vmem:[%s1709_s13 + $0x38] sm:$0xff]   ;;  %1341 = vmatprep.subr.bf16.mxu1 %v1410_v3  ;;  %v1415_v8 = vld [vmem:[%s1709_s13 + $0x30] sm:$0xff]   ;;  %v1419_v12 = vld [vmem:[%s1709_s13 + $0x28] sm:$0xff]   ;;  %s556_s12 = scalar_lea.vmem %s1803_s3, %s553_s15  ;;  %s563_s21 = scalar_lea.vmem %s1804_s4, %s553_s15 }
  0x4b   : > { %v1412_v5 = vld [vmem:[%s1709_s13 + $0xb8] sm:$0xff]   ;;  %1314 = vmatpush3.bf16.msra.mxu0 %v1411_v4  ;;  %v1416_v9 = vld [vmem:[%s1709_s13 + $0xb0] sm:$0xff]   ;;  %v1420_v13 = vld [vmem:[%s1709_s13 + $0xa8] sm:$0xff]   ;;  %s1036_s27 = scalar_lea.vmem (%p1553_p6), %s1802_s2, %s1295_s22 }
  0x4c   : > { %1342 = vmatpush3.bf16.msra.mxu1 %v1412_v5  ;;  %1315 = vmatprep.subr.bf16.mxu0 %v1413_v6  ;;  %v1421_v14 = vld [vmem:[%s1709_s13 + $0x60] sm:$0xff]   ;;  %v1425_v18 = vld [vmem:[%s1709_s13 + $0x58] sm:$0xff]   ;;  %v1429_v22 = vld [vmem:[%s1709_s13 + $0x50] sm:$0xff]  }
  0x4d   : > { %1343 = vmatprep.subr.bf16.mxu1 %v1414_v7  ;;  %v1422_v15 = vld [vmem:[%s1709_s13 + $0xe0] sm:$0xff]   ;;  %v1426_v19 = vld [vmem:[%s1709_s13 + $0xd8] sm:$0xff]   ;;  %v1430_v23 = vld [vmem:[%s1709_s13 + $0xd0] sm:$0xff]  }
  0x4e   : > { %v1423_v16 = vld [vmem:[%s1709_s13 + $0x20] sm:$0xff]   ;;  %v1427_v20 = vld [vmem:[%s1709_s13 + $0x18] sm:$0xff]   ;;  %v1431_v24 = vld [vmem:[%s1709_s13 + $0x10] sm:$0xff]  }
  0x4f   : > { %1316 = vmatpush3.bf16.msra.mxu0 %v1415_v8  ;;  %v1424_v17 = vld [vmem:[%s1709_s13 + $0xa0] sm:$0xff]   ;;  %v1428_v21 = vld [vmem:[%s1709_s13 + $0x98] sm:$0xff]   ;;  %v1432_v25 = vld [vmem:[%s1709_s13 + $0x90] sm:$0xff]  }
  0x50   : > { %1344 = vmatpush3.bf16.msra.mxu1 %v1416_v9  ;;  %1317 = vmatprep.subr.bf16.mxu0 %v1417_v10  ;;  %v1433_v26 = vld [vmem:[%s1709_s13 + $0x48] sm:$0xff]   ;;  %v1437_v30 = vld [vmem:[%s1709_s13 + $0x40] sm:$0xff]  }
  0x51   : > { %1345 = vmatprep.subr.bf16.mxu1 %v1418_v11  ;;  %v1434_v27 = vld [vmem:[%s1709_s13 + $0xc8] sm:$0xff]   ;;  %v1438_v31 = vld [vmem:[%s1709_s13 + $0xc0] sm:$0xff]  }
  0x52   : > { %v1435_v28 = vld [vmem:[%s1709_s13 + $0x8] sm:$0xff]   ;;  %v1439_v33 = vld [vmem:[%s1709_s13] sm:$0xff]  }
  0x53   : > { %1318 = vmatpush3.bf16.msra.mxu0 %v1419_v12  ;;  %v1436_v29 = vld [vmem:[%s1709_s13 + $0x88] sm:$0xff]   ;;  %v1440_v35 = vld [vmem:[%s1709_s13 + $0x80] sm:$0xff]  }
  0x54   : > { %1346 = vmatpush3.bf16.msra.mxu1 %v1420_v13  ;;  %1319 = vmatprep.subr.bf16.mxu0 %v1421_v14  ;;  %v1444_v34 = vld [vmem:[%s1800_s0 + $0x8] ss:$16 sps:$4 sm:$0xff]   ;;  %v1447_v36 = vld [vmem:[%s1800_s0 + $0x24] ss:$16 sps:$4 sm:$0xff]   ;;  %v1449_v37 = vld [vmem:[%s1800_s0 + $0x2c] ss:$16 sps:$4 sm:$0xff]  }
  0x55   : > { %1347 = vmatprep.subr.bf16.mxu1 %v1422_v15  ;;  %v1451_v38 = vld [vmem:[%s1800_s0 + $0x20] ss:$16 sps:$4 sm:$0xff]   ;;  %v1452_v39 = vld [vmem:[%s1800_s0 + $0x28] ss:$16 sps:$4 sm:$0xff]  }
  0x57   : > { %1320 = vmatpush3.bf16.msra.mxu0 %v1423_v16 }
  0x58   : > { %1348 = vmatpush3.bf16.msra.mxu1 %v1424_v17  ;;  %1321 = vmatprep.subr.bf16.mxu0 %v1425_v18 }
  0x59   : > { %1349 = vmatprep.subr.bf16.mxu1 %v1426_v19 }
  0x5b   : > { %1322 = vmatpush3.bf16.msra.mxu0 %v1427_v20 }
  0x5c   : > { %1350 = vmatpush3.bf16.msra.mxu1 %v1428_v21  ;;  %1323 = vmatprep.subr.bf16.mxu0 %v1429_v22 }
  0x5d   : > { %1351 = vmatprep.subr.bf16.mxu1 %v1430_v23 }
  0x5f   : > { %1324 = vmatpush3.bf16.msra.mxu0 %v1431_v24 }
  0x60   : > { %1352 = vmatpush3.bf16.msra.mxu1 %v1432_v25  ;;  %1325 = vmatprep.subr.bf16.mxu0 %v1433_v26 }
  0x61   : > { %1353 = vmatprep.subr.bf16.mxu1 %v1434_v27 }
  0x63   : > { %1326 = vmatpush3.bf16.msra.mxu0 %v1435_v28 }
  0x64   : > { %1354 = vmatpush3.bf16.msra.mxu1 %v1436_v29  ;;  %1327 = vmatprep.subr.bf16.mxu0 %v1437_v30 }
  0x65   : > { %1355 = vmatprep.subr.bf16.mxu1 %v1438_v31 }
  0x67   : > { %1328 = vmatpush3.bf16.msra.mxu0 %v1439_v33 }
  0x68   : > { %1356 = vmatpush3.bf16.msra.mxu1 %v1440_v35 }
  0x6a   : > { %902 = vmatmul.mubr.bf16.vlgmr.msra.gmra.mxu0 %v1441_v32 }
  0x6b   : > { %951 = vmatmul.mubr.bf16.vlgmr.msra.gmra.mxu1 %v1444_v34  ;;  %909 = vmatprep.mubr.bf16.mxu0 %v1447_v36 }
  0x6c   : > { %958 = vmatprep.mubr.bf16.mxu1 %v1449_v37 }
  0x72   : > { %910 = vmatmul.mubr.bf16.gmra.mxu0 %v1451_v38 }
  0x73   : > { %959 = vmatmul.mubr.bf16.gmra.mxu1 %v1452_v39 }
 0x12a   : > { %v1329_v40 = vpop.f32.mrf.mxu0 }
 0x12b   : > { %v1357_v41 = vpop.f32.mrf.mxu1 }
 0x12c   : > { %v1330_v42 = vpop.f32.mrf.mxu0 }
 0x12d   : > { %v1358_v43 = vpop.f32.mrf.mxu1  ;;  %v1331_v46 = vadd.f32 %v1330_v42, %v1329_v40 }
 0x12e   : > { %v1332_v44 = vpop.f32.mrf.mxu0  ;;  %v1359_v47 = vadd.f32 %v1358_v43, %v1357_v41 }
 0x12f   : > { %v1360_v45 = vpop.f32.mrf.mxu1 }
 0x130   : > { %v1333_v48 = vpop.f32.mrf.mxu0  ;;  %v953_v54 = vadd.f32 %v1359_v47, %v1331_v46 }
 0x131   : > { %v1334_v49 = vadd.f32 %v1333_v48, %v1332_v44  ;;  %v1361_v50 = vpop.f32.mrf.mxu1 }
 0x132   : > { %v1362_v51 = vadd.f32 %v1361_v50, %v1360_v45  ;;  %v1335_v52 = vpop.f32.mrf.mxu0  ;;  %v997_v4 = vmul.f32 %v953_v54, %v953_v54 }
 0x133   : > { %v1363_v53 = vpop.f32.mrf.mxu1 }
 0x134   : > { %v956_v55 = vadd.f32 %v1362_v51, %v1334_v49  ;;  %v1336_v56 = vpop.f32.mrf.mxu0 }
 0x135   : > { %v1337_v57 = vadd.f32 %v1336_v56, %v1335_v52  ;;  %v1364_v58 = vpop.f32.mrf.mxu1 }
 0x136   : > { %v1305_v59 = vpack.c.bf16 %v956_v55, %v953_v54  ;;  %v1365_v60 = vadd.f32 %v1364_v58, %v1363_v53  ;;  %v1338_v61 = vpop.f32.mrf.mxu0  ;;  %v998_v63 = vmul.f32 %v956_v55, %v956_v55  ;;  %v987_v5 = vadd.f32 %v956_v55, %v953_v54 }
 0x137   : > { %v1366_v62 = vpop.f32.mrf.mxu1 }
 0x138   : > { %1306 = vst [vmem:[%s1763_s10] sm:$0xff] %v1305_v59   ;;  %v961_v0 = vadd.f32 %v1365_v60, %v1337_v57  ;;  %v1339_v1 = vpop.f32.mrf.mxu0  ;;  %v1001_v8 = vadd.f32 %v998_v63, %v997_v4 }
 0x139   : > { %v1340_v2 = vadd.f32 %v1339_v1, %v1338_v61  ;;  %v1367_v3 = vpop.f32.mrf.mxu1 }
 0x13a   : > { %v999_v6 = vmul.f32 %v961_v0, %v961_v0  ;;  %v1368_v7 = vadd.f32 %v1367_v3, %v1366_v62  ;;  %v988_v9 = vadd.f32 %v987_v5, %v961_v0 }
 0x13c   : > { %v964_v10 = vadd.f32 %v1368_v7, %v1340_v2  ;;  %v1002_v11 = vadd.f32 %v1001_v8, %v999_v6 }
 0x13e   : > { %v1310_v12 = vpack.c.bf16 %v964_v10, %v961_v0  ;;  %v989_v13 = vadd.f32 %v988_v9, %v964_v10  ;;  %v1000_v14 = vmul.f32 %v964_v10, %v964_v10 }
 0x13f   : > { %v1053_v28 = vld [vmem:[%s1763_s10] sm:$0xf] (%p1553_p6)  ;;  %v1055_v29 = vld [vmem:[%s1763_s10 + $0x4] sm:$0xf] (%p1553_p6) }
 0x140   : > { %1312 = vst [vmem:[%s1763_s10 + $0x8] sm:$0xff] %v1310_v12   ;;  %v990_v15 = vrot.slane %v989_v13, 4  ;;  %v1003_v16 = vadd.f32 %v1002_v11, %v1000_v14  ;;  %1054 = vst [vmem:[%s1036_s27] sm:$0xf] (%p1553_p6), %v1053_v28 }
 0x141   : > { %1056 = vst [vmem:[%s1036_s27 + $0x8] sm:$0xf] (%p1553_p6), %v1055_v29 }
 0x142   : > { %v991_v17 = vadd.f32 %v990_v15, %v989_v13  ;;  %v1004_v18 = vrot.slane %v1003_v16, 4 }
 0x144   : > { %v992_v19 = vrot.slane %v991_v17, 2  ;;  %v1005_v20 = vadd.f32 %v1004_v18, %v1003_v16 }
 0x146   : > { %v993_v21 = vadd.f32 %v992_v19, %v991_v17  ;;  %v1006_v22 = vrot.slane %v1005_v20, 2 }
 0x147   : > { %v1057_v30 = vld [vmem:[%s1763_s10 + $0x8] sm:$0xf] (%p1553_p6)  ;;  %v1059_v31 = vld [vmem:[%s1763_s10 + $0xc] sm:$0xf] (%p1553_p6) }
 0x148   : > { %v994_v23 = vrot.slane %v993_v21, 1  ;;  %v1007_v24 = vadd.f32 %v1006_v22, %v1005_v20  ;;  %1058 = vst [vmem:[%s1036_s27 + $0x10] sm:$0xf] (%p1553_p6), %v1057_v30  ;;  %1060 = vst [vmem:[%s1036_s27 + $0x18] sm:$0xf] (%p1553_p6), %v1059_v31 }
 0x14a   : > { %v995_v25 = vadd.f32 %v994_v23, %v993_v21  ;;  %v1008_v26 = vrot.slane %v1007_v24, 1  ;;  %1031 = sbr.rel (!%p1553_p6) target bundleno = 335 (0x14f), region = 73 }
 0x14c   : > { %996 = vst [vmem:[%s556_s12] sm:$0x1] %v995_v25  ;;  %v1009_v27 = vadd.f32 %v1008_v26, %v1007_v24 }
 0x14e   : > { %1010 = vst [vmem:[%s563_s21] sm:$0x1] %v1009_v27 }
 0x14f PF: > { %s15_s19 = sadd.s32 1, %s1491_s19   ;;  %s1806_s15 = smov %s1479_s16 }
 0x150   : > { %p12_p12 = scmp.ge.s32.totalorder %s15_s19, 4   ;;  %s1807_s16 = smov %s1558_s25 }
 0x151   : > { %s1808_s17 = smov %s1487_s18  ;;  %s1809_s18 = smov %s1811_s20 }
 0x152   :  { %14 = sbr.rel (!%p12_p12) target bundleno = 3 (0x3), region = 172 }

// kernel: generator_forward.25
= control target key start
LH: loop header
LB: loop body
LE: loop exit
PB: predicated region body
PF: predicated region fallthrough
CT: control target
= control target key end

     0   :  { %s1682_s15 = smov 0   ;;  %s1684_s16 = smov 0   ;;  %s1957_s0 = inlined_call_operand.vmem [shape: bf16[32,1152], index: 0, kind: input, shape index: {}]   ;;  %s1958_s1 = inlined_call_operand.vmem [shape: bf16[1152,128], index: 1, kind: input, shape index: {}]   ;;  %s1959_s2 = inlined_call_operand.vmem [shape: bf16[32,128], index: 2, kind: output, shape index: {0}]   ;;  %s1960_s3 = inlined_call_operand.vmem [shape: f32[2,1,128], index: 3, kind: output, shape index: {1}]   ;;  %s1961_s4 = inlined_call_operand.vmem [shape: f32[2,1,128], index: 4, kind: output, shape index: {2}]  }
   0x1   :  { %s1686_s17 = smov 0  }
   0x2 LB: > { %s27_s18 = sadd.s32 1, %s1649_s16  ;;  %p1305_p0 = scmp.ge.s32.totalorder %s1653_s17, 1  ;;  %s1653_s17 = sphi %s1686_s17, %s15_s17   ;;  %s1649_s16 = sphi %s1684_s16, %s1963_s16   ;;  %s1645_s15 = sphi %s1682_s15, %s1962_s15  }
   0x3   : > { %p29_p1 = scmp.ge.s32.totalorder %s27_s18, 2  ;;  %p196_p2 = scmp.lt.s32.totalorder %s1653_s17, 3 }
   0x5   : > { %s1965_s18 = smov (%p29_p1, %s27_s18), 0  ;;  %p197_p3 = pnand %p1305_p0, %p196_p2 }
   0x6   : > { %s1306_s27 = sshll.u32 (!%p197_p3), %s1645_s15, 1  ;;  %p262_p5 = scmp.lt.s32.totalorder (!%p197_p3), %s1645_s15, 1 }
   0x7   : > { %200 = sbr.rel (%p197_p3) target bundleno = 326 (0x146), region = 28  ;;  %p243_p4 = scmp.lt.s32.totalorder (!%p197_p3), %s1306_s27, 3 }
   0xc   : > { %v1546_v0 = vld [vmem:[%s1958_s1 + $0x78] sm:$0xff]   ;;  %v1550_v4 = vld [vmem:[%s1958_s1 + $0x70] sm:$0xff]   ;;  %v1554_v8 = vld [vmem:[%s1958_s1 + $0x68] sm:$0xff]   ;;  %s1967_s27 = smov (!%p243_p4, %s1306_s27), 3  ;;  %vm1656_vm0 = vmmov 0   ;;  %s1969_s15 = smov (!%p262_p5, %s1645_s15), 1 }
   0xd   : > { %v1547_v1 = vld [vmem:[%s1958_s1 + $0xf8] sm:$0xff]   ;;  %1402 = vmatprep.subr.bf16.mxu0 %v1546_v0  ;;  %v1551_v5 = vld [vmem:[%s1958_s1 + $0xf0] sm:$0xff]   ;;  %v1555_v9 = vld [vmem:[%s1958_s1 + $0xe8] sm:$0xff]   ;;  %s1519_s29 = smul.u32 36, %s1967_s27  ;;  %s267_s28 = scalar_lea.vmem %s1960_s3, %s1969_s15 }
   0xe   : > { %v1548_v2 = vld [vmem:[%s1958_s1 + $0x38] sm:$0xff]   ;;  %1424 = vmatprep.subr.bf16.mxu1 %v1547_v1  ;;  %v1552_v6 = vld [vmem:[%s1958_s1 + $0x30] sm:$0xff]   ;;  %v1556_v10 = vld [vmem:[%s1958_s1 + $0x28] sm:$0xff]   ;;  %s273_s5 = scalar_lea.vmem %s1961_s4, %s1969_s15 }
   0xf   : > { %v1549_v3 = vld [vmem:[%s1958_s1 + $0xb8] sm:$0xff]   ;;  %1403 = vmatpush3.bf16.msra.mxu0 %v1548_v2  ;;  %v1553_v7 = vld [vmem:[%s1958_s1 + $0xb0] sm:$0xff]   ;;  %v1557_v11 = vld [vmem:[%s1958_s1 + $0xa8] sm:$0xff]   ;;  %s1799_s14 = scalar_lea.vmem %s1957_s0, %s1519_s29 }
  0x10   : > { %1425 = vmatpush3.bf16.msra.mxu1 %v1549_v3  ;;  %1404 = vmatprep.subr.bf16.mxu0 %v1550_v4  ;;  %v1558_v12 = vld [vmem:[%s1958_s1 + $0x60] sm:$0xff]   ;;  %v1562_v16 = vld [vmem:[%s1958_s1 + $0x58] sm:$0xff]   ;;  %v1566_v20 = vld [vmem:[%s1958_s1 + $0x50] sm:$0xff]  }
  0x11   : > { %1426 = vmatprep.subr.bf16.mxu1 %v1551_v5  ;;  %v1559_v13 = vld [vmem:[%s1958_s1 + $0xe0] sm:$0xff]   ;;  %v1563_v17 = vld [vmem:[%s1958_s1 + $0xd8] sm:$0xff]   ;;  %v1567_v21 = vld [vmem:[%s1958_s1 + $0xd0] sm:$0xff]  }
  0x12   : > { %v1560_v14 = vld [vmem:[%s1958_s1 + $0x20] sm:$0xff]   ;;  %v1564_v18 = vld [vmem:[%s1958_s1 + $0x18] sm:$0xff]   ;;  %v1568_v22 = vld [vmem:[%s1958_s1 + $0x10] sm:$0xff]  }
  0x13   : > { %1405 = vmatpush3.bf16.msra.mxu0 %v1552_v6  ;;  %v1561_v15 = vld [vmem:[%s1958_s1 + $0xa0] sm:$0xff]   ;;  %v1565_v19 = vld [vmem:[%s1958_s1 + $0x98] sm:$0xff]   ;;  %v1569_v23 = vld [vmem:[%s1958_s1 + $0x90] sm:$0xff]   ;;  %v1655_v6 = vmov 0.0  }
  0x14   : > { %1427 = vmatpush3.bf16.msra.mxu1 %v1553_v7  ;;  %1406 = vmatprep.subr.bf16.mxu0 %v1554_v8  ;;  %v1570_v24 = vld [vmem:[%s1958_s1 + $0x48] sm:$0xff]   ;;  %v1574_v28 = vld [vmem:[%s1958_s1 + $0x40] sm:$0xff]   ;;  %v1584_v36 = vld [vmem:[%s1958_s1 + $0x178] sm:$0xff]  }
  0x15   : > { %1428 = vmatprep.subr.bf16.mxu1 %v1555_v9  ;;  %v1571_v25 = vld [vmem:[%s1958_s1 + $0xc8] sm:$0xff]   ;;  %v1575_v29 = vld [vmem:[%s1958_s1 + $0xc0] sm:$0xff]   ;;  %v1585_v37 = vld [vmem:[%s1958_s1 + $0x138] sm:$0xff]  }
  0x16   : > { %v1572_v26 = vld [vmem:[%s1958_s1 + $0x8] sm:$0xff]   ;;  %v1576_v30 = vld [vmem:[%s1958_s1] sm:$0xff]   ;;  %v1586_v38 = vld [vmem:[%s1958_s1 + $0x1f8] sm:$0xff]  }
  0x17   : > { %1407 = vmatpush3.bf16.msra.mxu0 %v1556_v10  ;;  %v1573_v27 = vld [vmem:[%s1958_s1 + $0x88] sm:$0xff]   ;;  %v1577_v31 = vld [vmem:[%s1958_s1 + $0x80] sm:$0xff]   ;;  %v1587_v39 = vld [vmem:[%s1958_s1 + $0x1b8] sm:$0xff]  }
  0x18   : > { %1429 = vmatpush3.bf16.msra.mxu1 %v1557_v11  ;;  %1408 = vmatprep.subr.bf16.mxu0 %v1558_v12  ;;  %v1578_v32 = vld [vmem:[%s1799_s14] ss:$36 sps:$4 sm:$0xff]   ;;  %v1581_v34 = vld [vmem:[%s1799_s14 + $0x8] ss:$36 sps:$4 sm:$0xff]   ;;  %v1588_v40 = vld [vmem:[%s1958_s1 + $0x170] sm:$0xff]  }
  0x19   : > { %1430 = vmatprep.subr.bf16.mxu1 %v1559_v13  ;;  %v1580_v33 = vld [vmem:[%s1799_s14 + $0x4] ss:$36 sps:$4 sm:$0xff]   ;;  %v1583_v35 = vld [vmem:[%s1799_s14 + $0xc] ss:$36 sps:$4 sm:$0xff]   ;;  %v1600_v52 = vld [vmem:[%s1958_s1 + $0x158] sm:$0xff]  }
  0x1a   : > { %939 = vmatprep.mubr.bf16.mxu0 %v1580_v33  ;;  %980 = vmatprep.mubr.bf16.mxu1 %v1583_v35  ;;  %v1589_v41 = vld [vmem:[%s1958_s1 + $0x130] sm:$0xff]   ;;  %v1592_v44 = vld [vmem:[%s1958_s1 + $0x168] sm:$0xff]   ;;  %v1596_v48 = vld [vmem:[%s1958_s1 + $0x160] sm:$0xff]  }
  0x1b   : > { %1409 = vmatpush3.bf16.msra.mxu0 %v1560_v14  ;;  %v1590_v42 = vld [vmem:[%s1958_s1 + $0x1f0] sm:$0xff]   ;;  %v1593_v45 = vld [vmem:[%s1958_s1 + $0x128] sm:$0xff]   ;;  %v1597_v49 = vld [vmem:[%s1958_s1 + $0x120] sm:$0xff]  }
  0x1c   : > { %1431 = vmatpush3.bf16.msra.mxu1 %v1561_v15  ;;  %1410 = vmatprep.subr.bf16.mxu0 %v1562_v16  ;;  %v1591_v43 = vld [vmem:[%s1958_s1 + $0x1b0] sm:$0xff]   ;;  %v1594_v46 = vld [vmem:[%s1958_s1 + $0x1e8] sm:$0xff]   ;;  %v1598_v50 = vld [vmem:[%s1958_s1 + $0x1e0] sm:$0xff]  }
  0x1d   : > { %1432 = vmatprep.subr.bf16.mxu1 %v1563_v17  ;;  %v1595_v47 = vld [vmem:[%s1958_s1 + $0x1a8] sm:$0xff]   ;;  %v1599_v51 = vld [vmem:[%s1958_s1 + $0x1a0] sm:$0xff]   ;;  %v1601_v53 = vld [vmem:[%s1958_s1 + $0x118] sm:$0xff]  }
  0x1e   : > { %v1602_v54 = vld [vmem:[%s1958_s1 + $0x1d8] sm:$0xff]   ;;  %v1604_v56 = vld [vmem:[%s1958_s1 + $0x150] sm:$0xff]   ;;  %v1608_v60 = vld [vmem:[%s1958_s1 + $0x148] sm:$0xff]  }
  0x1f   : > { %1411 = vmatpush3.bf16.msra.mxu0 %v1564_v18  ;;  %v1603_v55 = vld [vmem:[%s1958_s1 + $0x198] sm:$0xff]   ;;  %v1605_v57 = vld [vmem:[%s1958_s1 + $0x110] sm:$0xff]   ;;  %v1609_v61 = vld [vmem:[%s1958_s1 + $0x108] sm:$0xff]  }
  0x20   : > { %1433 = vmatpush3.bf16.msra.mxu1 %v1565_v19  ;;  %1412 = vmatprep.subr.bf16.mxu0 %v1566_v20  ;;  %v1606_v58 = vld [vmem:[%s1958_s1 + $0x1d0] sm:$0xff]   ;;  %v1610_v62 = vld [vmem:[%s1958_s1 + $0x1c8] sm:$0xff]   ;;  %v1612_v0 = vld [vmem:[%s1958_s1 + $0x140] sm:$0xff]  }
  0x21   : > { %1434 = vmatprep.subr.bf16.mxu1 %v1567_v21  ;;  %v1607_v59 = vld [vmem:[%s1958_s1 + $0x190] sm:$0xff]   ;;  %v1611_v63 = vld [vmem:[%s1958_s1 + $0x188] sm:$0xff]   ;;  %v1613_v1 = vld [vmem:[%s1958_s1 + $0x100] sm:$0xff]  }
  0x22   : > { %v1614_v2 = vld [vmem:[%s1958_s1 + $0x1c0] sm:$0xff]   ;;  %v1615_v3 = vld [vmem:[%s1799_s14 + $0x10] ss:$36 sps:$4 sm:$0xff]   ;;  %v1619_v7 = vld [vmem:[%s1799_s14 + $0x18] ss:$36 sps:$4 sm:$0xff]  }
  0x23   : > { %1413 = vmatpush3.bf16.msra.mxu0 %v1568_v22  ;;  %v1617_v4 = vld [vmem:[%s1799_s14 + $0x14] ss:$36 sps:$4 sm:$0xff]   ;;  %v1618_v5 = vld [vmem:[%s1958_s1 + $0x180] sm:$0xff]   ;;  %v1624_v11 = vld [vmem:[%s1958_s1 + $0x228] sm:$0xff]  }
  0x24   : > { %1435 = vmatpush3.bf16.msra.mxu1 %v1569_v23  ;;  %1414 = vmatprep.subr.bf16.mxu0 %v1570_v24  ;;  %v1621_v8 = vld [vmem:[%s1799_s14 + $0x1c] ss:$36 sps:$4 sm:$0xff]   ;;  %v1623_v10 = vld [vmem:[%s1958_s1 + $0x230] sm:$0xff]   ;;  %v1628_v15 = vld [vmem:[%s1958_s1 + $0x208] sm:$0xff]  }
  0x25   : > { %1436 = vmatprep.subr.bf16.mxu1 %v1571_v25  ;;  %v1622_v9 = vld [vmem:[%s1958_s1 + $0x238] sm:$0xff]   ;;  %v1625_v12 = vld [vmem:[%s1958_s1 + $0x220] sm:$0xff]   ;;  %v1627_v14 = vld [vmem:[%s1958_s1 + $0x210] sm:$0xff]  }
  0x26   : > { %v1626_v13 = vld [vmem:[%s1958_s1 + $0x218] sm:$0xff]   ;;  %v1629_v16 = vld [vmem:[%s1958_s1 + $0x200] sm:$0xff]  }
  0x27   : > { %1415 = vmatpush3.bf16.msra.mxu0 %v1572_v26  ;;  %v1630_v17 = vld [vmem:[%s1799_s14 + $0x20] ss:$36 sps:$4 sm:$0xff]   ;;  %s1309_s14 = sshll.u32 %s1967_s27, 2 }
  0x28   : > { %1437 = vmatpush3.bf16.msra.mxu1 %v1573_v27  ;;  %1416 = vmatprep.subr.bf16.mxu0 %v1574_v28  ;;  %s260_s25 = scalar_lea.vmem %s1959_s2, %s1309_s14 }
  0x29   : > { %1438 = vmatprep.subr.bf16.mxu1 %v1575_v29 }
  0x2b   : > { %1417 = vmatpush3.bf16.msra.mxu0 %v1576_v30 }
  0x2c   : > { %1439 = vmatpush3.bf16.msra.mxu1 %v1577_v31  ;;  %1446 = vmatprep.subr.bf16.mxu0 %v1584_v36 }
  0x2d   : > { %1468 = vmatprep.subr.bf16.mxu1 %v1586_v38 }
  0x2e   : > { %940 = vmatmul.mubr.bf16.vlgmr.msra.gmra.mxu0 %v1578_v32 }
  0x2f   : > { %981 = vmatmul.mubr.bf16.vlgmr.msra.gmra.mxu1 %v1581_v34  ;;  %1447 = vmatpush3.bf16.msra.mxu0 %v1585_v37 }
  0x30   : > { %1469 = vmatpush3.bf16.msra.mxu1 %v1587_v39  ;;  %1448 = vmatprep.subr.bf16.mxu0 %v1588_v40 }
  0x31   : > { %1470 = vmatprep.subr.bf16.mxu1 %v1590_v42  ;;  %1021 = vmatprep.mubr.bf16.mxu0 %v1617_v4 }
  0x32   : > { %1062 = vmatprep.mubr.bf16.mxu1 %v1621_v8 }
  0x33   : > { %1449 = vmatpush3.bf16.msra.mxu0 %v1589_v41 }
  0x34   : > { %1471 = vmatpush3.bf16.msra.mxu1 %v1591_v43  ;;  %1450 = vmatprep.subr.bf16.mxu0 %v1592_v44 }
  0x35   : > { %1472 = vmatprep.subr.bf16.mxu1 %v1594_v46 }
  0x37   : > { %1451 = vmatpush3.bf16.msra.mxu0 %v1593_v45 }
  0x38   : > { %1473 = vmatpush3.bf16.msra.mxu1 %v1595_v47  ;;  %1452 = vmatprep.subr.bf16.mxu0 %v1596_v48 }
  0x39   : > { %1474 = vmatprep.subr.bf16.mxu1 %v1598_v50 }
  0x3b   : > { %1453 = vmatpush3.bf16.msra.mxu0 %v1597_v49 }
  0x3c   : > { %1475 = vmatpush3.bf16.msra.mxu1 %v1599_v51  ;;  %1454 = vmatprep.subr.bf16.mxu0 %v1600_v52 }
  0x3d   : > { %1476 = vmatprep.subr.bf16.mxu1 %v1602_v54 }
  0x3f   : > { %1455 = vmatpush3.bf16.msra.mxu0 %v1601_v53 }
  0x40   : > { %1477 = vmatpush3.bf16.msra.mxu1 %v1603_v55  ;;  %1456 = vmatprep.subr.bf16.mxu0 %v1604_v56 }
  0x41   : > { %1478 = vmatprep.subr.bf16.mxu1 %v1606_v58 }
  0x43   : > { %1457 = vmatpush3.bf16.msra.mxu0 %v1605_v57 }
  0x44   : > { %1479 = vmatpush3.bf16.msra.mxu1 %v1607_v59  ;;  %1458 = vmatprep.subr.bf16.mxu0 %v1608_v60 }
  0x45   : > { %1480 = vmatprep.subr.bf16.mxu1 %v1610_v62 }
  0x47   : > { %1459 = vmatpush3.bf16.msra.mxu0 %v1609_v61 }
  0x48   : > { %1481 = vmatpush3.bf16.msra.mxu1 %v1611_v63  ;;  %1460 = vmatprep.subr.bf16.mxu0 %v1612_v0 }
  0x49   : > { %1482 = vmatprep.subr.bf16.mxu1 %v1614_v2 }
  0x4b   : > { %1461 = vmatpush3.bf16.msra.mxu0 %v1613_v1 }
  0x4c   : > { %1499 = vmatprep.subr.bf16.mxu0 %v1655_v6  ;;  %1483 = vmatpush3.bf16.msra.mxu1 %v1618_v5 }
  0x4e   : > { %1022 = vmatmul.mubr.bf16.vlgmr.msra.gmra.mxu0 %v1615_v3 }
  0x4f   : > { %1515 = vmatprep.mubr.msk.bf16.mxu0 %vm1656_vm0, %v1655_v6  ;;  %1500 = vmatpush3.bf16.msra.mxu0 %v1622_v9 }
  0x50   : > { %1063 = vmatmul.mubr.bf16.vlgmr.msra.gmra.mxu1 %v1619_v7  ;;  %1501 = vmatprep.subr.bf16.mxu0 %v1655_v6 }
  0x53   : > { %1502 = vmatpush3.bf16.msra.mxu0 %v1623_v10 }
  0x54   : > { %1503 = vmatprep.subr.bf16.mxu0 %v1655_v6 }
  0x57   : > { %1504 = vmatpush3.bf16.msra.mxu0 %v1624_v11 }
  0x58   : > { %1505 = vmatprep.subr.bf16.mxu0 %v1655_v6 }
  0x5b   : > { %1506 = vmatpush3.bf16.msra.mxu0 %v1625_v12 }
  0x5c   : > { %1507 = vmatprep.subr.bf16.mxu0 %v1655_v6 }
  0x5f   : > { %1508 = vmatpush3.bf16.msra.mxu0 %v1626_v13 }
  0x60   : > { %1509 = vmatprep.subr.bf16.mxu0 %v1655_v6 }
  0x63   : > { %1510 = vmatpush3.bf16.msra.mxu0 %v1627_v14 }
  0x64   : > { %1511 = vmatprep.subr.bf16.mxu0 %v1655_v6 }
  0x67   : > { %1512 = vmatpush3.bf16.msra.mxu0 %v1628_v15 }
  0x68   : > { %1513 = vmatprep.subr.bf16.mxu0 %v1655_v6 }
  0x6b   : > { %1514 = vmatpush3.bf16.msra.mxu0 %v1629_v16 }
  0x6e   : > { %1516 = vmatmul.mubr.bf16.vlgmr.msra.gmra.mxu0 %v1630_v17 }
  0xee   : > { %v1418_v18 = vpop.f32.mrf.mxu0 }
  0xef   : > { %v1440_v19 = vpop.f32.mrf.mxu1 }
  0xf0   : > { %v1419_v20 = vpop.f32.mrf.mxu0 }
  0xf1   : > { %v1441_v21 = vpop.f32.mrf.mxu1  ;;  %v1420_v31 = vadd.f32 %v1419_v20, %v1418_v18 }
  0xf2   : > { %v1421_v22 = vpop.f32.mrf.mxu0  ;;  %v1442_v32 = vadd.f32 %v1441_v21, %v1440_v19 }
  0xf3   : > { %v1443_v23 = vpop.f32.mrf.mxu1 }
  0xf4   : > { %v1422_v24 = vpop.f32.mrf.mxu0  ;;  %v983_v38 = vadd.f32 %v1442_v32, %v1420_v31 }
  0xf5   : > { %v1444_v26 = vpop.f32.mrf.mxu1  ;;  %v1423_v35 = vadd.f32 %v1422_v24, %v1421_v22 }
  0xf6   : > { %v1445_v36 = vadd.f32 %v1444_v26, %v1443_v23 }
  0xf8   : > { %v986_v41 = vadd.f32 %v1445_v36, %v1423_v35 }
 0x10e   : > { %v1462_v25 = vpop.f32.mrf.mxu0 }
 0x110   : > { %v1463_v27 = vpop.f32.mrf.mxu0  ;;  %v1484_v28 = vpop.f32.mrf.mxu1 }
 0x111   : > { %v1464_v37 = vadd.f32 %v1463_v27, %v1462_v25 }
 0x112   : > { %v1465_v29 = vpop.f32.mrf.mxu0  ;;  %v1485_v30 = vpop.f32.mrf.mxu1 }
 0x113   : > { %v1024_v42 = vadd.f32 %v1464_v37, %v983_v38  ;;  %v1486_v43 = vadd.f32 %v1485_v30, %v1484_v28 }
 0x114   : > { %v1466_v33 = vpop.f32.mrf.mxu0  ;;  %v1487_v34 = vpop.f32.mrf.mxu1 }
 0x115   : > { %v1467_v39 = vadd.f32 %v1466_v33, %v1465_v29  ;;  %v1065_v47 = vadd.f32 %v1486_v43, %v1024_v42 }
 0x116   : > { %v1488_v40 = vpop.f32.mrf.mxu1 }
 0x117   : > { %v1027_v44 = vadd.f32 %v1467_v39, %v986_v41  ;;  %v1489_v45 = vadd.f32 %v1488_v40, %v1487_v34 }
 0x119   : > { %v1068_v50 = vadd.f32 %v1489_v45, %v1027_v44 }
 0x12e   : > { %v1105_v46 = vpop.f32.mrf.mxu0 }
 0x12f   : > { %v1106_v49 = vadd.f32 %v1105_v46, %v1065_v47 }
 0x130   : > { %v1517_v48 = vpop.f32.mrf.mxu0 }
 0x131   : > { %v1130_v54 = vmul.f32 %v1106_v49, %v1106_v49 }
 0x132   : > { %v1108_v51 = vpop.f32.mrf.mxu0 }
 0x133   : > { %v1109_v52 = vadd.f32 %v1108_v51, %v1068_v50 }
 0x134   : > { %v1518_v53 = vpop.f32.mrf.mxu0 }
 0x135   : > { %v1400_v55 = vpack.c.bf16 %v1109_v52, %v1106_v49  ;;  %v1122_v56 = vadd.f32 %v1109_v52, %v1106_v49  ;;  %v1131_v57 = vmul.f32 %v1109_v52, %v1109_v52 }
 0x137   : > { %1401 = vst [vmem:[%s260_s25] sm:$0xff] %v1400_v55   ;;  %v1123_v58 = vrot.slane %v1122_v56, 4  ;;  %v1132_v59 = vadd.f32 %v1131_v57, %v1130_v54 }
 0x139   : > { %v1124_v60 = vadd.f32 %v1123_v58, %v1122_v56  ;;  %v1133_v61 = vrot.slane %v1132_v59, 4 }
 0x13b   : > { %v1125_v62 = vrot.slane %v1124_v60, 2  ;;  %v1134_v63 = vadd.f32 %v1133_v61, %v1132_v59 }
 0x13d   : > { %v1126_v0 = vadd.f32 %v1125_v62, %v1124_v60  ;;  %v1135_v1 = vrot.slane %v1134_v63, 2 }
 0x13f   : > { %v1127_v2 = vrot.slane %v1126_v0, 1  ;;  %v1136_v3 = vadd.f32 %v1135_v1, %v1134_v63 }
 0x141   : > { %v1128_v4 = vadd.f32 %v1127_v2, %v1126_v0  ;;  %v1137_v5 = vrot.slane %v1136_v3, 1 }
 0x143   : > { %1129 = vst [vmem:[%s267_s28] sm:$0x1] %v1128_v4  ;;  %v1138_v6 = vadd.f32 %v1137_v5, %v1136_v3 }
 0x145   : > { %1139 = vst [vmem:[%s273_s5] sm:$0x1] %v1138_v6 }
 0x146 PF: > { %s15_s17 = sadd.s32 1, %s1653_s17   ;;  %s1962_s15 = smov %s1649_s16 }
 0x147   : > { %p12_p6 = scmp.ge.s32.totalorder %s15_s17, 4   ;;  %s1963_s16 = smov %s1965_s18 }
 0x149   :  { %14 = sbr.rel (!%p12_p6) target bundleno = 2 (0x2), region = 85 }

// kernel: generator_forward.34
= control target key start
LH: loop header
LB: loop body
LE: loop exit
PB: predicated region body
PF: predicated region fallthrough
CT: control target
= control target key end

     0   :  { %s348_s12 = smov 0   ;;  %s374_s0 = inlined_call_operand.vmem [shape: bf16[32,256], index: 0, kind: input, shape index: {}]   ;;  %s375_s1 = inlined_call_operand.vmem [shape: f32[1,256], index: 1, kind: input, shape index: {}]   ;;  %s376_s2 = inlined_call_operand.vmem [shape: f32[1,256], index: 2, kind: input, shape index: {}]   ;;  %s377_s3 = inlined_call_operand.vmem [shape: bf16[32,256], index: 3, kind: output, shape index: {}]  }
   0x1 LB: > { %s293_s13 = sadd.s32 4294967295, %s326_s12   ;;  %p297_p0 = scmp.ge.s32.totalorder %s326_s12, 1  ;;  %s326_s12 = sphi %s348_s12, %s13_s12  }
   0x2   : > { %p139_p1 = scmp.lt.s32.totalorder %s326_s12, 3 }
   0x4   : > { %p140_p2 = pnand %p297_p0, %p139_p1 }
   0x5   : > { %s298_s14 = sshll.u32 (!%p140_p2), %s293_s13, 1 }
   0x6   : > { %143 = sbr.rel (%p140_p2) target bundleno = 28 (0x1c), region = 32  ;;  %p166_p3 = scmp.lt.s32.totalorder (!%p140_p2), %s298_s14, 3 }
   0xb   : > { %v187_v0 = vlaneseq  ;;  %s379_s14 = smov (!%p166_p3, %s298_s14), 3  ;;  %v185_v2 = vld [vmem:[%s375_s1] sm:$0x3] }
   0xc   : > { %v201_v5 = vld [vmem:[%s376_s2] sm:$0x3]  ;;  %s308_s19 = sshll.u32 %s379_s14, 3 }
   0xd   : > { %v188_v1 = vshrl.u32 %v187_v0, 7  ;;  %s170_s22 = scalar_lea.vmem %s374_s0, %s308_s19  ;;  %s177_s25 = scalar_lea.vmem %s377_s3, %s308_s19 }
   0xe   : > { %v179_v8 = vld [vmem:[%s170_s22] sm:$0xff]  ;;  %v180_v9 = vld [vmem:[%s170_s22 + $0x8] sm:$0xff] }
   0xf   : > { %v189_v3 = vsub.s32 0, %v188_v1  ;;  %v193_v4 = vsub.s32 1, %v188_v1  ;;  %v181_v12 = vunpack.c.l.bf16 %v179_v8  ;;  %v182_v13 = vunpack.c.h.bf16 %v179_v8 }
  0x10   : > { %v183_v14 = vunpack.c.l.bf16 %v180_v9  ;;  %v184_v15 = vunpack.c.h.bf16 %v180_v9 }
  0x11   : > { %v190_v6 = vrot.slane %v185_v2, %v189_v3  ;;  %v194_v7 = vrot.slane %v185_v2, %v193_v4  ;;  %v206_v10 = vrot.slane %v201_v5, %v189_v3  ;;  %v210_v11 = vrot.slane %v201_v5, %v193_v4 }
  0x13   : > { %v197_v16 = vmul.f32 %v190_v6, %v181_v12  ;;  %v198_v17 = vmul.f32 %v194_v7, %v182_v13  ;;  %v199_v18 = vmul.f32 %v190_v6, %v183_v14  ;;  %v200_v19 = vmul.f32 %v194_v7, %v184_v15 }
  0x15   : > { %v213_v20 = vadd.f32 %v206_v10, %v197_v16  ;;  %v214_v21 = vadd.f32 %v210_v11, %v198_v17  ;;  %v215_v22 = vadd.f32 %v206_v10, %v199_v18  ;;  %v216_v23 = vadd.f32 %v210_v11, %v200_v19 }
  0x17   : > { %v217_v24 = vmax.f32 %v213_v20, 0.0  ;;  %v218_v25 = vmax.f32 %v214_v21, 0.0  ;;  %v219_v26 = vmax.f32 %v215_v22, 0.0  ;;  %v220_v27 = vmax.f32 %v216_v23, 0.0 }
  0x19   : > { %v310_v28 = vpack.c.bf16 %v218_v25, %v217_v24  ;;  %v311_v29 = vpack.c.bf16 %v220_v27, %v219_v26 }
  0x1b   : > { %233 = vst [vmem:[%s177_s25] sm:$0xff] %v310_v28  ;;  %234 = vst [vmem:[%s177_s25 + $0x8] sm:$0xff] %v311_v29 }
  0x1c PF: > { %s13_s12 = sadd.s32 1, %s326_s12  }
  0x1d   : > { %p10_p4 = scmp.ge.s32.totalorder %s13_s12, 4  }
  0x1f   :  { %12 = sbr.rel (!%p10_p4) target bundleno = 1 (0x1), region = 62 }

// kernel: tile.38
= control target key start
LH: loop header
LB: loop body
LE: loop exit
PB: predicated region body
PF: predicated region fallthrough
CT: control target
= control target key end

     0   :  { %s22_s0 = inlined_call_operand.vmem [shape: f32[32], index: 0, kind: input, shape index: {}]   ;;  %s23_s1 = inlined_call_operand.vmem [shape: f32[4,32], index: 1, kind: output, shape index: {}]  }
   0x1   :  { %v4_v0 = vld [vmem:[%s22_s0] ss:$0 sm:$0xff] }
   0x2   :  { %5 = vst [vmem:[%s23_s1] sm:$0xf] %v4_v0 }

// kernel: generator_forward.35
= control target key start
LH: loop header
LB: loop body
LE: loop exit
PB: predicated region body
PF: predicated region fallthrough
CT: control target
= control target key end

     0   :  { %s986_s15 = smov 0   ;;  %s988_s16 = smov 0   ;;  %s1098_s0 = inlined_call_operand.vmem [shape: bf16[128,256], index: 0, kind: input, shape index: {}]   ;;  %s1099_s1 = inlined_call_operand.vmem [shape: bf16[256,128], index: 1, kind: input, shape index: {}]   ;;  %s1100_s2 = inlined_call_operand.vmem [shape: bf16[128,128], index: 2, kind: output, shape index: {0}]   ;;  %s1101_s3 = inlined_call_operand.vmem [shape: f32[2,1,128], index: 3, kind: output, shape index: {1}]   ;;  %s1102_s4 = inlined_call_operand.vmem [shape: f32[2,1,128], index: 4, kind: output, shape index: {2}]  }
   0x1   :  { %s990_s17 = smov 0  }
   0x2 LB: > { %s27_s18 = sadd.s32 1, %s955_s16  ;;  %p757_p0 = scmp.ge.s32.totalorder %s959_s17, 1  ;;  %s959_s17 = sphi %s990_s17, %s15_s17   ;;  %s955_s16 = sphi %s988_s16, %s1104_s16   ;;  %s951_s15 = sphi %s986_s15, %s1103_s15  }
   0x3   : > { %p29_p1 = scmp.ge.s32.totalorder %s27_s18, 2  ;;  %p196_p2 = scmp.lt.s32.totalorder %s959_s17, 3 }
   0x5   : > { %s1106_s18 = smov (%p29_p1, %s27_s18), 0  ;;  %p197_p3 = pnand %p757_p0, %p196_p2 }
   0x6   : > { %s758_s21 = sshll.u32 (!%p197_p3), %s951_s15, 3  ;;  %p262_p5 = scmp.lt.s32.totalorder (!%p197_p3), %s951_s15, 1 }
   0x7   : > { %200 = sbr.rel (%p197_p3) target bundleno = 279 (0x117), region = 28  ;;  %p243_p4 = scmp.lt.s32.totalorder (!%p197_p3), %s758_s21, 15 }
   0xc   : > { %v909_v0 = vld [vmem:[%s1099_s1 + $0x78] sm:$0xff]   ;;  %v911_v2 = vld [vmem:[%s1099_s1 + $0x70] sm:$0xff]   ;;  %v913_v4 = vld [vmem:[%s1099_s1 + $0x68] sm:$0xff]   ;;  %s1108_s21 = smov (!%p243_p4, %s758_s21), 15  ;;  %s1110_s15 = smov (!%p262_p5, %s951_s15), 1 }
   0xd   : > { %v910_v1 = vld [vmem:[%s1099_s1 + $0x38] sm:$0xff]   ;;  %829 = vmatprep.subr.bf16.mxu0 %v909_v0  ;;  %869 = vmatprep.subr.bf16.mxu1 %v909_v0  ;;  %v912_v3 = vld [vmem:[%s1099_s1 + $0x30] sm:$0xff]   ;;  %v914_v5 = vld [vmem:[%s1099_s1 + $0x28] sm:$0xff]   ;;  %s797_s10 = sshll.u32 %s1108_s21, 3  ;;  %s762_s9 = sshll.u32 %s1108_s21, 2 }
   0xe   : > { %830 = vmatpush3.bf16.msra.mxu0 %v910_v1  ;;  %877 = vmatpush3.bf16.msra.mxu1 %v910_v1  ;;  %v915_v6 = vld [vmem:[%s1099_s1 + $0x60] sm:$0xff]   ;;  %v917_v8 = vld [vmem:[%s1099_s1 + $0x58] sm:$0xff]   ;;  %s1040_s19 = scalar_lea.vmem %s1098_s0, %s797_s10  ;;  %v919_v10 = vld [vmem:[%s1099_s1 + $0x50] sm:$0xff]   ;;  %s1075_s12 = scalar_lea.vmem %s1100_s2, %s762_s9 }
   0xf   : > { %831 = vmatprep.subr.bf16.mxu0 %v911_v2  ;;  %870 = vmatprep.subr.bf16.mxu1 %v911_v2  ;;  %v916_v7 = vld [vmem:[%s1099_s1 + $0x20] sm:$0xff]   ;;  %v918_v9 = vld [vmem:[%s1099_s1 + $0x18] sm:$0xff]   ;;  %v920_v13 = vld [vmem:[%s1099_s1 + $0x10] sm:$0xff]   ;;  %s267_s14 = scalar_lea.vmem %s1101_s3, %s1110_s15  ;;  %s273_s22 = scalar_lea.vmem %s1102_s4, %s1110_s15 }
  0x10   : > { %v927_v11 = vld [vmem:[%s1040_s19 + $0x4] ss:$8 sps:$4 sm:$0xff]   ;;  %v925_v18 = vld [vmem:[%s1040_s19] ss:$8 sps:$4 sm:$0xff]   ;;  %v931_v20 = vld [vmem:[%s1040_s19 + $0x14] ss:$8 sps:$4 sm:$0xff]  }
  0x11   : > { %v930_v12 = vld [vmem:[%s1040_s19 + $0x24] ss:$8 sps:$4 sm:$0xff]   ;;  %483 = vmatprep.mubr.bf16.mxu0 %v927_v11  ;;  %v928_v19 = vld [vmem:[%s1040_s19 + $0x20] ss:$8 sps:$4 sm:$0xff]   ;;  %v934_v21 = vld [vmem:[%s1040_s19 + $0x34] ss:$8 sps:$4 sm:$0xff]  }
  0x12   : > { %832 = vmatpush3.bf16.msra.mxu0 %v912_v3  ;;  %878 = vmatpush3.bf16.msra.mxu1 %v912_v3  ;;  %v921_v14 = vld [vmem:[%s1099_s1 + $0x48] sm:$0xff]   ;;  %v923_v16 = vld [vmem:[%s1099_s1 + $0x40] sm:$0xff]   ;;  %v933_v22 = vld [vmem:[%s1040_s19 + $0x10] ss:$8 sps:$4 sm:$0xff]  }
  0x13   : > { %833 = vmatprep.subr.bf16.mxu0 %v913_v4  ;;  %871 = vmatprep.subr.bf16.mxu1 %v913_v4  ;;  %v922_v15 = vld [vmem:[%s1099_s1 + $0x8] sm:$0xff]   ;;  %v924_v17 = vld [vmem:[%s1099_s1] sm:$0xff]   ;;  %v936_v23 = vld [vmem:[%s1040_s19 + $0x30] ss:$8 sps:$4 sm:$0xff]  }
  0x14   : > { %499 = vmatprep.mubr.bf16.mxu1 %v930_v12 }
  0x16   : > { %834 = vmatpush3.bf16.msra.mxu0 %v914_v5  ;;  %879 = vmatpush3.bf16.msra.mxu1 %v914_v5 }
  0x17   : > { %835 = vmatprep.subr.bf16.mxu0 %v915_v6  ;;  %872 = vmatprep.subr.bf16.mxu1 %v915_v6 }
  0x1a   : > { %836 = vmatpush3.bf16.msra.mxu0 %v916_v7  ;;  %880 = vmatpush3.bf16.msra.mxu1 %v916_v7 }
  0x1b   : > { %837 = vmatprep.subr.bf16.mxu0 %v917_v8  ;;  %873 = vmatprep.subr.bf16.mxu1 %v917_v8 }
  0x1e   : > { %838 = vmatpush3.bf16.msra.mxu0 %v918_v9  ;;  %881 = vmatpush3.bf16.msra.mxu1 %v918_v9 }
  0x1f   : > { %839 = vmatprep.subr.bf16.mxu0 %v919_v10  ;;  %874 = vmatprep.subr.bf16.mxu1 %v919_v10 }
  0x22   : > { %840 = vmatpush3.bf16.msra.mxu0 %v920_v13  ;;  %882 = vmatpush3.bf16.msra.mxu1 %v920_v13 }
  0x23   : > { %841 = vmatprep.subr.bf16.mxu0 %v921_v14  ;;  %875 = vmatprep.subr.bf16.mxu1 %v921_v14 }
  0x26   : > { %842 = vmatpush3.bf16.msra.mxu0 %v922_v15  ;;  %883 = vmatpush3.bf16.msra.mxu1 %v922_v15 }
  0x27   : > { %843 = vmatprep.subr.bf16.mxu0 %v923_v16  ;;  %876 = vmatprep.subr.bf16.mxu1 %v923_v16 }
  0x2a   : > { %844 = vmatpush3.bf16.msra.mxu0 %v924_v17  ;;  %884 = vmatpush3.bf16.msra.mxu1 %v924_v17 }
  0x2d   : > { %484 = vmatmul.mubr.bf16.vlgmr.msra.gmra.mxu0 %v925_v18  ;;  %500 = vmatmul.mubr.bf16.vlgmr.msra.gmra.mxu1 %v928_v19 }
  0x2e   : > { %491 = vmatprep.mubr.bf16.mxu0 %v931_v20  ;;  %507 = vmatprep.mubr.bf16.mxu1 %v934_v21 }
  0x35   : > { %492 = vmatmul.mubr.bf16.gmra.mxu0 %v933_v22  ;;  %508 = vmatmul.mubr.bf16.gmra.mxu1 %v936_v23 }
  0xed   : > { %v845_v24 = vpop.f32.mrf.mxu0  ;;  %v857_v25 = vpop.f32.mrf.mxu1 }
  0xef   : > { %v846_v26 = vpop.f32.mrf.mxu0  ;;  %v858_v27 = vpop.f32.mrf.mxu1 }
  0xf0   : > { %v859_v30 = vadd.f32 %v858_v27, %v857_v25  ;;  %v847_v33 = vadd.f32 %v846_v26, %v845_v24 }
  0xf1   : > { %v848_v28 = vpop.f32.mrf.mxu0  ;;  %v860_v29 = vpop.f32.mrf.mxu1 }
  0xf2   : > { %v570_v44 = vmul.f32 %v847_v33, %v847_v33  ;;  %v574_v61 = vmul.f32 %v859_v30, %v859_v30 }
  0xf3   : > { %v849_v31 = vpop.f32.mrf.mxu0  ;;  %v861_v32 = vpop.f32.mrf.mxu1 }
  0xf4   : > { %v850_v34 = vadd.f32 %v849_v31, %v848_v28  ;;  %v862_v35 = vadd.f32 %v861_v32, %v860_v29 }
  0xf5   : > { %v851_v36 = vpop.f32.mrf.mxu0  ;;  %v863_v37 = vpop.f32.mrf.mxu1 }
  0xf6   : > { %v809_v38 = vpack.c.bf16 %v850_v34, %v847_v33  ;;  %v819_v39 = vpack.c.bf16 %v862_v35, %v859_v30  ;;  %v571_v40 = vmul.f32 %v850_v34, %v850_v34  ;;  %v556_v47 = vadd.f32 %v850_v34, %v847_v33 }
  0xf7   : > { %v852_v41 = vpop.f32.mrf.mxu0  ;;  %v864_v42 = vpop.f32.mrf.mxu1  ;;  %v575_v0 = vmul.f32 %v862_v35, %v862_v35 }
  0xf8   : > { %810 = vst [vmem:[%s1075_s12] sm:$0xff] %v809_v38   ;;  %827 = vst [vmem:[%s1075_s12 + $0x10] sm:$0xff] %v819_v39   ;;  %v853_v43 = vadd.f32 %v852_v41, %v851_v36  ;;  %v865_v49 = vadd.f32 %v864_v42, %v863_v37  ;;  %v578_v50 = vadd.f32 %v571_v40, %v570_v44 }
  0xf9   : > { %v854_v45 = vpop.f32.mrf.mxu0  ;;  %v866_v46 = vpop.f32.mrf.mxu1 }
  0xfa   : > { %v572_v48 = vmul.f32 %v853_v43, %v853_v43  ;;  %v557_v53 = vadd.f32 %v853_v43, %v556_v47  ;;  %v576_v3 = vmul.f32 %v865_v49, %v865_v49 }
  0xfb   : > { %v855_v51 = vpop.f32.mrf.mxu0  ;;  %v867_v52 = vpop.f32.mrf.mxu1 }
  0xfc   : > { %v856_v54 = vadd.f32 %v855_v51, %v854_v45  ;;  %v868_v55 = vadd.f32 %v867_v52, %v866_v46  ;;  %v579_v56 = vadd.f32 %v578_v50, %v572_v48 }
  0xfe   : > { %v814_v57 = vpack.c.bf16 %v856_v54, %v853_v43  ;;  %v558_v58 = vadd.f32 %v856_v54, %v557_v53  ;;  %v573_v59 = vmul.f32 %v856_v54, %v856_v54  ;;  %v824_v60 = vpack.c.bf16 %v868_v55, %v865_v49 }
  0xff   : > { %v577_v7 = vmul.f32 %v868_v55, %v868_v55 }
 0x100   : > { %826 = vst [vmem:[%s1075_s12 + $0x8] sm:$0xff] %v814_v57   ;;  %v559_v62 = vadd.f32 %v859_v30, %v558_v58  ;;  %v580_v63 = vadd.f32 %v579_v56, %v573_v59  ;;  %828 = vst [vmem:[%s1075_s12 + $0x18] sm:$0xff] %v824_v60  }
 0x102   : > { %v581_v1 = vadd.f32 %v580_v63, %v574_v61  ;;  %v560_v2 = vadd.f32 %v862_v35, %v559_v62 }
 0x104   : > { %v561_v4 = vadd.f32 %v865_v49, %v560_v2  ;;  %v582_v5 = vadd.f32 %v581_v1, %v575_v0 }
 0x106   : > { %v562_v6 = vadd.f32 %v868_v55, %v561_v4  ;;  %v583_v8 = vadd.f32 %v582_v5, %v576_v3 }
 0x108   : > { %v563_v9 = vrot.slane %v562_v6, 4  ;;  %v584_v10 = vadd.f32 %v583_v8, %v577_v7 }
 0x10a   : > { %v564_v11 = vadd.f32 %v563_v9, %v562_v6  ;;  %v585_v12 = vrot.slane %v584_v10, 4 }
 0x10c   : > { %v565_v13 = vrot.slane %v564_v11, 2  ;;  %v586_v14 = vadd.f32 %v585_v12, %v584_v10 }
 0x10e   : > { %v566_v15 = vadd.f32 %v565_v13, %v564_v11  ;;  %v587_v16 = vrot.slane %v586_v14, 2 }
 0x110   : > { %v567_v17 = vrot.slane %v566_v15, 1  ;;  %v588_v18 = vadd.f32 %v587_v16, %v586_v14 }
 0x112   : > { %v568_v19 = vadd.f32 %v567_v17, %v566_v15  ;;  %v589_v20 = vrot.slane %v588_v18, 1 }
 0x114   : > { %569 = vst [vmem:[%s267_s14] sm:$0x1] %v568_v19  ;;  %v590_v21 = vadd.f32 %v589_v20, %v588_v18 }
 0x116   : > { %591 = vst [vmem:[%s273_s22] sm:$0x1] %v590_v21 }
 0x117 PF: > { %s15_s17 = sadd.s32 1, %s959_s17   ;;  %s1103_s15 = smov %s955_s16 }
 0x118   : > { %p12_p6 = scmp.ge.s32.totalorder %s15_s17, 4   ;;  %s1104_s16 = smov %s1106_s18 }
 0x11a   :  { %14 = sbr.rel (!%p12_p6) target bundleno = 2 (0x2), region = 85 }

// kernel: generator_forward.37
= control target key start
LH: loop header
LB: loop body
LE: loop exit
PB: predicated region body
PF: predicated region fallthrough
CT: control target
= control target key end

     0   :  { %s5268_s12 = smov 0   ;;  %s5270_s13 = smov 0   ;;  %s6514_s0 = inlined_call_operand.vmem [shape: bf16[512,1664], index: 0, kind: input, shape index: {}]   ;;  %s6515_s1 = inlined_call_operand.vmem [shape: bf16[1664,128], index: 1, kind: input, shape index: {}]   ;;  %s6516_s2 = inlined_call_operand.vmem [shape: f32[1,128], index: 2, kind: input, shape index: {}]   ;;  %s6517_s3 = inlined_call_operand.vmem [shape: f32[512,128], index: 3, kind: output, shape index: {}]  }
   0x1   :  { %s5272_s14 = smov 0  }
   0x2 LB: > { %s25_s15 = sadd.s32 1, %s5242_s13  ;;  %p3647_p0 = scmp.ge.s32.totalorder %s5246_s14, 1  ;;  %s5246_s14 = sphi %s5272_s14, %s13_s14   ;;  %s5242_s13 = sphi %s5270_s13, %s6541_s13   ;;  %s5238_s12 = sphi %s5268_s12, %s6540_s12  }
   0x3   : > { %p27_p1 = scmp.ge.s32.totalorder %s25_s15, 2  ;;  %p170_p2 = scmp.lt.s32.totalorder %s5246_s14, 3 }
   0x5   : > { %s6543_s15 = smov (%p27_p1, %s25_s15), 0  ;;  %p171_p3 = pnand %p3647_p0, %p170_p2 }
   0x7   : > { %174 = sbr.rel (%p171_p3) target bundleno = 673 (0x2a1), region = 32 }
   0xc   : > { %v4752_v0 = vld [vmem:[%s6515_s1 + $0x78] sm:$0xff]   ;;  %s3648_s18 = sshll.u32 %s5238_s12, 5  ;;  %v4754_v2 = vld [vmem:[%s6515_s1 + $0x70] sm:$0xff]   ;;  %v4756_v4 = vld [vmem:[%s6515_s1 + $0x68] sm:$0xff]  }
   0xd   : > { %v4753_v1 = vld [vmem:[%s6515_s1 + $0x38] sm:$0xff]   ;;  %3967 = vmatprep.subr.bf16.mxu0 %v4752_v0  ;;  %4711 = vmatprep.subr.bf16.mxu1 %v4752_v0  ;;  %p206_p4 = scmp.lt.s32.totalorder %s3648_s18, 63  ;;  %v4755_v3 = vld [vmem:[%s6515_s1 + $0x30] sm:$0xff]   ;;  %v4757_v5 = vld [vmem:[%s6515_s1 + $0x28] sm:$0xff]  }
   0xe   : > { %3968 = vmatpush3.bf16.msra.mxu0 %v4753_v1  ;;  %4719 = vmatpush3.bf16.msra.mxu1 %v4753_v1  ;;  %v4758_v6 = vld [vmem:[%s6515_s1 + $0x60] sm:$0xff]   ;;  %v4760_v8 = vld [vmem:[%s6515_s1 + $0x58] sm:$0xff]   ;;  %v4762_v10 = vld [vmem:[%s6515_s1 + $0x50] sm:$0xff]  }
   0xf   : > { %3969 = vmatprep.subr.bf16.mxu0 %v4754_v2  ;;  %4712 = vmatprep.subr.bf16.mxu1 %v4754_v2  ;;  %s6545_s18 = smov (!%p206_p4, %s3648_s18), 63  ;;  %v4759_v7 = vld [vmem:[%s6515_s1 + $0x20] sm:$0xff]   ;;  %v4761_v9 = vld [vmem:[%s6515_s1 + $0x18] sm:$0xff]   ;;  %v4763_v13 = vld [vmem:[%s6515_s1 + $0x10] sm:$0xff]  }
  0x10   : > { %s4727_s4 = smul.u32 52, %s6545_s18  ;;  %v4764_v14 = vld [vmem:[%s6515_s1 + $0x48] sm:$0xff]   ;;  %v4766_v16 = vld [vmem:[%s6515_s1 + $0x40] sm:$0xff]   ;;  %v4774_v18 = vld [vmem:[%s6515_s1 + $0xf8] sm:$0xff]  }
  0x11   : > { %v4765_v15 = vld [vmem:[%s6515_s1 + $0x8] sm:$0xff]   ;;  %v4767_v17 = vld [vmem:[%s6515_s1] sm:$0xff]   ;;  %v4777_v21 = vld [vmem:[%s6515_s1 + $0x178] sm:$0xff]  }
  0x12   : > { %3970 = vmatpush3.bf16.msra.mxu0 %v4755_v3  ;;  %4720 = vmatpush3.bf16.msra.mxu1 %v4755_v3  ;;  %s5319_s11 = scalar_lea.vmem %s6514_s0, %s4727_s4  ;;  %v4775_v22 = vld [vmem:[%s6515_s1 + $0xb8] sm:$0xff]   ;;  %v4776_v23 = vld [vmem:[%s6515_s1 + $0xf0] sm:$0xff]   ;;  %v4786_v31 = vld [vmem:[%s6515_s1 + $0xe8] sm:$0xff]  }
  0x13   : > { %3971 = vmatprep.subr.bf16.mxu0 %v4756_v4  ;;  %4713 = vmatprep.subr.bf16.mxu1 %v4756_v4  ;;  %v4770_v11 = vld [vmem:[%s5319_s11 + $0x4] ss:$52 sps:$4 sm:$0xff]   ;;  %v4768_v19 = vld [vmem:[%s5319_s11] ss:$52 sps:$4 sm:$0xff]   ;;  %v4784_v29 = vld [vmem:[%s5319_s11 + $0x68] ss:$52 sps:$4 sm:$0xff]  }
  0x14   : > { %v4773_v12 = vld [vmem:[%s5319_s11 + $0x4e4] ss:$52 sps:$4 sm:$0xff]   ;;  %2380 = vmatprep.mubr.bf16.mxu0 %v4770_v11  ;;  %v4771_v20 = vld [vmem:[%s5319_s11 + $0x4e0] ss:$52 sps:$4 sm:$0xff]   ;;  %v4785_v30 = vld [vmem:[%s5319_s11 + $0x548] ss:$52 sps:$4 sm:$0xff]  }
  0x15   : > { %2476 = vmatprep.mubr.bf16.mxu1 %v4773_v12  ;;  %v4779_v24 = vld [vmem:[%s6515_s1 + $0x138] sm:$0xff]   ;;  %v4780_v25 = vld [vmem:[%s5319_s11 + $0x6c] ss:$52 sps:$4 sm:$0xff]   ;;  %v4778_v27 = vld [vmem:[%s6515_s1 + $0xb0] sm:$0xff]  }
  0x16   : > { %3972 = vmatpush3.bf16.msra.mxu0 %v4757_v5  ;;  %4721 = vmatpush3.bf16.msra.mxu1 %v4757_v5  ;;  %v4782_v26 = vld [vmem:[%s5319_s11 + $0x54c] ss:$52 sps:$4 sm:$0xff]   ;;  %v4797_v28 = vld [vmem:[%s6515_s1 + $0x170] sm:$0xff]   ;;  %v4796_v40 = vld [vmem:[%s6515_s1 + $0xd8] sm:$0xff]  }
  0x17   : > { %3973 = vmatprep.subr.bf16.mxu0 %v4758_v6  ;;  %4714 = vmatprep.subr.bf16.mxu1 %v4758_v6  ;;  %v4787_v32 = vld [vmem:[%s6515_s1 + $0xa8] sm:$0xff]   ;;  %v4799_v33 = vld [vmem:[%s6515_s1 + $0x130] sm:$0xff]   ;;  %v4788_v34 = vld [vmem:[%s6515_s1 + $0xe0] sm:$0xff]  }
  0x18   : > { %v4790_v35 = vld [vmem:[%s5319_s11 + $0xd4] ss:$52 sps:$4 sm:$0xff]   ;;  %v4789_v37 = vld [vmem:[%s6515_s1 + $0xa0] sm:$0xff]   ;;  %v4798_v41 = vld [vmem:[%s6515_s1 + $0x98] sm:$0xff]  }
  0x19   : > { %v4792_v36 = vld [vmem:[%s5319_s11 + $0x5b4] ss:$52 sps:$4 sm:$0xff]   ;;  %v4794_v38 = vld [vmem:[%s5319_s11 + $0xd0] ss:$52 sps:$4 sm:$0xff]   ;;  %v4806_v49 = vld [vmem:[%s5319_s11 + $0x138] ss:$52 sps:$4 sm:$0xff]  }
  0x1a   : > { %3974 = vmatpush3.bf16.msra.mxu0 %v4759_v7  ;;  %4722 = vmatpush3.bf16.msra.mxu1 %v4759_v7  ;;  %v4795_v39 = vld [vmem:[%s5319_s11 + $0x5b0] ss:$52 sps:$4 sm:$0xff]   ;;  %v4811_v43 = vld [vmem:[%s6515_s1 + $0x168] sm:$0xff]   ;;  %v4819_v59 = vld [vmem:[%s5319_s11 + $0x1a0] ss:$52 sps:$4 sm:$0xff]  }
  0x1b   : > { %3975 = vmatprep.subr.bf16.mxu0 %v4760_v8  ;;  %4715 = vmatprep.subr.bf16.mxu1 %v4760_v8  ;;  %v4800_v42 = vld [vmem:[%s6515_s1 + $0xd0] sm:$0xff]   ;;  %v4813_v46 = vld [vmem:[%s6515_s1 + $0x128] sm:$0xff]   ;;  %v4810_v52 = vld [vmem:[%s6515_s1 + $0xc0] sm:$0xff]  }
  0x1c   : > { %v4802_v44 = vld [vmem:[%s5319_s11 + $0x13c] ss:$52 sps:$4 sm:$0xff]   ;;  %v4808_v48 = vld [vmem:[%s6515_s1 + $0xc8] sm:$0xff]   ;;  %v4814_v53 = vld [vmem:[%s5319_s11 + $0x1a4] ss:$52 sps:$4 sm:$0xff]  }
  0x1d   : > { %v4804_v45 = vld [vmem:[%s5319_s11 + $0x61c] ss:$52 sps:$4 sm:$0xff]   ;;  %v4807_v50 = vld [vmem:[%s5319_s11 + $0x618] ss:$52 sps:$4 sm:$0xff]   ;;  %v4828_v55 = vld [vmem:[%s6515_s1 + $0x160] sm:$0xff]  }
  0x1e   : > { %3976 = vmatpush3.bf16.msra.mxu0 %v4761_v9  ;;  %4723 = vmatpush3.bf16.msra.mxu1 %v4761_v9  ;;  %v4801_v47 = vld [vmem:[%s6515_s1 + $0x90] sm:$0xff]   ;;  %v4809_v51 = vld [vmem:[%s6515_s1 + $0x88] sm:$0xff]   ;;  %v4829_v56 = vld [vmem:[%s6515_s1 + $0x120] sm:$0xff]  }
  0x1f   : > { %3977 = vmatprep.subr.bf16.mxu0 %v4762_v10  ;;  %4716 = vmatprep.subr.bf16.mxu1 %v4762_v10  ;;  %v4818_v54 = vld [vmem:[%s5319_s11 + $0xc] ss:$52 sps:$4 sm:$0xff]   ;;  %v4816_v58 = vld [vmem:[%s5319_s11 + $0x8] ss:$52 sps:$4 sm:$0xff]   ;;  %v4836_v1 = vld [vmem:[%s6515_s1 + $0x1f0] sm:$0xff]  }
  0x20   : > { %v4812_v57 = vld [vmem:[%s6515_s1 + $0x80] sm:$0xff]   ;;  %v4820_v60 = vld [vmem:[%s6515_s1 + $0x1f8] sm:$0xff]   ;;  %v4824_v63 = vld [vmem:[%s5319_s11 + $0x74] ss:$52 sps:$4 sm:$0xff]  }
  0x21   : > { %v4821_v61 = vld [vmem:[%s6515_s1 + $0x1b8] sm:$0xff]   ;;  %v4822_v62 = vld [vmem:[%s5319_s11 + $0x20c] ss:$52 sps:$4 sm:$0xff]   ;;  %v4837_v3 = vld [vmem:[%s6515_s1 + $0x1b0] sm:$0xff]  }
  0x22   : > { %3978 = vmatpush3.bf16.msra.mxu0 %v4763_v13  ;;  %4724 = vmatpush3.bf16.msra.mxu1 %v4763_v13  ;;  %v4838_v0 = vld [vmem:[%s6515_s1 + $0x158] sm:$0xff]   ;;  %v4827_v5 = vld [vmem:[%s5319_s11 + $0x70] ss:$52 sps:$4 sm:$0xff]   ;;  %v4830_v6 = vld [vmem:[%s5319_s11 + $0x274] ss:$52 sps:$4 sm:$0xff]  }
  0x23   : > { %3979 = vmatprep.subr.bf16.mxu0 %v4764_v14  ;;  %4717 = vmatprep.subr.bf16.mxu1 %v4764_v14  ;;  %v4839_v2 = vld [vmem:[%s6515_s1 + $0x118] sm:$0xff]   ;;  %v4852_v8 = vld [vmem:[%s6515_s1 + $0x150] sm:$0xff]   ;;  %v4853_v9 = vld [vmem:[%s6515_s1 + $0x1e8] sm:$0xff]  }
  0x24   : > { %v4826_v4 = vld [vmem:[%s5319_s11 + $0x208] ss:$52 sps:$4 sm:$0xff]   ;;  %v4854_v10 = vld [vmem:[%s6515_s1 + $0x110] sm:$0xff]   ;;  %v4835_v13 = vld [vmem:[%s5319_s11 + $0xd8] ss:$52 sps:$4 sm:$0xff]  }
  0x25   : > { %v4832_v7 = vld [vmem:[%s5319_s11 + $0xdc] ss:$52 sps:$4 sm:$0xff]   ;;  %v4855_v11 = vld [vmem:[%s6515_s1 + $0x1a8] sm:$0xff]  }
  0x26   : > { %3980 = vmatpush3.bf16.msra.mxu0 %v4765_v15  ;;  %4725 = vmatpush3.bf16.msra.mxu1 %v4765_v15  ;;  %v4834_v12 = vld [vmem:[%s5319_s11 + $0x270] ss:$52 sps:$4 sm:$0xff]   ;;  %v4862_v15 = vld [vmem:[%s6515_s1 + $0x148] sm:$0xff]  }
  0x27   : > { %3981 = vmatprep.subr.bf16.mxu0 %v4766_v16  ;;  %4718 = vmatprep.subr.bf16.mxu1 %v4766_v16  ;;  %v4840_v14 = vld [vmem:[%s5319_s11 + $0x2dc] ss:$52 sps:$4 sm:$0xff]   ;;  %v4863_v16 = vld [vmem:[%s6515_s1 + $0x108] sm:$0xff]  }
  0x2a   : > { %3982 = vmatpush3.bf16.msra.mxu0 %v4767_v17  ;;  %4726 = vmatpush3.bf16.msra.mxu1 %v4767_v17  ;;  %v4842_v17 = vld [vmem:[%s5319_s11 + $0x144] ss:$52 sps:$4 sm:$0xff]  }
  0x2b   : > { %4079 = vmatprep.subr.bf16.mxu1 %v4774_v18  ;;  %4191 = vmatprep.subr.bf16.mxu0 %v4777_v21  ;;  %v4870_v18 = vld [vmem:[%s6515_s1 + $0x1e0] sm:$0xff]  }
  0x2c   : > { %v4845_v21 = vld [vmem:[%s5319_s11 + $0x140] ss:$52 sps:$4 sm:$0xff]  }
  0x2d   : > { %2381 = vmatmul.mubr.bf16.vlgmr.msra.gmra.mxu0 %v4768_v19  ;;  %2477 = vmatmul.mubr.bf16.vlgmr.msra.gmra.mxu1 %v4771_v20  ;;  %v4871_v19 = vld [vmem:[%s6515_s1 + $0x1a0] sm:$0xff]   ;;  %v4844_v20 = vld [vmem:[%s5319_s11 + $0x2d8] ss:$52 sps:$4 sm:$0xff]  }
  0x2e   : > { %4080 = vmatpush3.bf16.msra.mxu1 %v4775_v22  ;;  %4192 = vmatpush3.bf16.msra.mxu0 %v4779_v24  ;;  %v4846_v22 = vld [vmem:[%s5319_s11 + $0x344] ss:$52 sps:$4 sm:$0xff]  }
  0x2f   : > { %4081 = vmatprep.subr.bf16.mxu1 %v4776_v23  ;;  %2388 = vmatprep.mubr.bf16.mxu0 %v4780_v25  ;;  %v4848_v23 = vld [vmem:[%s5319_s11 + $0x1ac] ss:$52 sps:$4 sm:$0xff]  }
  0x30   : > { %2484 = vmatprep.mubr.bf16.mxu1 %v4782_v26  ;;  %4193 = vmatprep.subr.bf16.mxu0 %v4797_v28  ;;  %v4878_v24 = vld [vmem:[%s6515_s1 + $0x140] sm:$0xff]   ;;  %v4886_v26 = vld [vmem:[%s6515_s1 + $0x1d8] sm:$0xff]  }
  0x31   : > { %v4879_v25 = vld [vmem:[%s6515_s1 + $0x100] sm:$0xff]   ;;  %v4851_v28 = vld [vmem:[%s5319_s11 + $0x1a8] ss:$52 sps:$4 sm:$0xff]  }
  0x32   : > { %4082 = vmatpush3.bf16.msra.mxu1 %v4778_v27  ;;  %4194 = vmatpush3.bf16.msra.mxu0 %v4799_v33  ;;  %v4850_v27 = vld [vmem:[%s5319_s11 + $0x340] ss:$52 sps:$4 sm:$0xff]   ;;  %v4860_v33 = vld [vmem:[%s5319_s11 + $0x3a8] ss:$52 sps:$4 sm:$0xff]  }
  0x33   : > { %4083 = vmatprep.subr.bf16.mxu1 %v4786_v31  ;;  %4195 = vmatprep.subr.bf16.mxu0 %v4811_v43  ;;  %v4856_v31 = vld [vmem:[%s5319_s11 + $0x3ac] ss:$52 sps:$4 sm:$0xff]  }
  0x34   : > { %v4918_v43 = vld [vmem:[%s6515_s1 + $0x1c8] sm:$0xff]  }
  0x35   : > { %2389 = vmatmul.mubr.bf16.gmra.mxu0 %v4784_v29  ;;  %2485 = vmatmul.mubr.bf16.gmra.mxu1 %v4785_v30  ;;  %v4887_v29 = vld [vmem:[%s6515_s1 + $0x198] sm:$0xff]  }
  0x36   : > { %4084 = vmatpush3.bf16.msra.mxu1 %v4787_v32  ;;  %2396 = vmatprep.mubr.bf16.mxu0 %v4790_v35  ;;  %v4888_v30 = vld [vmem:[%s6515_s1 + $0x278] sm:$0xff]   ;;  %v4858_v32 = vld [vmem:[%s5319_s11 + $0x214] ss:$52 sps:$4 sm:$0xff]  }
  0x37   : > { %4085 = vmatprep.subr.bf16.mxu1 %v4788_v34  ;;  %2492 = vmatprep.mubr.bf16.mxu1 %v4792_v36  ;;  %v4861_v34 = vld [vmem:[%s5319_s11 + $0x210] ss:$52 sps:$4 sm:$0xff]  }
  0x38   : > { %4196 = vmatpush3.bf16.msra.mxu0 %v4813_v46  ;;  %v4902_v35 = vld [vmem:[%s6515_s1 + $0x1d0] sm:$0xff]  }
  0x39   : > { %4197 = vmatprep.subr.bf16.mxu0 %v4828_v55  ;;  %v4903_v36 = vld [vmem:[%s6515_s1 + $0x190] sm:$0xff]  }
  0x3a   : > { %4086 = vmatpush3.bf16.msra.mxu1 %v4789_v37  ;;  %v4864_v37 = vld [vmem:[%s5319_s11 + $0x414] ss:$52 sps:$4 sm:$0xff]   ;;  %v4892_v55 = vld [vmem:[%s5319_s11 + $0x7c] ss:$52 sps:$4 sm:$0xff]  }
  0x3b   : > { %4087 = vmatprep.subr.bf16.mxu1 %v4796_v40  ;;  %v4869_v40 = vld [vmem:[%s5319_s11 + $0x278] ss:$52 sps:$4 sm:$0xff]   ;;  %v4877_v46 = vld [vmem:[%s5319_s11 + $0x2e0] ss:$52 sps:$4 sm:$0xff]  }
  0x3c   : > { %4198 = vmatpush3.bf16.msra.mxu0 %v4829_v56  ;;  %v4904_v56 = vld [vmem:[%s6515_s1 + $0x270] sm:$0xff]  }
  0x3d   : > { %2397 = vmatmul.mubr.bf16.gmra.mxu0 %v4794_v38  ;;  %2493 = vmatmul.mubr.bf16.gmra.mxu1 %v4795_v39  ;;  %v4866_v38 = vld [vmem:[%s5319_s11 + $0x27c] ss:$52 sps:$4 sm:$0xff]  }
  0x3e   : > { %4088 = vmatpush3.bf16.msra.mxu1 %v4798_v41  ;;  %2404 = vmatprep.mubr.bf16.mxu0 %v4802_v44  ;;  %v4868_v39 = vld [vmem:[%s5319_s11 + $0x410] ss:$52 sps:$4 sm:$0xff]   ;;  %v4919_v44 = vld [vmem:[%s6515_s1 + $0x188] sm:$0xff]  }
  0x3f   : > { %4089 = vmatprep.subr.bf16.mxu1 %v4800_v42  ;;  %2500 = vmatprep.mubr.bf16.mxu1 %v4804_v45  ;;  %v4872_v41 = vld [vmem:[%s5319_s11 + $0x47c] ss:$52 sps:$4 sm:$0xff]   ;;  %v4874_v42 = vld [vmem:[%s5319_s11 + $0x2e4] ss:$52 sps:$4 sm:$0xff]  }
  0x40   : > { %4199 = vmatprep.subr.bf16.mxu0 %v4838_v0  ;;  %v4876_v45 = vld [vmem:[%s5319_s11 + $0x478] ss:$52 sps:$4 sm:$0xff]  }
  0x41   : > { %4200 = vmatpush3.bf16.msra.mxu0 %v4839_v2  ;;  %v4921_v0 = vld [vmem:[%s6515_s1 + $0x228] sm:$0xff]  }
  0x42   : > { %4090 = vmatpush3.bf16.msra.mxu1 %v4801_v47  ;;  %4201 = vmatprep.subr.bf16.mxu0 %v4852_v8  ;;  %v4880_v47 = vld [vmem:[%s5319_s11 + $0x34c] ss:$52 sps:$4 sm:$0xff]   ;;  %v4953_v8 = vld [vmem:[%s6515_s1 + $0x218] sm:$0xff]  }
  0x43   : > { %4091 = vmatprep.subr.bf16.mxu1 %v4808_v48  ;;  %v4884_v48 = vld [vmem:[%s5319_s11 + $0x14] ss:$52 sps:$4 sm:$0xff]   ;;  %v4900_v2 = vld [vmem:[%s5319_s11 + $0x418] ss:$52 sps:$4 sm:$0xff]  }
  0x45   : > { %2405 = vmatmul.mubr.bf16.gmra.mxu0 %v4806_v49  ;;  %2501 = vmatmul.mubr.bf16.gmra.mxu1 %v4807_v50  ;;  %v4934_v49 = vld [vmem:[%s6515_s1 + $0x1c0] sm:$0xff]  }
  0x46   : > { %4092 = vmatpush3.bf16.msra.mxu1 %v4809_v51  ;;  %2412 = vmatprep.mubr.bf16.mxu0 %v4814_v53  ;;  %v4935_v50 = vld [vmem:[%s6515_s1 + $0x180] sm:$0xff]   ;;  %v4889_v53 = vld [vmem:[%s6515_s1 + $0x238] sm:$0xff]  }
  0x47   : > { %4093 = vmatprep.subr.bf16.mxu1 %v4810_v52  ;;  %2541 = vmatprep.mubr.bf16.mxu1 %v4818_v54  ;;  %v4882_v51 = vld [vmem:[%s5319_s11 + $0x10] ss:$52 sps:$4 sm:$0xff]   ;;  %v4885_v52 = vld [vmem:[%s5319_s11 + $0x348] ss:$52 sps:$4 sm:$0xff]  }
  0x48   : > { %4202 = vmatpush3.bf16.msra.mxu0 %v4854_v10  ;;  %v4890_v54 = vld [vmem:[%s5319_s11 + $0x3b4] ss:$52 sps:$4 sm:$0xff]  }
  0x49   : > { %4203 = vmatprep.subr.bf16.mxu0 %v4862_v15  ;;  %v4910_v10 = vld [vmem:[%s5319_s11 + $0x480] ss:$52 sps:$4 sm:$0xff]  }
  0x4a   : > { %4094 = vmatpush3.bf16.msra.mxu1 %v4812_v57  ;;  %v4950_v57 = vld [vmem:[%s6515_s1 + $0x2f8] sm:$0xff]   ;;  %v4914_v15 = vld [vmem:[%s5319_s11 + $0x1b4] ss:$52 sps:$4 sm:$0xff]  }
  0x4b   : > { %4303 = vmatprep.subr.bf16.mxu1 %v4820_v60  ;;  %v4894_v60 = vld [vmem:[%s5319_s11 + $0x3b0] ss:$52 sps:$4 sm:$0xff]  }
  0x4c   : > { %4204 = vmatpush3.bf16.msra.mxu0 %v4863_v16  ;;  %v4985_v16 = vld [vmem:[%s6515_s1 + $0x208] sm:$0xff]  }
  0x4d   : > { %2413 = vmatmul.mubr.bf16.gmra.mxu0 %v4819_v59  ;;  %2542 = vmatmul.mubr.bf16.vlgmr.msra.gmra.mxu1 %v4816_v58  ;;  %v4905_v58 = vld [vmem:[%s6515_s1 + $0x230] sm:$0xff]   ;;  %v4920_v59 = vld [vmem:[%s6515_s1 + $0x268] sm:$0xff]  }
  0x4e   : > { %4304 = vmatpush3.bf16.msra.mxu1 %v4821_v61  ;;  %2420 = vmatprep.mubr.bf16.mxu0 %v4822_v62  ;;  %v4895_v61 = vld [vmem:[%s5319_s11 + $0x78] ss:$52 sps:$4 sm:$0xff]   ;;  %v4896_v62 = vld [vmem:[%s5319_s11 + $0x41c] ss:$52 sps:$4 sm:$0xff]  }
  0x4f   : > { %2549 = vmatprep.mubr.bf16.mxu1 %v4824_v63  ;;  %4305 = vmatprep.subr.bf16.mxu1 %v4836_v1  ;;  %v4898_v63 = vld [vmem:[%s5319_s11 + $0xe4] ss:$52 sps:$4 sm:$0xff]  }
  0x50   : > { %4205 = vmatprep.subr.bf16.mxu0 %v4878_v24  ;;  %v4936_v1 = vld [vmem:[%s6515_s1 + $0x260] sm:$0xff]   ;;  %v4927_v24 = vld [vmem:[%s5319_s11 + $0x218] ss:$52 sps:$4 sm:$0xff]  }
  0x51   : > { %4206 = vmatpush3.bf16.msra.mxu0 %v4879_v25  ;;  %v4928_v25 = vld [vmem:[%s5319_s11 + $0x5bc] ss:$52 sps:$4 sm:$0xff]  }
  0x52   : > { %4306 = vmatpush3.bf16.msra.mxu1 %v4837_v3  ;;  %4415 = vmatprep.subr.bf16.mxu0 %v4888_v30  ;;  %v4937_v3 = vld [vmem:[%s6515_s1 + $0x220] sm:$0xff]  }
  0x53   : > { %4307 = vmatprep.subr.bf16.mxu1 %v4853_v9  ;;  %v4968_v9 = vld [vmem:[%s6515_s1 + $0x250] sm:$0xff]   ;;  %v4938_v30 = vld [vmem:[%s5319_s11 + $0x624] ss:$52 sps:$4 sm:$0xff]  }
  0x55   : > { %2421 = vmatmul.mubr.bf16.gmra.mxu0 %v4826_v4  ;;  %2550 = vmatmul.mubr.bf16.gmra.mxu1 %v4827_v5  ;;  %v4952_v4 = vld [vmem:[%s6515_s1 + $0x258] sm:$0xff]   ;;  %v4901_v5 = vld [vmem:[%s5319_s11 + $0xe0] ss:$52 sps:$4 sm:$0xff]  }
  0x56   : > { %2428 = vmatprep.mubr.bf16.mxu0 %v4830_v6  ;;  %2557 = vmatprep.mubr.bf16.mxu1 %v4832_v7  ;;  %v4906_v6 = vld [vmem:[%s5319_s11 + $0x484] ss:$52 sps:$4 sm:$0xff]   ;;  %v4908_v7 = vld [vmem:[%s5319_s11 + $0x14c] ss:$52 sps:$4 sm:$0xff]  }
  0x57   : > { %4308 = vmatpush3.bf16.msra.mxu1 %v4855_v11  ;;  %v4911_v11 = vld [vmem:[%s5319_s11 + $0x148] ss:$52 sps:$4 sm:$0xff]  }
  0x58   : > { %4309 = vmatprep.subr.bf16.mxu1 %v4870_v18  ;;  %v4917_v18 = vld [vmem:[%s5319_s11 + $0x1b0] ss:$52 sps:$4 sm:$0xff]  }
  0x5b   : > { %4310 = vmatpush3.bf16.msra.mxu1 %v4871_v19  ;;  %v4922_v19 = vld [vmem:[%s5319_s11 + $0x554] ss:$52 sps:$4 sm:$0xff]  }
  0x5c   : > { %4311 = vmatprep.subr.bf16.mxu1 %v4886_v26  ;;  %v4930_v26 = vld [vmem:[%s5319_s11 + $0x284] ss:$52 sps:$4 sm:$0xff]  }
  0x5d   : > { %2429 = vmatmul.mubr.bf16.gmra.mxu0 %v4834_v12  ;;  %2558 = vmatmul.mubr.bf16.gmra.mxu1 %v4835_v13  ;;  %v4969_v12 = vld [vmem:[%s6515_s1 + $0x210] sm:$0xff]   ;;  %v4984_v13 = vld [vmem:[%s6515_s1 + $0x248] sm:$0xff]  }
  0x5e   : > { %2436 = vmatprep.mubr.bf16.mxu0 %v4840_v14  ;;  %2565 = vmatprep.mubr.bf16.mxu1 %v4842_v17  ;;  %v4912_v14 = vld [vmem:[%s5319_s11 + $0x4ec] ss:$52 sps:$4 sm:$0xff]   ;;  %v4916_v17 = vld [vmem:[%s5319_s11 + $0x4e8] ss:$52 sps:$4 sm:$0xff]  }
  0x5f   : > { %4312 = vmatpush3.bf16.msra.mxu1 %v4887_v29  ;;  %v4933_v29 = vld [vmem:[%s5319_s11 + $0x280] ss:$52 sps:$4 sm:$0xff]  }
  0x60   : > { %4313 = vmatprep.subr.bf16.mxu1 %v4902_v35  ;;  %v4948_v35 = vld [vmem:[%s5319_s11 + $0x1c] ss:$52 sps:$4 sm:$0xff]  }
  0x63   : > { %4314 = vmatpush3.bf16.msra.mxu1 %v4903_v36  ;;  %v4946_v36 = vld [vmem:[%s5319_s11 + $0x18] ss:$52 sps:$4 sm:$0xff]  }
  0x64   : > { %4315 = vmatprep.subr.bf16.mxu1 %v4918_v43  ;;  %v4982_v43 = vld [vmem:[%s6515_s1 + $0x2e8] sm:$0xff]  }
  0x65   : > { %2437 = vmatmul.mubr.bf16.gmra.mxu0 %v4844_v20  ;;  %2566 = vmatmul.mubr.bf16.gmra.mxu1 %v4845_v21  ;;  %v4924_v20 = vld [vmem:[%s5319_s11 + $0x21c] ss:$52 sps:$4 sm:$0xff]   ;;  %v5000_v21 = vld [vmem:[%s6515_s1 + $0x240] sm:$0xff]  }
  0x66   : > { %2444 = vmatprep.mubr.bf16.mxu0 %v4846_v22  ;;  %2573 = vmatprep.mubr.bf16.mxu1 %v4848_v23  ;;  %v5001_v22 = vld [vmem:[%s6515_s1 + $0x200] sm:$0xff]  }
  0x67   : > { %4316 = vmatpush3.bf16.msra.mxu1 %v4919_v44  ;;  %v4926_v23 = vld [vmem:[%s5319_s11 + $0x550] ss:$52 sps:$4 sm:$0xff]   ;;  %v4958_v44 = vld [vmem:[%s5319_s11 + $0x3b8] ss:$52 sps:$4 sm:$0xff]  }
  0x68   : > { %4317 = vmatprep.subr.bf16.mxu1 %v4934_v49  ;;  %v4998_v49 = vld [vmem:[%s6515_s1 + $0x2e0] sm:$0xff]  }
  0x6b   : > { %4318 = vmatpush3.bf16.msra.mxu1 %v4935_v50  ;;  %v4999_v50 = vld [vmem:[%s6515_s1 + $0x2a0] sm:$0xff]  }
  0x6c   : > { %4527 = vmatprep.subr.bf16.mxu1 %v4950_v57  ;;  %v5029_v57 = vld [vmem:[%s6515_s1 + $0x2d0] sm:$0xff]  }
  0x6d   : > { %2445 = vmatmul.mubr.bf16.gmra.mxu0 %v4850_v27  ;;  %2574 = vmatmul.mubr.bf16.gmra.mxu1 %v4851_v28  ;;  %v5614_v27 = vld [vmem:[%s6515_s1 + $0x338] sm:$0xff]  }
  0x6e   : > { %2452 = vmatprep.mubr.bf16.mxu0 %v4856_v31  ;;  %2581 = vmatprep.mubr.bf16.mxu1 %v4858_v32  ;;  %v4932_v28 = vld [vmem:[%s5319_s11 + $0x5b8] ss:$52 sps:$4 sm:$0xff]   ;;  %v4942_v32 = vld [vmem:[%s5319_s11 + $0x620] ss:$52 sps:$4 sm:$0xff]  }
  0x6f   : > { %v4940_v31 = vld [vmem:[%s5319_s11 + $0x2ec] ss:$52 sps:$4 sm:$0xff]  }
  0x75   : > { %2453 = vmatmul.mubr.bf16.gmra.mxu0 %v4860_v33  ;;  %2582 = vmatmul.mubr.bf16.gmra.mxu1 %v4861_v34  ;;  %v4943_v33 = vld [vmem:[%s5319_s11 + $0x2e8] ss:$52 sps:$4 sm:$0xff]  }
  0x76   : > { %2460 = vmatprep.mubr.bf16.mxu0 %v4864_v37  ;;  %2589 = vmatprep.mubr.bf16.mxu1 %v4866_v38  ;;  %v4944_v34 = vld [vmem:[%s5319_s11 + $0x354] ss:$52 sps:$4 sm:$0xff]   ;;  %v4949_v37 = vld [vmem:[%s5319_s11 + $0x350] ss:$52 sps:$4 sm:$0xff]   ;;  %v4951_v38 = vld [vmem:[%s6515_s1 + $0x2b8] sm:$0xff]  }
  0x7d   : > { %2461 = vmatmul.mubr.bf16.gmra.mxu0 %v4868_v39  ;;  %2590 = vmatmul.mubr.bf16.gmra.mxu1 %v4869_v40  ;;  %v4954_v39 = vld [vmem:[%s5319_s11 + $0x3bc] ss:$52 sps:$4 sm:$0xff]   ;;  %v4956_v40 = vld [vmem:[%s5319_s11 + $0x84] ss:$52 sps:$4 sm:$0xff]  }
  0x7e   : > { %2468 = vmatprep.mubr.bf16.mxu0 %v4872_v41  ;;  %2597 = vmatprep.mubr.bf16.mxu1 %v4874_v42  ;;  %v4966_v41 = vld [vmem:[%s6515_s1 + $0x2f0] sm:$0xff]  }
  0x7f   : > { %v4967_v42 = vld [vmem:[%s6515_s1 + $0x2b0] sm:$0xff]  }
  0x85   : > { %2469 = vmatmul.mubr.bf16.gmra.mxu0 %v4876_v45  ;;  %2598 = vmatmul.mubr.bf16.gmra.mxu1 %v4877_v46  ;;  %v4959_v45 = vld [vmem:[%s5319_s11 + $0x80] ss:$52 sps:$4 sm:$0xff]   ;;  %v4960_v46 = vld [vmem:[%s5319_s11 + $0x424] ss:$52 sps:$4 sm:$0xff]  }
  0x86   : > { %2605 = vmatprep.mubr.bf16.mxu1 %v4880_v47  ;;  %2702 = vmatprep.mubr.bf16.mxu0 %v4884_v48  ;;  %v4962_v47 = vld [vmem:[%s5319_s11 + $0xec] ss:$52 sps:$4 sm:$0xff]  }
  0x87   : > { %v4983_v48 = vld [vmem:[%s6515_s1 + $0x2a8] sm:$0xff]  }
  0x8d   : > { %2606 = vmatmul.mubr.bf16.gmra.mxu1 %v4885_v52  ;;  %2703 = vmatmul.mubr.bf16.vlgmr.msra.gmra.mxu0 %v4882_v51  ;;  %v5014_v51 = vld [vmem:[%s6515_s1 + $0x2d8] sm:$0xff]   ;;  %v4964_v52 = vld [vmem:[%s5319_s11 + $0x420] ss:$52 sps:$4 sm:$0xff]  }
  0x8e   : > { %4416 = vmatpush3.bf16.msra.mxu0 %v4889_v53  ;;  %2613 = vmatprep.mubr.bf16.mxu1 %v4890_v54  ;;  %v4965_v53 = vld [vmem:[%s5319_s11 + $0xe8] ss:$52 sps:$4 sm:$0xff]   ;;  %v4970_v54 = vld [vmem:[%s5319_s11 + $0x48c] ss:$52 sps:$4 sm:$0xff]  }
  0x8f   : > { %2710 = vmatprep.mubr.bf16.mxu0 %v4892_v55  ;;  %4417 = vmatprep.subr.bf16.mxu0 %v4904_v56  ;;  %v4972_v55 = vld [vmem:[%s5319_s11 + $0x154] ss:$52 sps:$4 sm:$0xff]   ;;  %v5015_v56 = vld [vmem:[%s6515_s1 + $0x298] sm:$0xff]  }
  0x92   : > { %4418 = vmatpush3.bf16.msra.mxu0 %v4905_v58  ;;  %v5030_v58 = vld [vmem:[%s6515_s1 + $0x290] sm:$0xff]  }
  0x93   : > { %4419 = vmatprep.subr.bf16.mxu0 %v4920_v59  ;;  %v5044_v59 = vld [vmem:[%s6515_s1 + $0x2c8] sm:$0xff]  }
  0x95   : > { %2614 = vmatmul.mubr.bf16.gmra.mxu1 %v4894_v60  ;;  %2711 = vmatmul.mubr.bf16.gmra.mxu0 %v4895_v61  ;;  %v4974_v60 = vld [vmem:[%s5319_s11 + $0x488] ss:$52 sps:$4 sm:$0xff]   ;;  %v4975_v61 = vld [vmem:[%s5319_s11 + $0x150] ss:$52 sps:$4 sm:$0xff]  }
  0x96   : > { %2621 = vmatprep.mubr.bf16.mxu1 %v4896_v62  ;;  %2718 = vmatprep.mubr.bf16.mxu0 %v4898_v63  ;;  %v4976_v62 = vld [vmem:[%s5319_s11 + $0x4f4] ss:$52 sps:$4 sm:$0xff]   ;;  %v4978_v63 = vld [vmem:[%s5319_s11 + $0x1bc] ss:$52 sps:$4 sm:$0xff]  }
  0x97   : > { %4420 = vmatpush3.bf16.msra.mxu0 %v4921_v0  ;;  %v5045_v0 = vld [vmem:[%s6515_s1 + $0x288] sm:$0xff]  }
  0x98   : > { %4421 = vmatprep.subr.bf16.mxu0 %v4936_v1  ;;  %v5059_v1 = vld [vmem:[%s6515_s1 + $0x2c0] sm:$0xff]  }
  0x9b   : > { %4422 = vmatpush3.bf16.msra.mxu0 %v4937_v3  ;;  %v4980_v3 = vld [vmem:[%s5319_s11 + $0x4f0] ss:$52 sps:$4 sm:$0xff]  }
  0x9c   : > { %4423 = vmatprep.subr.bf16.mxu0 %v4952_v4  ;;  %v4981_v4 = vld [vmem:[%s5319_s11 + $0x1b8] ss:$52 sps:$4 sm:$0xff]  }
  0x9d   : > { %2622 = vmatmul.mubr.bf16.gmra.mxu1 %v4900_v2  ;;  %2719 = vmatmul.mubr.bf16.gmra.mxu0 %v4901_v5  ;;  %v5060_v2 = vld [vmem:[%s6515_s1 + $0x280] sm:$0xff]   ;;  %v4986_v5 = vld [vmem:[%s5319_s11 + $0x55c] ss:$52 sps:$4 sm:$0xff]  }
  0x9e   : > { %2629 = vmatprep.mubr.bf16.mxu1 %v4906_v6  ;;  %2726 = vmatprep.mubr.bf16.mxu0 %v4908_v7  ;;  %v4988_v6 = vld [vmem:[%s5319_s11 + $0x224] ss:$52 sps:$4 sm:$0xff]  }
  0x9f   : > { %4424 = vmatpush3.bf16.msra.mxu0 %v4953_v8 }
  0xa0   : > { %4425 = vmatprep.subr.bf16.mxu0 %v4968_v9 }
  0xa3   : > { %4426 = vmatpush3.bf16.msra.mxu0 %v4969_v12  ;;  %v4991_v12 = vld [vmem:[%s5319_s11 + $0x220] ss:$52 sps:$4 sm:$0xff]  }
  0xa4   : > { %4427 = vmatprep.subr.bf16.mxu0 %v4984_v13 }
  0xa5   : > { %2630 = vmatmul.mubr.bf16.gmra.mxu1 %v4910_v10  ;;  %2727 = vmatmul.mubr.bf16.gmra.mxu0 %v4911_v11  ;;  %v4990_v11 = vld [vmem:[%s5319_s11 + $0x558] ss:$52 sps:$4 sm:$0xff]  }
  0xa6   : > { %2637 = vmatprep.mubr.bf16.mxu1 %v4912_v14  ;;  %2734 = vmatprep.mubr.bf16.mxu0 %v4914_v15 }
  0xa7   : > { %4428 = vmatpush3.bf16.msra.mxu0 %v4985_v16 }
  0xa8   : > { %4429 = vmatprep.subr.bf16.mxu0 %v5000_v21 }
  0xab   : > { %4430 = vmatpush3.bf16.msra.mxu0 %v5001_v22 }
  0xac   : > { %4663 = vmatprep.subr.bf16.mxu0 %v5614_v27 }
  0xad   : > { %2638 = vmatmul.mubr.bf16.gmra.mxu1 %v4916_v17  ;;  %2735 = vmatmul.mubr.bf16.gmra.mxu0 %v4917_v18  ;;  %v4992_v17 = vld [vmem:[%s5319_s11 + $0x5c4] ss:$52 sps:$4 sm:$0xff]   ;;  %v4994_v18 = vld [vmem:[%s5319_s11 + $0x28c] ss:$52 sps:$4 sm:$0xff]  }
  0xae   : > { %2645 = vmatprep.mubr.bf16.mxu1 %v4922_v19  ;;  %2742 = vmatprep.mubr.bf16.mxu0 %v4924_v20 }
  0xb5   : > { %2646 = vmatmul.mubr.bf16.gmra.mxu1 %v4926_v23  ;;  %2743 = vmatmul.mubr.bf16.gmra.mxu0 %v4927_v24 }
  0xb6   : > { %2653 = vmatprep.mubr.bf16.mxu1 %v4928_v25  ;;  %2750 = vmatprep.mubr.bf16.mxu0 %v4930_v26 }
  0xbd   : > { %2654 = vmatmul.mubr.bf16.gmra.mxu1 %v4932_v28  ;;  %2751 = vmatmul.mubr.bf16.gmra.mxu0 %v4933_v29 }
  0xbe   : > { %2661 = vmatprep.mubr.bf16.mxu1 %v4938_v30  ;;  %2758 = vmatprep.mubr.bf16.mxu0 %v4940_v31 }
  0xc5   : > { %2662 = vmatmul.mubr.bf16.gmra.mxu1 %v4942_v32  ;;  %2759 = vmatmul.mubr.bf16.gmra.mxu0 %v4943_v33  ;;  %v4996_v32 = vld [vmem:[%s5319_s11 + $0x5c0] ss:$52 sps:$4 sm:$0xff]   ;;  %v4997_v33 = vld [vmem:[%s5319_s11 + $0x288] ss:$52 sps:$4 sm:$0xff]  }
  0xc6   : > { %2766 = vmatprep.mubr.bf16.mxu0 %v4944_v34  ;;  %2863 = vmatprep.mubr.bf16.mxu1 %v4948_v35  ;;  %v5002_v34 = vld [vmem:[%s5319_s11 + $0x62c] ss:$52 sps:$4 sm:$0xff]   ;;  %v5004_v35 = vld [vmem:[%s5319_s11 + $0x2f4] ss:$52 sps:$4 sm:$0xff]  }
  0xcd   : > { %2767 = vmatmul.mubr.bf16.gmra.mxu0 %v4949_v37  ;;  %2864 = vmatmul.mubr.bf16.vlgmr.msra.gmra.mxu1 %v4946_v36 }
  0xce   : > { %4528 = vmatpush3.bf16.msra.mxu1 %v4951_v38  ;;  %2774 = vmatprep.mubr.bf16.mxu0 %v4954_v39 }
  0xcf   : > { %2871 = vmatprep.mubr.bf16.mxu1 %v4956_v40  ;;  %4529 = vmatprep.subr.bf16.mxu1 %v4966_v41 }
  0xd2   : > { %4530 = vmatpush3.bf16.msra.mxu1 %v4967_v42 }
  0xd3   : > { %4531 = vmatprep.subr.bf16.mxu1 %v4982_v43 }
  0xd5   : > { %2775 = vmatmul.mubr.bf16.gmra.mxu0 %v4958_v44  ;;  %2872 = vmatmul.mubr.bf16.gmra.mxu1 %v4959_v45 }
  0xd6   : > { %2782 = vmatprep.mubr.bf16.mxu0 %v4960_v46  ;;  %2879 = vmatprep.mubr.bf16.mxu1 %v4962_v47 }
  0xd7   : > { %4532 = vmatpush3.bf16.msra.mxu1 %v4983_v48  ;;  %v5006_v48 = vld [vmem:[%s5319_s11 + $0x628] ss:$52 sps:$4 sm:$0xff]  }
  0xd8   : > { %4533 = vmatprep.subr.bf16.mxu1 %v4998_v49  ;;  %v5007_v49 = vld [vmem:[%s5319_s11 + $0x2f0] ss:$52 sps:$4 sm:$0xff]  }
  0xdb   : > { %4534 = vmatpush3.bf16.msra.mxu1 %v4999_v50  ;;  %v5010_v50 = vld [vmem:[%s5319_s11 + $0x35c] ss:$52 sps:$4 sm:$0xff]  }
  0xdc   : > { %4535 = vmatprep.subr.bf16.mxu1 %v5014_v51  ;;  %v5013_v51 = vld [vmem:[%s5319_s11 + $0x24] ss:$52 sps:$4 sm:$0xff]  }
  0xdd   : > { %2783 = vmatmul.mubr.bf16.gmra.mxu0 %v4964_v52  ;;  %2880 = vmatmul.mubr.bf16.gmra.mxu1 %v4965_v53 }
  0xde   : > { %2790 = vmatprep.mubr.bf16.mxu0 %v4970_v54  ;;  %2887 = vmatprep.mubr.bf16.mxu1 %v4972_v55 }
  0xdf   : > { %4536 = vmatpush3.bf16.msra.mxu1 %v5015_v56 }
  0xe0   : > { %4537 = vmatprep.subr.bf16.mxu1 %v5029_v57 }
  0xe3   : > { %4538 = vmatpush3.bf16.msra.mxu1 %v5030_v58 }
  0xe4   : > { %4539 = vmatprep.subr.bf16.mxu1 %v5044_v59 }
  0xe5   : > { %2791 = vmatmul.mubr.bf16.gmra.mxu0 %v4974_v60  ;;  %2888 = vmatmul.mubr.bf16.gmra.mxu1 %v4975_v61 }
  0xe6   : > { %2798 = vmatprep.mubr.bf16.mxu0 %v4976_v62  ;;  %2895 = vmatprep.mubr.bf16.mxu1 %v4978_v63 }
  0xe7   : > { %4540 = vmatpush3.bf16.msra.mxu1 %v5045_v0  ;;  %v5008_v0 = vld [vmem:[%s5319_s11 + $0x358] ss:$52 sps:$4 sm:$0xff]  }
  0xe8   : > { %4541 = vmatprep.subr.bf16.mxu1 %v5059_v1  ;;  %v5011_v1 = vld [vmem:[%s5319_s11 + $0x20] ss:$52 sps:$4 sm:$0xff]  }
  0xeb   : > { %4542 = vmatpush3.bf16.msra.mxu1 %v5060_v2  ;;  %v5019_v2 = vld [vmem:[%s5319_s11 + $0x3c4] ss:$52 sps:$4 sm:$0xff]  }
  0xed   : > { %v3983_v7 = vpop.f32.mrf.mxu0  ;;  %v4055_v8 = vpop.f32.mrf.mxu1  ;;  %2799 = vmatmul.mubr.bf16.gmra.mxu0 %v4980_v3  ;;  %2896 = vmatmul.mubr.bf16.gmra.mxu1 %v4981_v4 }
  0xee   : > { %2806 = vmatprep.mubr.bf16.mxu0 %v4986_v5  ;;  %2903 = vmatprep.mubr.bf16.mxu1 %v4988_v6  ;;  %v5022_v5 = vld [vmem:[%s5319_s11 + $0x8c] ss:$52 sps:$4 sm:$0xff]   ;;  %v5031_v6 = vld [vmem:[%s6515_s1 + $0x330] sm:$0xff]  }
  0xef   : > { %v3984_v9 = vpop.f32.mrf.mxu0  ;;  %v4056_v10 = vpop.f32.mrf.mxu1 }
  0xf0   : > { %v5692_v13 = vadd.f32 %v3984_v9, %v3983_v7  ;;  %v5694_v14 = vadd.f32 %v4056_v10, %v4055_v8 }
  0xf1   : > { %v3986_v15 = vpop.f32.mrf.mxu0  ;;  %v4058_v16 = vpop.f32.mrf.mxu1 }
  0xf3   : > { %v3987_v19 = vpop.f32.mrf.mxu0  ;;  %v4059_v20 = vpop.f32.mrf.mxu1 }
  0xf4   : > { %v5698_v21 = vadd.f32 %v3987_v19, %v3986_v15  ;;  %v5700_v22 = vadd.f32 %v4059_v20, %v4058_v16  ;;  %v5046_v16 = vld [vmem:[%s6515_s1 + $0x328] sm:$0xff]  }
  0xf5   : > { %v3989_v23 = vpop.f32.mrf.mxu0  ;;  %v4061_v24 = vpop.f32.mrf.mxu1  ;;  %2807 = vmatmul.mubr.bf16.gmra.mxu0 %v4990_v11  ;;  %2904 = vmatmul.mubr.bf16.gmra.mxu1 %v4991_v12  ;;  %v5745_v11 = vld [vmem:[%s6516_s2] ss:$0 sm:$0xff] }
  0xf6   : > { %2814 = vmatprep.mubr.bf16.mxu0 %v4992_v17  ;;  %2911 = vmatprep.mubr.bf16.mxu1 %v4994_v18  ;;  %v2383_v17 = vadd.f32 %v5692_v13, %v5745_v11 }
  0xf7   : > { %v3990_v25 = vpop.f32.mrf.mxu0  ;;  %v4062_v26 = vpop.f32.mrf.mxu1 }
  0xf8   : > { %v5702_v28 = vadd.f32 %v3990_v25, %v3989_v23  ;;  %v5704_v29 = vadd.f32 %v4062_v26, %v4061_v24  ;;  %v5017_v23 = vld [vmem:[%s5319_s11 + $0x3c0] ss:$52 sps:$4 sm:$0xff]   ;;  %v5020_v24 = vld [vmem:[%s5319_s11 + $0x88] ss:$52 sps:$4 sm:$0xff]  }
  0xf9   : > { %v3992_v30 = vpop.f32.mrf.mxu0  ;;  %v4064_v31 = vpop.f32.mrf.mxu1  ;;  %v5025_v26 = vld [vmem:[%s5319_s11 + $0x42c] ss:$52 sps:$4 sm:$0xff]  }
  0xfb   : > { %v3993_v36 = vpop.f32.mrf.mxu0  ;;  %v4065_v37 = vpop.f32.mrf.mxu1 }
  0xfc   : > { %v5710_v38 = vadd.f32 %v3993_v36, %v3992_v30  ;;  %v5712_v39 = vadd.f32 %v4065_v37, %v4064_v31  ;;  %v5028_v30 = vld [vmem:[%s5319_s11 + $0xf4] ss:$52 sps:$4 sm:$0xff]  }
  0xfd   : > { %v3995_v40 = vpop.f32.mrf.mxu0  ;;  %v4067_v41 = vpop.f32.mrf.mxu1  ;;  %2815 = vmatmul.mubr.bf16.gmra.mxu0 %v4996_v32  ;;  %2912 = vmatmul.mubr.bf16.gmra.mxu1 %v4997_v33  ;;  %v2386_v33 = vadd.f32 %v5698_v21, %v5745_v11 }
  0xfe   : > { %2822 = vmatprep.mubr.bf16.mxu0 %v5002_v34  ;;  %2919 = vmatprep.mubr.bf16.mxu1 %v5004_v35  ;;  %v5061_v35 = vld [vmem:[%s6515_s1 + $0x320] sm:$0xff]  }
  0xff   : > { %v3996_v42 = vpop.f32.mrf.mxu0  ;;  %v4068_v43 = vpop.f32.mrf.mxu1 }
 0x100   : > { %v5714_v44 = vadd.f32 %v3996_v42, %v3995_v40  ;;  %v5716_v45 = vadd.f32 %v4068_v43, %v4067_v41  ;;  %v2391_v42 = vadd.f32 %v5702_v28, %v5745_v11  ;;  %v2394_v28 = vadd.f32 %v5710_v38, %v5745_v11 }
 0x101   : > { %v3998_v46 = vpop.f32.mrf.mxu0  ;;  %v4070_v47 = vpop.f32.mrf.mxu1 }
 0x103   : > { %v3999_v52 = vpop.f32.mrf.mxu0  ;;  %v4071_v53 = vpop.f32.mrf.mxu1 }
 0x104   : > { %v5722_v54 = vadd.f32 %v3999_v52, %v3998_v46  ;;  %v5724_v55 = vadd.f32 %v4071_v53, %v4070_v47  ;;  %v5074_v47 = vld [vmem:[%s6515_s1 + $0x318] sm:$0xff]   ;;  %v5034_v53 = vld [vmem:[%s5319_s11 + $0x494] ss:$52 sps:$4 sm:$0xff]  }
 0x105   : > { %v4001_v56 = vpop.f32.mrf.mxu0  ;;  %v4073_v57 = vpop.f32.mrf.mxu1  ;;  %2823 = vmatmul.mubr.bf16.gmra.mxu0 %v5006_v48  ;;  %2920 = vmatmul.mubr.bf16.gmra.mxu1 %v5007_v49 }
 0x106   : > { %2927 = vmatprep.mubr.bf16.mxu1 %v5010_v50  ;;  %3024 = vmatprep.mubr.bf16.mxu0 %v5013_v51  ;;  %v5023_v50 = vld [vmem:[%s5319_s11 + $0x428] ss:$52 sps:$4 sm:$0xff]   ;;  %v5026_v51 = vld [vmem:[%s5319_s11 + $0xf0] ss:$52 sps:$4 sm:$0xff]  }
 0x107   : > { %v4002_v58 = vpop.f32.mrf.mxu0  ;;  %v4074_v59 = vpop.f32.mrf.mxu1 }
 0x108   : > { %v5726_v60 = vadd.f32 %v4002_v58, %v4001_v56  ;;  %v5728_v61 = vadd.f32 %v4074_v59, %v4073_v57  ;;  %v5037_v56 = vld [vmem:[%s5319_s11 + $0x15c] ss:$52 sps:$4 sm:$0xff]  }
 0x109   : > { %v4004_v62 = vpop.f32.mrf.mxu0  ;;  %v4076_v63 = vpop.f32.mrf.mxu1 }
 0x10b   : > { %v4005_v3 = vpop.f32.mrf.mxu0  ;;  %v4077_v4 = vpop.f32.mrf.mxu1 }
 0x10c   : > { %v5737_v7 = vadd.f32 %v4005_v3, %v4004_v62  ;;  %v5739_v8 = vadd.f32 %v4077_v4, %v4076_v63  ;;  %v5087_v63 = vld [vmem:[%s6515_s1 + $0x310] sm:$0xff]   ;;  %v2399_v4 = vadd.f32 %v5714_v44, %v5745_v11  ;;  %v2402_v44 = vadd.f32 %v5722_v54, %v5745_v11 }
 0x10d   : > { %v4007_v9 = vpop.f32.mrf.mxu0  ;;  %v4095_v10 = vpop.f32.mrf.mxu1  ;;  %2928 = vmatmul.mubr.bf16.gmra.mxu1 %v5008_v0  ;;  %3025 = vmatmul.mubr.bf16.vlgmr.msra.gmra.mxu0 %v5011_v1 }
 0x10e   : > { %4664 = vmatpush3.bf16.msra.mxu0 %v5614_v27  ;;  %2935 = vmatprep.mubr.bf16.mxu1 %v5019_v2 }
 0x10f   : > { %v4008_v12 = vpop.f32.mrf.mxu0  ;;  %v4096_v15 = vpop.f32.mrf.mxu1  ;;  %3032 = vmatprep.mubr.bf16.mxu0 %v5022_v5  ;;  %4665 = vmatprep.subr.bf16.mxu0 %v5031_v6 }
 0x110   : > { %v5752_v27 = vadd.f32 %v4008_v12, %v4007_v9  ;;  %v4097_v18 = vadd.f32 %v4096_v15, %v4095_v10  ;;  %v5100_v9 = vld [vmem:[%s6515_s1 + $0x308] sm:$0xff]   ;;  %v5032_v15 = vld [vmem:[%s5319_s11 + $0x490] ss:$52 sps:$4 sm:$0xff]  }
 0x111   : > { %v4010_v19 = vpop.f32.mrf.mxu0  ;;  %v4098_v20 = vpop.f32.mrf.mxu1 }
 0x112   : > { %v5756_v25 = vadd.f32 %v4097_v18, %v2383_v17  ;;  %4666 = vmatpush3.bf16.msra.mxu0 %v5031_v6  ;;  %v5040_v18 = vld [vmem:[%s5319_s11 + $0x4fc] ss:$52 sps:$4 sm:$0xff]  }
 0x113   : > { %v4011_v31 = vpop.f32.mrf.mxu0  ;;  %v4099_v32 = vpop.f32.mrf.mxu1  ;;  %4667 = vmatprep.subr.bf16.mxu0 %v5046_v16 }
 0x114   : > { %v5762_v34 = vadd.f32 %v4011_v31, %v4010_v19  ;;  %v4100_v13 = vadd.f32 %v4099_v32, %v4098_v20  ;;  %v5043_v19 = vld [vmem:[%s5319_s11 + $0x1c4] ss:$52 sps:$4 sm:$0xff]  }
 0x115   : > { %v4013_v36 = vpop.f32.mrf.mxu0  ;;  %v4101_v37 = vpop.f32.mrf.mxu1  ;;  %2936 = vmatmul.mubr.bf16.gmra.mxu1 %v5017_v23  ;;  %3033 = vmatmul.mubr.bf16.gmra.mxu0 %v5020_v24 }
 0x116   : > { %v5767_v40 = vadd.f32 %v4100_v13, %v2386_v33  ;;  %2943 = vmatprep.mubr.bf16.mxu1 %v5025_v26  ;;  %3040 = vmatprep.mubr.bf16.mxu0 %v5028_v30  ;;  %v5113_v30 = vld [vmem:[%s6515_s1 + $0x300] sm:$0xff]  }
 0x117   : > { %v4014_v21 = vpop.f32.mrf.mxu0  ;;  %v4102_v41 = vpop.f32.mrf.mxu1  ;;  %4668 = vmatpush3.bf16.msra.mxu0 %v5046_v16  ;;  %v5035_v16 = vld [vmem:[%s5319_s11 + $0x158] ss:$52 sps:$4 sm:$0xff]  }
 0x118   : > { %v5771_v43 = vadd.f32 %v4014_v21, %v4013_v36  ;;  %v4103_v46 = vadd.f32 %v4102_v41, %v4101_v37  ;;  %4669 = vmatprep.subr.bf16.mxu0 %v5061_v35 }
 0x119   : > { %v4016_v48 = vpop.f32.mrf.mxu0  ;;  %v4104_v49 = vpop.f32.mrf.mxu1 }
 0x11a   : > { %v5778_v52 = vadd.f32 %v4103_v46, %v2391_v42  ;;  %v5038_v42 = vld [vmem:[%s5319_s11 + $0x4f8] ss:$52 sps:$4 sm:$0xff]   ;;  %v5041_v46 = vld [vmem:[%s5319_s11 + $0x1c0] ss:$52 sps:$4 sm:$0xff]  }
 0x11b   : > { %v4017_v57 = vpop.f32.mrf.mxu0  ;;  %v4105_v58 = vpop.f32.mrf.mxu1  ;;  %4670 = vmatpush3.bf16.msra.mxu0 %v5061_v35  ;;  %v2407_v35 = vadd.f32 %v5726_v60, %v5745_v11 }
 0x11c   : > { %v5784_v59 = vadd.f32 %v4017_v57, %v4016_v48  ;;  %v4106_v62 = vadd.f32 %v4105_v58, %v4104_v49  ;;  %4671 = vmatprep.subr.bf16.mxu0 %v5074_v47  ;;  %v5049_v48 = vld [vmem:[%s5319_s11 + $0x564] ss:$52 sps:$4 sm:$0xff]   ;;  %v5052_v49 = vld [vmem:[%s5319_s11 + $0x22c] ss:$52 sps:$4 sm:$0xff]  }
 0x11d   : > { %v4019_v0 = vpop.f32.mrf.mxu0  ;;  %v4107_v1 = vpop.f32.mrf.mxu1  ;;  %2944 = vmatmul.mubr.bf16.gmra.mxu1 %v5023_v50  ;;  %3041 = vmatmul.mubr.bf16.gmra.mxu0 %v5026_v51 }
 0x11e   : > { %v5789_v2 = vadd.f32 %v4106_v62, %v2394_v28  ;;  %2951 = vmatprep.mubr.bf16.mxu1 %v5034_v53  ;;  %3048 = vmatprep.mubr.bf16.mxu0 %v5037_v56  ;;  %v2410_v53 = vadd.f32 %v5737_v7, %v5745_v11  ;;  %v2415_v7 = vadd.f32 %v5752_v27, %v5745_v11 }
 0x11f   : > { %v4020_v38 = vpop.f32.mrf.mxu0  ;;  %v4108_v3 = vpop.f32.mrf.mxu1  ;;  %4672 = vmatpush3.bf16.msra.mxu0 %v5074_v47 }
 0x120   : > { %v5793_v5 = vadd.f32 %v4020_v38, %v4019_v0  ;;  %v4109_v6 = vadd.f32 %v4108_v3, %v4107_v1  ;;  %4673 = vmatprep.subr.bf16.mxu0 %v5087_v63 }
 0x121   : > { %v4022_v10 = vpop.f32.mrf.mxu0  ;;  %v4110_v12 = vpop.f32.mrf.mxu1 }
 0x122   : > { %v5800_v17 = vadd.f32 %v4109_v6, %v2399_v4  ;;  %v5047_v4 = vld [vmem:[%s5319_s11 + $0x560] ss:$52 sps:$4 sm:$0xff]   ;;  %v5050_v6 = vld [vmem:[%s5319_s11 + $0x228] ss:$52 sps:$4 sm:$0xff]  }
 0x123   : > { %v4023_v20 = vpop.f32.mrf.mxu0  ;;  %v4111_v23 = vpop.f32.mrf.mxu1  ;;  %4674 = vmatpush3.bf16.msra.mxu0 %v5087_v63 }
 0x124   : > { %v5806_v24 = vadd.f32 %v4023_v20, %v4022_v10  ;;  %v4112_v26 = vadd.f32 %v4111_v23, %v4110_v12  ;;  %4675 = vmatprep.subr.bf16.mxu0 %v5100_v9  ;;  %v5055_v10 = vld [vmem:[%s5319_s11 + $0x5cc] ss:$52 sps:$4 sm:$0xff]   ;;  %v5058_v12 = vld [vmem:[%s5319_s11 + $0x294] ss:$52 sps:$4 sm:$0xff]  }
 0x125   : > { %v4025_v31 = vpop.f32.mrf.mxu0  ;;  %v4113_v32 = vpop.f32.mrf.mxu1  ;;  %2952 = vmatmul.mubr.bf16.gmra.mxu1 %v5032_v15  ;;  %3049 = vmatmul.mubr.bf16.gmra.mxu0 %v5035_v16 }
 0x126   : > { %v5811_v33 = vadd.f32 %v4112_v26, %v2402_v44  ;;  %2959 = vmatprep.mubr.bf16.mxu1 %v5040_v18  ;;  %3056 = vmatprep.mubr.bf16.mxu0 %v5043_v19  ;;  %v2418_v18 = vadd.f32 %v5762_v34, %v5745_v11  ;;  %v2423_v34 = vadd.f32 %v5771_v43, %v5745_v11 }
 0x127   : > { %v4026_v54 = vpop.f32.mrf.mxu0  ;;  %v4114_v13 = vpop.f32.mrf.mxu1  ;;  %4676 = vmatpush3.bf16.msra.mxu0 %v5100_v9 }
 0x128   : > { %v5815_v36 = vadd.f32 %v4026_v54, %v4025_v31  ;;  %v4115_v37 = vadd.f32 %v4114_v13, %v4113_v32  ;;  %4677 = vmatprep.subr.bf16.mxu0 %v5113_v30 }
 0x129   : > { %v4028_v21 = vpop.f32.mrf.mxu0  ;;  %v4116_v41 = vpop.f32.mrf.mxu1 }
 0x12a   : > { %v5819_v47 = vadd.f32 %v4115_v37, %v2407_v35  ;;  %v5053_v35 = vld [vmem:[%s5319_s11 + $0x5c8] ss:$52 sps:$4 sm:$0xff]   ;;  %v5056_v37 = vld [vmem:[%s5319_s11 + $0x290] ss:$52 sps:$4 sm:$0xff]  }
 0x12b   : > { %v4029_v50 = vpop.f32.mrf.mxu0  ;;  %v4117_v51 = vpop.f32.mrf.mxu1  ;;  %4678 = vmatpush3.bf16.msra.mxu0 %v5113_v30 }
 0x12c   : > { %v5825_v56 = vadd.f32 %v4029_v50, %v4028_v21  ;;  %v4118_v60 = vadd.f32 %v4117_v51, %v4116_v41  ;;  %v5064_v41 = vld [vmem:[%s5319_s11 + $0x634] ss:$52 sps:$4 sm:$0xff]  }
 0x12d   : > { %v4031_v57 = vpop.f32.mrf.mxu0  ;;  %v4119_v58 = vpop.f32.mrf.mxu1  ;;  %2960 = vmatmul.mubr.bf16.gmra.mxu1 %v5038_v42  ;;  %3057 = vmatmul.mubr.bf16.gmra.mxu0 %v5041_v46  ;;  %v5067_v42 = vld [vmem:[%s5319_s11 + $0x2fc] ss:$52 sps:$4 sm:$0xff]  }
 0x12e   : > { %v5827_v28 = vadd.f32 %v4118_v60, %v2410_v53  ;;  %2967 = vmatprep.mubr.bf16.mxu1 %v5049_v48  ;;  %3064 = vmatprep.mubr.bf16.mxu0 %v5052_v49  ;;  %v2426_v49 = vadd.f32 %v5784_v59, %v5745_v11  ;;  %v2431_v59 = vadd.f32 %v5793_v5, %v5745_v11 }
 0x12f   : > { %v4032_v62 = vpop.f32.mrf.mxu0  ;;  %v4120_v63 = vpop.f32.mrf.mxu1 }
 0x130   : > { %v5831_v0 = vadd.f32 %v4032_v62, %v4031_v57  ;;  %v4121_v1 = vadd.f32 %v4120_v63, %v4119_v58 }
 0x131   : > { %v4034_v38 = vpop.f32.mrf.mxu0  ;;  %v4122_v3 = vpop.f32.mrf.mxu1 }
 0x132   : > { %v5835_v9 = vadd.f32 %v4121_v1, %v2415_v7 }
 0x133   : > { %v4035_v15 = vpop.f32.mrf.mxu0  ;;  %v4123_v16 = vpop.f32.mrf.mxu1 }
 0x134   : > { %v5841_v19 = vadd.f32 %v4035_v15, %v4034_v38  ;;  %v4124_v27 = vadd.f32 %v4123_v16, %v4122_v3  ;;  %v5062_v38 = vld [vmem:[%s5319_s11 + $0x630] ss:$52 sps:$4 sm:$0xff]   ;;  %v5065_v3 = vld [vmem:[%s5319_s11 + $0x2f8] ss:$52 sps:$4 sm:$0xff]   ;;  %v2434_v16 = vadd.f32 %v5806_v24, %v5745_v11  ;;  %v2439_v24 = vadd.f32 %v5815_v36, %v5745_v11 }
 0x135   : > { %v4037_v20 = vpop.f32.mrf.mxu0  ;;  %v4125_v23 = vpop.f32.mrf.mxu1  ;;  %2968 = vmatmul.mubr.bf16.gmra.mxu1 %v5047_v4  ;;  %3065 = vmatmul.mubr.bf16.gmra.mxu0 %v5050_v6  ;;  %v5070_v6 = vld [vmem:[%s5319_s11 + $0x364] ss:$52 sps:$4 sm:$0xff]  }
 0x136   : > { %v5843_v44 = vadd.f32 %v4124_v27, %v2418_v18  ;;  %2975 = vmatprep.mubr.bf16.mxu1 %v5055_v10  ;;  %3072 = vmatprep.mubr.bf16.mxu0 %v5058_v12  ;;  %v5073_v10 = vld [vmem:[%s5319_s11 + $0x2c] ss:$52 sps:$4 sm:$0xff]  }
 0x137   : > { %v4038_v26 = vpop.f32.mrf.mxu0  ;;  %v4126_v30 = vpop.f32.mrf.mxu1 }
 0x138   : > { %v5847_v31 = vadd.f32 %v4038_v26, %v4037_v20  ;;  %v4127_v32 = vadd.f32 %v4126_v30, %v4125_v23 }
 0x139   : > { %v4040_v54 = vpop.f32.mrf.mxu0  ;;  %v4128_v13 = vpop.f32.mrf.mxu1 }
 0x13a   : > { %v5851_v21 = vadd.f32 %v4127_v32, %v2423_v34 }
 0x13b   : > { %v4041_v46 = vpop.f32.mrf.mxu0  ;;  %v4129_v48 = vpop.f32.mrf.mxu1 }
 0x13c   : > { %v5857_v50 = vadd.f32 %v4041_v46, %v4040_v54  ;;  %v4130_v43 = vadd.f32 %v4129_v48, %v4128_v13  ;;  %v5080_v46 = vld [vmem:[%s5319_s11 + $0x94] ss:$52 sps:$4 sm:$0xff]  }
 0x13d   : > { %v4043_v51 = vpop.f32.mrf.mxu0  ;;  %v4131_v53 = vpop.f32.mrf.mxu1  ;;  %2976 = vmatmul.mubr.bf16.gmra.mxu1 %v5053_v35  ;;  %3073 = vmatmul.mubr.bf16.gmra.mxu0 %v5056_v37  ;;  %v5068_v35 = vld [vmem:[%s5319_s11 + $0x360] ss:$52 sps:$4 sm:$0xff]   ;;  %v5071_v37 = vld [vmem:[%s5319_s11 + $0x28] ss:$52 sps:$4 sm:$0xff]  }
 0x13e   : > { %v5859_v60 = vadd.f32 %v4130_v43, %v2426_v49  ;;  %2983 = vmatprep.mubr.bf16.mxu1 %v5064_v41  ;;  %3080 = vmatprep.mubr.bf16.mxu0 %v5067_v42  ;;  %v5077_v42 = vld [vmem:[%s5319_s11 + $0x3cc] ss:$52 sps:$4 sm:$0xff]   ;;  %v2442_v43 = vadd.f32 %v5825_v56, %v5745_v11  ;;  %v2447_v56 = vadd.f32 %v5831_v0, %v5745_v11 }
 0x13f   : > { %v4044_v57 = vpop.f32.mrf.mxu0  ;;  %v4132_v58 = vpop.f32.mrf.mxu1 }
 0x140   : > { %v5863_v62 = vadd.f32 %v4044_v57, %v4043_v51  ;;  %v4133_v63 = vadd.f32 %v4132_v58, %v4131_v53 }
 0x141   : > { %v4046_v7 = vpop.f32.mrf.mxu0  ;;  %v4134_v1 = vpop.f32.mrf.mxu1 }
 0x142   : > { %v5867_v4 = vadd.f32 %v4133_v63, %v2431_v59 }
 0x143   : > { %v4047_v12 = vpop.f32.mrf.mxu0  ;;  %v4135_v15 = vpop.f32.mrf.mxu1 }
 0x144   : > { %v5873_v18 = vadd.f32 %v4047_v12, %v4046_v7  ;;  %v4136_v5 = vadd.f32 %v4135_v15, %v4134_v1 }
 0x145   : > { %v4049_v27 = vpop.f32.mrf.mxu0  ;;  %v4137_v20 = vpop.f32.mrf.mxu1  ;;  %2984 = vmatmul.mubr.bf16.gmra.mxu1 %v5062_v38  ;;  %3081 = vmatmul.mubr.bf16.gmra.mxu0 %v5065_v3 }
 0x146   : > { %v5875_v23 = vadd.f32 %v4136_v5, %v2434_v16  ;;  %3088 = vmatprep.mubr.bf16.mxu0 %v5070_v6  ;;  %3185 = vmatprep.mubr.bf16.mxu1 %v5073_v10  ;;  %v5075_v6 = vld [vmem:[%s5319_s11 + $0x3c8] ss:$52 sps:$4 sm:$0xff]   ;;  %v5078_v10 = vld [vmem:[%s5319_s11 + $0x90] ss:$52 sps:$4 sm:$0xff]  }
 0x147   : > { %v4050_v26 = vpop.f32.mrf.mxu0  ;;  %v4138_v30 = vpop.f32.mrf.mxu1  ;;  %v5083_v16 = vld [vmem:[%s5319_s11 + $0x434] ss:$52 sps:$4 sm:$0xff]   ;;  %v5086_v5 = vld [vmem:[%s5319_s11 + $0xfc] ss:$52 sps:$4 sm:$0xff]  }
 0x148   : > { %v5879_v34 = vadd.f32 %v4050_v26, %v4049_v27  ;;  %v4139_v32 = vadd.f32 %v4138_v30, %v4137_v20  ;;  %v2450_v26 = vadd.f32 %v5841_v19, %v5745_v11  ;;  %v2455_v19 = vadd.f32 %v5847_v31, %v5745_v11 }
 0x149   : > { %v4052_v54 = vpop.f32.mrf.mxu0  ;;  %v4140_v13 = vpop.f32.mrf.mxu1 }
 0x14a   : > { %v5883_v41 = vadd.f32 %v4139_v32, %v2439_v24 }
 0x14b   : > { %v4053_v48 = vpop.f32.mrf.mxu0  ;;  %v4141_v49 = vpop.f32.mrf.mxu1 }
 0x14c   : > { %v5889_v51 = vadd.f32 %v4053_v48, %v4052_v54  ;;  %v4142_v36 = vadd.f32 %v4141_v49, %v4140_v13  ;;  %v5081_v49 = vld [vmem:[%s5319_s11 + $0x430] ss:$52 sps:$4 sm:$0xff]  }
 0x14d   : > { %v4143_v53 = vpop.f32.mrf.mxu1  ;;  %v4207_v57 = vpop.f32.mrf.mxu0  ;;  %3089 = vmatmul.mubr.bf16.gmra.mxu0 %v5068_v35  ;;  %3186 = vmatmul.mubr.bf16.vlgmr.msra.gmra.mxu1 %v5071_v37 }
 0x14e   : > { %v5891_v58 = vadd.f32 %v4142_v36, %v2442_v43  ;;  %3096 = vmatprep.mubr.bf16.mxu0 %v5077_v42  ;;  %3193 = vmatprep.mubr.bf16.mxu1 %v5080_v46  ;;  %v5084_v43 = vld [vmem:[%s5319_s11 + $0xf8] ss:$52 sps:$4 sm:$0xff]  }
 0x14f   : > { %v4144_v59 = vpop.f32.mrf.mxu1  ;;  %v4208_v63 = vpop.f32.mrf.mxu0 }
 0x150   : > { %v4145_v7 = vadd.f32 %v4144_v59, %v4143_v53  ;;  %v4209_v1 = vadd.f32 %v4208_v63, %v4207_v57  ;;  %v5093_v57 = vld [vmem:[%s5319_s11 + $0x164] ss:$52 sps:$4 sm:$0xff]  }
 0x151   : > { %v4146_v38 = vpop.f32.mrf.mxu1  ;;  %v4210_v3 = vpop.f32.mrf.mxu0 }
 0x152   : > { %v5897_v12 = vadd.f32 %v4145_v7, %v2447_v56  ;;  %v5900_v15 = vadd.f32 %v4209_v1, %v5756_v25  ;;  %v2458_v56 = vadd.f32 %v5857_v50, %v5745_v11  ;;  %v2463_v50 = vadd.f32 %v5863_v62, %v5745_v11 }
 0x153   : > { %v4147_v27 = vpop.f32.mrf.mxu1  ;;  %v4211_v20 = vpop.f32.mrf.mxu0 }
 0x154   : > { %v4148_v30 = vadd.f32 %v4147_v27, %v4146_v38  ;;  %v4212_v0 = vadd.f32 %v4211_v20, %v4210_v3 }
 0x155   : > { %v4149_v24 = vpop.f32.mrf.mxu1  ;;  %v4213_v32 = vpop.f32.mrf.mxu0  ;;  %3097 = vmatmul.mubr.bf16.gmra.mxu0 %v5075_v6  ;;  %3194 = vmatmul.mubr.bf16.gmra.mxu1 %v5078_v10 }
 0x156   : > { %v5906_v54 = vadd.f32 %v4148_v30, %v2450_v26  ;;  %v5909_v25 = vadd.f32 %v4212_v0, %v5767_v40  ;;  %3104 = vmatprep.mubr.bf16.mxu0 %v5083_v16  ;;  %3201 = vmatprep.mubr.bf16.mxu1 %v5086_v5  ;;  %v5090_v40 = vld [vmem:[%s5319_s11 + $0x49c] ss:$52 sps:$4 sm:$0xff]   ;;  %v5088_v26 = vld [vmem:[%s5319_s11 + $0x498] ss:$52 sps:$4 sm:$0xff]   ;;  %v5091_v30 = vld [vmem:[%s5319_s11 + $0x160] ss:$52 sps:$4 sm:$0xff]  }
 0x157   : > { %v4150_v13 = vpop.f32.mrf.mxu1  ;;  %v4214_v35 = vpop.f32.mrf.mxu0 }
 0x158   : > { %v4151_v37 = vadd.f32 %v4150_v13, %v4149_v24  ;;  %v4215_v42 = vadd.f32 %v4214_v35, %v4213_v32  ;;  %v5099_v32 = vld [vmem:[%s5319_s11 + $0x1cc] ss:$52 sps:$4 sm:$0xff]  }
 0x159   : > { %v4152_v46 = vpop.f32.mrf.mxu1  ;;  %v4216_v48 = vpop.f32.mrf.mxu0 }
 0x15a   : > { %v5915_v36 = vadd.f32 %v4151_v37, %v2455_v19  ;;  %v5918_v53 = vadd.f32 %v4215_v42, %v5778_v52  ;;  %v2466_v19 = vadd.f32 %v5873_v18, %v5745_v11  ;;  %v2471_v18 = vadd.f32 %v5879_v34, %v5745_v11 }
 0x15b   : > { %v4153_v59 = vpop.f32.mrf.mxu1  ;;  %v4217_v63 = vpop.f32.mrf.mxu0 }
 0x15c   : > { %v4154_v7 = vadd.f32 %v4153_v59, %v4152_v46  ;;  %v4218_v31 = vadd.f32 %v4217_v63, %v4216_v48 }
 0x15d   : > { %v4155_v1 = vpop.f32.mrf.mxu1  ;;  %v4219_v38 = vpop.f32.mrf.mxu0  ;;  %3105 = vmatmul.mubr.bf16.gmra.mxu0 %v5081_v49  ;;  %3202 = vmatmul.mubr.bf16.gmra.mxu1 %v5084_v43 }
 0x15e   : > { %v5924_v3 = vadd.f32 %v4154_v7, %v2458_v56  ;;  %v5927_v52 = vadd.f32 %v4218_v31, %v5789_v2  ;;  %3112 = vmatprep.mubr.bf16.mxu0 %v5090_v40  ;;  %3209 = vmatprep.mubr.bf16.mxu1 %v5093_v57  ;;  %v5096_v2 = vld [vmem:[%s5319_s11 + $0x504] ss:$52 sps:$4 sm:$0xff]   ;;  %v5094_v56 = vld [vmem:[%s5319_s11 + $0x500] ss:$52 sps:$4 sm:$0xff]   ;;  %v5097_v7 = vld [vmem:[%s5319_s11 + $0x1c8] ss:$52 sps:$4 sm:$0xff]  }
 0x15f   : > { %v4156_v6 = vpop.f32.mrf.mxu1  ;;  %v4220_v10 = vpop.f32.mrf.mxu0 }
 0x160   : > { %v4157_v16 = vadd.f32 %v4156_v6, %v4155_v1  ;;  %v4221_v5 = vadd.f32 %v4220_v10, %v4219_v38  ;;  %v5106_v38 = vld [vmem:[%s5319_s11 + $0x234] ss:$52 sps:$4 sm:$0xff]  }
 0x161   : > { %v4158_v27 = vpop.f32.mrf.mxu1  ;;  %v4222_v20 = vpop.f32.mrf.mxu0 }
 0x162   : > { %v5933_v0 = vadd.f32 %v4157_v16, %v2463_v50  ;;  %v5936_v24 = vadd.f32 %v4221_v5, %v5800_v17  ;;  %v2474_v50 = vadd.f32 %v5889_v51, %v5745_v11  ;;  %v2479_v51 = vadd.f32 %v5694_v14, %v5745_v11 }
 0x163   : > { %v4159_v13 = vpop.f32.mrf.mxu1  ;;  %v4223_v35 = vpop.f32.mrf.mxu0 }
 0x164   : > { %v4160_v37 = vadd.f32 %v4159_v13, %v4158_v27  ;;  %v4224_v62 = vadd.f32 %v4223_v35, %v4222_v20 }
 0x165   : > { %v4161_v42 = vpop.f32.mrf.mxu1  ;;  %v4225_v46 = vpop.f32.mrf.mxu0  ;;  %3113 = vmatmul.mubr.bf16.gmra.mxu0 %v5088_v26  ;;  %3210 = vmatmul.mubr.bf16.gmra.mxu1 %v5091_v30 }
 0x166   : > { %v5942_v48 = vadd.f32 %v4160_v37, %v2466_v19  ;;  %v5945_v17 = vadd.f32 %v4224_v62, %v5811_v33  ;;  %3120 = vmatprep.mubr.bf16.mxu0 %v5096_v2  ;;  %3217 = vmatprep.mubr.bf16.mxu1 %v5099_v32  ;;  %v5103_v33 = vld [vmem:[%s5319_s11 + $0x56c] ss:$52 sps:$4 sm:$0xff]   ;;  %v5101_v19 = vld [vmem:[%s5319_s11 + $0x568] ss:$52 sps:$4 sm:$0xff]   ;;  %v5104_v37 = vld [vmem:[%s5319_s11 + $0x230] ss:$52 sps:$4 sm:$0xff]  }
 0x167   : > { %v4162_v49 = vpop.f32.mrf.mxu1  ;;  %v4226_v43 = vpop.f32.mrf.mxu0 }
 0x168   : > { %v4163_v40 = vadd.f32 %v4162_v49, %v4161_v42  ;;  %v4227_v57 = vadd.f32 %v4226_v43, %v4225_v46  ;;  %v5112_v46 = vld [vmem:[%s5319_s11 + $0x29c] ss:$52 sps:$4 sm:$0xff]  }
 0x169   : > { %v4164_v59 = vpop.f32.mrf.mxu1  ;;  %v4228_v63 = vpop.f32.mrf.mxu0 }
 0x16a   : > { %v5951_v31 = vadd.f32 %v4163_v40, %v2471_v18  ;;  %v5954_v1 = vadd.f32 %v4227_v57, %v5819_v47  ;;  %v2482_v18 = vadd.f32 %v5700_v22, %v5745_v11  ;;  %v2487_v22 = vadd.f32 %v5704_v29, %v5745_v11 }
 0x16b   : > { %v4165_v6 = vpop.f32.mrf.mxu1  ;;  %v4229_v10 = vpop.f32.mrf.mxu0 }
 0x16c   : > { %v4166_v16 = vadd.f32 %v4165_v6, %v4164_v59  ;;  %v4230_v34 = vadd.f32 %v4229_v10, %v4228_v63 }
 0x16d   : > { %v4167_v5 = vpop.f32.mrf.mxu1  ;;  %v4231_v27 = vpop.f32.mrf.mxu0  ;;  %3121 = vmatmul.mubr.bf16.gmra.mxu0 %v5094_v56  ;;  %3218 = vmatmul.mubr.bf16.gmra.mxu1 %v5097_v7 }
 0x16e   : > { %v5960_v20 = vadd.f32 %v4166_v16, %v2474_v50  ;;  %v5963_v47 = vadd.f32 %v4230_v34, %v5827_v28  ;;  %3128 = vmatprep.mubr.bf16.mxu0 %v5103_v33  ;;  %3225 = vmatprep.mubr.bf16.mxu1 %v5106_v38  ;;  %v5109_v28 = vld [vmem:[%s5319_s11 + $0x5d4] ss:$52 sps:$4 sm:$0xff]   ;;  %v5107_v50 = vld [vmem:[%s5319_s11 + $0x5d0] ss:$52 sps:$4 sm:$0xff]   ;;  %v5110_v16 = vld [vmem:[%s5319_s11 + $0x298] ss:$52 sps:$4 sm:$0xff]  }
 0x16f   : > { %v4168_v26 = vpop.f32.mrf.mxu1  ;;  %v4232_v30 = vpop.f32.mrf.mxu0 }
 0x170   : > { %v4169_v2 = vadd.f32 %v4168_v26, %v4167_v5  ;;  %v4233_v32 = vadd.f32 %v4232_v30, %v4231_v27  ;;  %v5119_v27 = vld [vmem:[%s5319_s11 + $0x304] ss:$52 sps:$4 sm:$0xff]  }
 0x171   : > { %v4170_v13 = vpop.f32.mrf.mxu1  ;;  %v4234_v35 = vpop.f32.mrf.mxu0 }
 0x172   : > { %v5969_v62 = vadd.f32 %v4169_v2, %v2479_v51  ;;  %v5972_v42 = vadd.f32 %v4233_v32, %v5835_v9  ;;  %v2490_v51 = vadd.f32 %v5712_v39, %v5745_v11  ;;  %v2495_v39 = vadd.f32 %v5716_v45, %v5745_v11 }
 0x173   : > { %v4171_v49 = vpop.f32.mrf.mxu1  ;;  %v4235_v43 = vpop.f32.mrf.mxu0 }
 0x174   : > { %v4172_v40 = vadd.f32 %v4171_v49, %v4170_v13  ;;  %v4236_v14 = vadd.f32 %v4235_v43, %v4234_v35 }
 0x175   : > { %v4173_v57 = vpop.f32.mrf.mxu1  ;;  %v4237_v59 = vpop.f32.mrf.mxu0  ;;  %3129 = vmatmul.mubr.bf16.gmra.mxu0 %v5101_v19  ;;  %3226 = vmatmul.mubr.bf16.gmra.mxu1 %v5104_v37 }
 0x176   : > { %v5978_v63 = vadd.f32 %v4172_v40, %v2482_v18  ;;  %v5981_v9 = vadd.f32 %v4236_v14, %v5843_v44  ;;  %3136 = vmatprep.mubr.bf16.mxu0 %v5109_v28  ;;  %3233 = vmatprep.mubr.bf16.mxu1 %v5112_v46  ;;  %v5116_v44 = vld [vmem:[%s5319_s11 + $0x63c] ss:$52 sps:$4 sm:$0xff]   ;;  %v5114_v18 = vld [vmem:[%s5319_s11 + $0x638] ss:$52 sps:$4 sm:$0xff]   ;;  %v5117_v40 = vld [vmem:[%s5319_s11 + $0x300] ss:$52 sps:$4 sm:$0xff]  }
 0x177   : > { %v4174_v56 = vpop.f32.mrf.mxu1  ;;  %v4238_v7 = vpop.f32.mrf.mxu0 }
 0x178   : > { %v4175_v33 = vadd.f32 %v4174_v56, %v4173_v57  ;;  %v4239_v38 = vadd.f32 %v4238_v7, %v4237_v59  ;;  %v5123_v59 = vld [vmem:[%s5319_s11 + $0x30] ss:$52 sps:$4 sm:$0xff]  }
 0x179   : > { %v4176_v6 = vpop.f32.mrf.mxu1  ;;  %v4240_v10 = vpop.f32.mrf.mxu0 }
 0x17a   : > { %v5987_v34 = vadd.f32 %v4175_v33, %v2487_v22  ;;  %v5990_v5 = vadd.f32 %v4239_v38, %v5851_v21  ;;  %v2498_v22 = vadd.f32 %v5724_v55, %v5745_v11  ;;  %v2503_v55 = vadd.f32 %v5728_v61, %v5745_v11 }
 0x17b   : > { %v4177_v26 = vpop.f32.mrf.mxu1  ;;  %v4241_v30 = vpop.f32.mrf.mxu0 }
 0x17c   : > { %v4178_v2 = vadd.f32 %v4177_v26, %v4176_v6  ;;  %v4242_v29 = vadd.f32 %v4241_v30, %v4240_v10 }
 0x17d   : > { %v4179_v32 = vpop.f32.mrf.mxu1  ;;  %v4243_v13 = vpop.f32.mrf.mxu0  ;;  %3137 = vmatmul.mubr.bf16.gmra.mxu0 %v5107_v50  ;;  %3234 = vmatmul.mubr.bf16.gmra.mxu1 %v5110_v16 }
 0x17e   : > { %v5996_v35 = vadd.f32 %v4178_v2, %v2490_v51  ;;  %v5999_v21 = vadd.f32 %v4242_v29, %v5859_v60  ;;  %3144 = vmatprep.mubr.bf16.mxu0 %v5116_v44  ;;  %3241 = vmatprep.mubr.bf16.mxu1 %v5119_v27  ;;  %v5122_v60 = vld [vmem:[%s5319_s11 + $0x36c] ss:$52 sps:$4 sm:$0xff]   ;;  %v5120_v51 = vld [vmem:[%s5319_s11 + $0x368] ss:$52 sps:$4 sm:$0xff]  }
 0x17f   : > { %v4180_v19 = vpop.f32.mrf.mxu1  ;;  %v4244_v37 = vpop.f32.mrf.mxu0  ;;  %v5124_v2 = vld [vmem:[%s5319_s11 + $0x98] ss:$52 sps:$4 sm:$0xff]  }
 0x180   : > { %v4181_v28 = vadd.f32 %v4180_v19, %v4179_v32  ;;  %v4245_v46 = vadd.f32 %v4244_v37, %v4243_v13  ;;  %v5128_v13 = vld [vmem:[%s5319_s11 + $0x100] ss:$52 sps:$4 sm:$0xff]  }
 0x181   : > { %v4182_v49 = vpop.f32.mrf.mxu1  ;;  %v4246_v43 = vpop.f32.mrf.mxu0 }
 0x182   : > { %v6005_v14 = vadd.f32 %v4181_v28, %v2495_v39  ;;  %v6008_v57 = vadd.f32 %v4245_v46, %v5867_v4  ;;  %v2506_v39 = vadd.f32 %v5739_v8, %v5745_v11 }
 0x183   : > { %v4183_v56 = vpop.f32.mrf.mxu1  ;;  %v4247_v7 = vpop.f32.mrf.mxu0 }
 0x184   : > { %v4184_v33 = vadd.f32 %v4183_v56, %v4182_v49  ;;  %v4248_v45 = vadd.f32 %v4247_v7, %v4246_v43  ;;  %v5125_v56 = vld [vmem:[%s5319_s11 + $0x3d0] ss:$52 sps:$4 sm:$0xff]   ;;  %v5129_v7 = vld [vmem:[%s5319_s11 + $0x168] ss:$52 sps:$4 sm:$0xff]  }
 0x185   : > { %v4185_v38 = vpop.f32.mrf.mxu1  ;;  %v4249_v6 = vpop.f32.mrf.mxu0  ;;  %3145 = vmatmul.mubr.bf16.gmra.mxu0 %v5114_v18  ;;  %3242 = vmatmul.mubr.bf16.gmra.mxu1 %v5117_v40 }
 0x186   : > { %v6014_v10 = vadd.f32 %v4184_v33, %v2498_v22  ;;  %v6017_v4 = vadd.f32 %v4248_v45, %v5875_v23  ;;  %3249 = vmatprep.mubr.bf16.mxu1 %v5122_v60  ;;  %4679 = vmatprep.mubr.bf16.mxu0 %v5123_v59  ;;  %v5127_v23 = vld [vmem:[%s5319_s11 + $0x3d4] ss:$52 sps:$4 sm:$0xff]   ;;  %v5132_v45 = vld [vmem:[%s5319_s11 + $0x43c] ss:$52 sps:$4 sm:$0xff]  }
 0x187   : > { %v4186_v50 = vpop.f32.mrf.mxu1  ;;  %v4250_v16 = vpop.f32.mrf.mxu0 }
 0x188   : > { %v4187_v44 = vadd.f32 %v4186_v50, %v4185_v38  ;;  %v4251_v27 = vadd.f32 %v4250_v16, %v4249_v6  ;;  %v5133_v38 = vld [vmem:[%s5319_s11 + $0x1d0] ss:$52 sps:$4 sm:$0xff]  }
 0x189   : > { %v4188_v26 = vpop.f32.mrf.mxu1  ;;  %v4252_v30 = vpop.f32.mrf.mxu0 }
 0x18a   : > { %v6023_v29 = vadd.f32 %v4187_v44, %v2503_v55  ;;  %v6026_v32 = vadd.f32 %v4251_v27, %v5883_v41 }
 0x18b   : > { %v4189_v19 = vpop.f32.mrf.mxu1  ;;  %v4253_v37 = vpop.f32.mrf.mxu0 }
 0x18c   : > { %v4190_v28 = vadd.f32 %v4189_v19, %v4188_v26  ;;  %v4254_v61 = vadd.f32 %v4253_v37, %v4252_v30  ;;  %v5134_v19 = vld [vmem:[%s5319_s11 + $0x238] ss:$52 sps:$4 sm:$0xff]  }
 0x18d   : > { %v4255_v46 = vpop.f32.mrf.mxu0  ;;  %v4319_v49 = vpop.f32.mrf.mxu1  ;;  %3250 = vmatmul.mubr.bf16.gmra.mxu1 %v5120_v51  ;;  %4680 = vmatmul.mubr.bf16.vlgmr.msra.gmra.mxu0 %v5124_v2 }
 0x18e   : > { %v6032_v43 = vadd.f32 %v4190_v28, %v2506_v39  ;;  %v6035_v41 = vadd.f32 %v4254_v61, %v5891_v58  ;;  %3257 = vmatprep.mubr.bf16.mxu1 %v5127_v23  ;;  %4683 = vmatprep.mubr.bf16.mxu0 %v5128_v13  ;;  %v5130_v13 = vld [vmem:[%s5319_s11 + $0x438] ss:$52 sps:$4 sm:$0xff]   ;;  %v5138_v28 = vld [vmem:[%s5319_s11 + $0x2a0] ss:$52 sps:$4 sm:$0xff]  }
 0x18f   : > { %v4256_v18 = vpop.f32.mrf.mxu0  ;;  %v4320_v40 = vpop.f32.mrf.mxu1 }
 0x190   : > { %v4257_v8 = vadd.f32 %v4256_v18, %v4255_v46  ;;  %v4321_v11 = vadd.f32 %v4320_v40, %v4319_v49 }
 0x191   : > { %v4258_v60 = vpop.f32.mrf.mxu0  ;;  %v4322_v59 = vpop.f32.mrf.mxu1 }
 0x192   : > { %v6040_v22 = vadd.f32 %v4257_v8, %v5897_v12  ;;  %v6043_v33 = vadd.f32 %v4321_v11, %v5900_v15 }
 0x193   : > { %v4259_v58 = vpop.f32.mrf.mxu0  ;;  %v4323_v6 = vpop.f32.mrf.mxu1 }
 0x194   : > { %v4260_v50 = vadd.f32 %v4259_v58, %v4258_v60  ;;  %v4324_v16 = vadd.f32 %v4323_v6, %v4322_v59 }
 0x195   : > { %v4261_v55 = vpop.f32.mrf.mxu0  ;;  %v4325_v44 = vpop.f32.mrf.mxu1  ;;  %3258 = vmatmul.mubr.bf16.gmra.mxu1 %v5125_v56  ;;  %4684 = vmatmul.mubr.bf16.gmra.mxu0 %v5129_v7 }
 0x196   : > { %v6048_v12 = vadd.f32 %v4260_v50, %v5906_v54  ;;  %v6051_v15 = vadd.f32 %v4324_v16, %v5909_v25  ;;  %3265 = vmatprep.mubr.bf16.mxu1 %v5132_v45  ;;  %4687 = vmatprep.mubr.bf16.mxu0 %v5133_v38  ;;  %v5137_v54 = vld [vmem:[%s5319_s11 + $0x4a4] ss:$52 sps:$4 sm:$0xff]   ;;  %v5135_v45 = vld [vmem:[%s5319_s11 + $0x4a0] ss:$52 sps:$4 sm:$0xff]   ;;  %v5139_v38 = vld [vmem:[%s5319_s11 + $0x308] ss:$52 sps:$4 sm:$0xff]  }
 0x197   : > { %v4262_v27 = vpop.f32.mrf.mxu0  ;;  %v4326_v26 = vpop.f32.mrf.mxu1  ;;  %v5143_v50 = vld [vmem:[%s5319_s11 + $0x370] ss:$52 sps:$4 sm:$0xff]  }
 0x198   : > { %v4263_v30 = vadd.f32 %v4262_v27, %v4261_v55  ;;  %v4327_v51 = vadd.f32 %v4326_v26, %v4325_v44 }
 0x199   : > { %v4264_v2 = vpop.f32.mrf.mxu0  ;;  %v4328_v23 = vpop.f32.mrf.mxu1 }
 0x19a   : > { %v6056_v37 = vadd.f32 %v4263_v30, %v5915_v36  ;;  %v6059_v39 = vadd.f32 %v4327_v51, %v5918_v53 }
 0x19b   : > { %v4265_v25 = vpop.f32.mrf.mxu0  ;;  %v4329_v61 = vpop.f32.mrf.mxu1 }
 0x19c   : > { %v4266_v46 = vadd.f32 %v4265_v25, %v4264_v2  ;;  %v4330_v49 = vadd.f32 %v4329_v61, %v4328_v23 }
 0x19d   : > { %v4267_v18 = vpop.f32.mrf.mxu0  ;;  %v4331_v40 = vpop.f32.mrf.mxu1  ;;  %3266 = vmatmul.mubr.bf16.gmra.mxu1 %v5130_v13  ;;  %4688 = vmatmul.mubr.bf16.gmra.mxu0 %v5134_v19 }
 0x19e   : > { %v6064_v36 = vadd.f32 %v4266_v46, %v5924_v3  ;;  %v6067_v53 = vadd.f32 %v4330_v49, %v5927_v52  ;;  %3273 = vmatprep.mubr.bf16.mxu1 %v5137_v54  ;;  %4691 = vmatprep.mubr.bf16.mxu0 %v5138_v28  ;;  %v5142_v3 = vld [vmem:[%s5319_s11 + $0x50c] ss:$52 sps:$4 sm:$0xff]   ;;  %v5140_v54 = vld [vmem:[%s5319_s11 + $0x508] ss:$52 sps:$4 sm:$0xff]  }
 0x19f   : > { %v4268_v8 = vpop.f32.mrf.mxu0  ;;  %v4332_v11 = vpop.f32.mrf.mxu1  ;;  %v5144_v28 = vld [vmem:[%s5319_s11 + $0x3d8] ss:$52 sps:$4 sm:$0xff]   ;;  %v5148_v46 = vld [vmem:[%s5319_s11 + $0x440] ss:$52 sps:$4 sm:$0xff]  }
 0x1a0   : > { %v4269_v60 = vadd.f32 %v4268_v8, %v4267_v18  ;;  %v4333_v59 = vadd.f32 %v4332_v11, %v4331_v40 }
 0x1a1   : > { %v4270_v56 = vpop.f32.mrf.mxu0  ;;  %v4334_v7 = vpop.f32.mrf.mxu1 }
 0x1a2   : > { %v6072_v58 = vadd.f32 %v4269_v60, %v5933_v0  ;;  %v6075_v6 = vadd.f32 %v4333_v59, %v5936_v24 }
 0x1a3   : > { %v4271_v52 = vpop.f32.mrf.mxu0  ;;  %v4335_v16 = vpop.f32.mrf.mxu1 }
 0x1a4   : > { %v4272_v55 = vadd.f32 %v4271_v52, %v4270_v56  ;;  %v4336_v44 = vadd.f32 %v4335_v16, %v4334_v7 }
 0x1a5   : > { %v4273_v27 = vpop.f32.mrf.mxu0  ;;  %v4337_v26 = vpop.f32.mrf.mxu1  ;;  %3274 = vmatmul.mubr.bf16.gmra.mxu1 %v5135_v45  ;;  %4692 = vmatmul.mubr.bf16.gmra.mxu0 %v5139_v38 }
 0x1a6   : > { %v6080_v0 = vadd.f32 %v4272_v55, %v5942_v48  ;;  %v6083_v24 = vadd.f32 %v4336_v44, %v5945_v17  ;;  %3281 = vmatprep.mubr.bf16.mxu1 %v5142_v3  ;;  %4695 = vmatprep.mubr.bf16.mxu0 %v5143_v50  ;;  %v5147_v48 = vld [vmem:[%s5319_s11 + $0x574] ss:$52 sps:$4 sm:$0xff]   ;;  %v5145_v3 = vld [vmem:[%s5319_s11 + $0x570] ss:$52 sps:$4 sm:$0xff]  }
 0x1a7   : > { %v4274_v30 = vpop.f32.mrf.mxu0  ;;  %v4338_v51 = vpop.f32.mrf.mxu1  ;;  %v5149_v50 = vld [vmem:[%s5319_s11 + $0x4a8] ss:$52 sps:$4 sm:$0xff]   ;;  %v5153_v55 = vld [vmem:[%s5319_s11 + $0x510] ss:$52 sps:$4 sm:$0xff]  }
 0x1a8   : > { %v4275_v2 = vadd.f32 %v4274_v30, %v4273_v27  ;;  %v4339_v23 = vadd.f32 %v4338_v51, %v4337_v26 }
 0x1a9   : > { %v4276_v13 = vpop.f32.mrf.mxu0  ;;  %v4340_v19 = vpop.f32.mrf.mxu1 }
 0x1aa   : > { %v6088_v25 = vadd.f32 %v4275_v2, %v5951_v31  ;;  %v6091_v61 = vadd.f32 %v4339_v23, %v5954_v1 }
 0x1ab   : > { %v4277_v17 = vpop.f32.mrf.mxu0  ;;  %v4341_v49 = vpop.f32.mrf.mxu1 }
 0x1ac   : > { %v4278_v18 = vadd.f32 %v4277_v17, %v4276_v13  ;;  %v4342_v40 = vadd.f32 %v4341_v49, %v4340_v19 }
 0x1ad   : > { %v4279_v8 = vpop.f32.mrf.mxu0  ;;  %v4343_v11 = vpop.f32.mrf.mxu1  ;;  %3282 = vmatmul.mubr.bf16.gmra.mxu1 %v5140_v54  ;;  %4696 = vmatmul.mubr.bf16.gmra.mxu0 %v5144_v28 }
 0x1ae   : > { %v6096_v31 = vadd.f32 %v4278_v18, %v5960_v20  ;;  %v6099_v1 = vadd.f32 %v4342_v40, %v5963_v47  ;;  %3289 = vmatprep.mubr.bf16.mxu1 %v5147_v48  ;;  %4699 = vmatprep.mubr.bf16.mxu0 %v5148_v46  ;;  %v5152_v20 = vld [vmem:[%s5319_s11 + $0x5dc] ss:$52 sps:$4 sm:$0xff]   ;;  %v5150_v48 = vld [vmem:[%s5319_s11 + $0x5d8] ss:$52 sps:$4 sm:$0xff]   ;;  %v5158_v18 = vld [vmem:[%s5319_s11 + $0x5e0] ss:$52 sps:$4 sm:$0xff]  }
 0x1af   : > { %v4280_v60 = vpop.f32.mrf.mxu0  ;;  %v4344_v59 = vpop.f32.mrf.mxu1  ;;  %v5154_v46 = vld [vmem:[%s5319_s11 + $0x578] ss:$52 sps:$4 sm:$0xff]  }
 0x1b0   : > { %v4281_v56 = vadd.f32 %v4280_v60, %v4279_v8  ;;  %v4345_v7 = vadd.f32 %v4344_v59, %v4343_v11 }
 0x1b1   : > { %v4282_v45 = vpop.f32.mrf.mxu0  ;;  %v4346_v38 = vpop.f32.mrf.mxu1 }
 0x1b2   : > { %v6104_v52 = vadd.f32 %v4281_v56, %v5969_v62  ;;  %v6107_v16 = vadd.f32 %v4345_v7, %v5972_v42 }
 0x1b3   : > { %v4283_v47 = vpop.f32.mrf.mxu0  ;;  %v4347_v44 = vpop.f32.mrf.mxu1 }
 0x1b4   : > { %v4284_v27 = vadd.f32 %v4283_v47, %v4282_v45  ;;  %v4348_v26 = vadd.f32 %v4347_v44, %v4346_v38 }
 0x1b5   : > { %v4285_v30 = vpop.f32.mrf.mxu0  ;;  %v4349_v51 = vpop.f32.mrf.mxu1  ;;  %3290 = vmatmul.mubr.bf16.gmra.mxu1 %v5145_v3  ;;  %4700 = vmatmul.mubr.bf16.gmra.mxu0 %v5149_v50 }
 0x1b6   : > { %v6112_v62 = vadd.f32 %v4284_v27, %v5978_v63  ;;  %v6115_v42 = vadd.f32 %v4348_v26, %v5981_v9  ;;  %3297 = vmatprep.mubr.bf16.mxu1 %v5152_v20  ;;  %4703 = vmatprep.mubr.bf16.mxu0 %v5153_v55  ;;  %v5157_v63 = vld [vmem:[%s5319_s11 + $0x644] ss:$52 sps:$4 sm:$0xff]   ;;  %v5155_v20 = vld [vmem:[%s5319_s11 + $0x640] ss:$52 sps:$4 sm:$0xff]   ;;  %v5159_v55 = vld [vmem:[%s5319_s11 + $0x648] ss:$52 sps:$4 sm:$0xff]  }
 0x1b7   : > { %v4286_v2 = vpop.f32.mrf.mxu0  ;;  %v4350_v23 = vpop.f32.mrf.mxu1  ;;  %s3651_s11 = sshll.u32 %s6545_s18, 3 }
 0x1b8   : > { %v4287_v13 = vadd.f32 %v4286_v2, %v4285_v30  ;;  %v4351_v19 = vadd.f32 %v4350_v23, %v4349_v51  ;;  %s6413_s7 = scalar_lea.vmem %s6517_s3, %s3651_s11 }
 0x1b9   : > { %v4288_v54 = vpop.f32.mrf.mxu0  ;;  %v4352_v28 = vpop.f32.mrf.mxu1 }
 0x1ba   : > { %v6120_v17 = vadd.f32 %v4287_v13, %v5987_v34  ;;  %v6123_v49 = vadd.f32 %v4351_v19, %v5990_v5 }
 0x1bb   : > { %v4289_v9 = vpop.f32.mrf.mxu0  ;;  %v4353_v40 = vpop.f32.mrf.mxu1 }
 0x1bc   : > { %v4290_v8 = vadd.f32 %v4289_v9, %v4288_v54  ;;  %v4354_v11 = vadd.f32 %v4353_v40, %v4352_v28 }
 0x1bd   : > { %v4291_v60 = vpop.f32.mrf.mxu0  ;;  %v4355_v59 = vpop.f32.mrf.mxu1  ;;  %3298 = vmatmul.mubr.bf16.gmra.mxu1 %v5150_v48  ;;  %4704 = vmatmul.mubr.bf16.gmra.mxu0 %v5154_v46 }
 0x1be   : > { %v6128_v56 = vadd.f32 %v4290_v8, %v5996_v35  ;;  %v6131_v34 = vadd.f32 %v4354_v11, %v5999_v21  ;;  %3305 = vmatprep.mubr.bf16.mxu1 %v5157_v63  ;;  %4707 = vmatprep.mubr.bf16.mxu0 %v5158_v18 }
 0x1bf   : > { %v4292_v5 = vpop.f32.mrf.mxu0  ;;  %v4356_v7 = vpop.f32.mrf.mxu1 }
 0x1c0   : > { %v4293_v45 = vadd.f32 %v4292_v5, %v4291_v60  ;;  %v4357_v38 = vadd.f32 %v4356_v7, %v4355_v59 }
 0x1c1   : > { %v4294_v3 = vpop.f32.mrf.mxu0  ;;  %v4358_v50 = vpop.f32.mrf.mxu1 }
 0x1c2   : > { %v6136_v47 = vadd.f32 %v4293_v45, %v6005_v14  ;;  %v6139_v44 = vadd.f32 %v4357_v38, %v6008_v57 }
 0x1c3   : > { %v4295_v35 = vpop.f32.mrf.mxu0  ;;  %v4359_v27 = vpop.f32.mrf.mxu1 }
 0x1c4   : > { %v4296_v21 = vadd.f32 %v4295_v35, %v4294_v3  ;;  %v4360_v26 = vadd.f32 %v4359_v27, %v4358_v50 }
 0x1c5   : > { %v4297_v30 = vpop.f32.mrf.mxu0  ;;  %v4361_v51 = vpop.f32.mrf.mxu1  ;;  %3306 = vmatmul.mubr.bf16.gmra.mxu1 %v5155_v20  ;;  %4708 = vmatmul.mubr.bf16.gmra.mxu0 %v5159_v55 }
 0x1c6   : > { %v6142_v2 = vadd.f32 %v4296_v21, %v6014_v10  ;;  %v6145_v23 = vadd.f32 %v4360_v26, %v6017_v4 }
 0x1c7   : > { %v4298_v13 = vpop.f32.mrf.mxu0  ;;  %v4362_v14 = vpop.f32.mrf.mxu1 }
 0x1c8   : > { %v4299_v19 = vadd.f32 %v4298_v13, %v4297_v30  ;;  %v4363_v54 = vadd.f32 %v4362_v14, %v4361_v51 }
 0x1c9   : > { %v4300_v57 = vpop.f32.mrf.mxu0  ;;  %v4364_v28 = vpop.f32.mrf.mxu1 }
 0x1ca   : > { %v6148_v48 = vadd.f32 %v4299_v19, %v6023_v29  ;;  %v6151_v46 = vadd.f32 %v4363_v54, %v6026_v32 }
 0x1cb   : > { %v4301_v63 = vpop.f32.mrf.mxu0  ;;  %v4365_v18 = vpop.f32.mrf.mxu1 }
 0x1cc   : > { %v4302_v9 = vadd.f32 %v4301_v63, %v4300_v57  ;;  %v4366_v10 = vadd.f32 %v4365_v18, %v4364_v28 }
 0x1cd   : > { %v4367_v40 = vpop.f32.mrf.mxu1  ;;  %v4431_v8 = vpop.f32.mrf.mxu0 }
 0x1ce   : > { %v6154_v4 = vadd.f32 %v4302_v9, %v6032_v43  ;;  %v6157_v11 = vadd.f32 %v4366_v10, %v6035_v41 }
 0x1cf   : > { %v4368_v60 = vpop.f32.mrf.mxu1  ;;  %v4432_v59 = vpop.f32.mrf.mxu0 }
 0x1d0   : > { %v4369_v5 = vadd.f32 %v4368_v60, %v4367_v40  ;;  %v4433_v29 = vadd.f32 %v4432_v59, %v4431_v8 }
 0x1d1   : > { %v4370_v7 = vpop.f32.mrf.mxu1  ;;  %v4434_v45 = vpop.f32.mrf.mxu0 }
 0x1d2   : > { %v6160_v32 = vadd.f32 %v4369_v5, %v6040_v22  ;;  %v6163_v38 = vadd.f32 %v4433_v29, %v6043_v33 }
 0x1d3   : > { %v4371_v3 = vpop.f32.mrf.mxu1  ;;  %v4435_v50 = vpop.f32.mrf.mxu0 }
 0x1d4   : > { %v4372_v20 = vadd.f32 %v4371_v3, %v4370_v7  ;;  %v4436_v43 = vadd.f32 %v4435_v50, %v4434_v45 }
 0x1d5   : > { %v4373_v55 = vpop.f32.mrf.mxu1  ;;  %v4437_v35 = vpop.f32.mrf.mxu0 }
 0x1d6   : > { %v6166_v41 = vadd.f32 %v4372_v20, %v6048_v12  ;;  %v6169_v27 = vadd.f32 %v4436_v43, %v6051_v15 }
 0x1d7   : > { %v4374_v21 = vpop.f32.mrf.mxu1  ;;  %v4438_v26 = vpop.f32.mrf.mxu0 }
 0x1d8   : > { %v4375_v30 = vadd.f32 %v4374_v21, %v4373_v55  ;;  %v4439_v22 = vadd.f32 %v4438_v26, %v4437_v35 }
 0x1d9   : > { %v4376_v51 = vpop.f32.mrf.mxu1  ;;  %v4440_v13 = vpop.f32.mrf.mxu0 }
 0x1da   : > { %v6172_v33 = vadd.f32 %v4375_v30, %v6056_v37  ;;  %v6175_v14 = vadd.f32 %v4439_v22, %v6059_v39 }
 0x1db   : > { %v4377_v19 = vpop.f32.mrf.mxu1  ;;  %v4441_v54 = vpop.f32.mrf.mxu0 }
 0x1dc   : > { %v4378_v57 = vadd.f32 %v4377_v19, %v4376_v51  ;;  %v4442_v12 = vadd.f32 %v4441_v54, %v4440_v13 }
 0x1dd   : > { %v4379_v28 = vpop.f32.mrf.mxu1  ;;  %v4443_v63 = vpop.f32.mrf.mxu0 }
 0x1de   : > { %v6178_v15 = vadd.f32 %v4378_v57, %v6064_v36  ;;  %v6181_v18 = vadd.f32 %v4442_v12, %v6067_v53 }
 0x1df   : > { %v4380_v9 = vpop.f32.mrf.mxu1  ;;  %v4444_v10 = vpop.f32.mrf.mxu0 }
 0x1e0   : > { %v4381_v40 = vadd.f32 %v4380_v9, %v4379_v28  ;;  %v4445_v37 = vadd.f32 %v4444_v10, %v4443_v63 }
 0x1e1   : > { %v4382_v8 = vpop.f32.mrf.mxu1  ;;  %v4446_v60 = vpop.f32.mrf.mxu0 }
 0x1e2   : > { %v6184_v39 = vadd.f32 %v4381_v40, %v6072_v58  ;;  %v6187_v59 = vadd.f32 %v4445_v37, %v6075_v6 }
 0x1e3   : > { %v4383_v5 = vpop.f32.mrf.mxu1  ;;  %v4447_v29 = vpop.f32.mrf.mxu0 }
 0x1e4   : > { %v4384_v7 = vadd.f32 %v4383_v5, %v4382_v8  ;;  %v4448_v36 = vadd.f32 %v4447_v29, %v4446_v60 }
 0x1e5   : > { %v4385_v45 = vpop.f32.mrf.mxu1  ;;  %v4449_v3 = vpop.f32.mrf.mxu0 }
 0x1e6   : > { %v6190_v53 = vadd.f32 %v4384_v7, %v6080_v0  ;;  %v6193_v50 = vadd.f32 %v4448_v36, %v6083_v24 }
 0x1e7   : > { %v4386_v20 = vpop.f32.mrf.mxu1  ;;  %v4450_v43 = vpop.f32.mrf.mxu0 }
 0x1e8   : > { %v4387_v55 = vadd.f32 %v4386_v20, %v4385_v45  ;;  %v4451_v58 = vadd.f32 %v4450_v43, %v4449_v3 }
 0x1e9   : > { %v4388_v35 = vpop.f32.mrf.mxu1  ;;  %v4452_v21 = vpop.f32.mrf.mxu0 }
 0x1ea   : > { %v6196_v6 = vadd.f32 %v4387_v55, %v6088_v25  ;;  %v6199_v26 = vadd.f32 %v4451_v58, %v6091_v61 }
 0x1eb   : > { %v4389_v30 = vpop.f32.mrf.mxu1  ;;  %v4453_v22 = vpop.f32.mrf.mxu0 }
 0x1ec   : > { %v4390_v51 = vadd.f32 %v4389_v30, %v4388_v35  ;;  %v4454_v0 = vadd.f32 %v4453_v22, %v4452_v21 }
 0x1ed   : > { %v4391_v13 = vpop.f32.mrf.mxu1  ;;  %v4455_v19 = vpop.f32.mrf.mxu0 }
 0x1ee   : > { %v6202_v24 = vadd.f32 %v4390_v51, %v6096_v31  ;;  %v6205_v54 = vadd.f32 %v4454_v0, %v6099_v1 }
 0x1ef   : > { %v4392_v57 = vpop.f32.mrf.mxu1  ;;  %v4456_v12 = vpop.f32.mrf.mxu0 }
 0x1f0   : > { %v4393_v28 = vadd.f32 %v4392_v57, %v4391_v13  ;;  %v4457_v25 = vadd.f32 %v4456_v12, %v4455_v19 }
 0x1f1   : > { %v4394_v63 = vpop.f32.mrf.mxu1  ;;  %v4458_v9 = vpop.f32.mrf.mxu0 }
 0x1f2   : > { %v6208_v61 = vadd.f32 %v4393_v28, %v6104_v52  ;;  %v6211_v10 = vadd.f32 %v4457_v25, %v6107_v16 }
 0x1f3   : > { %v4395_v40 = vpop.f32.mrf.mxu1  ;;  %v4459_v37 = vpop.f32.mrf.mxu0 }
 0x1f4   : > { %v4396_v8 = vadd.f32 %v4395_v40, %v4394_v63  ;;  %v4460_v31 = vadd.f32 %v4459_v37, %v4458_v9 }
 0x1f5   : > { %v4397_v60 = vpop.f32.mrf.mxu1  ;;  %v4461_v5 = vpop.f32.mrf.mxu0 }
 0x1f6   : > { %v6214_v1 = vadd.f32 %v4396_v8, %v6112_v62  ;;  %v6217_v29 = vadd.f32 %v4460_v31, %v6115_v42 }
 0x1f7   : > { %v4398_v7 = vpop.f32.mrf.mxu1  ;;  %v4462_v36 = vpop.f32.mrf.mxu0 }
 0x1f8   : > { %v4399_v45 = vadd.f32 %v4398_v7, %v4397_v60  ;;  %v4463_v52 = vadd.f32 %v4462_v36, %v4461_v5 }
 0x1f9   : > { %v4400_v3 = vpop.f32.mrf.mxu1  ;;  %v4464_v20 = vpop.f32.mrf.mxu0 }
 0x1fa   : > { %v6220_v16 = vadd.f32 %v4399_v45, %v6120_v17  ;;  %v6223_v43 = vadd.f32 %v4463_v52, %v6123_v49 }
 0x1fb   : > { %v4401_v55 = vpop.f32.mrf.mxu1  ;;  %v4465_v58 = vpop.f32.mrf.mxu0 }
 0x1fc   : > { %v4402_v35 = vadd.f32 %v4401_v55, %v4400_v3  ;;  %v4466_v62 = vadd.f32 %v4465_v58, %v4464_v20 }
 0x1fd   : > { %v4403_v21 = vpop.f32.mrf.mxu1  ;;  %v4467_v30 = vpop.f32.mrf.mxu0 }
 0x1fe   : > { %v6226_v42 = vadd.f32 %v4402_v35, %v6128_v56  ;;  %v6229_v22 = vadd.f32 %v4466_v62, %v6131_v34 }
 0x1ff   : > { %v4404_v51 = vpop.f32.mrf.mxu1  ;;  %v4468_v0 = vpop.f32.mrf.mxu0 }
 0x200   : > { %v4405_v13 = vadd.f32 %v4404_v51, %v4403_v21  ;;  %v4469_v17 = vadd.f32 %v4468_v0, %v4467_v30 }
 0x201   : > { %v4406_v19 = vpop.f32.mrf.mxu1  ;;  %v4470_v57 = vpop.f32.mrf.mxu0 }
 0x202   : > { %v6232_v49 = vadd.f32 %v4405_v13, %v6136_v47  ;;  %v6235_v12 = vadd.f32 %v4469_v17, %v6139_v44 }
 0x203   : > { %v4407_v28 = vpop.f32.mrf.mxu1  ;;  %v4471_v25 = vpop.f32.mrf.mxu0 }
 0x204   : > { %v4408_v63 = vadd.f32 %v4407_v28, %v4406_v19  ;;  %v4472_v56 = vadd.f32 %v4471_v25, %v4470_v57 }
 0x205   : > { %v4409_v9 = vpop.f32.mrf.mxu1  ;;  %v4473_v40 = vpop.f32.mrf.mxu0 }
 0x206   : > { %v6238_v34 = vadd.f32 %v4408_v63, %v6142_v2  ;;  %v6241_v37 = vadd.f32 %v4472_v56, %v6145_v23 }
 0x207   : > { %v4410_v8 = vpop.f32.mrf.mxu1  ;;  %v4474_v31 = vpop.f32.mrf.mxu0 }
 0x208   : > { %v4411_v60 = vadd.f32 %v4410_v8, %v4409_v9  ;;  %v4475_v47 = vadd.f32 %v4474_v31, %v4473_v40 }
 0x209   : > { %v4412_v5 = vpop.f32.mrf.mxu1  ;;  %v4476_v7 = vpop.f32.mrf.mxu0 }
 0x20a   : > { %v6244_v44 = vadd.f32 %v4411_v60, %v6148_v48  ;;  %v6247_v36 = vadd.f32 %v4475_v47, %v6151_v46 }
 0x20b   : > { %v4413_v45 = vpop.f32.mrf.mxu1  ;;  %v4477_v52 = vpop.f32.mrf.mxu0 }
 0x20c   : > { %v4414_v3 = vadd.f32 %v4413_v45, %v4412_v5  ;;  %v4478_v2 = vadd.f32 %v4477_v52, %v4476_v7 }
 0x20d   : > { %v4479_v20 = vpop.f32.mrf.mxu0  ;;  %v6249_v55 = vpop.f32.mrf.mxu1 }
 0x20e   : > { %v6252_v23 = vadd.f32 %v4414_v3, %v6154_v4  ;;  %v6255_v58 = vadd.f32 %v4478_v2, %v6157_v11 }
 0x20f   : > { %v4480_v35 = vpop.f32.mrf.mxu0  ;;  %v6257_v62 = vpop.f32.mrf.mxu1 }
 0x210   : > { %v4481_v48 = vadd.f32 %v4480_v35, %v4479_v20 }
 0x211   : > { %v4482_v21 = vpop.f32.mrf.mxu0  ;;  %v6259_v46 = vpop.f32.mrf.mxu1 }
 0x212   : > { %v6262_v30 = vadd.f32 %v4481_v48, %v6160_v32 }
 0x213   : > { %v4483_v51 = vpop.f32.mrf.mxu0  ;;  %v6264_v0 = vpop.f32.mrf.mxu1 }
 0x214   : > { %v4484_v13 = vadd.f32 %v4483_v51, %v4482_v21 }
 0x215   : > { %v4485_v17 = vpop.f32.mrf.mxu0  ;;  %v6266_v4 = vpop.f32.mrf.mxu1 }
 0x216   : > { %v6269_v11 = vadd.f32 %v4484_v13, %v6166_v41 }
 0x217   : > { %v4486_v19 = vpop.f32.mrf.mxu0  ;;  %v6271_v57 = vpop.f32.mrf.mxu1 }
 0x218   : > { %6518 = vst [vmem:[#allocation2_spill] sm:$0xff] %v6269_v11  ;;  %v4487_v28 = vadd.f32 %v4486_v19, %v4485_v17 }
 0x219   : > { %v4488_v25 = vpop.f32.mrf.mxu0  ;;  %v6273_v63 = vpop.f32.mrf.mxu1 }
 0x21a   : > { %v6276_v32 = vadd.f32 %v4487_v28, %v6172_v33 }
 0x21b   : > { %v4489_v56 = vpop.f32.mrf.mxu0  ;;  %v6278_v9 = vpop.f32.mrf.mxu1 }
 0x21c   : > { %v4490_v40 = vadd.f32 %v4489_v56, %v4488_v25 }
 0x21d   : > { %v4491_v8 = vpop.f32.mrf.mxu0  ;;  %v6280_v31 = vpop.f32.mrf.mxu1 }
 0x21e   : > { %v6283_v41 = vadd.f32 %v4490_v40, %v6178_v15 }
 0x21f   : > { %v4492_v60 = vpop.f32.mrf.mxu0  ;;  %v6285_v47 = vpop.f32.mrf.mxu1 }
 0x220   : > { %v4493_v5 = vadd.f32 %v4492_v60, %v4491_v8 }
 0x221   : > { %v4494_v7 = vpop.f32.mrf.mxu0  ;;  %v6287_v45 = vpop.f32.mrf.mxu1 }
 0x222   : > { %v6290_v33 = vadd.f32 %v4493_v5, %v6184_v39 }
 0x223   : > { %v4495_v52 = vpop.f32.mrf.mxu0  ;;  %v6292_v3 = vpop.f32.mrf.mxu1 }
 0x224   : > { %6519 = vst [vmem:[#allocation3_spill] sm:$0xff] %v6290_v33  ;;  %v4496_v2 = vadd.f32 %v4495_v52, %v4494_v7 }
 0x225   : > { %v4497_v20 = vpop.f32.mrf.mxu0  ;;  %v6294_v35 = vpop.f32.mrf.mxu1 }
 0x226   : > { %v6297_v15 = vadd.f32 %v4496_v2, %v6190_v53 }
 0x227   : > { %v4498_v48 = vpop.f32.mrf.mxu0  ;;  %v6299_v21 = vpop.f32.mrf.mxu1 }
 0x228   : > { %6520 = vst [vmem:[#allocation4_spill] sm:$0xff] %v6297_v15  ;;  %v4499_v51 = vadd.f32 %v4498_v48, %v4497_v20 }
 0x229   : > { %v4500_v13 = vpop.f32.mrf.mxu0  ;;  %v6301_v17 = vpop.f32.mrf.mxu1 }
 0x22a   : > { %v6304_v39 = vadd.f32 %v4499_v51, %v6196_v6 }
 0x22b   : > { %v4501_v19 = vpop.f32.mrf.mxu0  ;;  %v6306_v28 = vpop.f32.mrf.mxu1 }
 0x22c   : > { %6521 = vst [vmem:[#allocation5_spill] sm:$0xff] %v6304_v39  ;;  %v4502_v25 = vadd.f32 %v4501_v19, %v4500_v13 }
 0x22d   : > { %v4503_v56 = vpop.f32.mrf.mxu0  ;;  %v6308_v40 = vpop.f32.mrf.mxu1 }
 0x22e   : > { %v6311_v53 = vadd.f32 %v4502_v25, %v6202_v24 }
 0x22f   : > { %v4504_v8 = vpop.f32.mrf.mxu0  ;;  %v6313_v60 = vpop.f32.mrf.mxu1 }
 0x230   : > { %6522 = vst [vmem:[#allocation6_spill] sm:$0xff] %v6311_v53  ;;  %v4505_v5 = vadd.f32 %v4504_v8, %v4503_v56 }
 0x231   : > { %v4506_v7 = vpop.f32.mrf.mxu0  ;;  %v6315_v52 = vpop.f32.mrf.mxu1 }
 0x232   : > { %v6318_v6 = vadd.f32 %v4505_v5, %v6208_v61 }
 0x233   : > { %v4507_v2 = vpop.f32.mrf.mxu0  ;;  %v6320_v20 = vpop.f32.mrf.mxu1 }
 0x234   : > { %6523 = vst [vmem:[#allocation7_spill] sm:$0xff] %v6318_v6  ;;  %v4508_v48 = vadd.f32 %v4507_v2, %v4506_v7 }
 0x235   : > { %v4509_v51 = vpop.f32.mrf.mxu0  ;;  %v6322_v13 = vpop.f32.mrf.mxu1 }
 0x236   : > { %v6325_v24 = vadd.f32 %v4508_v48, %v6214_v1 }
 0x237   : > { %v4510_v19 = vpop.f32.mrf.mxu0  ;;  %v6327_v25 = vpop.f32.mrf.mxu1 }
 0x238   : > { %6524 = vst [vmem:[#allocation8_spill] sm:$0xff] %v6325_v24  ;;  %v4511_v56 = vadd.f32 %v4510_v19, %v4509_v51 }
 0x239   : > { %v4512_v8 = vpop.f32.mrf.mxu0  ;;  %v6329_v15 = vpop.f32.mrf.mxu1 }
 0x23a   : > { %v6332_v61 = vadd.f32 %v4511_v56, %v6220_v16 }
 0x23b   : > { %v4513_v5 = vpop.f32.mrf.mxu0  ;;  %v6334_v6 = vpop.f32.mrf.mxu1 }
 0x23c   : > { %6525 = vst [vmem:[#allocation9_spill] sm:$0xff] %v6332_v61  ;;  %v4514_v7 = vadd.f32 %v4513_v5, %v4512_v8 }
 0x23d   : > { %v4515_v2 = vpop.f32.mrf.mxu0  ;;  %v6336_v53 = vpop.f32.mrf.mxu1 }
 0x23e   : > { %v6339_v1 = vadd.f32 %v4514_v7, %v6226_v42 }
 0x23f   : > { %v4516_v48 = vpop.f32.mrf.mxu0  ;;  %v6341_v24 = vpop.f32.mrf.mxu1 }
 0x240   : > { %6526 = vst [vmem:[#allocation10_spill] sm:$0xff] %v6339_v1  ;;  %v4517_v51 = vadd.f32 %v4516_v48, %v4515_v2  ;;  %v4551_v2 = vadd.f32 %v6271_v57, %v6266_v4 }
 0x241   : > { %v4518_v19 = vpop.f32.mrf.mxu0  ;;  %v6343_v33 = vpop.f32.mrf.mxu1 }
 0x242   : > { %v6346_v16 = vadd.f32 %v4517_v51, %v6232_v49  ;;  %v4545_v51 = vadd.f32 %v6257_v62, %v6249_v55 }
 0x243   : > { %v4519_v56 = vpop.f32.mrf.mxu0  ;;  %v6348_v61 = vpop.f32.mrf.mxu1 }
 0x244   : > { %6527 = vst [vmem:[#allocation11_spill] sm:$0xff] %v6346_v16  ;;  %v4520_v8 = vadd.f32 %v4519_v56, %v4518_v19  ;;  %v3188_v62 = vadd.f32 %v4545_v51, %v6163_v38 }
 0x245   : > { %v4521_v5 = vpop.f32.mrf.mxu0  ;;  %v6350_v39 = vpop.f32.mrf.mxu1 }
 0x246   : > { %v6353_v42 = vadd.f32 %v4520_v8, %v6238_v34  ;;  %v4554_v34 = vadd.f32 %v6278_v9, %v6273_v63 }
 0x247   : > { %v4522_v7 = vpop.f32.mrf.mxu0  ;;  %v6355_v1 = vpop.f32.mrf.mxu1 }
 0x248   : > { %6528 = vst [vmem:[#allocation12_spill] sm:$0xff] %v6353_v42  ;;  %v4523_v48 = vadd.f32 %v4522_v7, %v4521_v5  ;;  %v3196_v42 = vadd.f32 %v4551_v2, %v6175_v14  ;;  %v4548_v5 = vadd.f32 %v6264_v0, %v6259_v46  ;;  %v3199_v63 = vadd.f32 %v4554_v34, %v6181_v18 }
 0x249   : > { %v4524_v11 = vpop.f32.mrf.mxu0  ;;  %v6359_v49 = vpop.f32.mrf.mxu1 }
 0x24a   : > { %v6364_v19 = vadd.f32 %v4523_v48, %v6244_v44  ;;  %v3191_v38 = vadd.f32 %v4548_v5, %v6169_v27 }
 0x24b   : > { %v4525_v56 = vpop.f32.mrf.mxu0  ;;  %v6366_v16 = vpop.f32.mrf.mxu1 }
 0x24c   : > { %v4526_v8 = vadd.f32 %v4525_v56, %v4524_v11  ;;  %v4563_v11 = vadd.f32 %v6299_v21, %v6294_v35  ;;  %v4566_v35 = vadd.f32 %v6306_v28, %v6301_v17  ;;  %v4575_v17 = vadd.f32 %v6327_v25, %v6322_v13 }
 0x24d   : > { %v6371_v4 = vpop.f32.mrf.mxu1  ;;  %v4681_v57 = vpop.f32.mrf.mxu0 }
 0x24e   : > { %v6376_v55 = vadd.f32 %v4526_v8, %v6252_v23  ;;  %v3357_v44 = vadd.f32 %v4681_v57, %v3196_v42  ;;  %v4557_v23 = vadd.f32 %v6285_v47, %v6280_v31  ;;  %v3212_v18 = vadd.f32 %v4563_v11, %v6199_v26 }
 0x24f   : > { %v6379_v7 = vpop.f32.mrf.mxu1  ;;  %v3348_v48 = vpop.f32.mrf.mxu0  ;;  %v4560_v31 = vadd.f32 %v6292_v3, %v6287_v45  ;;  %v3215_v26 = vadd.f32 %v4566_v35, %v6205_v54  ;;  %v4569_v45 = vadd.f32 %v6313_v60, %v6308_v40  ;;  %v4578_v54 = vadd.f32 %v6334_v6, %v6329_v15 }
 0x250   : > { %5160 = vtanh.f32 %v3357_v44  ;;  %v3349_v14 = vadd.f32 %v3348_v48, %v3188_v62  ;;  %v3204_v27 = vadd.f32 %v4557_v23, %v6187_v59  ;;  %v3228_v40 = vadd.f32 %v4575_v17, %v6223_v43 }
 0x251   : > { %v6384_v9 = vpop.f32.mrf.mxu1  ;;  %v4682_v2 = vpop.f32.mrf.mxu0  ;;  %v3207_v59 = vadd.f32 %v4560_v31, %v6193_v50  ;;  %v4572_v48 = vadd.f32 %v6320_v20, %v6315_v52  ;;  %v4587_v43 = vadd.f32 %v6355_v1, %v6350_v39  ;;  %v3231_v23 = vadd.f32 %v4578_v54, %v6229_v22 }
 0x252   : > { %5162 = vtanh.f32 %v3349_v14  ;;  %v3360_v46 = vadd.f32 %v4682_v2, %v3199_v63  ;;  %v3220_v14 = vadd.f32 %v4569_v45, %v6211_v10  ;;  %v4581_v10 = vadd.f32 %v6341_v24, %v6336_v53 }
 0x253   : > { %v6389_v0 = vpop.f32.mrf.mxu1  ;;  %v3351_v42 = vpop.f32.mrf.mxu0  ;;  %v4590_v22 = vadd.f32 %v6366_v16, %v6359_v49  ;;  %v4584_v31 = vadd.f32 %v6348_v61, %v6343_v33 }
 0x254   : > { %5164 = vtanh.f32 %v3360_v46  ;;  %v3352_v21 = vadd.f32 %v3351_v42, %v3191_v38  ;;  %v3223_v42 = vadd.f32 %v4572_v48, %v6217_v29  ;;  %v4596_v54 = vadd.f32 %v6389_v0, %v6384_v9  ;;  %v6529_v0 = vld [vmem:[#allocation2_spill] sm:$0xff] }
 0x255   : > { %v6394_v51 = vpop.f32.mrf.mxu1  ;;  %v4685_v56 = vpop.f32.mrf.mxu0  ;;  %v3247_v17 = vadd.f32 %v4590_v22, %v6255_v58 }
 0x256   : > { %5166 = vtanh.f32 %v3352_v21  ;;  %v3373_v47 = vadd.f32 %v4685_v56, %v3212_v18  ;;  %v3244_v18 = vadd.f32 %v4587_v43, %v6247_v36 }
 0x257   : > { %v6399_v34 = vpop.f32.mrf.mxu1  ;;  %v3364_v8 = vpop.f32.mrf.mxu0 }
 0x258   : > { %5168 = vtanh.f32 %v3373_v47  ;;  %v3365_v28 = vadd.f32 %v3364_v8, %v3204_v27  ;;  %v3236_v47 = vadd.f32 %v4581_v10, %v6235_v12  ;;  %v4599_v8 = vadd.f32 %v6399_v34, %v6394_v51 }
 0x259   : > { %v6405_v57 = vpop.f32.mrf.mxu1  ;;  %v4686_v5 = vpop.f32.mrf.mxu0 }
 0x25a   : > { %5170 = vtanh.f32 %v3365_v28  ;;  %v3376_v3 = vadd.f32 %v4686_v5, %v3215_v26  ;;  %v4593_v26 = vadd.f32 %v6379_v7, %v6371_v4  ;;  %v3239_v5 = vadd.f32 %v4584_v31, %v6241_v37 }
 0x25b   : > { %v6415_v13 = vpop.f32.mrf.mxu1  ;;  %v3367_v25 = vpop.f32.mrf.mxu0 }
 0x25c   : > { %5172 = vtanh.f32 %v3376_v3  ;;  %v3368_v44 = vadd.f32 %v3367_v25, %v3207_v59  ;;  %v4602_v3 = vadd.f32 %v6415_v13, %v6405_v57  ;;  %v3260_v59 = vadd.f32 %v4599_v8, %v6276_v32 }
 0x25d   : > { %v5161_v60 = vpop.eup %5160  ;;  %v6420_v62 = vpop.f32.mrf.mxu1 }
 0x25e   : > { %v4689_v50 = vpop.f32.mrf.mxu0  ;;  %3509 = vst [vmem:[%s6413_s7 + $0x10] sm:$0xff] %v5161_v60  ;;  %5174 = vtanh.f32 %v3368_v44  ;;  %v3252_v44 = vadd.f32 %v4593_v26, %v6262_v30 }
 0x25f   : > { %v3389_v11 = vadd.f32 %v4689_v50, %v3228_v40  ;;  %v5163_v63 = vpop.eup %5162  ;;  %v6426_v15 = vpop.f32.mrf.mxu1  ;;  %v3263_v50 = vadd.f32 %v4602_v3, %v6283_v41  ;;  %v6535_v3 = vld [vmem:[#allocation7_spill] sm:$0xff] }
 0x260   : > { %v3380_v6 = vpop.f32.mrf.mxu0  ;;  %3507 = vst [vmem:[%s6413_s7] sm:$0xff] %v5163_v63  ;;  %v4605_v9 = vadd.f32 %v6426_v15, %v6420_v62  ;;  %v3255_v63 = vadd.f32 %v4596_v54, %v6529_v0  ;;  %v6536_v54 = vld [vmem:[#allocation10_spill] sm:$0xff] }
 0x261   : > { %5176 = vtanh.f32 %v3389_v11  ;;  %v3381_v2 = vadd.f32 %v3380_v6, %v3220_v14  ;;  %v5165_v52 = vpop.eup %5164  ;;  %v6432_v20 = vpop.f32.mrf.mxu1 }
 0x262   : > { %v4690_v46 = vpop.f32.mrf.mxu0  ;;  %3510 = vst [vmem:[%s6413_s7 + $0x18] sm:$0xff] %v5165_v52  ;;  %v6530_v52 = vld [vmem:[#allocation5_spill] sm:$0xff] }
 0x263   : > { %5178 = vtanh.f32 %v3381_v2  ;;  %v3392_v38 = vadd.f32 %v4690_v46, %v3231_v23  ;;  %v5167_v39 = vpop.eup %5166  ;;  %v6438_v1 = vpop.f32.mrf.mxu1 }
 0x264   : > { %v3383_v35 = vpop.f32.mrf.mxu0  ;;  %3508 = vst [vmem:[%s6413_s7 + $0x8] sm:$0xff] %v5167_v39  ;;  %v4608_v62 = vadd.f32 %v6438_v1, %v6432_v20  ;;  %v6531_v39 = vld [vmem:[#allocation3_spill] sm:$0xff] }
 0x265   : > { %5180 = vtanh.f32 %v3392_v38  ;;  %v3384_v21 = vadd.f32 %v3383_v35, %v3223_v42  ;;  %v5169_v53 = vpop.eup %5168  ;;  %v4609_v24 = vpop.f32.mrf.mxu1  ;;  %v3268_v35 = vadd.f32 %v4605_v9, %v6531_v39  ;;  %v6539_v39 = vld [vmem:[#allocation12_spill] sm:$0xff] }
 0x266   : > { %v4693_v56 = vpop.f32.mrf.mxu0  ;;  %3513 = vst [vmem:[%s6413_s7 + $0x30] sm:$0xff] %v5169_v53 }
 0x267   : > { %5182 = vtanh.f32 %v3384_v21  ;;  %v3405_v29 = vadd.f32 %v4693_v56, %v3244_v18  ;;  %v5171_v27 = vpop.eup %5170  ;;  %v4610_v16 = vpop.f32.mrf.mxu1  ;;  %v6532_v56 = vld [vmem:[#allocation6_spill] sm:$0xff] }
 0x268   : > { %v3396_v49 = vpop.f32.mrf.mxu0  ;;  %3511 = vst [vmem:[%s6413_s7 + $0x20] sm:$0xff] %v5171_v27  ;;  %v4611_v60 = vadd.f32 %v4610_v16, %v4609_v24  ;;  %v6533_v16 = vld [vmem:[#allocation4_spill] sm:$0xff] }
 0x269   : > { %5184 = vtanh.f32 %v3405_v29  ;;  %v3397_v36 = vadd.f32 %v3396_v49, %v3236_v47  ;;  %v5173_v28 = vpop.eup %5172  ;;  %v4612_v33 = vpop.f32.mrf.mxu1  ;;  %v3271_v49 = vadd.f32 %v4608_v62, %v6533_v16 }
 0x26a   : > { %v4694_v61 = vpop.f32.mrf.mxu0  ;;  %3514 = vst [vmem:[%s6413_s7 + $0x38] sm:$0xff] %v5173_v28  ;;  %v3276_v46 = vadd.f32 %v4611_v60, %v6530_v52 }
 0x26b   : > { %5186 = vtanh.f32 %v3397_v36  ;;  %v3408_v12 = vadd.f32 %v4694_v61, %v3247_v17  ;;  %v5175_v45 = vpop.eup %5174  ;;  %v4613_v51 = vpop.f32.mrf.mxu1  ;;  %v6534_v61 = vld [vmem:[#allocation9_spill] sm:$0xff] }
 0x26c   : > { %v3399_v34 = vpop.f32.mrf.mxu0  ;;  %3512 = vst [vmem:[%s6413_s7 + $0x28] sm:$0xff] %v5175_v45  ;;  %v4614_v23 = vadd.f32 %v4613_v51, %v4612_v33 }
 0x26d   : > { %5188 = vtanh.f32 %v3408_v12  ;;  %v3400_v58 = vadd.f32 %v3399_v34, %v3239_v5  ;;  %v4615_v4 = vpop.f32.mrf.mxu1 }
 0x26e   : > { %v5177_v25 = vpop.eup %5176  ;;  %v4697_v7 = vpop.f32.mrf.mxu0  ;;  %v3279_v31 = vadd.f32 %v4614_v23, %v6532_v56 }
 0x26f   : > { %3517 = vst [vmem:[%s6413_s7 + $0x50] sm:$0xff] %v5177_v25  ;;  %5190 = vtanh.f32 %v3400_v58  ;;  %v3421_v37 = vadd.f32 %v4697_v7, %v3260_v59  ;;  %v4616_v57 = vpop.f32.mrf.mxu1 }
 0x270   : > { %v5179_v40 = vpop.eup %5178  ;;  %v3412_v13 = vpop.f32.mrf.mxu0  ;;  %v4617_v20 = vadd.f32 %v4616_v57, %v4615_v4 }
 0x271   : > { %3515 = vst [vmem:[%s6413_s7 + $0x40] sm:$0xff] %v5179_v40  ;;  %5192 = vtanh.f32 %v3421_v37  ;;  %v3413_v32 = vadd.f32 %v3412_v13, %v3252_v44  ;;  %v4618_v11 = vpop.f32.mrf.mxu1 }
 0x272   : > { %v5181_v48 = vpop.eup %5180  ;;  %v4698_v14 = vpop.f32.mrf.mxu0  ;;  %v3284_v58 = vadd.f32 %v4617_v20, %v6535_v3 }
 0x273   : > { %3518 = vst [vmem:[%s6413_s7 + $0x58] sm:$0xff] %v5181_v48  ;;  %5194 = vtanh.f32 %v3413_v32  ;;  %v3424_v30 = vadd.f32 %v4698_v14, %v3263_v50  ;;  %v4619_v43 = vpop.f32.mrf.mxu1  ;;  %v6537_v32 = vld [vmem:[#allocation8_spill] sm:$0xff] }
 0x274   : > { %v5183_v6 = vpop.eup %5182  ;;  %v3415_v2 = vpop.f32.mrf.mxu0  ;;  %v4620_v51 = vadd.f32 %v4619_v43, %v4618_v11  ;;  %v6538_v43 = vld [vmem:[#allocation11_spill] sm:$0xff] }
 0x275   : > { %3516 = vst [vmem:[%s6413_s7 + $0x48] sm:$0xff] %v5183_v6  ;;  %5196 = vtanh.f32 %v3424_v30  ;;  %v3416_v41 = vadd.f32 %v3415_v2, %v3255_v63  ;;  %v4621_v38 = vpop.f32.mrf.mxu1 }
 0x276   : > { %v5185_v10 = vpop.eup %5184  ;;  %v4701_v42 = vpop.f32.mrf.mxu0  ;;  %v3287_v50 = vadd.f32 %v4620_v51, %v6537_v32 }
 0x277   : > { %3521 = vst [vmem:[%s6413_s7 + $0x70] sm:$0xff] %v5185_v10  ;;  %5198 = vtanh.f32 %v3416_v41  ;;  %v3437_v15 = vadd.f32 %v4701_v42, %v3276_v46  ;;  %v4622_v21 = vpop.f32.mrf.mxu1 }
 0x278   : > { %v5187_v22 = vpop.eup %5186  ;;  %v3428_v18 = vpop.f32.mrf.mxu0  ;;  %v4623_v53 = vadd.f32 %v4622_v21, %v4621_v38 }
 0x279   : > { %3519 = vst [vmem:[%s6413_s7 + $0x60] sm:$0xff] %v5187_v22  ;;  %5200 = vtanh.f32 %v3437_v15  ;;  %v3429_v24 = vadd.f32 %v3428_v18, %v3268_v35  ;;  %v4624_v47 = vpop.f32.mrf.mxu1 }
 0x27a   : > { %v5189_v29 = vpop.eup %5188  ;;  %v4702_v27 = vpop.f32.mrf.mxu0  ;;  %v3292_v26 = vadd.f32 %v4623_v53, %v6534_v61 }
 0x27b   : > { %3522 = vst [vmem:[%s6413_s7 + $0x78] sm:$0xff] %v5189_v29  ;;  %5202 = vtanh.f32 %v3429_v24  ;;  %v3440_v1 = vadd.f32 %v4702_v27, %v3279_v31  ;;  %v4625_v36 = vpop.f32.mrf.mxu1 }
 0x27c   : > { %v5191_v8 = vpop.eup %5190  ;;  %v3431_v17 = vpop.f32.mrf.mxu0  ;;  %v4626_v28 = vadd.f32 %v4625_v36, %v4624_v47 }
 0x27d   : > { %3520 = vst [vmem:[%s6413_s7 + $0x68] sm:$0xff] %v5191_v8  ;;  %5204 = vtanh.f32 %v3440_v1  ;;  %v3432_v33 = vadd.f32 %v3431_v17, %v3271_v49  ;;  %v4627_v5 = vpop.f32.mrf.mxu1 }
 0x27e   : > { %v5193_v12 = vpop.eup %5192  ;;  %v4705_v45 = vpop.f32.mrf.mxu0  ;;  %v3295_v37 = vadd.f32 %v4626_v28, %v6536_v54 }
 0x27f   : > { %3525 = vst [vmem:[%s6413_s7 + $0x90] sm:$0xff] %v5193_v12  ;;  %5206 = vtanh.f32 %v3432_v33  ;;  %v3453_v34 = vadd.f32 %v4705_v45, %v3292_v26  ;;  %v4628_v25 = vpop.f32.mrf.mxu1 }
 0x280   : > { %v5195_v59 = vpop.eup %5194  ;;  %v3444_v4 = vpop.f32.mrf.mxu0  ;;  %v4629_v13 = vadd.f32 %v4628_v25, %v4627_v5 }
 0x281   : > { %3523 = vst [vmem:[%s6413_s7 + $0x80] sm:$0xff] %v5195_v59  ;;  %5208 = vtanh.f32 %v3453_v34  ;;  %v3445_v7 = vadd.f32 %v3444_v4, %v3284_v58  ;;  %v4630_v40 = vpop.f32.mrf.mxu1 }
 0x282   : > { %v5197_v44 = vpop.eup %5196  ;;  %v4706_v57 = vpop.f32.mrf.mxu0  ;;  %v3300_v2 = vadd.f32 %v4629_v13, %v6538_v43 }
 0x283   : > { %3526 = vst [vmem:[%s6413_s7 + $0x98] sm:$0xff] %v5197_v44  ;;  %5210 = vtanh.f32 %v3445_v7  ;;  %v3456_v60 = vadd.f32 %v4706_v57, %v3295_v37  ;;  %v4631_v11 = vpop.f32.mrf.mxu1 }
 0x284   : > { %v5199_v48 = vpop.eup %5198  ;;  %v3447_v14 = vpop.f32.mrf.mxu0  ;;  %v4632_v6 = vadd.f32 %v4631_v11, %v4630_v40 }
 0x285   : > { %3524 = vst [vmem:[%s6413_s7 + $0x88] sm:$0xff] %v5199_v48  ;;  %5212 = vtanh.f32 %v3456_v60  ;;  %v3448_v9 = vadd.f32 %v3447_v14, %v3287_v50  ;;  %v4633_v0 = vpop.f32.mrf.mxu1 }
 0x286   : > { %v5201_v30 = vpop.eup %5200  ;;  %v4709_v63 = vpop.f32.mrf.mxu0  ;;  %v3303_v35 = vadd.f32 %v4632_v6, %v6539_v39 }
 0x287   : > { %3529 = vst [vmem:[%s6413_s7 + $0xb0] sm:$0xff] %v5201_v30  ;;  %5214 = vtanh.f32 %v3448_v9  ;;  %v4634_v41 = vpop.f32.mrf.mxu1 }
 0x288   : > { %v5203_v23 = vpop.eup %5202  ;;  %v3460_v52 = vpop.f32.mrf.mxu0  ;;  %v4635_v46 = vadd.f32 %v4634_v41, %v4633_v0 }
 0x289   : > { %3527 = vst [vmem:[%s6413_s7 + $0xa0] sm:$0xff] %v5203_v23  ;;  %v3461_v10 = vadd.f32 %v3460_v52, %v3300_v2  ;;  %v4636_v42 = vpop.f32.mrf.mxu1 }
 0x28a   : > { %v5205_v38 = vpop.eup %5204  ;;  %v4710_v62 = vpop.f32.mrf.mxu0  ;;  %v3308_v15 = vadd.f32 %v4635_v46, %v6364_v19 }
 0x28b   : > { %3530 = vst [vmem:[%s6413_s7 + $0xb8] sm:$0xff] %v5205_v38  ;;  %5216 = vtanh.f32 %v3461_v10  ;;  %v4637_v21 = vpop.f32.mrf.mxu1 }
 0x28c   : > { %v5207_v22 = vpop.eup %5206  ;;  %v3463_v18 = vpop.f32.mrf.mxu0  ;;  %v3469_v53 = vadd.f32 %v4709_v63, %v3308_v15  ;;  %v4638_v24 = vadd.f32 %v4637_v21, %v4636_v42 }
 0x28d   : > { %3528 = vst [vmem:[%s6413_s7 + $0xa8] sm:$0xff] %v5207_v22  ;;  %v3464_v56 = vadd.f32 %v3463_v18, %v3303_v35 }
 0x28e   : > { %v5209_v31 = vpop.eup %5208  ;;  %5218 = vtanh.f32 %v3469_v53  ;;  %v3311_v19 = vadd.f32 %v4638_v24, %v6376_v55 }
 0x28f   : > { %3533 = vst [vmem:[%s6413_s7 + $0xd0] sm:$0xff] %v5209_v31  ;;  %5220 = vtanh.f32 %v3464_v56 }
 0x290   : > { %v5211_v29 = vpop.eup %5210  ;;  %v3472_v47 = vadd.f32 %v4710_v62, %v3311_v19 }
 0x291   : > { %3531 = vst [vmem:[%s6413_s7 + $0xc0] sm:$0xff] %v5211_v29 }
 0x292   : > { %v5213_v27 = vpop.eup %5212  ;;  %5222 = vtanh.f32 %v3472_v47 }
 0x293   : > { %3534 = vst [vmem:[%s6413_s7 + $0xd8] sm:$0xff] %v5213_v27 }
 0x294   : > { %v5215_v20 = vpop.eup %5214 }
 0x295   : > { %3532 = vst [vmem:[%s6413_s7 + $0xc8] sm:$0xff] %v5215_v20 }
 0x298   : > { %v5217_v1 = vpop.eup %5216 }
 0x299   : > { %3535 = vst [vmem:[%s6413_s7 + $0xe0] sm:$0xff] %v5217_v1 }
 0x29b   : > { %v5219_v16 = vpop.eup %5218 }
 0x29c   : > { %v5221_v49 = vpop.eup %5220  ;;  %3537 = vst [vmem:[%s6413_s7 + $0xf0] sm:$0xff] %v5219_v16 }
 0x29d   : > { %3536 = vst [vmem:[%s6413_s7 + $0xe8] sm:$0xff] %v5221_v49 }
 0x29f   : > { %v5223_v8 = vpop.eup %5222 }
 0x2a0   : > { %3538 = vst [vmem:[%s6413_s7 + $0xf8] sm:$0xff] %v5223_v8 }
 0x2a1 PF: > { %s13_s14 = sadd.s32 1, %s5246_s14   ;;  %s6540_s12 = smov %s5242_s13 }
 0x2a2   : > { %p10_p5 = scmp.ge.s32.totalorder %s13_s14, 4   ;;  %s6541_s13 = smov %s6543_s15 }
 0x2a4   :  { %12 = sbr.rel (!%p10_p5) target bundleno = 2 (0x2), region = 68 }

</bundles_post_ra>
